<compile_context>
chip_gen: v6e
topology: v6e:2x2x1
jax: 0.10.0
libtpu: 0.0.40
codegen_flags: <defaults>
</compile_context>

<pallas_src>
import functools
import math

import jax
import jax.numpy as jnp
from jax import lax
from jax.experimental import pallas as pl
from jax.experimental.pallas import tpu as pltpu

LANE = 128
SUBLANE = 8


def _round_up(n, m):
    return ((n + m - 1) // m) * m


def _full_spec(shape):
    nd = len(shape)
    return pl.BlockSpec(shape, lambda *_: (0,) * nd)


# ----------------------------------------------------------------------------
# Single fused kernel: all GRU layers + Linear/ReLU head.
# ----------------------------------------------------------------------------
def _fused_kernel(*refs, n_layers, T, Bt, t_chunk):
    """refs = (x2, [wih, whh, bi, bhn] * n_layers, lw, lb, out, gi, seq_a, seq_b)

    Per layer (shapes already zero-padded so Hp % 128 == 0):
        wih : (in_pad, 3*Hp)  fused, pre-transposed input weights  [r|z|n]
        whh : (Hp,     3*Hp)  fused, pre-transposed recurrent weights
        bi  : (1, 3*Hp) f32   [b_ir+b_hr | b_iz+b_hz | b_in]
        bhn : (1, Hp)   f32   (kept separate: multiplied by the reset gate)
    Scratch (shared across ALL layers):
        gi    : (T*Bt, 3*H_max)  hoisted gate projections of the current layer
        seq_a/seq_b : (T*Bt, H_max)  ping-pong sequence buffers
    """
    x_ref = refs[0]
    layer_refs = [refs[1 + 4 * l: 1 + 4 * (l + 1)] for l in range(n_layers)]
    lw_ref = refs[1 + 4 * n_layers]
    lb_ref = refs[2 + 4 * n_layers]
    out_ref = refs[3 + 4 * n_layers]
    gi_ref, seq_a, seq_b = refs[4 + 4 * n_layers: 7 + 4 * n_layers]
    seq_bufs = (seq_a, seq_b)

    unroll = T if T <= 16 else 8

    for l in range(n_layers):
        wih_ref, whh_ref, bi_ref, bhn_ref = layer_refs[l]
        in_w = wih_ref.shape[0]        # padded width of this layer's input
        hp = whh_ref.shape[0]          # padded hidden size (multiple of 128)
        w_dt = wih_ref.dtype
        out_seq = seq_bufs[l % 2]
        in_seq = seq_bufs[(l - 1) % 2] if l > 0 else None

        # ---- hoisted, time-invariant input projection:
        #      one fused (rows, in) x (in, 3*Hp) MXU matmul, chunked in time
        #      to bound live-value size. Linear biases are folded in here. ----
        wih = wih_ref[...]
        bi = bi_ref[...]
        for t0 in range(0, T, t_chunk):
            tc = min(t_chunk, T - t0)
            r0 = t0 * Bt
            if l == 0:
                xin = x_ref[pl.ds(r0, tc * Bt), :]
            else:
                xin = in_seq[pl.ds(r0, tc * Bt), pl.ds(0, in_w)]
            g = jnp.dot(xin.astype(w_dt), wih,
                        preferred_element_type=jnp.float32) + bi
            gi_ref[pl.ds(r0, tc * Bt), pl.ds(0, 3 * hp)] = g.astype(gi_ref.dtype)

        # ---- sequential recurrence: ONE fused (Bt, Hp) x (Hp, 3*Hp) matmul
        #      per step; gate slices are lane-tile aligned (Hp % 128 == 0). ----
        whh = whh_ref[...]                                    # stays resident
        bhn = jnp.broadcast_to(bhn_ref[...], (Bt, hp))        # hoisted broadcast

        def step(t, h):
            row = pl.multiple_of(t * Bt, Bt)                  # sublane-aligned
            gir = gi_ref[pl.ds(row, Bt), pl.ds(0, hp)].astype(jnp.float32)
            giz = gi_ref[pl.ds(row, Bt), pl.ds(hp, hp)].astype(jnp.float32)
            gin = gi_ref[pl.ds(row, Bt), pl.ds(2 * hp, hp)].astype(jnp.float32)
            gh = jnp.dot(h.astype(w_dt), whh,
                         preferred_element_type=jnp.float32)  # (Bt, 3*Hp)
            r = jax.nn.sigmoid(gir + gh[:, :hp])
            z = jax.nn.sigmoid(giz + gh[:, hp:2 * hp])
            n = jnp.tanh(gin + r * (gh[:, 2 * hp:] + bhn))
            h_new = n + z * (h - n)                           # == (1-z)*n + z*h
            out_seq[pl.ds(row, Bt), pl.ds(0, hp)] = h_new.astype(out_seq.dtype)
            return h_new

        lax.fori_loop(0, T, step, jnp.zeros((Bt, hp), jnp.float32),
                      unroll=unroll)

    # ---- fused Linear + ReLU head over the decoded sequence (lane-dense). ----
    dec = seq_bufs[(n_layers - 1) % 2]
    last_w = layer_refs[-1][1].shape[0]
    lw = lw_ref[...]
    lb = lb_ref[...]
    for t0 in range(0, T, t_chunk):
        tc = min(t_chunk, T - t0)
        r0 = t0 * Bt
        d = dec[pl.ds(r0, tc * Bt), pl.ds(0, last_w)]
        y = jnp.dot(d.astype(lw.dtype), lw,
                    preferred_element_type=jnp.float32) + lb
        out_ref[pl.ds(r0, tc * Bt), :] = jnp.maximum(y, 0.0).astype(out_ref.dtype)


# ----------------------------------------------------------------------------
# Jitted forward wrapper.
# ----------------------------------------------------------------------------
@jax.jit
def forward(params, x_tbf):
    """x_tbf: [T, B, F] time-major (nn.GRU default). Returns [T, B, F]."""
    T, B, F_in = x_tbf.shape
    B_pad = _round_up(B, SUBLANE)
    # Batch-tile grid axis (parallel): 2 tiles when the padded batch allows it
    # (uses both TensorCores on v7x); otherwise a single grid point.
    n_bt = 2 if (B_pad >= 16 and B_pad % 16 == 0) else 1
    Bt = B_pad // n_bt

    layers = params["layers"]
    lw, lb = params["lin"]
    sdt = params["scratch_proto"].dtype
    n_layers = len(layers)
    h_max = max(l["whh"].shape[0] for l in layers)
    f_out_pad = lw.shape[1]
    rows = T * Bt
    t_chunk = max(1, min(T, 512 // Bt))   # time rows per hoisted-matmul chunk

    # Pad batch to a sublane multiple and rearrange to batch-tile-major rows:
    # (T, B_pad, F) -> (n_bt, T, Bt, F) -> (n_bt*T*Bt, F); time-major inside
    # each tile so every recurrence step touches Bt contiguous rows.
    x_pad = jnp.zeros((T, B_pad, F_in), jnp.float32).at[:, :B, :].set(
        x_tbf.astype(jnp.float32))
    x2 = (x_pad.reshape(T, n_bt, Bt, F_in)
          .transpose(1, 0, 2, 3)
          .reshape(n_bt * rows, F_in))

    flat = [x2]
    in_specs = [pl.BlockSpec((rows, F_in), lambda b: (b, 0))]
    for lyr in layers:
        for name in ("wih", "whh", "bi", "bhn"):
            a = lyr[name]
            flat.append(a)
            in_specs.append(_full_spec(a.shape))
    flat += [lw, lb]
    in_specs += [_full_spec(lw.shape), _full_spec(lb.shape)]

    # Scratch shared by ALL layers (ping-pong) instead of per-layer buffers.
    scratch_shapes = [
        pltpu.VMEM((rows, 3 * h_max), sdt),   # fused gate projections
        pltpu.VMEM((rows, h_max), sdt),       # sequence ping
        pltpu.VMEM((rows, h_max), sdt),       # sequence pong
    ]

    # Explicit VMEM budget: inputs are (conservatively) double-buffered by the
    # pipeline + scratch + in/out blocks, with a little headroom.
    def _nb(a):
        return int(a.size) * a.dtype.itemsize
    weight_bytes = sum(_nb(a) for a in flat[1:])
    io_bytes = 2 * (rows * F_in * 4) + 2 * (rows * f_out_pad * 4)
    scr_bytes = rows * 5 * h_max * jnp.dtype(sdt).itemsize
    vmem_limit = int(min(max(2 * weight_bytes + io_bytes + scr_bytes + (4 << 20),
                             16 << 20), 100 << 20))

    out2 = pl.pallas_call(
        functools.partial(_fused_kernel, n_layers=n_layers, T=T, Bt=Bt,
                          t_chunk=t_chunk),
        out_shape=jax.ShapeDtypeStruct((n_bt * rows, f_out_pad), jnp.float32),
        grid=(n_bt,),
        in_specs=in_specs,
        out_specs=pl.BlockSpec((rows, f_out_pad), lambda b: (b, 0)),
        scratch_shapes=scratch_shapes,
        compiler_params=pltpu.CompilerParams(
            dimension_semantics=("parallel",),
            vmem_limit_bytes=vmem_limit),
    )(*flat)

    out = (out2.reshape(n_bt, T, Bt, f_out_pad)
           .transpose(1, 0, 2, 3)
           .reshape(T, B_pad, f_out_pad))
    # Autoencoder: the Linear head reconstructs n_features == F_in.
    return out[:, :B, :F_in]


# ----------------------------------------------------------------------------
# Parameter construction (PyTorch-style init) + one-time kernel-ready prep.
# ----------------------------------------------------------------------------
def init_gru_torch(key, in_dim, hidden):
    k = 1.0 / math.sqrt(hidden)
    k1, k2, k3, k4 = jax.random.split(key, 4)
    wih = jax.random.uniform(k1, (3 * hidden, in_dim), jnp.float32, -k, k)
    whh = jax.random.uniform(k2, (3 * hidden, hidden), jnp.float32, -k, k)
    bih = jax.random.uniform(k3, (3 * hidden,), jnp.float32, -k, k)
    bhh = jax.random.uniform(k4, (3 * hidden,), jnp.float32, -k, k)
    return (wih, whh, bih, bhh)


def init_linear_torch(key, in_dim, out_dim):
    k = 1.0 / math.sqrt(in_dim)
    k1, k2 = jax.random.split(key)
    w = jax.random.uniform(k1, (out_dim, in_dim), jnp.float32, -k, k)
    b = jax.random.uniform(k2, (out_dim,), jnp.float32, -k, k)
    return (w, b)


def gru_layer_dims(n_features, hidden_layer_list):
    """Mirror LSTM_Simple_v2.__init__: encoder stack, then decoder stack on the
    reversed hidden list; Linear input dim is the reversed list's last entry."""
    hiddens = list(hidden_layer_list)
    dims = []
    in_dim = n_features
    for h in hiddens:
        dims.append((in_dim, h))
        in_dim = h
    rev = hiddens[::-1]                   # self.hiddens.reverse()
    in_dim = rev[0]
    for h in rev:
        dims.append((in_dim, h))
        in_dim = h
    return dims, rev[-1]


def init_torch_params(key, n_features, hidden_layer_list):
    dims, lin_in = gru_layer_dims(n_features, hidden_layer_list)
    keys = jax.random.split(key, len(dims) + 1)
    grus = [init_gru_torch(k, i, h) for k, (i, h) in zip(keys[:-1], dims)]
    lin = init_linear_torch(keys[-1], lin_in, n_features)
    return dict(gru=grus, lin=lin)


def _pad2(a, rows, cols):
    return jnp.pad(a, ((0, rows - a.shape[0]), (0, cols - a.shape[1])))


def prep_gru(wih, whh, bih, bhh, in_pad, w_dtype):
    """Split PyTorch (r,z,n)-stacked GRU weights, transpose, zero-pad the hidden
    size to a lane multiple, fuse the gates along columns, fold linear biases."""
    H = whh.shape[1]
    Hp = _round_up(H, LANE)

    def split(m):
        return m[:H], m[H:2 * H], m[2 * H:]

    wir, wiz, win = split(wih)
    whr, whz, whn = split(whh)
    bir, biz, bin_ = split(bih)
    bhr, bhz, bhn = split(bhh)

    wih_all = jnp.concatenate(
        [_pad2(w.T, in_pad, Hp) for w in (wir, wiz, win)], axis=1).astype(w_dtype)
    whh_all = jnp.concatenate(
        [_pad2(w.T, Hp, Hp) for w in (whr, whz, whn)], axis=1).astype(w_dtype)

    def padv(v):
        return jnp.pad(v, (0, Hp - H)).reshape(1, Hp)

    bi_all = jnp.concatenate(
        [padv(bir + bhr), padv(biz + bhz), padv(bin_)], axis=1).astype(jnp.float32)
    bhn_p = padv(bhn).astype(jnp.float32)   # NOT folded: multiplied by reset gate
    return dict(wih=wih_all, whh=whh_all, bi=bi_all, bhn=bhn_p), Hp


def prep_params(torch_params, n_features, weight_dtype=jnp.float32,
                scratch_dtype=None):
    """weight_dtype=bf16 (v6e/v7x) halves weight VMEM; scratch_dtype controls the
    big sequence/projection buffers (f32 recommended on v5e)."""
    if scratch_dtype is None:
        scratch_dtype = weight_dtype
    layers = []
    in_pad = n_features
    for (wih, whh, bih, bhh) in torch_params["gru"]:
        layer, Hp = prep_gru(wih, whh, bih, bhh, in_pad, weight_dtype)
        layers.append(layer)
        in_pad = Hp
    w, b = torch_params["lin"]
    F_out = w.shape[0]
    Fp = _round_up(F_out, LANE)             # lane-dense head output
    lw = _pad2(w.T, in_pad, Fp).astype(weight_dtype)
    lb = jnp.pad(b, (0, Fp - F_out)).reshape(1, Fp).astype(jnp.float32)
    return dict(layers=layers, lin=(lw, lb),
                scratch_proto=jnp.zeros((), scratch_dtype))


# ----------------------------------------------------------------------------
# Pure-JAX reference (PyTorch GRU math, torch weight layout) for sanity checks.
# ----------------------------------------------------------------------------
def _ref_gru(x_tbf, wih, whh, bih, bhh):
    T, B, _ = x_tbf.shape
    H = whh.shape[1]
    h = jnp.zeros((B, H), jnp.float32)
    outs = []
    for t in range(T):
        gi = x_tbf[t] @ wih.T + bih
        gh = h @ whh.T + bhh
        r = jax.nn.sigmoid(gi[:, :H] + gh[:, :H])
        z = jax.nn.sigmoid(gi[:, H:2 * H] + gh[:, H:2 * H])
        n = jnp.tanh(gi[:, 2 * H:] + r * gh[:, 2 * H:])
        h = (1.0 - z) * n + z * h
        outs.append(h)
    return jnp.stack(outs, 0)


def _ref_forward(torch_params, x_tbf):
    h = x_tbf
    for p in torch_params["gru"]:
        h = _ref_gru(h, *p)
    w, b = torch_params["lin"]
    return jnp.maximum(h @ w.T + b, 0.0)


if __name__ == "__main__":
    # Small shapes consistent with the module.
    seq_len, batch, n_features = 8, 2, 4
    hidden_layer_list = [32, 16]

    key = jax.random.PRNGKey(0)
    kp, kx = jax.random.split(key)
    torch_params = init_torch_params(kp, n_features, hidden_layer_list)
    # nn.GRU default layout (batch_first=False): x is [seq_len, batch, features]
    x = jax.random.uniform(kx, (seq_len, batch, n_features), jnp.float32)

    ref = _ref_forward(torch_params, x)

    # f32 weights + f32 scratch (exact vs. the f32 reference; v5e-safe).
    params_f32 = prep_params(torch_params, n_features)
    out = jax.block_until_ready(forward(params_f32, x))
    assert out.shape == (seq_len, batch, n_features)
    err = float(jnp.max(jnp.abs(out - ref)))
    assert err < 1e-4, err

    # bf16 weights + bf16 scratch (v6e/v7x config): halves VMEM for weights and
    # the dominant sequence/projection scratch; f32 accumulation + f32 h carry.
    params_bf16 = prep_params(torch_params, n_features,
                              weight_dtype=jnp.bfloat16,
                              scratch_dtype=jnp.bfloat16)
    out_bf = jax.block_until_ready(forward(params_bf16, x))
    err_bf = float(jnp.max(jnp.abs(out_bf.astype(jnp.float32) - ref)))
    assert err_bf < 5e-2, err_bf

    print("KERNEL_OK")
</pallas_src>

<mosaic_0001>
module attributes {stable_mosaic.version = 11 : i64} {
  func.func @_fused_kernel(%arg0: i32, %arg1: memref<64x4xf32, #tpu.memory_space<vmem>>, %arg2: memref<4x384xf32, #tpu.memory_space<vmem>>, %arg3: memref<128x384xf32, #tpu.memory_space<vmem>>, %arg4: memref<1x384xf32, #tpu.memory_space<vmem>>, %arg5: memref<1x128xf32, #tpu.memory_space<vmem>>, %arg6: memref<128x384xf32, #tpu.memory_space<vmem>>, %arg7: memref<128x384xf32, #tpu.memory_space<vmem>>, %arg8: memref<1x384xf32, #tpu.memory_space<vmem>>, %arg9: memref<1x128xf32, #tpu.memory_space<vmem>>, %arg10: memref<128x384xf32, #tpu.memory_space<vmem>>, %arg11: memref<128x384xf32, #tpu.memory_space<vmem>>, %arg12: memref<1x384xf32, #tpu.memory_space<vmem>>, %arg13: memref<1x128xf32, #tpu.memory_space<vmem>>, %arg14: memref<128x384xf32, #tpu.memory_space<vmem>>, %arg15: memref<128x384xf32, #tpu.memory_space<vmem>>, %arg16: memref<1x384xf32, #tpu.memory_space<vmem>>, %arg17: memref<1x128xf32, #tpu.memory_space<vmem>>, %arg18: memref<128x128xf32, #tpu.memory_space<vmem>>, %arg19: memref<1x128xf32, #tpu.memory_space<vmem>>, %arg20: memref<64x128xf32, #tpu.memory_space<vmem>>, %arg21: memref<64x384xf32, #tpu.memory_space<vmem>>, %arg22: memref<64x128xf32, #tpu.memory_space<vmem>>, %arg23: memref<64x128xf32, #tpu.memory_space<vmem>>) attributes {dimension_semantics = [#tpu.dimension_semantics<parallel>], iteration_bounds = array<i64: 1>, scalar_prefetch = 0 : i64, scratch_operands = 3 : i64, tpu.core_type = #tpu.core_type<tc>, window_params = [{transform_indices = @transform_0, window_bounds = array<i64: 64, 4>}, {pipeline_mode = #tpu.pipeline_mode<synchronous>, transform_indices = @transform_1, window_bounds = array<i64: 4, 384>}, {pipeline_mode = #tpu.pipeline_mode<synchronous>, transform_indices = @transform_2, window_bounds = array<i64: 128, 384>}, {pipeline_mode = #tpu.pipeline_mode<synchronous>, transform_indices = @transform_3, window_bounds = array<i64: 1, 384>}, {pipeline_mode = #tpu.pipeline_mode<synchronous>, transform_indices = @transform_4, window_bounds = array<i64: 1, 128>}, {pipeline_mode = #tpu.pipeline_mode<synchronous>, transform_indices = @transform_5, window_bounds = array<i64: 128, 384>}, {pipeline_mode = #tpu.pipeline_mode<synchronous>, transform_indices = @transform_6, window_bounds = array<i64: 128, 384>}, {pipeline_mode = #tpu.pipeline_mode<synchronous>, transform_indices = @transform_7, window_bounds = array<i64: 1, 384>}, {pipeline_mode = #tpu.pipeline_mode<synchronous>, transform_indices = @transform_8, window_bounds = array<i64: 1, 128>}, {pipeline_mode = #tpu.pipeline_mode<synchronous>, transform_indices = @transform_9, window_bounds = array<i64: 128, 384>}, {pipeline_mode = #tpu.pipeline_mode<synchronous>, transform_indices = @transform_10, window_bounds = array<i64: 128, 384>}, {pipeline_mode = #tpu.pipeline_mode<synchronous>, transform_indices = @transform_11, window_bounds = array<i64: 1, 384>}, {pipeline_mode = #tpu.pipeline_mode<synchronous>, transform_indices = @transform_12, window_bounds = array<i64: 1, 128>}, {pipeline_mode = #tpu.pipeline_mode<synchronous>, transform_indices = @transform_13, window_bounds = array<i64: 128, 384>}, {pipeline_mode = #tpu.pipeline_mode<synchronous>, transform_indices = @transform_14, window_bounds = array<i64: 128, 384>}, {pipeline_mode = #tpu.pipeline_mode<synchronous>, transform_indices = @transform_15, window_bounds = array<i64: 1, 384>}, {pipeline_mode = #tpu.pipeline_mode<synchronous>, transform_indices = @transform_16, window_bounds = array<i64: 1, 128>}, {pipeline_mode = #tpu.pipeline_mode<synchronous>, transform_indices = @transform_17, window_bounds = array<i64: 128, 128>}, {pipeline_mode = #tpu.pipeline_mode<synchronous>, transform_indices = @transform_18, window_bounds = array<i64: 1, 128>}, {transform_indices = @transform_19, window_bounds = array<i64: 64, 128>}]} {
    %c0 = arith.constant 0 : index
    %c0_0 = arith.constant 0 : index
    %0 = vector.load %arg2[%c0, %c0_0] : memref<4x384xf32, #tpu.memory_space<vmem>>, vector<4x384xf32>
    %c0_1 = arith.constant 0 : index
    %c0_2 = arith.constant 0 : index
    %1 = vector.load %arg4[%c0_1, %c0_2] : memref<1x384xf32, #tpu.memory_space<vmem>>, vector<1x384xf32>
    %c0_3 = arith.constant 0 : index
    %c0_4 = arith.constant 0 : index
    %2 = vector.load %arg1[%c0_3, %c0_4] : memref<64x4xf32, #tpu.memory_space<vmem>>, vector<64x4xf32>
    %cst = arith.constant dense<0.000000e+00> : vector<64x384xf32>
    %3 = tpu.matmul %2, %0, %cst {dimension_numbers = #tpu.dot_dimension_numbers<[1], [0], [0], [1], [0, 0, 1, 1], [], []>} : vector<64x4xf32>, vector<4x384xf32>, vector<64x384xf32> -> vector<64x384xf32>
    %4 = vector.broadcast %1 : vector<1x384xf32> to vector<64x384xf32>
    %5 = arith.addf %3, %4 : vector<64x384xf32>
    %c0_5 = arith.constant 0 : index
    %c0_6 = arith.constant 0 : index
    %6 = vector.load %arg21[%c0_5, %c0_6] : memref<64x384xf32, #tpu.memory_space<vmem>>, vector<64x384xf32>
    tpu.vector_store %arg21[%c0_5, %c0_6], %5 {strides = array<i32>} : memref<64x384xf32, #tpu.memory_space<vmem>>, vector<64x384xf32>,
    %c0_7 = arith.constant 0 : index
    %c0_8 = arith.constant 0 : index
    %7 = vector.load %arg3[%c0_7, %c0_8] : memref<128x384xf32, #tpu.memory_space<vmem>>, vector<128x384xf32>
    %c0_9 = arith.constant 0 : index
    %c0_10 = arith.constant 0 : index
    %8 = vector.load %arg5[%c0_9, %c0_10] : memref<1x128xf32, #tpu.memory_space<vmem>>, vector<1x128xf32>
    %9 = vector.shape_cast %8 : vector<1x128xf32> to vector<1x128xf32>
    %10 = vector.broadcast %9 : vector<1x128xf32> to vector<8x128xf32>
    %cst_11 = arith.constant 0.000000e+00 : f32
    %11 = vector.broadcast %cst_11 : f32 to vector<8x128xf32>
    %c0_i32 = arith.constant 0 : i32
    %c8_i32 = arith.constant 8 : i32
    %12 = arith.muli %c0_i32, %c8_i32 : i32
    %13 = tpu.assume_multiple %12, 8 : i32
    %14 = arith.index_cast %13 : i32 to index
    %c0_12 = arith.constant 0 : index
    %15 = vector.load %arg21[%14, %c0_12] : memref<64x384xf32, #tpu.memory_space<vmem>>, vector<8x128xf32>
    %16 = arith.index_cast %13 : i32 to index
    %c128 = arith.constant 128 : index
    %17 = vector.load %arg21[%16, %c128] : memref<64x384xf32, #tpu.memory_space<vmem>>, vector<8x128xf32>
    %18 = arith.index_cast %13 : i32 to index
    %c256 = arith.constant 256 : index
    %19 = vector.load %arg21[%18, %c256] : memref<64x384xf32, #tpu.memory_space<vmem>>, vector<8x128xf32>
    %cst_13 = arith.constant dense<0.000000e+00> : vector<8x384xf32>
    %20 = tpu.matmul %11, %7, %cst_13 {dimension_numbers = #tpu.dot_dimension_numbers<[1], [0], [0], [1], [0, 0, 1, 1], [], []>} : vector<8x128xf32>, vector<128x384xf32>, vector<8x384xf32> -> vector<8x384xf32>
    %21 = vector.extract_strided_slice %20 {offsets = [0, 0], sizes = [8, 128], strides = [1, 1]} : vector<8x384xf32> to vector<8x128xf32>
    %22 = arith.addf %15, %21 : vector<8x128xf32>
    %23 = arith.negf %22 : vector<8x128xf32>
    %24 = math.exp %23 : vector<8x128xf32>
    %cst_14 = arith.constant 1.000000e+00 : f32
    %25 = vector.broadcast %cst_14 : f32 to vector<8x128xf32>
    %26 = arith.addf %25, %24 : vector<8x128xf32>
    %27 = arith.divf %25, %26 : vector<8x128xf32>
    %28 = vector.extract_strided_slice %20 {offsets = [0, 128], sizes = [8, 128], strides = [1, 1]} : vector<8x384xf32> to vector<8x128xf32>
    %29 = arith.addf %17, %28 : vector<8x128xf32>
    %30 = arith.negf %29 : vector<8x128xf32>
    %31 = math.exp %30 : vector<8x128xf32>
    %cst_15 = arith.constant 1.000000e+00 : f32
    %32 = vector.broadcast %cst_15 : f32 to vector<8x128xf32>
    %33 = arith.addf %32, %31 : vector<8x128xf32>
    %34 = arith.divf %32, %33 : vector<8x128xf32>
    %35 = vector.extract_strided_slice %20 {offsets = [0, 256], sizes = [8, 128], strides = [1, 1]} : vector<8x384xf32> to vector<8x128xf32>
    %36 = arith.addf %35, %10 : vector<8x128xf32>
    %37 = arith.mulf %27, %36 : vector<8x128xf32>
    %38 = arith.addf %19, %37 : vector<8x128xf32>
    %39 = math.tanh %38 : vector<8x128xf32>
    %40 = arith.subf %11, %39 : vector<8x128xf32>
    %41 = arith.mulf %34, %40 : vector<8x128xf32>
    %42 = arith.addf %39, %41 : vector<8x128xf32>
    %43 = arith.index_cast %13 : i32 to index
    %c0_16 = arith.constant 0 : index
    %44 = vector.load %arg22[%43, %c0_16] : memref<64x128xf32, #tpu.memory_space<vmem>>, vector<8x128xf32>
    tpu.vector_store %arg22[%43, %c0_16], %42 {strides = array<i32>} : memref<64x128xf32, #tpu.memory_space<vmem>>, vector<8x128xf32>,
    %c1_i32 = arith.constant 1 : i32
    %c8_i32_17 = arith.constant 8 : i32
    %45 = arith.muli %c1_i32, %c8_i32_17 : i32
    %46 = tpu.assume_multiple %45, 8 : i32
    %47 = arith.index_cast %46 : i32 to index
    %c0_18 = arith.constant 0 : index
    %48 = vector.load %arg21[%47, %c0_18] : memref<64x384xf32, #tpu.memory_space<vmem>>, vector<8x128xf32>
    %49 = arith.index_cast %46 : i32 to index
    %c128_19 = arith.constant 128 : index
    %50 = vector.load %arg21[%49, %c128_19] : memref<64x384xf32, #tpu.memory_space<vmem>>, vector<8x128xf32>
    %51 = arith.index_cast %46 : i32 to index
    %c256_20 = arith.constant 256 : index
    %52 = vector.load %arg21[%51, %c256_20] : memref<64x384xf32, #tpu.memory_space<vmem>>, vector<8x128xf32>
    %cst_21 = arith.constant dense<0.000000e+00> : vector<8x384xf32>
    %53 = tpu.matmul %42, %7, %cst_21 {dimension_numbers = #tpu.dot_dimension_numbers<[1], [0], [0], [1], [0, 0, 1, 1], [], []>} : vector<8x128xf32>, vector<128x384xf32>, vector<8x384xf32> -> vector<8x384xf32>
    %54 = vector.extract_strided_slice %53 {offsets = [0, 0], sizes = [8, 128], strides = [1, 1]} : vector<8x384xf32> to vector<8x128xf32>
    %55 = arith.addf %48, %54 : vector<8x128xf32>
    %56 = arith.negf %55 : vector<8x128xf32>
    %57 = math.exp %56 : vector<8x128xf32>
    %cst_22 = arith.constant 1.000000e+00 : f32
    %58 = vector.broadcast %cst_22 : f32 to vector<8x128xf32>
    %59 = arith.addf %58, %57 : vector<8x128xf32>
    %60 = arith.divf %58, %59 : vector<8x128xf32>
    %61 = vector.extract_strided_slice %53 {offsets = [0, 128], sizes = [8, 128], strides = [1, 1]} : vector<8x384xf32> to vector<8x128xf32>
    %62 = arith.addf %50, %61 : vector<8x128xf32>
    %63 = arith.negf %62 : vector<8x128xf32>
    %64 = math.exp %63 : vector<8x128xf32>
    %cst_23 = arith.constant 1.000000e+00 : f32
    %65 = vector.broadcast %cst_23 : f32 to vector<8x128xf32>
    %66 = arith.addf %65, %64 : vector<8x128xf32>
    %67 = arith.divf %65, %66 : vector<8x128xf32>
    %68 = vector.extract_strided_slice %53 {offsets = [0, 256], sizes = [8, 128], strides = [1, 1]} : vector<8x384xf32> to vector<8x128xf32>
    %69 = arith.addf %68, %10 : vector<8x128xf32>
    %70 = arith.mulf %60, %69 : vector<8x128xf32>
    %71 = arith.addf %52, %70 : vector<8x128xf32>
    %72 = math.tanh %71 : vector<8x128xf32>
    %73 = arith.subf %42, %72 : vector<8x128xf32>
    %74 = arith.mulf %67, %73 : vector<8x128xf32>
    %75 = arith.addf %72, %74 : vector<8x128xf32>
    %76 = arith.index_cast %46 : i32 to index
    %c0_24 = arith.constant 0 : index
    %77 = vector.load %arg22[%76, %c0_24] : memref<64x128xf32, #tpu.memory_space<vmem>>, vector<8x128xf32>
    tpu.vector_store %arg22[%76, %c0_24], %75 {strides = array<i32>} : memref<64x128xf32, #tpu.memory_space<vmem>>, vector<8x128xf32>,
    %c2_i32 = arith.constant 2 : i32
    %c8_i32_25 = arith.constant 8 : i32
    %78 = arith.muli %c2_i32, %c8_i32_25 : i32
    %79 = tpu.assume_multiple %78, 8 : i32
    %80 = arith.index_cast %79 : i32 to index
    %c0_26 = arith.constant 0 : index
    %81 = vector.load %arg21[%80, %c0_26] : memref<64x384xf32, #tpu.memory_space<vmem>>, vector<8x128xf32>
    %82 = arith.index_cast %79 : i32 to index
    %c128_27 = arith.constant 128 : index
    %83 = vector.load %arg21[%82, %c128_27] : memref<64x384xf32, #tpu.memory_space<vmem>>, vector<8x128xf32>
    %84 = arith.index_cast %79 : i32 to index
    %c256_28 = arith.constant 256 : index
    %85 = vector.load %arg21[%84, %c256_28] : memref<64x384xf32, #tpu.memory_space<vmem>>, vector<8x128xf32>
    %cst_29 = arith.constant dense<0.000000e+00> : vector<8x384xf32>
    %86 = tpu.matmul %75, %7, %cst_29 {dimension_numbers = #tpu.dot_dimension_numbers<[1], [0], [0], [1], [0, 0, 1, 1], [], []>} : vector<8x128xf32>, vector<128x384xf32>, vector<8x384xf32> -> vector<8x384xf32>
    %87 = vector.extract_strided_slice %86 {offsets = [0, 0], sizes = [8, 128], strides = [1, 1]} : vector<8x384xf32> to vector<8x128xf32>
    %88 = arith.addf %81, %87 : vector<8x128xf32>
    %89 = arith.negf %88 : vector<8x128xf32>
    %90 = math.exp %89 : vector<8x128xf32>
    %cst_30 = arith.constant 1.000000e+00 : f32
    %91 = vector.broadcast %cst_30 : f32 to vector<8x128xf32>
    %92 = arith.addf %91, %90 : vector<8x128xf32>
    %93 = arith.divf %91, %92 : vector<8x128xf32>
    %94 = vector.extract_strided_slice %86 {offsets = [0, 128], sizes = [8, 128], strides = [1, 1]} : vector<8x384xf32> to vector<8x128xf32>
    %95 = arith.addf %83, %94 : vector<8x128xf32>
    %96 = arith.negf %95 : vector<8x128xf32>
    %97 = math.exp %96 : vector<8x128xf32>
    %cst_31 = arith.constant 1.000000e+00 : f32
    %98 = vector.broadcast %cst_31 : f32 to vector<8x128xf32>
    %99 = arith.addf %98, %97 : vector<8x128xf32>
    %100 = arith.divf %98, %99 : vector<8x128xf32>
    %101 = vector.extract_strided_slice %86 {offsets = [0, 256], sizes = [8, 128], strides = [1, 1]} : vector<8x384xf32> to vector<8x128xf32>
    %102 = arith.addf %101, %10 : vector<8x128xf32>
    %103 = arith.mulf %93, %102 : vector<8x128xf32>
    %104 = arith.addf %85, %103 : vector<8x128xf32>
    %105 = math.tanh %104 : vector<8x128xf32>
    %106 = arith.subf %75, %105 : vector<8x128xf32>
    %107 = arith.mulf %100, %106 : vector<8x128xf32>
    %108 = arith.addf %105, %107 : vector<8x128xf32>
    %109 = arith.index_cast %79 : i32 to index
    %c0_32 = arith.constant 0 : index
    %110 = vector.load %arg22[%109, %c0_32] : memref<64x128xf32, #tpu.memory_space<vmem>>, vector<8x128xf32>
    tpu.vector_store %arg22[%109, %c0_32], %108 {strides = array<i32>} : memref<64x128xf32, #tpu.memory_space<vmem>>, vector<8x128xf32>,
    %c3_i32 = arith.constant 3 : i32
    %c8_i32_33 = arith.constant 8 : i32
    %111 = arith.muli %c3_i32, %c8_i32_33 : i32
    %112 = tpu.assume_multiple %111, 8 : i32
    %113 = arith.index_cast %112 : i32 to index
    %c0_34 = arith.constant 0 : index
    %114 = vector.load %arg21[%113, %c0_34] : memref<64x384xf32, #tpu.memory_space<vmem>>, vector<8x128xf32>
    %115 = arith.index_cast %112 : i32 to index
    %c128_35 = arith.constant 128 : index
    %116 = vector.load %arg21[%115, %c128_35] : memref<64x384xf32, #tpu.memory_space<vmem>>, vector<8x128xf32>
    %117 = arith.index_cast %112 : i32 to index
    %c256_36 = arith.constant 256 : index
    %118 = vector.load %arg21[%117, %c256_36] : memref<64x384xf32, #tpu.memory_space<vmem>>, vector<8x128xf32>
    %cst_37 = arith.constant dense<0.000000e+00> : vector<8x384xf32>
    %119 = tpu.matmul %108, %7, %cst_37 {dimension_numbers = #tpu.dot_dimension_numbers<[1], [0], [0], [1], [0, 0, 1, 1], [], []>} : vector<8x128xf32>, vector<128x384xf32>, vector<8x384xf32> -> vector<8x384xf32>
    %120 = vector.extract_strided_slice %119 {offsets = [0, 0], sizes = [8, 128], strides = [1, 1]} : vector<8x384xf32> to vector<8x128xf32>
    %121 = arith.addf %114, %120 : vector<8x128xf32>
    %122 = arith.negf %121 : vector<8x128xf32>
    %123 = math.exp %122 : vector<8x128xf32>
    %cst_38 = arith.constant 1.000000e+00 : f32
    %124 = vector.broadcast %cst_38 : f32 to vector<8x128xf32>
    %125 = arith.addf %124, %123 : vector<8x128xf32>
    %126 = arith.divf %124, %125 : vector<8x128xf32>
    %127 = vector.extract_strided_slice %119 {offsets = [0, 128], sizes = [8, 128], strides = [1, 1]} : vector<8x384xf32> to vector<8x128xf32>
    %128 = arith.addf %116, %127 : vector<8x128xf32>
    %129 = arith.negf %128 : vector<8x128xf32>
    %130 = math.exp %129 : vector<8x128xf32>
    %cst_39 = arith.constant 1.000000e+00 : f32
    %131 = vector.broadcast %cst_39 : f32 to vector<8x128xf32>
    %132 = arith.addf %131, %130 : vector<8x128xf32>
    %133 = arith.divf %131, %132 : vector<8x128xf32>
    %134 = vector.extract_strided_slice %119 {offsets = [0, 256], sizes = [8, 128], strides = [1, 1]} : vector<8x384xf32> to vector<8x128xf32>
    %135 = arith.addf %134, %10 : vector<8x128xf32>
    %136 = arith.mulf %126, %135 : vector<8x128xf32>
    %137 = arith.addf %118, %136 : vector<8x128xf32>
    %138 = math.tanh %137 : vector<8x128xf32>
    %139 = arith.subf %108, %138 : vector<8x128xf32>
    %140 = arith.mulf %133, %139 : vector<8x128xf32>
    %141 = arith.addf %138, %140 : vector<8x128xf32>
    %142 = arith.index_cast %112 : i32 to index
    %c0_40 = arith.constant 0 : index
    %143 = vector.load %arg22[%142, %c0_40] : memref<64x128xf32, #tpu.memory_space<vmem>>, vector<8x128xf32>
    tpu.vector_store %arg22[%142, %c0_40], %141 {strides = array<i32>} : memref<64x128xf32, #tpu.memory_space<vmem>>, vector<8x128xf32>,
    %c4_i32 = arith.constant 4 : i32
    %c8_i32_41 = arith.constant 8 : i32
    %144 = arith.muli %c4_i32, %c8_i32_41 : i32
    %145 = tpu.assume_multiple %144, 8 : i32
    %146 = arith.index_cast %145 : i32 to index
    %c0_42 = arith.constant 0 : index
    %147 = vector.load %arg21[%146, %c0_42] : memref<64x384xf32, #tpu.memory_space<vmem>>, vector<8x128xf32>
    %148 = arith.index_cast %145 : i32 to index
    %c128_43 = arith.constant 128 : index
    %149 = vector.load %arg21[%148, %c128_43] : memref<64x384xf32, #tpu.memory_space<vmem>>, vector<8x128xf32>
    %150 = arith.index_cast %145 : i32 to index
    %c256_44 = arith.constant 256 : index
    %151 = vector.load %arg21[%150, %c256_44] : memref<64x384xf32, #tpu.memory_space<vmem>>, vector<8x128xf32>
    %cst_45 = arith.constant dense<0.000000e+00> : vector<8x384xf32>
    %152 = tpu.matmul %141, %7, %cst_45 {dimension_numbers = #tpu.dot_dimension_numbers<[1], [0], [0], [1], [0, 0, 1, 1], [], []>} : vector<8x128xf32>, vector<128x384xf32>, vector<8x384xf32> -> vector<8x384xf32>
    %153 = vector.extract_strided_slice %152 {offsets = [0, 0], sizes = [8, 128], strides = [1, 1]} : vector<8x384xf32> to vector<8x128xf32>
    %154 = arith.addf %147, %153 : vector<8x128xf32>
    %155 = arith.negf %154 : vector<8x128xf32>
    %156 = math.exp %155 : vector<8x128xf32>
    %cst_46 = arith.constant 1.000000e+00 : f32
    %157 = vector.broadcast %cst_46 : f32 to vector<8x128xf32>
    %158 = arith.addf %157, %156 : vector<8x128xf32>
    %159 = arith.divf %157, %158 : vector<8x128xf32>
    %160 = vector.extract_strided_slice %152 {offsets = [0, 128], sizes = [8, 128], strides = [1, 1]} : vector<8x384xf32> to vector<8x128xf32>
    %161 = arith.addf %149, %160 : vector<8x128xf32>
    %162 = arith.negf %161 : vector<8x128xf32>
    %163 = math.exp %162 : vector<8x128xf32>
    %cst_47 = arith.constant 1.000000e+00 : f32
    %164 = vector.broadcast %cst_47 : f32 to vector<8x128xf32>
    %165 = arith.addf %164, %163 : vector<8x128xf32>
    %166 = arith.divf %164, %165 : vector<8x128xf32>
    %167 = vector.extract_strided_slice %152 {offsets = [0, 256], sizes = [8, 128], strides = [1, 1]} : vector<8x384xf32> to vector<8x128xf32>
    %168 = arith.addf %167, %10 : vector<8x128xf32>
    %169 = arith.mulf %159, %168 : vector<8x128xf32>
    %170 = arith.addf %151, %169 : vector<8x128xf32>
    %171 = math.tanh %170 : vector<8x128xf32>
    %172 = arith.subf %141, %171 : vector<8x128xf32>
    %173 = arith.mulf %166, %172 : vector<8x128xf32>
    %174 = arith.addf %171, %173 : vector<8x128xf32>
    %175 = arith.index_cast %145 : i32 to index
    %c0_48 = arith.constant 0 : index
    %176 = vector.load %arg22[%175, %c0_48] : memref<64x128xf32, #tpu.memory_space<vmem>>, vector<8x128xf32>
    tpu.vector_store %arg22[%175, %c0_48], %174 {strides = array<i32>} : memref<64x128xf32, #tpu.memory_space<vmem>>, vector<8x128xf32>,
    %c5_i32 = arith.constant 5 : i32
    %c8_i32_49 = arith.constant 8 : i32
    %177 = arith.muli %c5_i32, %c8_i32_49 : i32
    %178 = tpu.assume_multiple %177, 8 : i32
    %179 = arith.index_cast %178 : i32 to index
    %c0_50 = arith.constant 0 : index
    %180 = vector.load %arg21[%179, %c0_50] : memref<64x384xf32, #tpu.memory_space<vmem>>, vector<8x128xf32>
    %181 = arith.index_cast %178 : i32 to index
    %c128_51 = arith.constant 128 : index
    %182 = vector.load %arg21[%181, %c128_51] : memref<64x384xf32, #tpu.memory_space<vmem>>, vector<8x128xf32>
    %183 = arith.index_cast %178 : i32 to index
    %c256_52 = arith.constant 256 : index
    %184 = vector.load %arg21[%183, %c256_52] : memref<64x384xf32, #tpu.memory_space<vmem>>, vector<8x128xf32>
    %cst_53 = arith.constant dense<0.000000e+00> : vector<8x384xf32>
    %185 = tpu.matmul %174, %7, %cst_53 {dimension_numbers = #tpu.dot_dimension_numbers<[1], [0], [0], [1], [0, 0, 1, 1], [], []>} : vector<8x128xf32>, vector<128x384xf32>, vector<8x384xf32> -> vector<8x384xf32>
    %186 = vector.extract_strided_slice %185 {offsets = [0, 0], sizes = [8, 128], strides = [1, 1]} : vector<8x384xf32> to vector<8x128xf32>
    %187 = arith.addf %180, %186 : vector<8x128xf32>
    %188 = arith.negf %187 : vector<8x128xf32>
    %189 = math.exp %188 : vector<8x128xf32>
    %cst_54 = arith.constant 1.000000e+00 : f32
    %190 = vector.broadcast %cst_54 : f32 to vector<8x128xf32>
    %191 = arith.addf %190, %189 : vector<8x128xf32>
    %192 = arith.divf %190, %191 : vector<8x128xf32>
    %193 = vector.extract_strided_slice %185 {offsets = [0, 128], sizes = [8, 128], strides = [1, 1]} : vector<8x384xf32> to vector<8x128xf32>
    %194 = arith.addf %182, %193 : vector<8x128xf32>
    %195 = arith.negf %194 : vector<8x128xf32>
    %196 = math.exp %195 : vector<8x128xf32>
    %cst_55 = arith.constant 1.000000e+00 : f32
    %197 = vector.broadcast %cst_55 : f32 to vector<8x128xf32>
    %198 = arith.addf %197, %196 : vector<8x128xf32>
    %199 = arith.divf %197, %198 : vector<8x128xf32>
    %200 = vector.extract_strided_slice %185 {offsets = [0, 256], sizes = [8, 128], strides = [1, 1]} : vector<8x384xf32> to vector<8x128xf32>
    %201 = arith.addf %200, %10 : vector<8x128xf32>
    %202 = arith.mulf %192, %201 : vector<8x128xf32>
    %203 = arith.addf %184, %202 : vector<8x128xf32>
    %204 = math.tanh %203 : vector<8x128xf32>
    %205 = arith.subf %174, %204 : vector<8x128xf32>
    %206 = arith.mulf %199, %205 : vector<8x128xf32>
    %207 = arith.addf %204, %206 : vector<8x128xf32>
    %208 = arith.index_cast %178 : i32 to index
    %c0_56 = arith.constant 0 : index
    %209 = vector.load %arg22[%208, %c0_56] : memref<64x128xf32, #tpu.memory_space<vmem>>, vector<8x128xf32>
    tpu.vector_store %arg22[%208, %c0_56], %207 {strides = array<i32>} : memref<64x128xf32, #tpu.memory_space<vmem>>, vector<8x128xf32>,
    %c6_i32 = arith.constant 6 : i32
    %c8_i32_57 = arith.constant 8 : i32
    %210 = arith.muli %c6_i32, %c8_i32_57 : i32
    %211 = tpu.assume_multiple %210, 8 : i32
    %212 = arith.index_cast %211 : i32 to index
    %c0_58 = arith.constant 0 : index
    %213 = vector.load %arg21[%212, %c0_58] : memref<64x384xf32, #tpu.memory_space<vmem>>, vector<8x128xf32>
    %214 = arith.index_cast %211 : i32 to index
    %c128_59 = arith.constant 128 : index
    %215 = vector.load %arg21[%214, %c128_59] : memref<64x384xf32, #tpu.memory_space<vmem>>, vector<8x128xf32>
    %216 = arith.index_cast %211 : i32 to index
    %c256_60 = arith.constant 256 : index
    %217 = vector.load %arg21[%216, %c256_60] : memref<64x384xf32, #tpu.memory_space<vmem>>, vector<8x128xf32>
    %cst_61 = arith.constant dense<0.000000e+00> : vector<8x384xf32>
    %218 = tpu.matmul %207, %7, %cst_61 {dimension_numbers = #tpu.dot_dimension_numbers<[1], [0], [0], [1], [0, 0, 1, 1], [], []>} : vector<8x128xf32>, vector<128x384xf32>, vector<8x384xf32> -> vector<8x384xf32>
    %219 = vector.extract_strided_slice %218 {offsets = [0, 0], sizes = [8, 128], strides = [1, 1]} : vector<8x384xf32> to vector<8x128xf32>
    %220 = arith.addf %213, %219 : vector<8x128xf32>
    %221 = arith.negf %220 : vector<8x128xf32>
    %222 = math.exp %221 : vector<8x128xf32>
    %cst_62 = arith.constant 1.000000e+00 : f32
    %223 = vector.broadcast %cst_62 : f32 to vector<8x128xf32>
    %224 = arith.addf %223, %222 : vector<8x128xf32>
    %225 = arith.divf %223, %224 : vector<8x128xf32>
    %226 = vector.extract_strided_slice %218 {offsets = [0, 128], sizes = [8, 128], strides = [1, 1]} : vector<8x384xf32> to vector<8x128xf32>
    %227 = arith.addf %215, %226 : vector<8x128xf32>
    %228 = arith.negf %227 : vector<8x128xf32>
    %229 = math.exp %228 : vector<8x128xf32>
    %cst_63 = arith.constant 1.000000e+00 : f32
    %230 = vector.broadcast %cst_63 : f32 to vector<8x128xf32>
    %231 = arith.addf %230, %229 : vector<8x128xf32>
    %232 = arith.divf %230, %231 : vector<8x128xf32>
    %233 = vector.extract_strided_slice %218 {offsets = [0, 256], sizes = [8, 128], strides = [1, 1]} : vector<8x384xf32> to vector<8x128xf32>
    %234 = arith.addf %233, %10 : vector<8x128xf32>
    %235 = arith.mulf %225, %234 : vector<8x128xf32>
    %236 = arith.addf %217, %235 : vector<8x128xf32>
    %237 = math.tanh %236 : vector<8x128xf32>
    %238 = arith.subf %207, %237 : vector<8x128xf32>
    %239 = arith.mulf %232, %238 : vector<8x128xf32>
    %240 = arith.addf %237, %239 : vector<8x128xf32>
    %241 = arith.index_cast %211 : i32 to index
    %c0_64 = arith.constant 0 : index
    %242 = vector.load %arg22[%241, %c0_64] : memref<64x128xf32, #tpu.memory_space<vmem>>, vector<8x128xf32>
    tpu.vector_store %arg22[%241, %c0_64], %240 {strides = array<i32>} : memref<64x128xf32, #tpu.memory_space<vmem>>, vector<8x128xf32>,
    %c7_i32 = arith.constant 7 : i32
    %c8_i32_65 = arith.constant 8 : i32
    %243 = arith.muli %c7_i32, %c8_i32_65 : i32
    %244 = tpu.assume_multiple %243, 8 : i32
    %245 = arith.index_cast %244 : i32 to index
    %c0_66 = arith.constant 0 : index
    %246 = vector.load %arg21[%245, %c0_66] : memref<64x384xf32, #tpu.memory_space<vmem>>, vector<8x128xf32>
    %247 = arith.index_cast %244 : i32 to index
    %c128_67 = arith.constant 128 : index
    %248 = vector.load %arg21[%247, %c128_67] : memref<64x384xf32, #tpu.memory_space<vmem>>, vector<8x128xf32>
    %249 = arith.index_cast %244 : i32 to index
    %c256_68 = arith.constant 256 : index
    %250 = vector.load %arg21[%249, %c256_68] : memref<64x384xf32, #tpu.memory_space<vmem>>, vector<8x128xf32>
    %cst_69 = arith.constant dense<0.000000e+00> : vector<8x384xf32>
    %251 = tpu.matmul %240, %7, %cst_69 {dimension_numbers = #tpu.dot_dimension_numbers<[1], [0], [0], [1], [0, 0, 1, 1], [], []>} : vector<8x128xf32>, vector<128x384xf32>, vector<8x384xf32> -> vector<8x384xf32>
    %252 = vector.extract_strided_slice %251 {offsets = [0, 0], sizes = [8, 128], strides = [1, 1]} : vector<8x384xf32> to vector<8x128xf32>
    %253 = arith.addf %246, %252 : vector<8x128xf32>
    %254 = arith.negf %253 : vector<8x128xf32>
    %255 = math.exp %254 : vector<8x128xf32>
    %cst_70 = arith.constant 1.000000e+00 : f32
    %256 = vector.broadcast %cst_70 : f32 to vector<8x128xf32>
    %257 = arith.addf %256, %255 : vector<8x128xf32>
    %258 = arith.divf %256, %257 : vector<8x128xf32>
    %259 = vector.extract_strided_slice %251 {offsets = [0, 128], sizes = [8, 128], strides = [1, 1]} : vector<8x384xf32> to vector<8x128xf32>
    %260 = arith.addf %248, %259 : vector<8x128xf32>
    %261 = arith.negf %260 : vector<8x128xf32>
    %262 = math.exp %261 : vector<8x128xf32>
    %cst_71 = arith.constant 1.000000e+00 : f32
    %263 = vector.broadcast %cst_71 : f32 to vector<8x128xf32>
    %264 = arith.addf %263, %262 : vector<8x128xf32>
    %265 = arith.divf %263, %264 : vector<8x128xf32>
    %266 = vector.extract_strided_slice %251 {offsets = [0, 256], sizes = [8, 128], strides = [1, 1]} : vector<8x384xf32> to vector<8x128xf32>
    %267 = arith.addf %266, %10 : vector<8x128xf32>
    %268 = arith.mulf %258, %267 : vector<8x128xf32>
    %269 = arith.addf %250, %268 : vector<8x128xf32>
    %270 = math.tanh %269 : vector<8x128xf32>
    %271 = arith.subf %240, %270 : vector<8x128xf32>
    %272 = arith.mulf %265, %271 : vector<8x128xf32>
    %273 = arith.addf %270, %272 : vector<8x128xf32>
    %274 = arith.index_cast %244 : i32 to index
    %c0_72 = arith.constant 0 : index
    %275 = vector.load %arg22[%274, %c0_72] : memref<64x128xf32, #tpu.memory_space<vmem>>, vector<8x128xf32>
    tpu.vector_store %arg22[%274, %c0_72], %273 {strides = array<i32>} : memref<64x128xf32, #tpu.memory_space<vmem>>, vector<8x128xf32>,
    %c8_i32_73 = arith.constant 8 : i32
    %c0_74 = arith.constant 0 : index
    %c0_75 = arith.constant 0 : index
    %276 = vector.load %arg6[%c0_74, %c0_75] : memref<128x384xf32, #tpu.memory_space<vmem>>, vector<128x384xf32>
    %c0_76 = arith.constant 0 : index
    %c0_77 = arith.constant 0 : index
    %277 = vector.load %arg8[%c0_76, %c0_77] : memref<1x384xf32, #tpu.memory_space<vmem>>, vector<1x384xf32>
    %c0_78 = arith.constant 0 : index
    %c0_79 = arith.constant 0 : index
    %278 = vector.load %arg22[%c0_78, %c0_79] : memref<64x128xf32, #tpu.memory_space<vmem>>, vector<64x128xf32>
    %cst_80 = arith.constant dense<0.000000e+00> : vector<64x384xf32>
    %279 = tpu.matmul %278, %276, %cst_80 {dimension_numbers = #tpu.dot_dimension_numbers<[1], [0], [0], [1], [0, 0, 1, 1], [], []>} : vector<64x128xf32>, vector<128x384xf32>, vector<64x384xf32> -> vector<64x384xf32>
    %280 = vector.broadcast %277 : vector<1x384xf32> to vector<64x384xf32>
    %281 = arith.addf %279, %280 : vector<64x384xf32>
    %c0_81 = arith.constant 0 : index
    %c0_82 = arith.constant 0 : index
    %282 = vector.load %arg21[%c0_81, %c0_82] : memref<64x384xf32, #tpu.memory_space<vmem>>, vector<64x384xf32>
    tpu.vector_store %arg21[%c0_81, %c0_82], %281 {strides = array<i32>} : memref<64x384xf32, #tpu.memory_space<vmem>>, vector<64x384xf32>,
    %c0_83 = arith.constant 0 : index
    %c0_84 = arith.constant 0 : index
    %283 = vector.load %arg7[%c0_83, %c0_84] : memref<128x384xf32, #tpu.memory_space<vmem>>, vector<128x384xf32>
    %c0_85 = arith.constant 0 : index
    %c0_86 = arith.constant 0 : index
    %284 = vector.load %arg9[%c0_85, %c0_86] : memref<1x128xf32, #tpu.memory_space<vmem>>, vector<1x128xf32>
    %285 = vector.shape_cast %284 : vector<1x128xf32> to vector<1x128xf32>
    %286 = vector.broadcast %285 : vector<1x128xf32> to vector<8x128xf32>
    %cst_87 = arith.constant 0.000000e+00 : f32
    %287 = vector.broadcast %cst_87 : f32 to vector<8x128xf32>
    %c0_i32_88 = arith.constant 0 : i32
    %c8_i32_89 = arith.constant 8 : i32
    %288 = arith.muli %c0_i32_88, %c8_i32_89 : i32
    %289 = tpu.assume_multiple %288, 8 : i32
    %290 = arith.index_cast %289 : i32 to index
    %c0_90 = arith.constant 0 : index
    %291 = vector.load %arg21[%290, %c0_90] : memref<64x384xf32, #tpu.memory_space<vmem>>, vector<8x128xf32>
    %292 = arith.index_cast %289 : i32 to index
    %c128_91 = arith.constant 128 : index
    %293 = vector.load %arg21[%292, %c128_91] : memref<64x384xf32, #tpu.memory_space<vmem>>, vector<8x128xf32>
    %294 = arith.index_cast %289 : i32 to index
    %c256_92 = arith.constant 256 : index
    %295 = vector.load %arg21[%294, %c256_92] : memref<64x384xf32, #tpu.memory_space<vmem>>, vector<8x128xf32>
    %cst_93 = arith.constant dense<0.000000e+00> : vector<8x384xf32>
    %296 = tpu.matmul %287, %283, %cst_93 {dimension_numbers = #tpu.dot_dimension_numbers<[1], [0], [0], [1], [0, 0, 1, 1], [], []>} : vector<8x128xf32>, vector<128x384xf32>, vector<8x384xf32> -> vector<8x384xf32>
    %297 = vector.extract_strided_slice %296 {offsets = [0, 0], sizes = [8, 128], strides = [1, 1]} : vector<8x384xf32> to vector<8x128xf32>
    %298 = arith.addf %291, %297 : vector<8x128xf32>
    %299 = arith.negf %298 : vector<8x128xf32>
    %300 = math.exp %299 : vector<8x128xf32>
    %cst_94 = arith.constant 1.000000e+00 : f32
    %301 = vector.broadcast %cst_94 : f32 to vector<8x128xf32>
    %302 = arith.addf %301, %300 : vector<8x128xf32>
    %303 = arith.divf %301, %302 : vector<8x128xf32>
    %304 = vector.extract_strided_slice %296 {offsets = [0, 128], sizes = [8, 128], strides = [1, 1]} : vector<8x384xf32> to vector<8x128xf32>
    %305 = arith.addf %293, %304 : vector<8x128xf32>
    %306 = arith.negf %305 : vector<8x128xf32>
    %307 = math.exp %306 : vector<8x128xf32>
    %cst_95 = arith.constant 1.000000e+00 : f32
    %308 = vector.broadcast %cst_95 : f32 to vector<8x128xf32>
    %309 = arith.addf %308, %307 : vector<8x128xf32>
    %310 = arith.divf %308, %309 : vector<8x128xf32>
    %311 = vector.extract_strided_slice %296 {offsets = [0, 256], sizes = [8, 128], strides = [1, 1]} : vector<8x384xf32> to vector<8x128xf32>
    %312 = arith.addf %311, %286 : vector<8x128xf32>
    %313 = arith.mulf %303, %312 : vector<8x128xf32>
    %314 = arith.addf %295, %313 : vector<8x128xf32>
    %315 = math.tanh %314 : vector<8x128xf32>
    %316 = arith.subf %287, %315 : vector<8x128xf32>
    %317 = arith.mulf %310, %316 : vector<8x128xf32>
    %318 = arith.addf %315, %317 : vector<8x128xf32>
    %319 = arith.index_cast %289 : i32 to index
    %c0_96 = arith.constant 0 : index
    %320 = vector.load %arg23[%319, %c0_96] : memref<64x128xf32, #tpu.memory_space<vmem>>, vector<8x128xf32>
    tpu.vector_store %arg23[%319, %c0_96], %318 {strides = array<i32>} : memref<64x128xf32, #tpu.memory_space<vmem>>, vector<8x128xf32>,
    %c1_i32_97 = arith.constant 1 : i32
    %c8_i32_98 = arith.constant 8 : i32
    %321 = arith.muli %c1_i32_97, %c8_i32_98 : i32
    %322 = tpu.assume_multiple %321, 8 : i32
    %323 = arith.index_cast %322 : i32 to index
    %c0_99 = arith.constant 0 : index
    %324 = vector.load %arg21[%323, %c0_99] : memref<64x384xf32, #tpu.memory_space<vmem>>, vector<8x128xf32>
    %325 = arith.index_cast %322 : i32 to index
    %c128_100 = arith.constant 128 : index
    %326 = vector.load %arg21[%325, %c128_100] : memref<64x384xf32, #tpu.memory_space<vmem>>, vector<8x128xf32>
    %327 = arith.index_cast %322 : i32 to index
    %c256_101 = arith.constant 256 : index
    %328 = vector.load %arg21[%327, %c256_101] : memref<64x384xf32, #tpu.memory_space<vmem>>, vector<8x128xf32>
    %cst_102 = arith.constant dense<0.000000e+00> : vector<8x384xf32>
    %329 = tpu.matmul %318, %283, %cst_102 {dimension_numbers = #tpu.dot_dimension_numbers<[1], [0], [0], [1], [0, 0, 1, 1], [], []>} : vector<8x128xf32>, vector<128x384xf32>, vector<8x384xf32> -> vector<8x384xf32>
    %330 = vector.extract_strided_slice %329 {offsets = [0, 0], sizes = [8, 128], strides = [1, 1]} : vector<8x384xf32> to vector<8x128xf32>
    %331 = arith.addf %324, %330 : vector<8x128xf32>
    %332 = arith.negf %331 : vector<8x128xf32>
    %333 = math.exp %332 : vector<8x128xf32>
    %cst_103 = arith.constant 1.000000e+00 : f32
    %334 = vector.broadcast %cst_103 : f32 to vector<8x128xf32>
    %335 = arith.addf %334, %333 : vector<8x128xf32>
    %336 = arith.divf %334, %335 : vector<8x128xf32>
    %337 = vector.extract_strided_slice %329 {offsets = [0, 128], sizes = [8, 128], strides = [1, 1]} : vector<8x384xf32> to vector<8x128xf32>
    %338 = arith.addf %326, %337 : vector<8x128xf32>
    %339 = arith.negf %338 : vector<8x128xf32>
    %340 = math.exp %339 : vector<8x128xf32>
    %cst_104 = arith.constant 1.000000e+00 : f32
    %341 = vector.broadcast %cst_104 : f32 to vector<8x128xf32>
    %342 = arith.addf %341, %340 : vector<8x128xf32>
    %343 = arith.divf %341, %342 : vector<8x128xf32>
    %344 = vector.extract_strided_slice %329 {offsets = [0, 256], sizes = [8, 128], strides = [1, 1]} : vector<8x384xf32> to vector<8x128xf32>
    %345 = arith.addf %344, %286 : vector<8x128xf32>
    %346 = arith.mulf %336, %345 : vector<8x128xf32>
    %347 = arith.addf %328, %346 : vector<8x128xf32>
    %348 = math.tanh %347 : vector<8x128xf32>
    %349 = arith.subf %318, %348 : vector<8x128xf32>
    %350 = arith.mulf %343, %349 : vector<8x128xf32>
    %351 = arith.addf %348, %350 : vector<8x128xf32>
    %352 = arith.index_cast %322 : i32 to index
    %c0_105 = arith.constant 0 : index
    %353 = vector.load %arg23[%352, %c0_105] : memref<64x128xf32, #tpu.memory_space<vmem>>, vector<8x128xf32>
    tpu.vector_store %arg23[%352, %c0_105], %351 {strides = array<i32>} : memref<64x128xf32, #tpu.memory_space<vmem>>, vector<8x128xf32>,
    %c2_i32_106 = arith.constant 2 : i32
    %c8_i32_107 = arith.constant 8 : i32
    %354 = arith.muli %c2_i32_106, %c8_i32_107 : i32
    %355 = tpu.assume_multiple %354, 8 : i32
    %356 = arith.index_cast %355 : i32 to index
    %c0_108 = arith.constant 0 : index
    %357 = vector.load %arg21[%356, %c0_108] : memref<64x384xf32, #tpu.memory_space<vmem>>, vector<8x128xf32>
    %358 = arith.index_cast %355 : i32 to index
    %c128_109 = arith.constant 128 : index
    %359 = vector.load %arg21[%358, %c128_109] : memref<64x384xf32, #tpu.memory_space<vmem>>, vector<8x128xf32>
    %360 = arith.index_cast %355 : i32 to index
    %c256_110 = arith.constant 256 : index
    %361 = vector.load %arg21[%360, %c256_110] : memref<64x384xf32, #tpu.memory_space<vmem>>, vector<8x128xf32>
    %cst_111 = arith.constant dense<0.000000e+00> : vector<8x384xf32>
    %362 = tpu.matmul %351, %283, %cst_111 {dimension_numbers = #tpu.dot_dimension_numbers<[1], [0], [0], [1], [0, 0, 1, 1], [], []>} : vector<8x128xf32>, vector<128x384xf32>, vector<8x384xf32> -> vector<8x384xf32>
    %363 = vector.extract_strided_slice %362 {offsets = [0, 0], sizes = [8, 128], strides = [1, 1]} : vector<8x384xf32> to vector<8x128xf32>
    %364 = arith.addf %357, %363 : vector<8x128xf32>
    %365 = arith.negf %364 : vector<8x128xf32>
    %366 = math.exp %365 : vector<8x128xf32>
    %cst_112 = arith.constant 1.000000e+00 : f32
    %367 = vector.broadcast %cst_112 : f32 to vector<8x128xf32>
    %368 = arith.addf %367, %366 : vector<8x128xf32>
    %369 = arith.divf %367, %368 : vector<8x128xf32>
    %370 = vector.extract_strided_slice %362 {offsets = [0, 128], sizes = [8, 128], strides = [1, 1]} : vector<8x384xf32> to vector<8x128xf32>
    %371 = arith.addf %359, %370 : vector<8x128xf32>
    %372 = arith.negf %371 : vector<8x128xf32>
    %373 = math.exp %372 : vector<8x128xf32>
    %cst_113 = arith.constant 1.000000e+00 : f32
    %374 = vector.broadcast %cst_113 : f32 to vector<8x128xf32>
    %375 = arith.addf %374, %373 : vector<8x128xf32>
    %376 = arith.divf %374, %375 : vector<8x128xf32>
    %377 = vector.extract_strided_slice %362 {offsets = [0, 256], sizes = [8, 128], strides = [1, 1]} : vector<8x384xf32> to vector<8x128xf32>
    %378 = arith.addf %377, %286 : vector<8x128xf32>
    %379 = arith.mulf %369, %378 : vector<8x128xf32>
    %380 = arith.addf %361, %379 : vector<8x128xf32>
    %381 = math.tanh %380 : vector<8x128xf32>
    %382 = arith.subf %351, %381 : vector<8x128xf32>
    %383 = arith.mulf %376, %382 : vector<8x128xf32>
    %384 = arith.addf %381, %383 : vector<8x128xf32>
    %385 = arith.index_cast %355 : i32 to index
    %c0_114 = arith.constant 0 : index
    %386 = vector.load %arg23[%385, %c0_114] : memref<64x128xf32, #tpu.memory_space<vmem>>, vector<8x128xf32>
    tpu.vector_store %arg23[%385, %c0_114], %384 {strides = array<i32>} : memref<64x128xf32, #tpu.memory_space<vmem>>, vector<8x128xf32>,
    %c3_i32_115 = arith.constant 3 : i32
    %c8_i32_116 = arith.constant 8 : i32
    %387 = arith.muli %c3_i32_115, %c8_i32_116 : i32
    %388 = tpu.assume_multiple %387, 8 : i32
    %389 = arith.index_cast %388 : i32 to index
    %c0_117 = arith.constant 0 : index
    %390 = vector.load %arg21[%389, %c0_117] : memref<64x384xf32, #tpu.memory_space<vmem>>, vector<8x128xf32>
    %391 = arith.index_cast %388 : i32 to index
    %c128_118 = arith.constant 128 : index
    %392 = vector.load %arg21[%391, %c128_118] : memref<64x384xf32, #tpu.memory_space<vmem>>, vector<8x128xf32>
    %393 = arith.index_cast %388 : i32 to index
    %c256_119 = arith.constant 256 : index
    %394 = vector.load %arg21[%393, %c256_119] : memref<64x384xf32, #tpu.memory_space<vmem>>, vector<8x128xf32>
    %cst_120 = arith.constant dense<0.000000e+00> : vector<8x384xf32>
    %395 = tpu.matmul %384, %283, %cst_120 {dimension_numbers = #tpu.dot_dimension_numbers<[1], [0], [0], [1], [0, 0, 1, 1], [], []>} : vector<8x128xf32>, vector<128x384xf32>, vector<8x384xf32> -> vector<8x384xf32>
    %396 = vector.extract_strided_slice %395 {offsets = [0, 0], sizes = [8, 128], strides = [1, 1]} : vector<8x384xf32> to vector<8x128xf32>
    %397 = arith.addf %390, %396 : vector<8x128xf32>
    %398 = arith.negf %397 : vector<8x128xf32>
    %399 = math.exp %398 : vector<8x128xf32>
    %cst_121 = arith.constant 1.000000e+00 : f32
    %400 = vector.broadcast %cst_121 : f32 to vector<8x128xf32>
    %401 = arith.addf %400, %399 : vector<8x128xf32>
    %402 = arith.divf %400, %401 : vector<8x128xf32>
    %403 = vector.extract_strided_slice %395 {offsets = [0, 128], sizes = [8, 128], strides = [1, 1]} : vector<8x384xf32> to vector<8x128xf32>
    %404 = arith.addf %392, %403 : vector<8x128xf32>
    %405 = arith.negf %404 : vector<8x128xf32>
    %406 = math.exp %405 : vector<8x128xf32>
    %cst_122 = arith.constant 1.000000e+00 : f32
    %407 = vector.broadcast %cst_122 : f32 to vector<8x128xf32>
    %408 = arith.addf %407, %406 : vector<8x128xf32>
    %409 = arith.divf %407, %408 : vector<8x128xf32>
    %410 = vector.extract_strided_slice %395 {offsets = [0, 256], sizes = [8, 128], strides = [1, 1]} : vector<8x384xf32> to vector<8x128xf32>
    %411 = arith.addf %410, %286 : vector<8x128xf32>
    %412 = arith.mulf %402, %411 : vector<8x128xf32>
    %413 = arith.addf %394, %412 : vector<8x128xf32>
    %414 = math.tanh %413 : vector<8x128xf32>
    %415 = arith.subf %384, %414 : vector<8x128xf32>
    %416 = arith.mulf %409, %415 : vector<8x128xf32>
    %417 = arith.addf %414, %416 : vector<8x128xf32>
    %418 = arith.index_cast %388 : i32 to index
    %c0_123 = arith.constant 0 : index
    %419 = vector.load %arg23[%418, %c0_123] : memref<64x128xf32, #tpu.memory_space<vmem>>, vector<8x128xf32>
    tpu.vector_store %arg23[%418, %c0_123], %417 {strides = array<i32>} : memref<64x128xf32, #tpu.memory_space<vmem>>, vector<8x128xf32>,
    %c4_i32_124 = arith.constant 4 : i32
    %c8_i32_125 = arith.constant 8 : i32
    %420 = arith.muli %c4_i32_124, %c8_i32_125 : i32
    %421 = tpu.assume_multiple %420, 8 : i32
    %422 = arith.index_cast %421 : i32 to index
    %c0_126 = arith.constant 0 : index
    %423 = vector.load %arg21[%422, %c0_126] : memref<64x384xf32, #tpu.memory_space<vmem>>, vector<8x128xf32>
    %424 = arith.index_cast %421 : i32 to index
    %c128_127 = arith.constant 128 : index
    %425 = vector.load %arg21[%424, %c128_127] : memref<64x384xf32, #tpu.memory_space<vmem>>, vector<8x128xf32>
    %426 = arith.index_cast %421 : i32 to index
    %c256_128 = arith.constant 256 : index
    %427 = vector.load %arg21[%426, %c256_128] : memref<64x384xf32, #tpu.memory_space<vmem>>, vector<8x128xf32>
    %cst_129 = arith.constant dense<0.000000e+00> : vector<8x384xf32>
    %428 = tpu.matmul %417, %283, %cst_129 {dimension_numbers = #tpu.dot_dimension_numbers<[1], [0], [0], [1], [0, 0, 1, 1], [], []>} : vector<8x128xf32>, vector<128x384xf32>, vector<8x384xf32> -> vector<8x384xf32>
    %429 = vector.extract_strided_slice %428 {offsets = [0, 0], sizes = [8, 128], strides = [1, 1]} : vector<8x384xf32> to vector<8x128xf32>
    %430 = arith.addf %423, %429 : vector<8x128xf32>
    %431 = arith.negf %430 : vector<8x128xf32>
    %432 = math.exp %431 : vector<8x128xf32>
    %cst_130 = arith.constant 1.000000e+00 : f32
    %433 = vector.broadcast %cst_130 : f32 to vector<8x128xf32>
    %434 = arith.addf %433, %432 : vector<8x128xf32>
    %435 = arith.divf %433, %434 : vector<8x128xf32>
    %436 = vector.extract_strided_slice %428 {offsets = [0, 128], sizes = [8, 128], strides = [1, 1]} : vector<8x384xf32> to vector<8x128xf32>
    %437 = arith.addf %425, %436 : vector<8x128xf32>
    %438 = arith.negf %437 : vector<8x128xf32>
    %439 = math.exp %438 : vector<8x128xf32>
    %cst_131 = arith.constant 1.000000e+00 : f32
    %440 = vector.broadcast %cst_131 : f32 to vector<8x128xf32>
    %441 = arith.addf %440, %439 : vector<8x128xf32>
    %442 = arith.divf %440, %441 : vector<8x128xf32>
    %443 = vector.extract_strided_slice %428 {offsets = [0, 256], sizes = [8, 128], strides = [1, 1]} : vector<8x384xf32> to vector<8x128xf32>
    %444 = arith.addf %443, %286 : vector<8x128xf32>
    %445 = arith.mulf %435, %444 : vector<8x128xf32>
    %446 = arith.addf %427, %445 : vector<8x128xf32>
    %447 = math.tanh %446 : vector<8x128xf32>
    %448 = arith.subf %417, %447 : vector<8x128xf32>
    %449 = arith.mulf %442, %448 : vector<8x128xf32>
    %450 = arith.addf %447, %449 : vector<8x128xf32>
    %451 = arith.index_cast %421 : i32 to index
    %c0_132 = arith.constant 0 : index
    %452 = vector.load %arg23[%451, %c0_132] : memref<64x128xf32, #tpu.memory_space<vmem>>, vector<8x128xf32>
    tpu.vector_store %arg23[%451, %c0_132], %450 {strides = array<i32>} : memref<64x128xf32, #tpu.memory_space<vmem>>, vector<8x128xf32>,
    %c5_i32_133 = arith.constant 5 : i32
    %c8_i32_134 = arith.constant 8 : i32
    %453 = arith.muli %c5_i32_133, %c8_i32_134 : i32
    %454 = tpu.assume_multiple %453, 8 : i32
    %455 = arith.index_cast %454 : i32 to index
    %c0_135 = arith.constant 0 : index
    %456 = vector.load %arg21[%455, %c0_135] : memref<64x384xf32, #tpu.memory_space<vmem>>, vector<8x128xf32>
    %457 = arith.index_cast %454 : i32 to index
    %c128_136 = arith.constant 128 : index
    %458 = vector.load %arg21[%457, %c128_136] : memref<64x384xf32, #tpu.memory_space<vmem>>, vector<8x128xf32>
    %459 = arith.index_cast %454 : i32 to index
    %c256_137 = arith.constant 256 : index
    %460 = vector.load %arg21[%459, %c256_137] : memref<64x384xf32, #tpu.memory_space<vmem>>, vector<8x128xf32>
    %cst_138 = arith.constant dense<0.000000e+00> : vector<8x384xf32>
    %461 = tpu.matmul %450, %283, %cst_138 {dimension_numbers = #tpu.dot_dimension_numbers<[1], [0], [0], [1], [0, 0, 1, 1], [], []>} : vector<8x128xf32>, vector<128x384xf32>, vector<8x384xf32> -> vector<8x384xf32>
    %462 = vector.extract_strided_slice %461 {offsets = [0, 0], sizes = [8, 128], strides = [1, 1]} : vector<8x384xf32> to vector<8x128xf32>
    %463 = arith.addf %456, %462 : vector<8x128xf32>
    %464 = arith.negf %463 : vector<8x128xf32>
    %465 = math.exp %464 : vector<8x128xf32>
    %cst_139 = arith.constant 1.000000e+00 : f32
    %466 = vector.broadcast %cst_139 : f32 to vector<8x128xf32>
    %467 = arith.addf %466, %465 : vector<8x128xf32>
    %468 = arith.divf %466, %467 : vector<8x128xf32>
    %469 = vector.extract_strided_slice %461 {offsets = [0, 128], sizes = [8, 128], strides = [1, 1]} : vector<8x384xf32> to vector<8x128xf32>
    %470 = arith.addf %458, %469 : vector<8x128xf32>
    %471 = arith.negf %470 : vector<8x128xf32>
    %472 = math.exp %471 : vector<8x128xf32>
    %cst_140 = arith.constant 1.000000e+00 : f32
    %473 = vector.broadcast %cst_140 : f32 to vector<8x128xf32>
    %474 = arith.addf %473, %472 : vector<8x128xf32>
    %475 = arith.divf %473, %474 : vector<8x128xf32>
    %476 = vector.extract_strided_slice %461 {offsets = [0, 256], sizes = [8, 128], strides = [1, 1]} : vector<8x384xf32> to vector<8x128xf32>
    %477 = arith.addf %476, %286 : vector<8x128xf32>
    %478 = arith.mulf %468, %477 : vector<8x128xf32>
    %479 = arith.addf %460, %478 : vector<8x128xf32>
    %480 = math.tanh %479 : vector<8x128xf32>
    %481 = arith.subf %450, %480 : vector<8x128xf32>
    %482 = arith.mulf %475, %481 : vector<8x128xf32>
    %483 = arith.addf %480, %482 : vector<8x128xf32>
    %484 = arith.index_cast %454 : i32 to index
    %c0_141 = arith.constant 0 : index
    %485 = vector.load %arg23[%484, %c0_141] : memref<64x128xf32, #tpu.memory_space<vmem>>, vector<8x128xf32>
    tpu.vector_store %arg23[%484, %c0_141], %483 {strides = array<i32>} : memref<64x128xf32, #tpu.memory_space<vmem>>, vector<8x128xf32>,
    %c6_i32_142 = arith.constant 6 : i32
    %c8_i32_143 = arith.constant 8 : i32
    %486 = arith.muli %c6_i32_142, %c8_i32_143 : i32
    %487 = tpu.assume_multiple %486, 8 : i32
    %488 = arith.index_cast %487 : i32 to index
    %c0_144 = arith.constant 0 : index
    %489 = vector.load %arg21[%488, %c0_144] : memref<64x384xf32, #tpu.memory_space<vmem>>, vector<8x128xf32>
    %490 = arith.index_cast %487 : i32 to index
    %c128_145 = arith.constant 128 : index
    %491 = vector.load %arg21[%490, %c128_145] : memref<64x384xf32, #tpu.memory_space<vmem>>, vector<8x128xf32>
    %492 = arith.index_cast %487 : i32 to index
    %c256_146 = arith.constant 256 : index
    %493 = vector.load %arg21[%492, %c256_146] : memref<64x384xf32, #tpu.memory_space<vmem>>, vector<8x128xf32>
    %cst_147 = arith.constant dense<0.000000e+00> : vector<8x384xf32>
    %494 = tpu.matmul %483, %283, %cst_147 {dimension_numbers = #tpu.dot_dimension_numbers<[1], [0], [0], [1], [0, 0, 1, 1], [], []>} : vector<8x128xf32>, vector<128x384xf32>, vector<8x384xf32> -> vector<8x384xf32>
    %495 = vector.extract_strided_slice %494 {offsets = [0, 0], sizes = [8, 128], strides = [1, 1]} : vector<8x384xf32> to vector<8x128xf32>
    %496 = arith.addf %489, %495 : vector<8x128xf32>
    %497 = arith.negf %496 : vector<8x128xf32>
    %498 = math.exp %497 : vector<8x128xf32>
    %cst_148 = arith.constant 1.000000e+00 : f32
    %499 = vector.broadcast %cst_148 : f32 to vector<8x128xf32>
    %500 = arith.addf %499, %498 : vector<8x128xf32>
    %501 = arith.divf %499, %500 : vector<8x128xf32>
    %502 = vector.extract_strided_slice %494 {offsets = [0, 128], sizes = [8, 128], strides = [1, 1]} : vector<8x384xf32> to vector<8x128xf32>
    %503 = arith.addf %491, %502 : vector<8x128xf32>
    %504 = arith.negf %503 : vector<8x128xf32>
    %505 = math.exp %504 : vector<8x128xf32>
    %cst_149 = arith.constant 1.000000e+00 : f32
    %506 = vector.broadcast %cst_149 : f32 to vector<8x128xf32>
    %507 = arith.addf %506, %505 : vector<8x128xf32>
    %508 = arith.divf %506, %507 : vector<8x128xf32>
    %509 = vector.extract_strided_slice %494 {offsets = [0, 256], sizes = [8, 128], strides = [1, 1]} : vector<8x384xf32> to vector<8x128xf32>
    %510 = arith.addf %509, %286 : vector<8x128xf32>
    %511 = arith.mulf %501, %510 : vector<8x128xf32>
    %512 = arith.addf %493, %511 : vector<8x128xf32>
    %513 = math.tanh %512 : vector<8x128xf32>
    %514 = arith.subf %483, %513 : vector<8x128xf32>
    %515 = arith.mulf %508, %514 : vector<8x128xf32>
    %516 = arith.addf %513, %515 : vector<8x128xf32>
    %517 = arith.index_cast %487 : i32 to index
    %c0_150 = arith.constant 0 : index
    %518 = vector.load %arg23[%517, %c0_150] : memref<64x128xf32, #tpu.memory_space<vmem>>, vector<8x128xf32>
    tpu.vector_store %arg23[%517, %c0_150], %516 {strides = array<i32>} : memref<64x128xf32, #tpu.memory_space<vmem>>, vector<8x128xf32>,
    %c7_i32_151 = arith.constant 7 : i32
    %c8_i32_152 = arith.constant 8 : i32
    %519 = arith.muli %c7_i32_151, %c8_i32_152 : i32
    %520 = tpu.assume_multiple %519, 8 : i32
    %521 = arith.index_cast %520 : i32 to index
    %c0_153 = arith.constant 0 : index
    %522 = vector.load %arg21[%521, %c0_153] : memref<64x384xf32, #tpu.memory_space<vmem>>, vector<8x128xf32>
    %523 = arith.index_cast %520 : i32 to index
    %c128_154 = arith.constant 128 : index
    %524 = vector.load %arg21[%523, %c128_154] : memref<64x384xf32, #tpu.memory_space<vmem>>, vector<8x128xf32>
    %525 = arith.index_cast %520 : i32 to index
    %c256_155 = arith.constant 256 : index
    %526 = vector.load %arg21[%525, %c256_155] : memref<64x384xf32, #tpu.memory_space<vmem>>, vector<8x128xf32>
    %cst_156 = arith.constant dense<0.000000e+00> : vector<8x384xf32>
    %527 = tpu.matmul %516, %283, %cst_156 {dimension_numbers = #tpu.dot_dimension_numbers<[1], [0], [0], [1], [0, 0, 1, 1], [], []>} : vector<8x128xf32>, vector<128x384xf32>, vector<8x384xf32> -> vector<8x384xf32>
    %528 = vector.extract_strided_slice %527 {offsets = [0, 0], sizes = [8, 128], strides = [1, 1]} : vector<8x384xf32> to vector<8x128xf32>
    %529 = arith.addf %522, %528 : vector<8x128xf32>
    %530 = arith.negf %529 : vector<8x128xf32>
    %531 = math.exp %530 : vector<8x128xf32>
    %cst_157 = arith.constant 1.000000e+00 : f32
    %532 = vector.broadcast %cst_157 : f32 to vector<8x128xf32>
    %533 = arith.addf %532, %531 : vector<8x128xf32>
    %534 = arith.divf %532, %533 : vector<8x128xf32>
    %535 = vector.extract_strided_slice %527 {offsets = [0, 128], sizes = [8, 128], strides = [1, 1]} : vector<8x384xf32> to vector<8x128xf32>
    %536 = arith.addf %524, %535 : vector<8x128xf32>
    %537 = arith.negf %536 : vector<8x128xf32>
    %538 = math.exp %537 : vector<8x128xf32>
    %cst_158 = arith.constant 1.000000e+00 : f32
    %539 = vector.broadcast %cst_158 : f32 to vector<8x128xf32>
    %540 = arith.addf %539, %538 : vector<8x128xf32>
    %541 = arith.divf %539, %540 : vector<8x128xf32>
    %542 = vector.extract_strided_slice %527 {offsets = [0, 256], sizes = [8, 128], strides = [1, 1]} : vector<8x384xf32> to vector<8x128xf32>
    %543 = arith.addf %542, %286 : vector<8x128xf32>
    %544 = arith.mulf %534, %543 : vector<8x128xf32>
    %545 = arith.addf %526, %544 : vector<8x128xf32>
    %546 = math.tanh %545 : vector<8x128xf32>
    %547 = arith.subf %516, %546 : vector<8x128xf32>
    %548 = arith.mulf %541, %547 : vector<8x128xf32>
    %549 = arith.addf %546, %548 : vector<8x128xf32>
    %550 = arith.index_cast %520 : i32 to index
    %c0_159 = arith.constant 0 : index
    %551 = vector.load %arg23[%550, %c0_159] : memref<64x128xf32, #tpu.memory_space<vmem>>, vector<8x128xf32>
    tpu.vector_store %arg23[%550, %c0_159], %549 {strides = array<i32>} : memref<64x128xf32, #tpu.memory_space<vmem>>, vector<8x128xf32>,
    %c8_i32_160 = arith.constant 8 : i32
    %c0_161 = arith.constant 0 : index
    %c0_162 = arith.constant 0 : index
    %552 = vector.load %arg10[%c0_161, %c0_162] : memref<128x384xf32, #tpu.memory_space<vmem>>, vector<128x384xf32>
    %c0_163 = arith.constant 0 : index
    %c0_164 = arith.constant 0 : index
    %553 = vector.load %arg12[%c0_163, %c0_164] : memref<1x384xf32, #tpu.memory_space<vmem>>, vector<1x384xf32>
    %c0_165 = arith.constant 0 : index
    %c0_166 = arith.constant 0 : index
    %554 = vector.load %arg23[%c0_165, %c0_166] : memref<64x128xf32, #tpu.memory_space<vmem>>, vector<64x128xf32>
    %cst_167 = arith.constant dense<0.000000e+00> : vector<64x384xf32>
    %555 = tpu.matmul %554, %552, %cst_167 {dimension_numbers = #tpu.dot_dimension_numbers<[1], [0], [0], [1], [0, 0, 1, 1], [], []>} : vector<64x128xf32>, vector<128x384xf32>, vector<64x384xf32> -> vector<64x384xf32>
    %556 = vector.broadcast %553 : vector<1x384xf32> to vector<64x384xf32>
    %557 = arith.addf %555, %556 : vector<64x384xf32>
    %c0_168 = arith.constant 0 : index
    %c0_169 = arith.constant 0 : index
    %558 = vector.load %arg21[%c0_168, %c0_169] : memref<64x384xf32, #tpu.memory_space<vmem>>, vector<64x384xf32>
    tpu.vector_store %arg21[%c0_168, %c0_169], %557 {strides = array<i32>} : memref<64x384xf32, #tpu.memory_space<vmem>>, vector<64x384xf32>,
    %c0_170 = arith.constant 0 : index
    %c0_171 = arith.constant 0 : index
    %559 = vector.load %arg11[%c0_170, %c0_171] : memref<128x384xf32, #tpu.memory_space<vmem>>, vector<128x384xf32>
    %c0_172 = arith.constant 0 : index
    %c0_173 = arith.constant 0 : index
    %560 = vector.load %arg13[%c0_172, %c0_173] : memref<1x128xf32, #tpu.memory_space<vmem>>, vector<1x128xf32>
    %561 = vector.shape_cast %560 : vector<1x128xf32> to vector<1x128xf32>
    %562 = vector.broadcast %561 : vector<1x128xf32> to vector<8x128xf32>
    %cst_174 = arith.constant 0.000000e+00 : f32
    %563 = vector.broadcast %cst_174 : f32 to vector<8x128xf32>
    %c0_i32_175 = arith.constant 0 : i32
    %c8_i32_176 = arith.constant 8 : i32
    %564 = arith.muli %c0_i32_175, %c8_i32_176 : i32
    %565 = tpu.assume_multiple %564, 8 : i32
    %566 = arith.index_cast %565 : i32 to index
    %c0_177 = arith.constant 0 : index
    %567 = vector.load %arg21[%566, %c0_177] : memref<64x384xf32, #tpu.memory_space<vmem>>, vector<8x128xf32>
    %568 = arith.index_cast %565 : i32 to index
    %c128_178 = arith.constant 128 : index
    %569 = vector.load %arg21[%568, %c128_178] : memref<64x384xf32, #tpu.memory_space<vmem>>, vector<8x128xf32>
    %570 = arith.index_cast %565 : i32 to index
    %c256_179 = arith.constant 256 : index
    %571 = vector.load %arg21[%570, %c256_179] : memref<64x384xf32, #tpu.memory_space<vmem>>, vector<8x128xf32>
    %cst_180 = arith.constant dense<0.000000e+00> : vector<8x384xf32>
    %572 = tpu.matmul %563, %559, %cst_180 {dimension_numbers = #tpu.dot_dimension_numbers<[1], [0], [0], [1], [0, 0, 1, 1], [], []>} : vector<8x128xf32>, vector<128x384xf32>, vector<8x384xf32> -> vector<8x384xf32>
    %573 = vector.extract_strided_slice %572 {offsets = [0, 0], sizes = [8, 128], strides = [1, 1]} : vector<8x384xf32> to vector<8x128xf32>
    %574 = arith.addf %567, %573 : vector<8x128xf32>
    %575 = arith.negf %574 : vector<8x128xf32>
    %576 = math.exp %575 : vector<8x128xf32>
    %cst_181 = arith.constant 1.000000e+00 : f32
    %577 = vector.broadcast %cst_181 : f32 to vector<8x128xf32>
    %578 = arith.addf %577, %576 : vector<8x128xf32>
    %579 = arith.divf %577, %578 : vector<8x128xf32>
    %580 = vector.extract_strided_slice %572 {offsets = [0, 128], sizes = [8, 128], strides = [1, 1]} : vector<8x384xf32> to vector<8x128xf32>
    %581 = arith.addf %569, %580 : vector<8x128xf32>
    %582 = arith.negf %581 : vector<8x128xf32>
    %583 = math.exp %582 : vector<8x128xf32>
    %cst_182 = arith.constant 1.000000e+00 : f32
    %584 = vector.broadcast %cst_182 : f32 to vector<8x128xf32>
    %585 = arith.addf %584, %583 : vector<8x128xf32>
    %586 = arith.divf %584, %585 : vector<8x128xf32>
    %587 = vector.extract_strided_slice %572 {offsets = [0, 256], sizes = [8, 128], strides = [1, 1]} : vector<8x384xf32> to vector<8x128xf32>
    %588 = arith.addf %587, %562 : vector<8x128xf32>
    %589 = arith.mulf %579, %588 : vector<8x128xf32>
    %590 = arith.addf %571, %589 : vector<8x128xf32>
    %591 = math.tanh %590 : vector<8x128xf32>
    %592 = arith.subf %563, %591 : vector<8x128xf32>
    %593 = arith.mulf %586, %592 : vector<8x128xf32>
    %594 = arith.addf %591, %593 : vector<8x128xf32>
    %595 = arith.index_cast %565 : i32 to index
    %c0_183 = arith.constant 0 : index
    %596 = vector.load %arg22[%595, %c0_183] : memref<64x128xf32, #tpu.memory_space<vmem>>, vector<8x128xf32>
    tpu.vector_store %arg22[%595, %c0_183], %594 {strides = array<i32>} : memref<64x128xf32, #tpu.memory_space<vmem>>, vector<8x128xf32>,
    %c1_i32_184 = arith.constant 1 : i32
    %c8_i32_185 = arith.constant 8 : i32
    %597 = arith.muli %c1_i32_184, %c8_i32_185 : i32
    %598 = tpu.assume_multiple %597, 8 : i32
    %599 = arith.index_cast %598 : i32 to index
    %c0_186 = arith.constant 0 : index
    %600 = vector.load %arg21[%599, %c0_186] : memref<64x384xf32, #tpu.memory_space<vmem>>, vector<8x128xf32>
    %601 = arith.index_cast %598 : i32 to index
    %c128_187 = arith.constant 128 : index
    %602 = vector.load %arg21[%601, %c128_187] : memref<64x384xf32, #tpu.memory_space<vmem>>, vector<8x128xf32>
    %603 = arith.index_cast %598 : i32 to index
    %c256_188 = arith.constant 256 : index
    %604 = vector.load %arg21[%603, %c256_188] : memref<64x384xf32, #tpu.memory_space<vmem>>, vector<8x128xf32>
    %cst_189 = arith.constant dense<0.000000e+00> : vector<8x384xf32>
    %605 = tpu.matmul %594, %559, %cst_189 {dimension_numbers = #tpu.dot_dimension_numbers<[1], [0], [0], [1], [0, 0, 1, 1], [], []>} : vector<8x128xf32>, vector<128x384xf32>, vector<8x384xf32> -> vector<8x384xf32>
    %606 = vector.extract_strided_slice %605 {offsets = [0, 0], sizes = [8, 128], strides = [1, 1]} : vector<8x384xf32> to vector<8x128xf32>
    %607 = arith.addf %600, %606 : vector<8x128xf32>
    %608 = arith.negf %607 : vector<8x128xf32>
    %609 = math.exp %608 : vector<8x128xf32>
    %cst_190 = arith.constant 1.000000e+00 : f32
    %610 = vector.broadcast %cst_190 : f32 to vector<8x128xf32>
    %611 = arith.addf %610, %609 : vector<8x128xf32>
    %612 = arith.divf %610, %611 : vector<8x128xf32>
    %613 = vector.extract_strided_slice %605 {offsets = [0, 128], sizes = [8, 128], strides = [1, 1]} : vector<8x384xf32> to vector<8x128xf32>
    %614 = arith.addf %602, %613 : vector<8x128xf32>
    %615 = arith.negf %614 : vector<8x128xf32>
    %616 = math.exp %615 : vector<8x128xf32>
    %cst_191 = arith.constant 1.000000e+00 : f32
    %617 = vector.broadcast %cst_191 : f32 to vector<8x128xf32>
    %618 = arith.addf %617, %616 : vector<8x128xf32>
    %619 = arith.divf %617, %618 : vector<8x128xf32>
    %620 = vector.extract_strided_slice %605 {offsets = [0, 256], sizes = [8, 128], strides = [1, 1]} : vector<8x384xf32> to vector<8x128xf32>
    %621 = arith.addf %620, %562 : vector<8x128xf32>
    %622 = arith.mulf %612, %621 : vector<8x128xf32>
    %623 = arith.addf %604, %622 : vector<8x128xf32>
    %624 = math.tanh %623 : vector<8x128xf32>
    %625 = arith.subf %594, %624 : vector<8x128xf32>
    %626 = arith.mulf %619, %625 : vector<8x128xf32>
    %627 = arith.addf %624, %626 : vector<8x128xf32>
    %628 = arith.index_cast %598 : i32 to index
    %c0_192 = arith.constant 0 : index
    %629 = vector.load %arg22[%628, %c0_192] : memref<64x128xf32, #tpu.memory_space<vmem>>, vector<8x128xf32>
    tpu.vector_store %arg22[%628, %c0_192], %627 {strides = array<i32>} : memref<64x128xf32, #tpu.memory_space<vmem>>, vector<8x128xf32>,
    %c2_i32_193 = arith.constant 2 : i32
    %c8_i32_194 = arith.constant 8 : i32
    %630 = arith.muli %c2_i32_193, %c8_i32_194 : i32
    %631 = tpu.assume_multiple %630, 8 : i32
    %632 = arith.index_cast %631 : i32 to index
    %c0_195 = arith.constant 0 : index
    %633 = vector.load %arg21[%632, %c0_195] : memref<64x384xf32, #tpu.memory_space<vmem>>, vector<8x128xf32>
    %634 = arith.index_cast %631 : i32 to index
    %c128_196 = arith.constant 128 : index
    %635 = vector.load %arg21[%634, %c128_196] : memref<64x384xf32, #tpu.memory_space<vmem>>, vector<8x128xf32>
    %636 = arith.index_cast %631 : i32 to index
    %c256_197 = arith.constant 256 : index
    %637 = vector.load %arg21[%636, %c256_197] : memref<64x384xf32, #tpu.memory_space<vmem>>, vector<8x128xf32>
    %cst_198 = arith.constant dense<0.000000e+00> : vector<8x384xf32>
    %638 = tpu.matmul %627, %559, %cst_198 {dimension_numbers = #tpu.dot_dimension_numbers<[1], [0], [0], [1], [0, 0, 1, 1], [], []>} : vector<8x128xf32>, vector<128x384xf32>, vector<8x384xf32> -> vector<8x384xf32>
    %639 = vector.extract_strided_slice %638 {offsets = [0, 0], sizes = [8, 128], strides = [1, 1]} : vector<8x384xf32> to vector<8x128xf32>
    %640 = arith.addf %633, %639 : vector<8x128xf32>
    %641 = arith.negf %640 : vector<8x128xf32>
    %642 = math.exp %641 : vector<8x128xf32>
    %cst_199 = arith.constant 1.000000e+00 : f32
    %643 = vector.broadcast %cst_199 : f32 to vector<8x128xf32>
    %644 = arith.addf %643, %642 : vector<8x128xf32>
    %645 = arith.divf %643, %644 : vector<8x128xf32>
    %646 = vector.extract_strided_slice %638 {offsets = [0, 128], sizes = [8, 128], strides = [1, 1]} : vector<8x384xf32> to vector<8x128xf32>
    %647 = arith.addf %635, %646 : vector<8x128xf32>
    %648 = arith.negf %647 : vector<8x128xf32>
    %649 = math.exp %648 : vector<8x128xf32>
    %cst_200 = arith.constant 1.000000e+00 : f32
    %650 = vector.broadcast %cst_200 : f32 to vector<8x128xf32>
    %651 = arith.addf %650, %649 : vector<8x128xf32>
    %652 = arith.divf %650, %651 : vector<8x128xf32>
    %653 = vector.extract_strided_slice %638 {offsets = [0, 256], sizes = [8, 128], strides = [1, 1]} : vector<8x384xf32> to vector<8x128xf32>
    %654 = arith.addf %653, %562 : vector<8x128xf32>
    %655 = arith.mulf %645, %654 : vector<8x128xf32>
    %656 = arith.addf %637, %655 : vector<8x128xf32>
    %657 = math.tanh %656 : vector<8x128xf32>
    %658 = arith.subf %627, %657 : vector<8x128xf32>
    %659 = arith.mulf %652, %658 : vector<8x128xf32>
    %660 = arith.addf %657, %659 : vector<8x128xf32>
    %661 = arith.index_cast %631 : i32 to index
    %c0_201 = arith.constant 0 : index
    %662 = vector.load %arg22[%661, %c0_201] : memref<64x128xf32, #tpu.memory_space<vmem>>, vector<8x128xf32>
    tpu.vector_store %arg22[%661, %c0_201], %660 {strides = array<i32>} : memref<64x128xf32, #tpu.memory_space<vmem>>, vector<8x128xf32>,
    %c3_i32_202 = arith.constant 3 : i32
    %c8_i32_203 = arith.constant 8 : i32
    %663 = arith.muli %c3_i32_202, %c8_i32_203 : i32
    %664 = tpu.assume_multiple %663, 8 : i32
    %665 = arith.index_cast %664 : i32 to index
    %c0_204 = arith.constant 0 : index
    %666 = vector.load %arg21[%665, %c0_204] : memref<64x384xf32, #tpu.memory_space<vmem>>, vector<8x128xf32>
    %667 = arith.index_cast %664 : i32 to index
    %c128_205 = arith.constant 128 : index
    %668 = vector.load %arg21[%667, %c128_205] : memref<64x384xf32, #tpu.memory_space<vmem>>, vector<8x128xf32>
    %669 = arith.index_cast %664 : i32 to index
    %c256_206 = arith.constant 256 : index
    %670 = vector.load %arg21[%669, %c256_206] : memref<64x384xf32, #tpu.memory_space<vmem>>, vector<8x128xf32>
    %cst_207 = arith.constant dense<0.000000e+00> : vector<8x384xf32>
    %671 = tpu.matmul %660, %559, %cst_207 {dimension_numbers = #tpu.dot_dimension_numbers<[1], [0], [0], [1], [0, 0, 1, 1], [], []>} : vector<8x128xf32>, vector<128x384xf32>, vector<8x384xf32> -> vector<8x384xf32>
    %672 = vector.extract_strided_slice %671 {offsets = [0, 0], sizes = [8, 128], strides = [1, 1]} : vector<8x384xf32> to vector<8x128xf32>
    %673 = arith.addf %666, %672 : vector<8x128xf32>
    %674 = arith.negf %673 : vector<8x128xf32>
    %675 = math.exp %674 : vector<8x128xf32>
    %cst_208 = arith.constant 1.000000e+00 : f32
    %676 = vector.broadcast %cst_208 : f32 to vector<8x128xf32>
    %677 = arith.addf %676, %675 : vector<8x128xf32>
    %678 = arith.divf %676, %677 : vector<8x128xf32>
    %679 = vector.extract_strided_slice %671 {offsets = [0, 128], sizes = [8, 128], strides = [1, 1]} : vector<8x384xf32> to vector<8x128xf32>
    %680 = arith.addf %668, %679 : vector<8x128xf32>
    %681 = arith.negf %680 : vector<8x128xf32>
    %682 = math.exp %681 : vector<8x128xf32>
    %cst_209 = arith.constant 1.000000e+00 : f32
    %683 = vector.broadcast %cst_209 : f32 to vector<8x128xf32>
    %684 = arith.addf %683, %682 : vector<8x128xf32>
    %685 = arith.divf %683, %684 : vector<8x128xf32>
    %686 = vector.extract_strided_slice %671 {offsets = [0, 256], sizes = [8, 128], strides = [1, 1]} : vector<8x384xf32> to vector<8x128xf32>
    %687 = arith.addf %686, %562 : vector<8x128xf32>
    %688 = arith.mulf %678, %687 : vector<8x128xf32>
    %689 = arith.addf %670, %688 : vector<8x128xf32>
    %690 = math.tanh %689 : vector<8x128xf32>
    %691 = arith.subf %660, %690 : vector<8x128xf32>
    %692 = arith.mulf %685, %691 : vector<8x128xf32>
    %693 = arith.addf %690, %692 : vector<8x128xf32>
    %694 = arith.index_cast %664 : i32 to index
    %c0_210 = arith.constant 0 : index
    %695 = vector.load %arg22[%694, %c0_210] : memref<64x128xf32, #tpu.memory_space<vmem>>, vector<8x128xf32>
    tpu.vector_store %arg22[%694, %c0_210], %693 {strides = array<i32>} : memref<64x128xf32, #tpu.memory_space<vmem>>, vector<8x128xf32>,
    %c4_i32_211 = arith.constant 4 : i32
    %c8_i32_212 = arith.constant 8 : i32
    %696 = arith.muli %c4_i32_211, %c8_i32_212 : i32
    %697 = tpu.assume_multiple %696, 8 : i32
    %698 = arith.index_cast %697 : i32 to index
    %c0_213 = arith.constant 0 : index
    %699 = vector.load %arg21[%698, %c0_213] : memref<64x384xf32, #tpu.memory_space<vmem>>, vector<8x128xf32>
    %700 = arith.index_cast %697 : i32 to index
    %c128_214 = arith.constant 128 : index
    %701 = vector.load %arg21[%700, %c128_214] : memref<64x384xf32, #tpu.memory_space<vmem>>, vector<8x128xf32>
    %702 = arith.index_cast %697 : i32 to index
    %c256_215 = arith.constant 256 : index
    %703 = vector.load %arg21[%702, %c256_215] : memref<64x384xf32, #tpu.memory_space<vmem>>, vector<8x128xf32>
    %cst_216 = arith.constant dense<0.000000e+00> : vector<8x384xf32>
    %704 = tpu.matmul %693, %559, %cst_216 {dimension_numbers = #tpu.dot_dimension_numbers<[1], [0], [0], [1], [0, 0, 1, 1], [], []>} : vector<8x128xf32>, vector<128x384xf32>, vector<8x384xf32> -> vector<8x384xf32>
    %705 = vector.extract_strided_slice %704 {offsets = [0, 0], sizes = [8, 128], strides = [1, 1]} : vector<8x384xf32> to vector<8x128xf32>
    %706 = arith.addf %699, %705 : vector<8x128xf32>
    %707 = arith.negf %706 : vector<8x128xf32>
    %708 = math.exp %707 : vector<8x128xf32>
    %cst_217 = arith.constant 1.000000e+00 : f32
    %709 = vector.broadcast %cst_217 : f32 to vector<8x128xf32>
    %710 = arith.addf %709, %708 : vector<8x128xf32>
    %711 = arith.divf %709, %710 : vector<8x128xf32>
    %712 = vector.extract_strided_slice %704 {offsets = [0, 128], sizes = [8, 128], strides = [1, 1]} : vector<8x384xf32> to vector<8x128xf32>
    %713 = arith.addf %701, %712 : vector<8x128xf32>
    %714 = arith.negf %713 : vector<8x128xf32>
    %715 = math.exp %714 : vector<8x128xf32>
    %cst_218 = arith.constant 1.000000e+00 : f32
    %716 = vector.broadcast %cst_218 : f32 to vector<8x128xf32>
    %717 = arith.addf %716, %715 : vector<8x128xf32>
    %718 = arith.divf %716, %717 : vector<8x128xf32>
    %719 = vector.extract_strided_slice %704 {offsets = [0, 256], sizes = [8, 128], strides = [1, 1]} : vector<8x384xf32> to vector<8x128xf32>
    %720 = arith.addf %719, %562 : vector<8x128xf32>
    %721 = arith.mulf %711, %720 : vector<8x128xf32>
    %722 = arith.addf %703, %721 : vector<8x128xf32>
    %723 = math.tanh %722 : vector<8x128xf32>
    %724 = arith.subf %693, %723 : vector<8x128xf32>
    %725 = arith.mulf %718, %724 : vector<8x128xf32>
    %726 = arith.addf %723, %725 : vector<8x128xf32>
    %727 = arith.index_cast %697 : i32 to index
    %c0_219 = arith.constant 0 : index
    %728 = vector.load %arg22[%727, %c0_219] : memref<64x128xf32, #tpu.memory_space<vmem>>, vector<8x128xf32>
    tpu.vector_store %arg22[%727, %c0_219], %726 {strides = array<i32>} : memref<64x128xf32, #tpu.memory_space<vmem>>, vector<8x128xf32>,
    %c5_i32_220 = arith.constant 5 : i32
    %c8_i32_221 = arith.constant 8 : i32
    %729 = arith.muli %c5_i32_220, %c8_i32_221 : i32
    %730 = tpu.assume_multiple %729, 8 : i32
    %731 = arith.index_cast %730 : i32 to index
    %c0_222 = arith.constant 0 : index
    %732 = vector.load %arg21[%731, %c0_222] : memref<64x384xf32, #tpu.memory_space<vmem>>, vector<8x128xf32>
    %733 = arith.index_cast %730 : i32 to index
    %c128_223 = arith.constant 128 : index
    %734 = vector.load %arg21[%733, %c128_223] : memref<64x384xf32, #tpu.memory_space<vmem>>, vector<8x128xf32>
    %735 = arith.index_cast %730 : i32 to index
    %c256_224 = arith.constant 256 : index
    %736 = vector.load %arg21[%735, %c256_224] : memref<64x384xf32, #tpu.memory_space<vmem>>, vector<8x128xf32>
    %cst_225 = arith.constant dense<0.000000e+00> : vector<8x384xf32>
    %737 = tpu.matmul %726, %559, %cst_225 {dimension_numbers = #tpu.dot_dimension_numbers<[1], [0], [0], [1], [0, 0, 1, 1], [], []>} : vector<8x128xf32>, vector<128x384xf32>, vector<8x384xf32> -> vector<8x384xf32>
    %738 = vector.extract_strided_slice %737 {offsets = [0, 0], sizes = [8, 128], strides = [1, 1]} : vector<8x384xf32> to vector<8x128xf32>
    %739 = arith.addf %732, %738 : vector<8x128xf32>
    %740 = arith.negf %739 : vector<8x128xf32>
    %741 = math.exp %740 : vector<8x128xf32>
    %cst_226 = arith.constant 1.000000e+00 : f32
    %742 = vector.broadcast %cst_226 : f32 to vector<8x128xf32>
    %743 = arith.addf %742, %741 : vector<8x128xf32>
    %744 = arith.divf %742, %743 : vector<8x128xf32>
    %745 = vector.extract_strided_slice %737 {offsets = [0, 128], sizes = [8, 128], strides = [1, 1]} : vector<8x384xf32> to vector<8x128xf32>
    %746 = arith.addf %734, %745 : vector<8x128xf32>
    %747 = arith.negf %746 : vector<8x128xf32>
    %748 = math.exp %747 : vector<8x128xf32>
    %cst_227 = arith.constant 1.000000e+00 : f32
    %749 = vector.broadcast %cst_227 : f32 to vector<8x128xf32>
    %750 = arith.addf %749, %748 : vector<8x128xf32>
    %751 = arith.divf %749, %750 : vector<8x128xf32>
    %752 = vector.extract_strided_slice %737 {offsets = [0, 256], sizes = [8, 128], strides = [1, 1]} : vector<8x384xf32> to vector<8x128xf32>
    %753 = arith.addf %752, %562 : vector<8x128xf32>
    %754 = arith.mulf %744, %753 : vector<8x128xf32>
    %755 = arith.addf %736, %754 : vector<8x128xf32>
    %756 = math.tanh %755 : vector<8x128xf32>
    %757 = arith.subf %726, %756 : vector<8x128xf32>
    %758 = arith.mulf %751, %757 : vector<8x128xf32>
    %759 = arith.addf %756, %758 : vector<8x128xf32>
    %760 = arith.index_cast %730 : i32 to index
    %c0_228 = arith.constant 0 : index
    %761 = vector.load %arg22[%760, %c0_228] : memref<64x128xf32, #tpu.memory_space<vmem>>, vector<8x128xf32>
    tpu.vector_store %arg22[%760, %c0_228], %759 {strides = array<i32>} : memref<64x128xf32, #tpu.memory_space<vmem>>, vector<8x128xf32>,
    %c6_i32_229 = arith.constant 6 : i32
    %c8_i32_230 = arith.constant 8 : i32
    %762 = arith.muli %c6_i32_229, %c8_i32_230 : i32
    %763 = tpu.assume_multiple %762, 8 : i32
    %764 = arith.index_cast %763 : i32 to index
    %c0_231 = arith.constant 0 : index
    %765 = vector.load %arg21[%764, %c0_231] : memref<64x384xf32, #tpu.memory_space<vmem>>, vector<8x128xf32>
    %766 = arith.index_cast %763 : i32 to index
    %c128_232 = arith.constant 128 : index
    %767 = vector.load %arg21[%766, %c128_232] : memref<64x384xf32, #tpu.memory_space<vmem>>, vector<8x128xf32>
    %768 = arith.index_cast %763 : i32 to index
    %c256_233 = arith.constant 256 : index
    %769 = vector.load %arg21[%768, %c256_233] : memref<64x384xf32, #tpu.memory_space<vmem>>, vector<8x128xf32>
    %cst_234 = arith.constant dense<0.000000e+00> : vector<8x384xf32>
    %770 = tpu.matmul %759, %559, %cst_234 {dimension_numbers = #tpu.dot_dimension_numbers<[1], [0], [0], [1], [0, 0, 1, 1], [], []>} : vector<8x128xf32>, vector<128x384xf32>, vector<8x384xf32> -> vector<8x384xf32>
    %771 = vector.extract_strided_slice %770 {offsets = [0, 0], sizes = [8, 128], strides = [1, 1]} : vector<8x384xf32> to vector<8x128xf32>
    %772 = arith.addf %765, %771 : vector<8x128xf32>
    %773 = arith.negf %772 : vector<8x128xf32>
    %774 = math.exp %773 : vector<8x128xf32>
    %cst_235 = arith.constant 1.000000e+00 : f32
    %775 = vector.broadcast %cst_235 : f32 to vector<8x128xf32>
    %776 = arith.addf %775, %774 : vector<8x128xf32>
    %777 = arith.divf %775, %776 : vector<8x128xf32>
    %778 = vector.extract_strided_slice %770 {offsets = [0, 128], sizes = [8, 128], strides = [1, 1]} : vector<8x384xf32> to vector<8x128xf32>
    %779 = arith.addf %767, %778 : vector<8x128xf32>
    %780 = arith.negf %779 : vector<8x128xf32>
    %781 = math.exp %780 : vector<8x128xf32>
    %cst_236 = arith.constant 1.000000e+00 : f32
    %782 = vector.broadcast %cst_236 : f32 to vector<8x128xf32>
    %783 = arith.addf %782, %781 : vector<8x128xf32>
    %784 = arith.divf %782, %783 : vector<8x128xf32>
    %785 = vector.extract_strided_slice %770 {offsets = [0, 256], sizes = [8, 128], strides = [1, 1]} : vector<8x384xf32> to vector<8x128xf32>
    %786 = arith.addf %785, %562 : vector<8x128xf32>
    %787 = arith.mulf %777, %786 : vector<8x128xf32>
    %788 = arith.addf %769, %787 : vector<8x128xf32>
    %789 = math.tanh %788 : vector<8x128xf32>
    %790 = arith.subf %759, %789 : vector<8x128xf32>
    %791 = arith.mulf %784, %790 : vector<8x128xf32>
    %792 = arith.addf %789, %791 : vector<8x128xf32>
    %793 = arith.index_cast %763 : i32 to index
    %c0_237 = arith.constant 0 : index
    %794 = vector.load %arg22[%793, %c0_237] : memref<64x128xf32, #tpu.memory_space<vmem>>, vector<8x128xf32>
    tpu.vector_store %arg22[%793, %c0_237], %792 {strides = array<i32>} : memref<64x128xf32, #tpu.memory_space<vmem>>, vector<8x128xf32>,
    %c7_i32_238 = arith.constant 7 : i32
    %c8_i32_239 = arith.constant 8 : i32
    %795 = arith.muli %c7_i32_238, %c8_i32_239 : i32
    %796 = tpu.assume_multiple %795, 8 : i32
    %797 = arith.index_cast %796 : i32 to index
    %c0_240 = arith.constant 0 : index
    %798 = vector.load %arg21[%797, %c0_240] : memref<64x384xf32, #tpu.memory_space<vmem>>, vector<8x128xf32>
    %799 = arith.index_cast %796 : i32 to index
    %c128_241 = arith.constant 128 : index
    %800 = vector.load %arg21[%799, %c128_241] : memref<64x384xf32, #tpu.memory_space<vmem>>, vector<8x128xf32>
    %801 = arith.index_cast %796 : i32 to index
    %c256_242 = arith.constant 256 : index
    %802 = vector.load %arg21[%801, %c256_242] : memref<64x384xf32, #tpu.memory_space<vmem>>, vector<8x128xf32>
    %cst_243 = arith.constant dense<0.000000e+00> : vector<8x384xf32>
    %803 = tpu.matmul %792, %559, %cst_243 {dimension_numbers = #tpu.dot_dimension_numbers<[1], [0], [0], [1], [0, 0, 1, 1], [], []>} : vector<8x128xf32>, vector<128x384xf32>, vector<8x384xf32> -> vector<8x384xf32>
    %804 = vector.extract_strided_slice %803 {offsets = [0, 0], sizes = [8, 128], strides = [1, 1]} : vector<8x384xf32> to vector<8x128xf32>
    %805 = arith.addf %798, %804 : vector<8x128xf32>
    %806 = arith.negf %805 : vector<8x128xf32>
    %807 = math.exp %806 : vector<8x128xf32>
    %cst_244 = arith.constant 1.000000e+00 : f32
    %808 = vector.broadcast %cst_244 : f32 to vector<8x128xf32>
    %809 = arith.addf %808, %807 : vector<8x128xf32>
    %810 = arith.divf %808, %809 : vector<8x128xf32>
    %811 = vector.extract_strided_slice %803 {offsets = [0, 128], sizes = [8, 128], strides = [1, 1]} : vector<8x384xf32> to vector<8x128xf32>
    %812 = arith.addf %800, %811 : vector<8x128xf32>
    %813 = arith.negf %812 : vector<8x128xf32>
    %814 = math.exp %813 : vector<8x128xf32>
    %cst_245 = arith.constant 1.000000e+00 : f32
    %815 = vector.broadcast %cst_245 : f32 to vector<8x128xf32>
    %816 = arith.addf %815, %814 : vector<8x128xf32>
    %817 = arith.divf %815, %816 : vector<8x128xf32>
    %818 = vector.extract_strided_slice %803 {offsets = [0, 256], sizes = [8, 128], strides = [1, 1]} : vector<8x384xf32> to vector<8x128xf32>
    %819 = arith.addf %818, %562 : vector<8x128xf32>
    %820 = arith.mulf %810, %819 : vector<8x128xf32>
    %821 = arith.addf %802, %820 : vector<8x128xf32>
    %822 = math.tanh %821 : vector<8x128xf32>
    %823 = arith.subf %792, %822 : vector<8x128xf32>
    %824 = arith.mulf %817, %823 : vector<8x128xf32>
    %825 = arith.addf %822, %824 : vector<8x128xf32>
    %826 = arith.index_cast %796 : i32 to index
    %c0_246 = arith.constant 0 : index
    %827 = vector.load %arg22[%826, %c0_246] : memref<64x128xf32, #tpu.memory_space<vmem>>, vector<8x128xf32>
    tpu.vector_store %arg22[%826, %c0_246], %825 {strides = array<i32>} : memref<64x128xf32, #tpu.memory_space<vmem>>, vector<8x128xf32>,
    %c8_i32_247 = arith.constant 8 : i32
    %c0_248 = arith.constant 0 : index
    %c0_249 = arith.constant 0 : index
    %828 = vector.load %arg14[%c0_248, %c0_249] : memref<128x384xf32, #tpu.memory_space<vmem>>, vector<128x384xf32>
    %c0_250 = arith.constant 0 : index
    %c0_251 = arith.constant 0 : index
    %829 = vector.load %arg16[%c0_250, %c0_251] : memref<1x384xf32, #tpu.memory_space<vmem>>, vector<1x384xf32>
    %c0_252 = arith.constant 0 : index
    %c0_253 = arith.constant 0 : index
    %830 = vector.load %arg22[%c0_252, %c0_253] : memref<64x128xf32, #tpu.memory_space<vmem>>, vector<64x128xf32>
    %cst_254 = arith.constant dense<0.000000e+00> : vector<64x384xf32>
    %831 = tpu.matmul %830, %828, %cst_254 {dimension_numbers = #tpu.dot_dimension_numbers<[1], [0], [0], [1], [0, 0, 1, 1], [], []>} : vector<64x128xf32>, vector<128x384xf32>, vector<64x384xf32> -> vector<64x384xf32>
    %832 = vector.broadcast %829 : vector<1x384xf32> to vector<64x384xf32>
    %833 = arith.addf %831, %832 : vector<64x384xf32>
    %c0_255 = arith.constant 0 : index
    %c0_256 = arith.constant 0 : index
    %834 = vector.load %arg21[%c0_255, %c0_256] : memref<64x384xf32, #tpu.memory_space<vmem>>, vector<64x384xf32>
    tpu.vector_store %arg21[%c0_255, %c0_256], %833 {strides = array<i32>} : memref<64x384xf32, #tpu.memory_space<vmem>>, vector<64x384xf32>,
    %c0_257 = arith.constant 0 : index
    %c0_258 = arith.constant 0 : index
    %835 = vector.load %arg15[%c0_257, %c0_258] : memref<128x384xf32, #tpu.memory_space<vmem>>, vector<128x384xf32>
    %c0_259 = arith.constant 0 : index
    %c0_260 = arith.constant 0 : index
    %836 = vector.load %arg17[%c0_259, %c0_260] : memref<1x128xf32, #tpu.memory_space<vmem>>, vector<1x128xf32>
    %837 = vector.shape_cast %836 : vector<1x128xf32> to vector<1x128xf32>
    %838 = vector.broadcast %837 : vector<1x128xf32> to vector<8x128xf32>
    %cst_261 = arith.constant 0.000000e+00 : f32
    %839 = vector.broadcast %cst_261 : f32 to vector<8x128xf32>
    %c0_i32_262 = arith.constant 0 : i32
    %c8_i32_263 = arith.constant 8 : i32
    %840 = arith.muli %c0_i32_262, %c8_i32_263 : i32
    %841 = tpu.assume_multiple %840, 8 : i32
    %842 = arith.index_cast %841 : i32 to index
    %c0_264 = arith.constant 0 : index
    %843 = vector.load %arg21[%842, %c0_264] : memref<64x384xf32, #tpu.memory_space<vmem>>, vector<8x128xf32>
    %844 = arith.index_cast %841 : i32 to index
    %c128_265 = arith.constant 128 : index
    %845 = vector.load %arg21[%844, %c128_265] : memref<64x384xf32, #tpu.memory_space<vmem>>, vector<8x128xf32>
    %846 = arith.index_cast %841 : i32 to index
    %c256_266 = arith.constant 256 : index
    %847 = vector.load %arg21[%846, %c256_266] : memref<64x384xf32, #tpu.memory_space<vmem>>, vector<8x128xf32>
    %cst_267 = arith.constant dense<0.000000e+00> : vector<8x384xf32>
    %848 = tpu.matmul %839, %835, %cst_267 {dimension_numbers = #tpu.dot_dimension_numbers<[1], [0], [0], [1], [0, 0, 1, 1], [], []>} : vector<8x128xf32>, vector<128x384xf32>, vector<8x384xf32> -> vector<8x384xf32>
    %849 = vector.extract_strided_slice %848 {offsets = [0, 0], sizes = [8, 128], strides = [1, 1]} : vector<8x384xf32> to vector<8x128xf32>
    %850 = arith.addf %843, %849 : vector<8x128xf32>
    %851 = arith.negf %850 : vector<8x128xf32>
    %852 = math.exp %851 : vector<8x128xf32>
    %cst_268 = arith.constant 1.000000e+00 : f32
    %853 = vector.broadcast %cst_268 : f32 to vector<8x128xf32>
    %854 = arith.addf %853, %852 : vector<8x128xf32>
    %855 = arith.divf %853, %854 : vector<8x128xf32>
    %856 = vector.extract_strided_slice %848 {offsets = [0, 128], sizes = [8, 128], strides = [1, 1]} : vector<8x384xf32> to vector<8x128xf32>
    %857 = arith.addf %845, %856 : vector<8x128xf32>
    %858 = arith.negf %857 : vector<8x128xf32>
    %859 = math.exp %858 : vector<8x128xf32>
    %cst_269 = arith.constant 1.000000e+00 : f32
    %860 = vector.broadcast %cst_269 : f32 to vector<8x128xf32>
    %861 = arith.addf %860, %859 : vector<8x128xf32>
    %862 = arith.divf %860, %861 : vector<8x128xf32>
    %863 = vector.extract_strided_slice %848 {offsets = [0, 256], sizes = [8, 128], strides = [1, 1]} : vector<8x384xf32> to vector<8x128xf32>
    %864 = arith.addf %863, %838 : vector<8x128xf32>
    %865 = arith.mulf %855, %864 : vector<8x128xf32>
    %866 = arith.addf %847, %865 : vector<8x128xf32>
    %867 = math.tanh %866 : vector<8x128xf32>
    %868 = arith.subf %839, %867 : vector<8x128xf32>
    %869 = arith.mulf %862, %868 : vector<8x128xf32>
    %870 = arith.addf %867, %869 : vector<8x128xf32>
    %871 = arith.index_cast %841 : i32 to index
    %c0_270 = arith.constant 0 : index
    %872 = vector.load %arg23[%871, %c0_270] : memref<64x128xf32, #tpu.memory_space<vmem>>, vector<8x128xf32>
    tpu.vector_store %arg23[%871, %c0_270], %870 {strides = array<i32>} : memref<64x128xf32, #tpu.memory_space<vmem>>, vector<8x128xf32>,
    %c1_i32_271 = arith.constant 1 : i32
    %c8_i32_272 = arith.constant 8 : i32
    %873 = arith.muli %c1_i32_271, %c8_i32_272 : i32
    %874 = tpu.assume_multiple %873, 8 : i32
    %875 = arith.index_cast %874 : i32 to index
    %c0_273 = arith.constant 0 : index
    %876 = vector.load %arg21[%875, %c0_273] : memref<64x384xf32, #tpu.memory_space<vmem>>, vector<8x128xf32>
    %877 = arith.index_cast %874 : i32 to index
    %c128_274 = arith.constant 128 : index
    %878 = vector.load %arg21[%877, %c128_274] : memref<64x384xf32, #tpu.memory_space<vmem>>, vector<8x128xf32>
    %879 = arith.index_cast %874 : i32 to index
    %c256_275 = arith.constant 256 : index
    %880 = vector.load %arg21[%879, %c256_275] : memref<64x384xf32, #tpu.memory_space<vmem>>, vector<8x128xf32>
    %cst_276 = arith.constant dense<0.000000e+00> : vector<8x384xf32>
    %881 = tpu.matmul %870, %835, %cst_276 {dimension_numbers = #tpu.dot_dimension_numbers<[1], [0], [0], [1], [0, 0, 1, 1], [], []>} : vector<8x128xf32>, vector<128x384xf32>, vector<8x384xf32> -> vector<8x384xf32>
    %882 = vector.extract_strided_slice %881 {offsets = [0, 0], sizes = [8, 128], strides = [1, 1]} : vector<8x384xf32> to vector<8x128xf32>
    %883 = arith.addf %876, %882 : vector<8x128xf32>
    %884 = arith.negf %883 : vector<8x128xf32>
    %885 = math.exp %884 : vector<8x128xf32>
    %cst_277 = arith.constant 1.000000e+00 : f32
    %886 = vector.broadcast %cst_277 : f32 to vector<8x128xf32>
    %887 = arith.addf %886, %885 : vector<8x128xf32>
    %888 = arith.divf %886, %887 : vector<8x128xf32>
    %889 = vector.extract_strided_slice %881 {offsets = [0, 128], sizes = [8, 128], strides = [1, 1]} : vector<8x384xf32> to vector<8x128xf32>
    %890 = arith.addf %878, %889 : vector<8x128xf32>
    %891 = arith.negf %890 : vector<8x128xf32>
    %892 = math.exp %891 : vector<8x128xf32>
    %cst_278 = arith.constant 1.000000e+00 : f32
    %893 = vector.broadcast %cst_278 : f32 to vector<8x128xf32>
    %894 = arith.addf %893, %892 : vector<8x128xf32>
    %895 = arith.divf %893, %894 : vector<8x128xf32>
    %896 = vector.extract_strided_slice %881 {offsets = [0, 256], sizes = [8, 128], strides = [1, 1]} : vector<8x384xf32> to vector<8x128xf32>
    %897 = arith.addf %896, %838 : vector<8x128xf32>
    %898 = arith.mulf %888, %897 : vector<8x128xf32>
    %899 = arith.addf %880, %898 : vector<8x128xf32>
    %900 = math.tanh %899 : vector<8x128xf32>
    %901 = arith.subf %870, %900 : vector<8x128xf32>
    %902 = arith.mulf %895, %901 : vector<8x128xf32>
    %903 = arith.addf %900, %902 : vector<8x128xf32>
    %904 = arith.index_cast %874 : i32 to index
    %c0_279 = arith.constant 0 : index
    %905 = vector.load %arg23[%904, %c0_279] : memref<64x128xf32, #tpu.memory_space<vmem>>, vector<8x128xf32>
    tpu.vector_store %arg23[%904, %c0_279], %903 {strides = array<i32>} : memref<64x128xf32, #tpu.memory_space<vmem>>, vector<8x128xf32>,
    %c2_i32_280 = arith.constant 2 : i32
    %c8_i32_281 = arith.constant 8 : i32
    %906 = arith.muli %c2_i32_280, %c8_i32_281 : i32
    %907 = tpu.assume_multiple %906, 8 : i32
    %908 = arith.index_cast %907 : i32 to index
    %c0_282 = arith.constant 0 : index
    %909 = vector.load %arg21[%908, %c0_282] : memref<64x384xf32, #tpu.memory_space<vmem>>, vector<8x128xf32>
    %910 = arith.index_cast %907 : i32 to index
    %c128_283 = arith.constant 128 : index
    %911 = vector.load %arg21[%910, %c128_283] : memref<64x384xf32, #tpu.memory_space<vmem>>, vector<8x128xf32>
    %912 = arith.index_cast %907 : i32 to index
    %c256_284 = arith.constant 256 : index
    %913 = vector.load %arg21[%912, %c256_284] : memref<64x384xf32, #tpu.memory_space<vmem>>, vector<8x128xf32>
    %cst_285 = arith.constant dense<0.000000e+00> : vector<8x384xf32>
    %914 = tpu.matmul %903, %835, %cst_285 {dimension_numbers = #tpu.dot_dimension_numbers<[1], [0], [0], [1], [0, 0, 1, 1], [], []>} : vector<8x128xf32>, vector<128x384xf32>, vector<8x384xf32> -> vector<8x384xf32>
    %915 = vector.extract_strided_slice %914 {offsets = [0, 0], sizes = [8, 128], strides = [1, 1]} : vector<8x384xf32> to vector<8x128xf32>
    %916 = arith.addf %909, %915 : vector<8x128xf32>
    %917 = arith.negf %916 : vector<8x128xf32>
    %918 = math.exp %917 : vector<8x128xf32>
    %cst_286 = arith.constant 1.000000e+00 : f32
    %919 = vector.broadcast %cst_286 : f32 to vector<8x128xf32>
    %920 = arith.addf %919, %918 : vector<8x128xf32>
    %921 = arith.divf %919, %920 : vector<8x128xf32>
    %922 = vector.extract_strided_slice %914 {offsets = [0, 128], sizes = [8, 128], strides = [1, 1]} : vector<8x384xf32> to vector<8x128xf32>
    %923 = arith.addf %911, %922 : vector<8x128xf32>
    %924 = arith.negf %923 : vector<8x128xf32>
    %925 = math.exp %924 : vector<8x128xf32>
    %cst_287 = arith.constant 1.000000e+00 : f32
    %926 = vector.broadcast %cst_287 : f32 to vector<8x128xf32>
    %927 = arith.addf %926, %925 : vector<8x128xf32>
    %928 = arith.divf %926, %927 : vector<8x128xf32>
    %929 = vector.extract_strided_slice %914 {offsets = [0, 256], sizes = [8, 128], strides = [1, 1]} : vector<8x384xf32> to vector<8x128xf32>
    %930 = arith.addf %929, %838 : vector<8x128xf32>
    %931 = arith.mulf %921, %930 : vector<8x128xf32>
    %932 = arith.addf %913, %931 : vector<8x128xf32>
    %933 = math.tanh %932 : vector<8x128xf32>
    %934 = arith.subf %903, %933 : vector<8x128xf32>
    %935 = arith.mulf %928, %934 : vector<8x128xf32>
    %936 = arith.addf %933, %935 : vector<8x128xf32>
    %937 = arith.index_cast %907 : i32 to index
    %c0_288 = arith.constant 0 : index
    %938 = vector.load %arg23[%937, %c0_288] : memref<64x128xf32, #tpu.memory_space<vmem>>, vector<8x128xf32>
    tpu.vector_store %arg23[%937, %c0_288], %936 {strides = array<i32>} : memref<64x128xf32, #tpu.memory_space<vmem>>, vector<8x128xf32>,
    %c3_i32_289 = arith.constant 3 : i32
    %c8_i32_290 = arith.constant 8 : i32
    %939 = arith.muli %c3_i32_289, %c8_i32_290 : i32
    %940 = tpu.assume_multiple %939, 8 : i32
    %941 = arith.index_cast %940 : i32 to index
    %c0_291 = arith.constant 0 : index
    %942 = vector.load %arg21[%941, %c0_291] : memref<64x384xf32, #tpu.memory_space<vmem>>, vector<8x128xf32>
    %943 = arith.index_cast %940 : i32 to index
    %c128_292 = arith.constant 128 : index
    %944 = vector.load %arg21[%943, %c128_292] : memref<64x384xf32, #tpu.memory_space<vmem>>, vector<8x128xf32>
    %945 = arith.index_cast %940 : i32 to index
    %c256_293 = arith.constant 256 : index
    %946 = vector.load %arg21[%945, %c256_293] : memref<64x384xf32, #tpu.memory_space<vmem>>, vector<8x128xf32>
    %cst_294 = arith.constant dense<0.000000e+00> : vector<8x384xf32>
    %947 = tpu.matmul %936, %835, %cst_294 {dimension_numbers = #tpu.dot_dimension_numbers<[1], [0], [0], [1], [0, 0, 1, 1], [], []>} : vector<8x128xf32>, vector<128x384xf32>, vector<8x384xf32> -> vector<8x384xf32>
    %948 = vector.extract_strided_slice %947 {offsets = [0, 0], sizes = [8, 128], strides = [1, 1]} : vector<8x384xf32> to vector<8x128xf32>
    %949 = arith.addf %942, %948 : vector<8x128xf32>
    %950 = arith.negf %949 : vector<8x128xf32>
    %951 = math.exp %950 : vector<8x128xf32>
    %cst_295 = arith.constant 1.000000e+00 : f32
    %952 = vector.broadcast %cst_295 : f32 to vector<8x128xf32>
    %953 = arith.addf %952, %951 : vector<8x128xf32>
    %954 = arith.divf %952, %953 : vector<8x128xf32>
    %955 = vector.extract_strided_slice %947 {offsets = [0, 128], sizes = [8, 128], strides = [1, 1]} : vector<8x384xf32> to vector<8x128xf32>
    %956 = arith.addf %944, %955 : vector<8x128xf32>
    %957 = arith.negf %956 : vector<8x128xf32>
    %958 = math.exp %957 : vector<8x128xf32>
    %cst_296 = arith.constant 1.000000e+00 : f32
    %959 = vector.broadcast %cst_296 : f32 to vector<8x128xf32>
    %960 = arith.addf %959, %958 : vector<8x128xf32>
    %961 = arith.divf %959, %960 : vector<8x128xf32>
    %962 = vector.extract_strided_slice %947 {offsets = [0, 256], sizes = [8, 128], strides = [1, 1]} : vector<8x384xf32> to vector<8x128xf32>
    %963 = arith.addf %962, %838 : vector<8x128xf32>
    %964 = arith.mulf %954, %963 : vector<8x128xf32>
    %965 = arith.addf %946, %964 : vector<8x128xf32>
    %966 = math.tanh %965 : vector<8x128xf32>
    %967 = arith.subf %936, %966 : vector<8x128xf32>
    %968 = arith.mulf %961, %967 : vector<8x128xf32>
    %969 = arith.addf %966, %968 : vector<8x128xf32>
    %970 = arith.index_cast %940 : i32 to index
    %c0_297 = arith.constant 0 : index
    %971 = vector.load %arg23[%970, %c0_297] : memref<64x128xf32, #tpu.memory_space<vmem>>, vector<8x128xf32>
    tpu.vector_store %arg23[%970, %c0_297], %969 {strides = array<i32>} : memref<64x128xf32, #tpu.memory_space<vmem>>, vector<8x128xf32>,
    %c4_i32_298 = arith.constant 4 : i32
    %c8_i32_299 = arith.constant 8 : i32
    %972 = arith.muli %c4_i32_298, %c8_i32_299 : i32
    %973 = tpu.assume_multiple %972, 8 : i32
    %974 = arith.index_cast %973 : i32 to index
    %c0_300 = arith.constant 0 : index
    %975 = vector.load %arg21[%974, %c0_300] : memref<64x384xf32, #tpu.memory_space<vmem>>, vector<8x128xf32>
    %976 = arith.index_cast %973 : i32 to index
    %c128_301 = arith.constant 128 : index
    %977 = vector.load %arg21[%976, %c128_301] : memref<64x384xf32, #tpu.memory_space<vmem>>, vector<8x128xf32>
    %978 = arith.index_cast %973 : i32 to index
    %c256_302 = arith.constant 256 : index
    %979 = vector.load %arg21[%978, %c256_302] : memref<64x384xf32, #tpu.memory_space<vmem>>, vector<8x128xf32>
    %cst_303 = arith.constant dense<0.000000e+00> : vector<8x384xf32>
    %980 = tpu.matmul %969, %835, %cst_303 {dimension_numbers = #tpu.dot_dimension_numbers<[1], [0], [0], [1], [0, 0, 1, 1], [], []>} : vector<8x128xf32>, vector<128x384xf32>, vector<8x384xf32> -> vector<8x384xf32>
    %981 = vector.extract_strided_slice %980 {offsets = [0, 0], sizes = [8, 128], strides = [1, 1]} : vector<8x384xf32> to vector<8x128xf32>
    %982 = arith.addf %975, %981 : vector<8x128xf32>
    %983 = arith.negf %982 : vector<8x128xf32>
    %984 = math.exp %983 : vector<8x128xf32>
    %cst_304 = arith.constant 1.000000e+00 : f32
    %985 = vector.broadcast %cst_304 : f32 to vector<8x128xf32>
    %986 = arith.addf %985, %984 : vector<8x128xf32>
    %987 = arith.divf %985, %986 : vector<8x128xf32>
    %988 = vector.extract_strided_slice %980 {offsets = [0, 128], sizes = [8, 128], strides = [1, 1]} : vector<8x384xf32> to vector<8x128xf32>
    %989 = arith.addf %977, %988 : vector<8x128xf32>
    %990 = arith.negf %989 : vector<8x128xf32>
    %991 = math.exp %990 : vector<8x128xf32>
    %cst_305 = arith.constant 1.000000e+00 : f32
    %992 = vector.broadcast %cst_305 : f32 to vector<8x128xf32>
    %993 = arith.addf %992, %991 : vector<8x128xf32>
    %994 = arith.divf %992, %993 : vector<8x128xf32>
    %995 = vector.extract_strided_slice %980 {offsets = [0, 256], sizes = [8, 128], strides = [1, 1]} : vector<8x384xf32> to vector<8x128xf32>
    %996 = arith.addf %995, %838 : vector<8x128xf32>
    %997 = arith.mulf %987, %996 : vector<8x128xf32>
    %998 = arith.addf %979, %997 : vector<8x128xf32>
    %999 = math.tanh %998 : vector<8x128xf32>
    %1000 = arith.subf %969, %999 : vector<8x128xf32>
    %1001 = arith.mulf %994, %1000 : vector<8x128xf32>
    %1002 = arith.addf %999, %1001 : vector<8x128xf32>
    %1003 = arith.index_cast %973 : i32 to index
    %c0_306 = arith.constant 0 : index
    %1004 = vector.load %arg23[%1003, %c0_306] : memref<64x128xf32, #tpu.memory_space<vmem>>, vector<8x128xf32>
    tpu.vector_store %arg23[%1003, %c0_306], %1002 {strides = array<i32>} : memref<64x128xf32, #tpu.memory_space<vmem>>, vector<8x128xf32>,
    %c5_i32_307 = arith.constant 5 : i32
    %c8_i32_308 = arith.constant 8 : i32
    %1005 = arith.muli %c5_i32_307, %c8_i32_308 : i32
    %1006 = tpu.assume_multiple %1005, 8 : i32
    %1007 = arith.index_cast %1006 : i32 to index
    %c0_309 = arith.constant 0 : index
    %1008 = vector.load %arg21[%1007, %c0_309] : memref<64x384xf32, #tpu.memory_space<vmem>>, vector<8x128xf32>
    %1009 = arith.index_cast %1006 : i32 to index
    %c128_310 = arith.constant 128 : index
    %1010 = vector.load %arg21[%1009, %c128_310] : memref<64x384xf32, #tpu.memory_space<vmem>>, vector<8x128xf32>
    %1011 = arith.index_cast %1006 : i32 to index
    %c256_311 = arith.constant 256 : index
    %1012 = vector.load %arg21[%1011, %c256_311] : memref<64x384xf32, #tpu.memory_space<vmem>>, vector<8x128xf32>
    %cst_312 = arith.constant dense<0.000000e+00> : vector<8x384xf32>
    %1013 = tpu.matmul %1002, %835, %cst_312 {dimension_numbers = #tpu.dot_dimension_numbers<[1], [0], [0], [1], [0, 0, 1, 1], [], []>} : vector<8x128xf32>, vector<128x384xf32>, vector<8x384xf32> -> vector<8x384xf32>
    %1014 = vector.extract_strided_slice %1013 {offsets = [0, 0], sizes = [8, 128], strides = [1, 1]} : vector<8x384xf32> to vector<8x128xf32>
    %1015 = arith.addf %1008, %1014 : vector<8x128xf32>
    %1016 = arith.negf %1015 : vector<8x128xf32>
    %1017 = math.exp %1016 : vector<8x128xf32>
    %cst_313 = arith.constant 1.000000e+00 : f32
    %1018 = vector.broadcast %cst_313 : f32 to vector<8x128xf32>
    %1019 = arith.addf %1018, %1017 : vector<8x128xf32>
    %1020 = arith.divf %1018, %1019 : vector<8x128xf32>
    %1021 = vector.extract_strided_slice %1013 {offsets = [0, 128], sizes = [8, 128], strides = [1, 1]} : vector<8x384xf32> to vector<8x128xf32>
    %1022 = arith.addf %1010, %1021 : vector<8x128xf32>
    %1023 = arith.negf %1022 : vector<8x128xf32>
    %1024 = math.exp %1023 : vector<8x128xf32>
    %cst_314 = arith.constant 1.000000e+00 : f32
    %1025 = vector.broadcast %cst_314 : f32 to vector<8x128xf32>
    %1026 = arith.addf %1025, %1024 : vector<8x128xf32>
    %1027 = arith.divf %1025, %1026 : vector<8x128xf32>
    %1028 = vector.extract_strided_slice %1013 {offsets = [0, 256], sizes = [8, 128], strides = [1, 1]} : vector<8x384xf32> to vector<8x128xf32>
    %1029 = arith.addf %1028, %838 : vector<8x128xf32>
    %1030 = arith.mulf %1020, %1029 : vector<8x128xf32>
    %1031 = arith.addf %1012, %1030 : vector<8x128xf32>
    %1032 = math.tanh %1031 : vector<8x128xf32>
    %1033 = arith.subf %1002, %1032 : vector<8x128xf32>
    %1034 = arith.mulf %1027, %1033 : vector<8x128xf32>
    %1035 = arith.addf %1032, %1034 : vector<8x128xf32>
    %1036 = arith.index_cast %1006 : i32 to index
    %c0_315 = arith.constant 0 : index
    %1037 = vector.load %arg23[%1036, %c0_315] : memref<64x128xf32, #tpu.memory_space<vmem>>, vector<8x128xf32>
    tpu.vector_store %arg23[%1036, %c0_315], %1035 {strides = array<i32>} : memref<64x128xf32, #tpu.memory_space<vmem>>, vector<8x128xf32>,
    %c6_i32_316 = arith.constant 6 : i32
    %c8_i32_317 = arith.constant 8 : i32
    %1038 = arith.muli %c6_i32_316, %c8_i32_317 : i32
    %1039 = tpu.assume_multiple %1038, 8 : i32
    %1040 = arith.index_cast %1039 : i32 to index
    %c0_318 = arith.constant 0 : index
    %1041 = vector.load %arg21[%1040, %c0_318] : memref<64x384xf32, #tpu.memory_space<vmem>>, vector<8x128xf32>
    %1042 = arith.index_cast %1039 : i32 to index
    %c128_319 = arith.constant 128 : index
    %1043 = vector.load %arg21[%1042, %c128_319] : memref<64x384xf32, #tpu.memory_space<vmem>>, vector<8x128xf32>
    %1044 = arith.index_cast %1039 : i32 to index
    %c256_320 = arith.constant 256 : index
    %1045 = vector.load %arg21[%1044, %c256_320] : memref<64x384xf32, #tpu.memory_space<vmem>>, vector<8x128xf32>
    %cst_321 = arith.constant dense<0.000000e+00> : vector<8x384xf32>
    %1046 = tpu.matmul %1035, %835, %cst_321 {dimension_numbers = #tpu.dot_dimension_numbers<[1], [0], [0], [1], [0, 0, 1, 1], [], []>} : vector<8x128xf32>, vector<128x384xf32>, vector<8x384xf32> -> vector<8x384xf32>
    %1047 = vector.extract_strided_slice %1046 {offsets = [0, 0], sizes = [8, 128], strides = [1, 1]} : vector<8x384xf32> to vector<8x128xf32>
    %1048 = arith.addf %1041, %1047 : vector<8x128xf32>
    %1049 = arith.negf %1048 : vector<8x128xf32>
    %1050 = math.exp %1049 : vector<8x128xf32>
    %cst_322 = arith.constant 1.000000e+00 : f32
    %1051 = vector.broadcast %cst_322 : f32 to vector<8x128xf32>
    %1052 = arith.addf %1051, %1050 : vector<8x128xf32>
    %1053 = arith.divf %1051, %1052 : vector<8x128xf32>
    %1054 = vector.extract_strided_slice %1046 {offsets = [0, 128], sizes = [8, 128], strides = [1, 1]} : vector<8x384xf32> to vector<8x128xf32>
    %1055 = arith.addf %1043, %1054 : vector<8x128xf32>
    %1056 = arith.negf %1055 : vector<8x128xf32>
    %1057 = math.exp %1056 : vector<8x128xf32>
    %cst_323 = arith.constant 1.000000e+00 : f32
    %1058 = vector.broadcast %cst_323 : f32 to vector<8x128xf32>
    %1059 = arith.addf %1058, %1057 : vector<8x128xf32>
    %1060 = arith.divf %1058, %1059 : vector<8x128xf32>
    %1061 = vector.extract_strided_slice %1046 {offsets = [0, 256], sizes = [8, 128], strides = [1, 1]} : vector<8x384xf32> to vector<8x128xf32>
    %1062 = arith.addf %1061, %838 : vector<8x128xf32>
    %1063 = arith.mulf %1053, %1062 : vector<8x128xf32>
    %1064 = arith.addf %1045, %1063 : vector<8x128xf32>
    %1065 = math.tanh %1064 : vector<8x128xf32>
    %1066 = arith.subf %1035, %1065 : vector<8x128xf32>
    %1067 = arith.mulf %1060, %1066 : vector<8x128xf32>
    %1068 = arith.addf %1065, %1067 : vector<8x128xf32>
    %1069 = arith.index_cast %1039 : i32 to index
    %c0_324 = arith.constant 0 : index
    %1070 = vector.load %arg23[%1069, %c0_324] : memref<64x128xf32, #tpu.memory_space<vmem>>, vector<8x128xf32>
    tpu.vector_store %arg23[%1069, %c0_324], %1068 {strides = array<i32>} : memref<64x128xf32, #tpu.memory_space<vmem>>, vector<8x128xf32>,
    %c7_i32_325 = arith.constant 7 : i32
    %c8_i32_326 = arith.constant 8 : i32
    %1071 = arith.muli %c7_i32_325, %c8_i32_326 : i32
    %1072 = tpu.assume_multiple %1071, 8 : i32
    %1073 = arith.index_cast %1072 : i32 to index
    %c0_327 = arith.constant 0 : index
    %1074 = vector.load %arg21[%1073, %c0_327] : memref<64x384xf32, #tpu.memory_space<vmem>>, vector<8x128xf32>
    %1075 = arith.index_cast %1072 : i32 to index
    %c128_328 = arith.constant 128 : index
    %1076 = vector.load %arg21[%1075, %c128_328] : memref<64x384xf32, #tpu.memory_space<vmem>>, vector<8x128xf32>
    %1077 = arith.index_cast %1072 : i32 to index
    %c256_329 = arith.constant 256 : index
    %1078 = vector.load %arg21[%1077, %c256_329] : memref<64x384xf32, #tpu.memory_space<vmem>>, vector<8x128xf32>
    %cst_330 = arith.constant dense<0.000000e+00> : vector<8x384xf32>
    %1079 = tpu.matmul %1068, %835, %cst_330 {dimension_numbers = #tpu.dot_dimension_numbers<[1], [0], [0], [1], [0, 0, 1, 1], [], []>} : vector<8x128xf32>, vector<128x384xf32>, vector<8x384xf32> -> vector<8x384xf32>
    %1080 = vector.extract_strided_slice %1079 {offsets = [0, 0], sizes = [8, 128], strides = [1, 1]} : vector<8x384xf32> to vector<8x128xf32>
    %1081 = arith.addf %1074, %1080 : vector<8x128xf32>
    %1082 = arith.negf %1081 : vector<8x128xf32>
    %1083 = math.exp %1082 : vector<8x128xf32>
    %cst_331 = arith.constant 1.000000e+00 : f32
    %1084 = vector.broadcast %cst_331 : f32 to vector<8x128xf32>
    %1085 = arith.addf %1084, %1083 : vector<8x128xf32>
    %1086 = arith.divf %1084, %1085 : vector<8x128xf32>
    %1087 = vector.extract_strided_slice %1079 {offsets = [0, 128], sizes = [8, 128], strides = [1, 1]} : vector<8x384xf32> to vector<8x128xf32>
    %1088 = arith.addf %1076, %1087 : vector<8x128xf32>
    %1089 = arith.negf %1088 : vector<8x128xf32>
    %1090 = math.exp %1089 : vector<8x128xf32>
    %cst_332 = arith.constant 1.000000e+00 : f32
    %1091 = vector.broadcast %cst_332 : f32 to vector<8x128xf32>
    %1092 = arith.addf %1091, %1090 : vector<8x128xf32>
    %1093 = arith.divf %1091, %1092 : vector<8x128xf32>
    %1094 = vector.extract_strided_slice %1079 {offsets = [0, 256], sizes = [8, 128], strides = [1, 1]} : vector<8x384xf32> to vector<8x128xf32>
    %1095 = arith.addf %1094, %838 : vector<8x128xf32>
    %1096 = arith.mulf %1086, %1095 : vector<8x128xf32>
    %1097 = arith.addf %1078, %1096 : vector<8x128xf32>
    %1098 = math.tanh %1097 : vector<8x128xf32>
    %1099 = arith.subf %1068, %1098 : vector<8x128xf32>
    %1100 = arith.mulf %1093, %1099 : vector<8x128xf32>
    %1101 = arith.addf %1098, %1100 : vector<8x128xf32>
    %1102 = arith.index_cast %1072 : i32 to index
    %c0_333 = arith.constant 0 : index
    %1103 = vector.load %arg23[%1102, %c0_333] : memref<64x128xf32, #tpu.memory_space<vmem>>, vector<8x128xf32>
    tpu.vector_store %arg23[%1102, %c0_333], %1101 {strides = array<i32>} : memref<64x128xf32, #tpu.memory_space<vmem>>, vector<8x128xf32>,
    %c8_i32_334 = arith.constant 8 : i32
    %c0_335 = arith.constant 0 : index
    %c0_336 = arith.constant 0 : index
    %1104 = vector.load %arg18[%c0_335, %c0_336] : memref<128x128xf32, #tpu.memory_space<vmem>>, vector<128x128xf32>
    %c0_337 = arith.constant 0 : index
    %c0_338 = arith.constant 0 : index
    %1105 = vector.load %arg19[%c0_337, %c0_338] : memref<1x128xf32, #tpu.memory_space<vmem>>, vector<1x128xf32>
    %c0_339 = arith.constant 0 : index
    %c0_340 = arith.constant 0 : index
    %1106 = vector.load %arg23[%c0_339, %c0_340] : memref<64x128xf32, #tpu.memory_space<vmem>>, vector<64x128xf32>
    %cst_341 = arith.constant dense<0.000000e+00> : vector<64x128xf32>
    %1107 = tpu.matmul %1106, %1104, %cst_341 {dimension_numbers = #tpu.dot_dimension_numbers<[1], [0], [0], [1], [0, 0, 1, 1], [], []>} : vector<64x128xf32>, vector<128x128xf32>, vector<64x128xf32> -> vector<64x128xf32>
    %1108 = vector.broadcast %1105 : vector<1x128xf32> to vector<64x128xf32>
    %1109 = arith.addf %1107, %1108 : vector<64x128xf32>
    %cst_342 = arith.constant 0.000000e+00 : f32
    %1110 = vector.broadcast %cst_342 : f32 to vector<64x128xf32>
    %1111 = arith.maximumf %1109, %1110 : vector<64x128xf32>
    %c0_343 = arith.constant 0 : index
    %c0_344 = arith.constant 0 : index
    %1112 = vector.load %arg20[%c0_343, %c0_344] : memref<64x128xf32, #tpu.memory_space<vmem>>, vector<64x128xf32>
    tpu.vector_store %arg20[%c0_343, %c0_344], %1111 {strides = array<i32>} : memref<64x128xf32, #tpu.memory_space<vmem>>, vector<64x128xf32>,
    return
  }
  func.func @transform_0(%arg0: i32) -> (i32, i32) {
    %c0_i32 = arith.constant 0 : i32
    %c0_i32_0 = arith.constant 0 : i32
    return %arg0, %c0_i32 : i32, i32
  }
  func.func @transform_1(%arg0: i32) -> (i32, i32) {
    %c0_i32 = arith.constant 0 : i32
    %c0_i32_0 = arith.constant 0 : i32
    %c0_i32_1 = arith.constant 0 : i32
    return %c0_i32, %c0_i32_0 : i32, i32
  }
  func.func @transform_2(%arg0: i32) -> (i32, i32) {
    %c0_i32 = arith.constant 0 : i32
    %c0_i32_0 = arith.constant 0 : i32
    %c0_i32_1 = arith.constant 0 : i32
    return %c0_i32, %c0_i32_0 : i32, i32
  }
  func.func @transform_3(%arg0: i32) -> (i32, i32) {
    %c0_i32 = arith.constant 0 : i32
    %c0_i32_0 = arith.constant 0 : i32
    %c0_i32_1 = arith.constant 0 : i32
    return %c0_i32, %c0_i32_0 : i32, i32
  }
  func.func @transform_4(%arg0: i32) -> (i32, i32) {
    %c0_i32 = arith.constant 0 : i32
    %c0_i32_0 = arith.constant 0 : i32
    %c0_i32_1 = arith.constant 0 : i32
    return %c0_i32, %c0_i32_0 : i32, i32
  }
  func.func @transform_5(%arg0: i32) -> (i32, i32) {
    %c0_i32 = arith.constant 0 : i32
    %c0_i32_0 = arith.constant 0 : i32
    %c0_i32_1 = arith.constant 0 : i32
    return %c0_i32, %c0_i32_0 : i32, i32
  }
  func.func @transform_6(%arg0: i32) -> (i32, i32) {
    %c0_i32 = arith.constant 0 : i32
    %c0_i32_0 = arith.constant 0 : i32
    %c0_i32_1 = arith.constant 0 : i32
    return %c0_i32, %c0_i32_0 : i32, i32
  }
  func.func @transform_7(%arg0: i32) -> (i32, i32) {
    %c0_i32 = arith.constant 0 : i32
    %c0_i32_0 = arith.constant 0 : i32
    %c0_i32_1 = arith.constant 0 : i32
    return %c0_i32, %c0_i32_0 : i32, i32
  }
  func.func @transform_8(%arg0: i32) -> (i32, i32) {
    %c0_i32 = arith.constant 0 : i32
    %c0_i32_0 = arith.constant 0 : i32
    %c0_i32_1 = arith.constant 0 : i32
    return %c0_i32, %c0_i32_0 : i32, i32
  }
  func.func @transform_9(%arg0: i32) -> (i32, i32) {
    %c0_i32 = arith.constant 0 : i32
    %c0_i32_0 = arith.constant 0 : i32
    %c0_i32_1 = arith.constant 0 : i32
    return %c0_i32, %c0_i32_0 : i32, i32
  }
  func.func @transform_10(%arg0: i32) -> (i32, i32) {
    %c0_i32 = arith.constant 0 : i32
    %c0_i32_0 = arith.constant 0 : i32
    %c0_i32_1 = arith.constant 0 : i32
    return %c0_i32, %c0_i32_0 : i32, i32
  }
  func.func @transform_11(%arg0: i32) -> (i32, i32) {
    %c0_i32 = arith.constant 0 : i32
    %c0_i32_0 = arith.constant 0 : i32
    %c0_i32_1 = arith.constant 0 : i32
    return %c0_i32, %c0_i32_0 : i32, i32
  }
  func.func @transform_12(%arg0: i32) -> (i32, i32) {
    %c0_i32 = arith.constant 0 : i32
    %c0_i32_0 = arith.constant 0 : i32
    %c0_i32_1 = arith.constant 0 : i32
    return %c0_i32, %c0_i32_0 : i32, i32
  }
  func.func @transform_13(%arg0: i32) -> (i32, i32) {
    %c0_i32 = arith.constant 0 : i32
    %c0_i32_0 = arith.constant 0 : i32
    %c0_i32_1 = arith.constant 0 : i32
    return %c0_i32, %c0_i32_0 : i32, i32
  }
  func.func @transform_14(%arg0: i32) -> (i32, i32) {
    %c0_i32 = arith.constant 0 : i32
    %c0_i32_0 = arith.constant 0 : i32
    %c0_i32_1 = arith.constant 0 : i32
    return %c0_i32, %c0_i32_0 : i32, i32
  }
  func.func @transform_15(%arg0: i32) -> (i32, i32) {
    %c0_i32 = arith.constant 0 : i32
    %c0_i32_0 = arith.constant 0 : i32
    %c0_i32_1 = arith.constant 0 : i32
    return %c0_i32, %c0_i32_0 : i32, i32
  }
  func.func @transform_16(%arg0: i32) -> (i32, i32) {
    %c0_i32 = arith.constant 0 : i32
    %c0_i32_0 = arith.constant 0 : i32
    %c0_i32_1 = arith.constant 0 : i32
    return %c0_i32, %c0_i32_0 : i32, i32
  }
  func.func @transform_17(%arg0: i32) -> (i32, i32) {
    %c0_i32 = arith.constant 0 : i32
    %c0_i32_0 = arith.constant 0 : i32
    %c0_i32_1 = arith.constant 0 : i32
    return %c0_i32, %c0_i32_0 : i32, i32
  }
  func.func @transform_18(%arg0: i32) -> (i32, i32) {
    %c0_i32 = arith.constant 0 : i32
    %c0_i32_0 = arith.constant 0 : i32
    %c0_i32_1 = arith.constant 0 : i32
    return %c0_i32, %c0_i32_0 : i32, i32
  }
  func.func @transform_19(%arg0: i32) -> (i32, i32) {
    %c0_i32 = arith.constant 0 : i32
    %c0_i32_0 = arith.constant 0 : i32
    return %arg0, %c0_i32 : i32, i32
  }
}

</mosaic_0001>

<bundles_post_ra>
// kernel: forward.1
= control target key start
LH: loop header
LB: loop body
LE: loop exit
PB: predicated region body
PF: predicated region fallthrough
CT: control target
= control target key end

     0   :  { %s14112_s0 = inlined_call_operand.vmem [shape: f32[64,4], index: 0, kind: input, shape index: {}]   ;;  %s14113_s1 = inlined_call_operand.hbm [shape: f32[4,384], index: 1, kind: input, shape index: {}]   ;;  %s14114_s2 = inlined_call_operand.hbm [shape: f32[128,384], index: 2, kind: input, shape index: {}]   ;;  %s14115_s3 = inlined_call_operand.hbm [shape: f32[1,384], index: 3, kind: input, shape index: {}]   ;;  %s14116_s4 = inlined_call_operand.hbm [shape: f32[1,128], index: 4, kind: input, shape index: {}]   ;;  %s14117_s5 = inlined_call_operand.hbm [shape: f32[128,384], index: 5, kind: input, shape index: {}]   ;;  %s14118_s6 = inlined_call_operand.hbm [shape: f32[128,384], index: 6, kind: input, shape index: {}]   ;;  %s14119_s7 = inlined_call_operand.hbm [shape: f32[1,384], index: 7, kind: input, shape index: {}]   ;;  %s14120_s8 = inlined_call_operand.hbm [shape: f32[1,128], index: 8, kind: input, shape index: {}]   ;;  %s14121_s9 = inlined_call_operand.hbm [shape: f32[128,384], index: 9, kind: input, shape index: {}]   ;;  %s14122_s10 = inlined_call_operand.hbm [shape: f32[128,384], index: 10, kind: input, shape index: {}]   ;;  %s14123_s11 = inlined_call_operand.hbm [shape: f32[1,384], index: 11, kind: input, shape index: {}]   ;;  %s14124_s12 = inlined_call_operand.hbm [shape: f32[1,128], index: 12, kind: input, shape index: {}]   ;;  %s14125_s13 = inlined_call_operand.hbm [shape: f32[128,384], index: 13, kind: input, shape index: {}]   ;;  %s14126_s14 = inlined_call_operand.hbm [shape: f32[128,384], index: 14, kind: input, shape index: {}]   ;;  %s14127_s15 = inlined_call_operand.hbm [shape: f32[1,384], index: 15, kind: input, shape index: {}]   ;;  %s14128_s16 = inlined_call_operand.hbm [shape: f32[1,128], index: 16, kind: input, shape index: {}]   ;;  %s14129_s17 = inlined_call_operand.vmem [shape: f32[128,128], index: 17, kind: input, shape index: {}]   ;;  %s14130_s18 = inlined_call_operand.hbm [shape: f32[1,128], index: 18, kind: input, shape index: {}]   ;;  %s14131_s19 = inlined_call_operand.vmem [shape: f32[64,128], index: 19, kind: output, shape index: {}]  }
   0x1   :  { %14251 = sst [smem:[#allocation72_spill]] %s14112_s0 }
   0x2   :  { %14252 = sst [smem:[#allocation73_spill]] %s14113_s1 }
   0x3   :  { %14253 = sst [smem:[#allocation74_spill]] %s14114_s2 }
   0x4   :  { %14254 = sst [smem:[#allocation75_spill]] %s14115_s3 }
   0x5   :  { %24 = vsyncpa [#allocation6], 0 }
   0x6   :  { %25 = vsyncpa [#allocation8], 0 }
   0x7   :  { %26 = vsyncpa [#allocation11], 0 }
   0x8   :  { %27 = vsyncpa [#allocation14], 0 }
   0x9   :  { %28 = vsyncpa [#allocation17], 0 }
   0xa   :  { %29 = vsyncpa [#allocation20], 0 }
   0xb   :  { %30 = vsyncpa [#allocation23], 0 }
   0xc   :  { %31 = vsyncpa [#allocation26], 0 }
   0xd   :  { %32 = vsyncpa [#allocation29], 0  ;;  %s10206_s0 = smov [#allocation7]  }
   0xe   :  { %s50_s30 = sshll.u32 %s10206_s0, 4  ;;  %s51_s30 = int_to_ptr.vmem [resolvable:$true] %s50_s30 }
   0xf   :  { %s9856_s20 = scalar_lea.vmem %s51_s30, 6144  ;;  %p9861_p1 = scmp.lt.s32.totalorder %s51_s30, %s51_s30 }
  0x10   :  { %p9857_p0 = scmp.ne.s32.totalorder %s51_s30, %s9856_s20  ;;  %p9862_p2 = scmp.lt.s32.totalorder %s9856_s20, %s9856_s20 }
  0x12   :  { %p9863_p3 = por %p9862_p2, %p9861_p1 }
  0x14   :  { %p9864_p4 = pnand %p9863_p3, %p9857_p0 }
  0x16   :  { %9867 = shalt.err (!%p9864_p4)
}
  0x17   :  { %s10207_s21 = smov 384   ;;  %s10208_s1 = smov 24  }
  0x18   :  { %s14255_s23 = sld [smem:[#allocation74_spill]]  ;;  %s10209_s24 = smov [#allocation10]  }
  0x19   :  { %s73_s25 = sshll.u32 %s10209_s24, 4  ;;  %s10210_s3 = smov [#allocation13]   ;;  %s74_s25 = int_to_ptr.vmem [resolvable:$true] %s73_s25 }
  0x1a   :  { %s94_s26 = sshll.u32 %s10210_s3, 4  ;;  %s9876_s27 = scalar_lea.vmem %s74_s25, 16  ;;  %s95_s26 = int_to_ptr.vmem [resolvable:$true] %s94_s26 }
  0x1b   :  { %p9877_p5 = scmp.ne.s32.totalorder %s74_s25, %s9876_s27  ;;  %s9880_s28 = scalar_lea.vmem %s74_s25, 32 }
  0x1c   :  { %p9881_p6 = scmp.lt.s32.totalorder %s74_s25, %s74_s25  ;;  %p9882_p7 = scmp.lt.s32.totalorder %s9880_s28, %s9876_s27 }
  0x1e   :  { %56 = dma.hbm_to_vmem [thread:$0]  %s14255_s23, 6144, %s51_s30, [#allocation8], %s10207_s21, %s10207_s21, %s10208_s1  }
  0x1f   :  { %p9883_p8 = por %p9882_p7, %p9881_p6 }
  0x21   :  { %p9884_p9 = pnand %p9883_p8, %p9877_p5 }
  0x23   :  { %9887 = shalt.err (!%p9884_p9)
}
  0x24   :  { %76 = dma.hbm_to_vmem [thread:$0]  %s14116_s4, 16, %s74_s25, [#allocation11]  }
  0x25   :  { %s9896_s20 = scalar_lea.vmem %s95_s26, 6144  ;;  %p9901_p11 = scmp.lt.s32.totalorder %s95_s26, %s95_s26 }
  0x26   :  { %p9897_p10 = scmp.ne.s32.totalorder %s95_s26, %s9896_s20  ;;  %p9902_p12 = scmp.lt.s32.totalorder %s9896_s20, %s9896_s20 }
  0x28   :  { %p9903_p13 = por %p9902_p12, %p9901_p11 }
  0x2a   :  { %p9904_p0 = pnand %p9903_p13, %p9897_p10 }
  0x2c   :  { %9907 = shalt.err (!%p9904_p0)
}
  0x2d   :  { %100 = dma.hbm_to_vmem [thread:$0]  %s14118_s6, 6144, %s95_s26, [#allocation14], %s10207_s21, %s10207_s21, %s10208_s1  }
  0x2e   :  { %s10211_s2 = smov [#allocation16]   ;;  %s10212_s24 = smov [#allocation19]  }
  0x2f   :  { %s117_s23 = sshll.u32 %s10211_s2, 4  ;;  %s138_s4 = sshll.u32 %s10212_s24, 4  ;;  %s118_s23 = int_to_ptr.vmem [resolvable:$true] %s117_s23  ;;  %s139_s4 = int_to_ptr.vmem [resolvable:$true] %s138_s4 }
  0x30   :  { %s9916_s25 = scalar_lea.vmem %s118_s23, 16  ;;  %s9920_s3 = scalar_lea.vmem %s118_s23, 32 }
  0x31   :  { %p9917_p1 = scmp.ne.s32.totalorder %s118_s23, %s9916_s25  ;;  %p9921_p2 = scmp.lt.s32.totalorder %s118_s23, %s118_s23 }
  0x32   :  { %p9922_p3 = scmp.lt.s32.totalorder %s9920_s3, %s9916_s25 }
  0x34   :  { %p9923_p4 = por %p9922_p3, %p9921_p2 }
  0x36   :  { %p9924_p5 = pnand %p9923_p4, %p9917_p1 }
  0x38   :  { %9927 = shalt.err (!%p9924_p5)
}
  0x39   :  { %120 = dma.hbm_to_vmem [thread:$0]  %s14120_s8, 16, %s118_s23, [#allocation17]  }
  0x3a   :  { %s9936_s29 = scalar_lea.vmem %s139_s4, 6144  ;;  %p9941_p7 = scmp.lt.s32.totalorder %s139_s4, %s139_s4 }
  0x3b   :  { %p9937_p6 = scmp.ne.s32.totalorder %s139_s4, %s9936_s29  ;;  %p9942_p8 = scmp.lt.s32.totalorder %s9936_s29, %s9936_s29 }
  0x3d   :  { %p9943_p9 = por %p9942_p8, %p9941_p7 }
  0x3f   :  { %p9944_p10 = pnand %p9943_p9, %p9937_p6 }
  0x41   :  { %9947 = shalt.err (!%p9944_p10)
}
  0x42   :  { %144 = dma.hbm_to_vmem [thread:$0]  %s14122_s10, 6144, %s139_s4, [#allocation20], %s10207_s21, %s10207_s21, %s10208_s1  }
  0x43   :  { %s10213_s0 = smov [#allocation22]   ;;  %s10214_s30 = smov [#allocation25]  }
  0x44   :  { %s161_s20 = sshll.u32 %s10213_s0, 4  ;;  %s182_s8 = sshll.u32 %s10214_s30, 4  ;;  %s162_s20 = int_to_ptr.vmem [resolvable:$true] %s161_s20  ;;  %s183_s8 = int_to_ptr.vmem [resolvable:$true] %s182_s8 }
  0x45   :  { %s9956_s22 = scalar_lea.vmem %s162_s20, 16  ;;  %s9960_s2 = scalar_lea.vmem %s162_s20, 32 }
  0x46   :  { %p9957_p11 = scmp.ne.s32.totalorder %s162_s20, %s9956_s22  ;;  %p9961_p12 = scmp.lt.s32.totalorder %s162_s20, %s162_s20 }
  0x47   :  { %p9962_p13 = scmp.lt.s32.totalorder %s9960_s2, %s9956_s22 }
  0x49   :  { %p9963_p0 = por %p9962_p13, %p9961_p12 }
  0x4b   :  { %p9964_p1 = pnand %p9963_p0, %p9957_p11 }
  0x4d   :  { %9967 = shalt.err (!%p9964_p1)
}
  0x4e   :  { %164 = dma.hbm_to_vmem [thread:$0]  %s14124_s12, 16, %s162_s20, [#allocation23]  }
  0x4f   :  { %s9976_s25 = scalar_lea.vmem %s183_s8, 6144  ;;  %p9981_p3 = scmp.lt.s32.totalorder %s183_s8, %s183_s8 }
  0x50   :  { %p9977_p2 = scmp.ne.s32.totalorder %s183_s8, %s9976_s25  ;;  %p9982_p4 = scmp.lt.s32.totalorder %s9976_s25, %s9976_s25 }
  0x52   :  { %p9983_p5 = por %p9982_p4, %p9981_p3 }
  0x54   :  { %p9984_p6 = pnand %p9983_p5, %p9977_p2 }
  0x56   :  { %9987 = shalt.err (!%p9984_p6)
}
  0x57   :  { %188 = dma.hbm_to_vmem [thread:$0]  %s14126_s14, 6144, %s183_s8, [#allocation26], %s10207_s21, %s10207_s21, %s10208_s1  }
  0x58   :  { %s10215_s3 = smov [#allocation28]   ;;  %s10216_s28 = smov [#allocation5]  }
  0x59   :  { %s205_s27 = sshll.u32 %s10215_s3, 4  ;;  %s41_s12 = sshll.u32 %s10216_s28, 4  ;;  %s206_s27 = int_to_ptr.vmem [resolvable:$true] %s205_s27  ;;  %s42_s12 = int_to_ptr.vmem [resolvable:$true] %s41_s12 }
  0x5a   :  { %s9996_s29 = scalar_lea.vmem %s206_s27, 16  ;;  %s10000_s6 = scalar_lea.vmem %s206_s27, 32 }
  0x5b   :  { %p9997_p7 = scmp.ne.s32.totalorder %s206_s27, %s9996_s29  ;;  %p10001_p8 = scmp.lt.s32.totalorder %s206_s27, %s206_s27 }
  0x5c   :  { %p10002_p9 = scmp.lt.s32.totalorder %s10000_s6, %s9996_s29 }
  0x5e   :  { %p10003_p10 = por %p10002_p9, %p10001_p8 }
  0x60   :  { %p10004_p11 = pnand %p10003_p10, %p9997_p7 }
  0x62   :  { %10007 = shalt.err (!%p10004_p11)
}
  0x63   :  { %208 = dma.hbm_to_vmem [thread:$0]  %s14128_s16, 16, %s206_s27, [#allocation29]  }
  0x64   :  { %s10016_s20 = scalar_lea.vmem %s42_s12, 192  ;;  %p10021_p13 = scmp.lt.s32.totalorder %s42_s12, %s42_s12 }
  0x65   :  { %p10017_p12 = scmp.ne.s32.totalorder %s42_s12, %s10016_s20  ;;  %p10022_p0 = scmp.lt.s32.totalorder %s10016_s20, %s10016_s20 }
  0x67   :  { %p10023_p1 = por %p10022_p0, %p10021_p13 }
  0x69   :  { %p10024_p2 = pnand %p10023_p1, %p10017_p12 }
  0x6b   :  { %10027 = shalt.err (!%p10024_p2)
}
  0x6c   :  { %s14256_s8 = sld [smem:[#allocation73_spill]]  ;;  %s10217_s22 = smov [#allocation9]  }
  0x6d   :  { %s63_s2 = sshll.u32 %s10217_s22, 4  ;;  %s10218_s23 = smov [#allocation12]   ;;  %s64_s2 = int_to_ptr.vmem [resolvable:$true] %s63_s2 }
  0x6e   :  { %s82_s24 = sshll.u32 %s10218_s23, 4  ;;  %s10036_s25 = scalar_lea.vmem %s64_s2, 48  ;;  %s83_s24 = int_to_ptr.vmem [resolvable:$true] %s82_s24 }
  0x6f   :  { %p10037_p3 = scmp.ne.s32.totalorder %s64_s2, %s10036_s25  ;;  %s10040_s16 = scalar_lea.vmem %s64_s2, 64 }
  0x70   :  { %p10041_p4 = scmp.lt.s32.totalorder %s64_s2, %s64_s2  ;;  %p10042_p5 = scmp.lt.s32.totalorder %s10040_s16, %s10036_s25 }
  0x72   :  { %44 = dma.hbm_to_vmem [thread:$0]  %s14256_s8, 192, %s42_s12, [#allocation6]  }
  0x73   :  { %p10043_p6 = por %p10042_p5, %p10041_p4 }
  0x75   :  { %p10044_p7 = pnand %p10043_p6, %p10037_p3 }
  0x77   :  { %10047 = shalt.err (!%p10044_p7)
}
  0x78   :  { %s14257_s3 = sld [smem:[#allocation75_spill]]  ;;  %s10056_s27 = scalar_lea.vmem %s83_s24, 6144 }
  0x79   :  { %p10057_p8 = scmp.ne.s32.totalorder %s83_s24, %s10056_s27  ;;  %p10061_p9 = scmp.lt.s32.totalorder %s83_s24, %s83_s24 }
  0x7a   :  { %p10062_p10 = scmp.lt.s32.totalorder %s10056_s27, %s10056_s27 }
  0x7c   :  { %p10063_p11 = por %p10062_p10, %p10061_p9 }
  0x7e   :  { %66 = dma.hbm_to_vmem [thread:$0]  %s14257_s3, 48, %s64_s2, [#allocation8]  }
  0x7f   :  { %p10064_p12 = pnand %p10063_p11, %p10057_p8 }
  0x81   :  { %10067 = shalt.err (!%p10064_p12)
}
  0x82   :  { %88 = dma.hbm_to_vmem [thread:$0]  %s14117_s5, 6144, %s83_s24, [#allocation11], %s10207_s21, %s10207_s21, %s10208_s1  }
  0x83   :  { %s10219_s29 = smov [#allocation15]   ;;  %s10220_s26 = smov [#allocation18]  }
  0x84   :  { %s107_s6 = sshll.u32 %s10219_s29, 4  ;;  %s126_s0 = sshll.u32 %s10220_s26, 4  ;;  %s108_s6 = int_to_ptr.vmem [resolvable:$true] %s107_s6  ;;  %s127_s0 = int_to_ptr.vmem [resolvable:$true] %s126_s0 }
  0x85   :  { %s10076_s20 = scalar_lea.vmem %s108_s6, 48  ;;  %s10080_s14 = scalar_lea.vmem %s108_s6, 64 }
  0x86   :  { %p10077_p13 = scmp.ne.s32.totalorder %s108_s6, %s10076_s20  ;;  %p10081_p0 = scmp.lt.s32.totalorder %s108_s6, %s108_s6 }
  0x87   :  { %p10082_p1 = scmp.lt.s32.totalorder %s10080_s14, %s10076_s20 }
  0x89   :  { %p10083_p2 = por %p10082_p1, %p10081_p0 }
  0x8b   :  { %p10084_p3 = pnand %p10083_p2, %p10077_p13 }
  0x8d   :  { %10087 = shalt.err (!%p10084_p3)
}
  0x8e   :  { %110 = dma.hbm_to_vmem [thread:$0]  %s14119_s7, 48, %s108_s6, [#allocation14]  }
  0x8f   :  { %s10096_s22 = scalar_lea.vmem %s127_s0, 6144  ;;  %p10101_p5 = scmp.lt.s32.totalorder %s127_s0, %s127_s0 }
  0x90   :  { %p10097_p4 = scmp.ne.s32.totalorder %s127_s0, %s10096_s22  ;;  %p10102_p6 = scmp.lt.s32.totalorder %s10096_s22, %s10096_s22 }
  0x92   :  { %p10103_p7 = por %p10102_p6, %p10101_p5 }
  0x94   :  { %p10104_p8 = pnand %p10103_p7, %p10097_p4 }
  0x96   :  { %10107 = shalt.err (!%p10104_p8)
}
  0x97   :  { %132 = dma.hbm_to_vmem [thread:$0]  %s14121_s9, 6144, %s127_s0, [#allocation17], %s10207_s21, %s10207_s21, %s10208_s1  }
  0x98   :  { %s10221_s23 = smov [#allocation21]   ;;  %s10222_s25 = smov [#allocation24]  }
  0x99   :  { %s151_s24 = sshll.u32 %s10221_s23, 4  ;;  %s170_s7 = sshll.u32 %s10222_s25, 4  ;;  %s152_s24 = int_to_ptr.vmem [resolvable:$true] %s151_s24  ;;  %s171_s7 = int_to_ptr.vmem [resolvable:$true] %s170_s7 }
  0x9a   :  { %s10116_s16 = scalar_lea.vmem %s152_s24, 48  ;;  %s10120_s10 = scalar_lea.vmem %s152_s24, 64 }
  0x9b   :  { %p10117_p9 = scmp.ne.s32.totalorder %s152_s24, %s10116_s16  ;;  %p10121_p10 = scmp.lt.s32.totalorder %s152_s24, %s152_s24 }
  0x9c   :  { %p10122_p11 = scmp.lt.s32.totalorder %s10120_s10, %s10116_s16 }
  0x9e   :  { %p10123_p12 = por %p10122_p11, %p10121_p10 }
  0xa0   :  { %p10124_p13 = pnand %p10123_p12, %p10117_p9 }
  0xa2   :  { %10127 = shalt.err (!%p10124_p13)
}
  0xa3   :  { %154 = dma.hbm_to_vmem [thread:$0]  %s14123_s11, 48, %s152_s24, [#allocation20]  }
  0xa4   :  { %s10136_s27 = scalar_lea.vmem %s171_s7, 6144  ;;  %p10141_p1 = scmp.lt.s32.totalorder %s171_s7, %s171_s7 }
  0xa5   :  { %p10137_p0 = scmp.ne.s32.totalorder %s171_s7, %s10136_s27  ;;  %p10142_p2 = scmp.lt.s32.totalorder %s10136_s27, %s10136_s27 }
  0xa7   :  { %p10143_p3 = por %p10142_p2, %p10141_p1 }
  0xa9   :  { %p10144_p4 = pnand %p10143_p3, %p10137_p0 }
  0xab   :  { %10147 = shalt.err (!%p10144_p4)
}
  0xac   :  { %176 = dma.hbm_to_vmem [thread:$0]  %s14125_s13, 6144, %s171_s7, [#allocation23], %s10207_s21, %s10207_s21, %s10208_s1  }
  0xad   :  { %s10223_s12 = smov [#allocation27]   ;;  %s10224_s6 = smov [#allocation30]  }
  0xae   :  { %s195_s29 = sshll.u32 %s10223_s12, 4  ;;  %s217_s11 = sshll.u32 %s10224_s6, 4  ;;  %s196_s29 = int_to_ptr.vmem [resolvable:$true] %s195_s29  ;;  %s218_s11 = int_to_ptr.vmem [resolvable:$true] %s217_s11 }
  0xaf   :  { %s10156_s26 = scalar_lea.vmem %s196_s29, 48  ;;  %s10160_s0 = scalar_lea.vmem %s196_s29, 64 }
  0xb0   :  { %p10157_p5 = scmp.ne.s32.totalorder %s196_s29, %s10156_s26  ;;  %p10161_p6 = scmp.lt.s32.totalorder %s196_s29, %s196_s29 }
  0xb1   :  { %p10162_p7 = scmp.lt.s32.totalorder %s10160_s0, %s10156_s26 }
  0xb3   :  { %p10163_p8 = por %p10162_p7, %p10161_p6 }
  0xb5   :  { %p10164_p9 = pnand %p10163_p8, %p10157_p5 }
  0xb7   :  { %10167 = shalt.err (!%p10164_p9)
}
  0xb8   :  { %198 = dma.hbm_to_vmem [thread:$0]  %s14127_s15, 48, %s196_s29, [#allocation26]  }
  0xb9   :  { %s10176_s30 = scalar_lea.vmem %s218_s11, 16  ;;  %s10180_s13 = scalar_lea.vmem %s218_s11, 32 }
  0xba   :  { %p10177_p10 = scmp.ne.s32.totalorder %s218_s11, %s10176_s30  ;;  %p10181_p11 = scmp.lt.s32.totalorder %s218_s11, %s218_s11 }
  0xbb   :  { %p10182_p12 = scmp.lt.s32.totalorder %s10180_s13, %s10176_s30 }
  0xbd   :  { %p10183_p13 = por %p10182_p12, %p10181_p11 }
  0xbf   :  { %p10184_p0 = pnand %p10183_p13, %p10177_p10 }
  0xc1   :  { %10187 = shalt.err (!%p10184_p0)
}
  0xc2   :  { %220 = dma.hbm_to_vmem [thread:$0]  %s14130_s18, 16, %s218_s11, [#allocation29]  }
  0xc3   :  { %10188 = dma.done.wait [#allocation6], 192  }
  0xc4   :  { %10189 = vsyncadd [#allocation6], 4294967104 }
  0xc5   :  { %10190 = dma.done.wait [#allocation8], 6192  }
  0xc6   :  { %10191 = vsyncadd [#allocation8], 4294961104 }
  0xc7   :  { %10192 = dma.done.wait [#allocation11], 6160  }
  0xc8   :  { %10193 = vsyncadd [#allocation11], 4294961136 }
  0xc9   :  { %10194 = dma.done.wait [#allocation14], 6192  }
  0xca   :  { %10195 = vsyncadd [#allocation14], 4294961104 }
  0xcb   :  { %10196 = dma.done.wait [#allocation17], 6160  }
  0xcc   :  { %10197 = vsyncadd [#allocation17], 4294961136 }
  0xcd   :  { %10198 = dma.done.wait [#allocation20], 6192  }
  0xce   :  { %10199 = vsyncadd [#allocation20], 4294961104 }
  0xcf   :  { %10200 = dma.done.wait [#allocation23], 6160  }
  0xd0   :  { %10201 = vsyncadd [#allocation23], 4294961136 }
  0xd1   :  { %10202 = dma.done.wait [#allocation26], 6192  }
  0xd2   :  { %10203 = vsyncadd [#allocation26], 4294961104 }
  0xd3   :  { %10204 = dma.done.wait [#allocation29], 32  }
  0xd4   :  { %10205 = vsyncadd [#allocation29], 4294967264  ;;  %v14133_v0 = vmov 0.0   ;;  %vm327_vm0 = vcmask 1043456   ;;  %vm302_vm1 = vcmask 31744   ;;  %s14258_s8 = sld [smem:[#allocation72_spill]]  ;;  %v284_v60 = vlaneseq }
  0xd5   :  { %398 = vmatprep.mubr.f32.mxu0 %v14133_v0  ;;  %v273_v1 = vld [vmem:[#allocation5 + $0x8] sm:$0xf]  ;;  %v10410_v4 = vld [vmem:[#allocation7 + $0x170] sm:$0xff]  ;;  %v10412_v5 = vld [vmem:[#allocation7 + $0x168] sm:$0xff]  ;;  %vm10226_vm2 = vmmov 0  }
  0xd6   :  { %8000 = vmatprep.subr.msk.mxu1 %vm327_vm0, %v273_v1  ;;  %14259 = vst [vmem:[#allocation40_spill] sm:$0xff] %v10410_v4  ;;  %v10415_v6 = vld [vmem:[#allocation7 + $0x158] sm:$0xff]  ;;  %v10420_v7 = vld [vmem:[#allocation7 + $0x150] sm:$0xff]  ;;  %v10423_v8 = vld [vmem:[#allocation7 + $0x140] sm:$0xff]  ;;  %v285_v61 = vshrl.u32 %v284_v60, 7 }
  0xd7   :  { %8001 = vmatpush3.msk.msra.mxu1 %vm327_vm0, %v273_v1  ;;  %v10426_v9 = vld [vmem:[#allocation7 + $0x138] sm:$0xff]  ;;  %v10429_v10 = vld [vmem:[#allocation7 + $0x128] sm:$0xff]  ;;  %v10437_v12 = vld [vmem:[#allocation7 + $0x120] sm:$0xff] }
  0xd8   :  { %637 = vmatprep.subr.mxu1 %v10410_v4  ;;  %v10447_v14 = vld [vmem:[#allocation7 + $0x110] sm:$0xff]  ;;  %v10455_v16 = vld [vmem:[#allocation7 + $0x108] sm:$0xff]  ;;  %v10460_v17 = vld [vmem:[#allocation7 + $0xf8] sm:$0xff]  ;;  %v10713_v62 = vsub.s32 2, %v285_v61 }
  0xd9   :  { %v10470_v19 = vld [vmem:[#allocation7 + $0xf0] sm:$0xff]  ;;  %v10478_v22 = vld [vmem:[#allocation7 + $0xe0] sm:$0xff]  ;;  %v10481_v24 = vld [vmem:[#allocation7 + $0xd8] sm:$0xff] }
  0xda   :  { %v275_v2 = vld [vmem:[%s14258_s8] sm:$0xff]  ;;  %v10406_v3 = vld [vmem:[%s14258_s8 + $0x8] sm:$0xff]  ;;  %v10434_v11 = vld [vmem:[%s14258_s8 + $0x10] sm:$0xff]  ;;  %14265 = vst [vmem:[#allocation46_spill] sm:$0xff] %v10713_v62 }
  0xdb   :  { %8002 = vmatprep.mubr.msk.f32.mxu1 %vm302_vm1, %v275_v2  ;;  %v10444_v13 = vld [vmem:[%s14258_s8 + $0x18] sm:$0xff]  ;;  %v10452_v15 = vld [vmem:[%s14258_s8 + $0x20] sm:$0xff]  ;;  %v10467_v18 = vld [vmem:[%s14258_s8 + $0x28] sm:$0xff] }
  0xdc   :  { %8003 = vmatmul.mubr.msk.f32.vlgmr.msra.gmra.mxu1 %vm302_vm1, %v10406_v3  ;;  %v10475_v20 = vld [vmem:[%s14258_s8 + $0x30] sm:$0xff]  ;;  %v272_v21 = vld [vmem:[#allocation5] sm:$0xff]  ;;  %v10493_v26 = vld [vmem:[%s14258_s8 + $0x38] sm:$0xff] }
  0xdd   :  { %638 = vmatpush1.msra.mxu1 %v10412_v5  ;;  %8005 = vmatprep.mubr.msk.f32.mxu1 %vm302_vm1, %v10434_v11  ;;  %v301_v23 = vcombine.high %v272_v21, %v272_v21  ;;  %v10486_v25 = vld [vmem:[#allocation7 + $0xc8] sm:$0xff]  ;;  %v10496_v27 = vld [vmem:[#allocation7 + $0xc0] sm:$0xff]  ;;  %v10500_v28 = vld [vmem:[#allocation7 + $0xb0] sm:$0xff] }
  0xde   :  { %639 = vmatprep.subr.mxu1 %v10415_v6  ;;  %v10504_v29 = vld [vmem:[#allocation7 + $0xa8] sm:$0xff]  ;;  %v10509_v30 = vld [vmem:[#allocation7 + $0x98] sm:$0xff]  ;;  %v10513_v31 = vld [vmem:[#allocation7 + $0x90] sm:$0xff] }
  0xdf   :  { %640 = vmatpush1.msra.mxu1 %v10420_v7  ;;  %7263 = vmatprep.subr.msk.mxu0 %vm327_vm0, %v301_v23  ;;  %v10517_v32 = vld [vmem:[#allocation7 + $0x80] sm:$0xff]  ;;  %v10521_v33 = vld [vmem:[#allocation7 + $0x78] sm:$0xff]  ;;  %v10525_v34 = vld [vmem:[#allocation7 + $0x68] sm:$0xff] }
  0xe0   :  { %641 = vmatprep.subr.mxu1 %v10423_v8  ;;  %8006 = vmatmul.mubr.msk.f32.gmra.mxu1 %vm302_vm1, %v10444_v13  ;;  %v10529_v35 = vld [vmem:[#allocation7 + $0x60] sm:$0xff]  ;;  %v10533_v36 = vld [vmem:[#allocation7 + $0x50] sm:$0xff]  ;;  %v10538_v37 = vld [vmem:[#allocation7 + $0x48] sm:$0xff] }
  0xe1   :  { %642 = vmatpush1.msra.mxu1 %v10426_v9  ;;  %8008 = vmatprep.mubr.msk.f32.mxu1 %vm302_vm1, %v10452_v15  ;;  %v10542_v38 = vld [vmem:[#allocation7 + $0x38] sm:$0xff]  ;;  %v10546_v39 = vld [vmem:[#allocation7 + $0x30] sm:$0xff]  ;;  %v10550_v40 = vld [vmem:[#allocation7 + $0x20] sm:$0xff] }
  0xe2   :  { %643 = vmatprep.subr.mxu1 %v10429_v10  ;;  %7264 = vmatpush1.msk.msra.mxu0 %vm327_vm0, %v272_v21  ;;  %v10554_v41 = vld [vmem:[#allocation7 + $0x18] sm:$0xff]  ;;  %v10558_v42 = vld [vmem:[#allocation7 + $0x8] sm:$0xff]  ;;  %v10563_v43 = vld [vmem:[#allocation7] sm:$0xff] }
  0xe3   :  { %644 = vmatpush1.msra.mxu1 %v10437_v12  ;;  %7265 = vmatmul.mubr.msk.f32.vlgmr.msra.gmra.mxu0 %vm302_vm1, %v275_v2  ;;  %14260 = vst [vmem:[#allocation41_spill] sm:$0xff] %v10554_v41  ;;  %14261 = vst [vmem:[#allocation42_spill] sm:$0xff] %v10558_v42  ;;  %v10569_v44 = vld [vmem:[#allocation7 + $0x178] sm:$0xff]  ;;  %v10576_v45 = vld [vmem:[#allocation7 + $0x160] sm:$0xff] }
  0xe4   :  { %645 = vmatprep.subr.mxu1 %v10447_v14  ;;  %8009 = vmatmul.mubr.msk.f32.gmra.mxu1 %vm302_vm1, %v10467_v18  ;;  %14262 = vst [vmem:[#allocation43_spill] sm:$0xff] %v10563_v43  ;;  %v10582_v46 = vld [vmem:[#allocation7 + $0x148] sm:$0xff]  ;;  %v10589_v47 = vld [vmem:[#allocation7 + $0x130] sm:$0xff]  ;;  %v10595_v48 = vld [vmem:[#allocation7 + $0x118] sm:$0xff] }
  0xe5   :  { %646 = vmatpush1.msra.mxu1 %v10455_v16  ;;  %8011 = vmatprep.mubr.msk.f32.mxu1 %vm302_vm1, %v10475_v20  ;;  %v10601_v49 = vld [vmem:[#allocation7 + $0x100] sm:$0xff]  ;;  %v10608_v50 = vld [vmem:[#allocation7 + $0xe8] sm:$0xff]  ;;  %v10614_v51 = vld [vmem:[#allocation7 + $0xd0] sm:$0xff] }
  0xe6   :  { %647 = vmatprep.subr.mxu1 %v10460_v17  ;;  %806 = vmatprep.subr.mxu0 %v10410_v4  ;;  %v10620_v52 = vld [vmem:[#allocation7 + $0xb8] sm:$0xff]  ;;  %v10627_v53 = vld [vmem:[#allocation7 + $0xa0] sm:$0xff]  ;;  %v10633_v54 = vld [vmem:[#allocation7 + $0x88] sm:$0xff] }
  0xe7   :  { %648 = vmatpush1.msra.mxu1 %v10470_v19  ;;  %807 = vmatpush1.msra.mxu0 %v10412_v5  ;;  %v10639_v55 = vld [vmem:[#allocation7 + $0x70] sm:$0xff]  ;;  %v10646_v56 = vld [vmem:[#allocation7 + $0x58] sm:$0xff]  ;;  %v10652_v57 = vld [vmem:[#allocation7 + $0x40] sm:$0xff] }
  0xe8   :  { %649 = vmatprep.subr.mxu1 %v10478_v22  ;;  %8012 = vmatmul.mubr.msk.f32.gmra.mxu1 %vm302_vm1, %v10493_v26  ;;  %v10658_v58 = vld [vmem:[#allocation7 + $0x28] sm:$0xff]  ;;  %v10665_v59 = vld [vmem:[#allocation7 + $0x10] sm:$0xff]  ;;  %v274_v63 = vld [vmem:[#allocation9] sm:$0x7] }
  0xe9   :  { %650 = vmatpush1.msra.mxu1 %v10481_v24  ;;  %701 = vmatprep.mubr.f32.mxu1 %v14133_v0  ;;  %14263 = vst [vmem:[#allocation44_spill] sm:$0xff] %v10658_v58  ;;  %14264 = vst [vmem:[#allocation45_spill] sm:$0xff] %v10665_v59  ;;  %v295_v1 = vrot.slane %v274_v63, %v10713_v62 }
  0xea   :  { %651 = vmatprep.subr.mxu1 %v10486_v25  ;;  %404 = vmatprep.mubr.f32.mxu0 %v14133_v0 }
  0xeb   :  { %652 = vmatpush1.msra.mxu1 %v10496_v27  ;;  %808 = vmatprep.subr.mxu0 %v10415_v6 }
  0xec   :  { %653 = vmatprep.subr.mxu1 %v10500_v28  ;;  %7266 = vmatmul.mubr.msk.f32.gmra.mxu0 %vm302_vm1, %v10406_v3 }
  0xed   :  { %654 = vmatpush1.msra.mxu1 %v10504_v29  ;;  %809 = vmatpush1.msra.mxu0 %v10420_v7 }
  0xee   :  { %655 = vmatprep.subr.mxu1 %v10509_v30  ;;  %810 = vmatprep.subr.mxu0 %v10423_v8 }
  0xef   :  { %656 = vmatpush1.msra.mxu1 %v10513_v31  ;;  %811 = vmatpush1.msra.mxu0 %v10426_v9 }
  0xf0   :  { %657 = vmatprep.subr.mxu1 %v10517_v32  ;;  %410 = vmatprep.mubr.f32.mxu0 %v14133_v0 }
  0xf1   :  { %658 = vmatpush1.msra.mxu1 %v10521_v33  ;;  %812 = vmatprep.subr.mxu0 %v10429_v10 }
  0xf2   :  { %659 = vmatprep.subr.mxu1 %v10525_v34  ;;  %7267 = vmatmul.mubr.msk.f32.gmra.mxu0 %vm302_vm1, %v10434_v11 }
  0xf3   :  { %660 = vmatpush1.msra.mxu1 %v10529_v35  ;;  %813 = vmatpush1.msra.mxu0 %v10437_v12 }
  0xf4   :  { %661 = vmatprep.subr.mxu1 %v10533_v36  ;;  %814 = vmatprep.subr.mxu0 %v10447_v14 }
  0xf5   :  { %662 = vmatpush1.msra.mxu1 %v10538_v37  ;;  %815 = vmatpush1.msra.mxu0 %v10455_v16 }
  0xf6   :  { %663 = vmatprep.subr.mxu1 %v10542_v38  ;;  %416 = vmatprep.mubr.f32.mxu0 %v14133_v0 }
  0xf7   :  { %664 = vmatpush1.msra.mxu1 %v10546_v39  ;;  %816 = vmatprep.subr.mxu0 %v10460_v17 }
  0xf8   :  { %665 = vmatprep.subr.mxu1 %v10550_v40  ;;  %7268 = vmatmul.mubr.msk.f32.gmra.mxu0 %vm302_vm1, %v10444_v13 }
  0xf9   :  { %666 = vmatpush1.msra.mxu1 %v10554_v41  ;;  %817 = vmatpush1.msra.mxu0 %v10470_v19 }
  0xfa   :  { %667 = vmatprep.subr.mxu1 %v10558_v42  ;;  %818 = vmatprep.subr.mxu0 %v10478_v22 }
  0xfb   :  { %668 = vmatpush1.msra.mxu1 %v10563_v43  ;;  %819 = vmatpush1.msra.mxu0 %v10481_v24 }
  0xfc   :  { %702 = vmatmul.mubr.f32.vlgmr.msra.gmra.mxu1 %v14133_v0  ;;  %8014 = vmatprep.subr.mxu1 %v14133_v0 }
  0xfd   :  { %8015 = vmatpush3.msra.mxu1 %v10569_v44  ;;  %8046 = vmatprep.mubr.msk.f32.mxu1 %vm10226_vm2, %v14133_v0 }
  0xfe   :  { %8016 = vmatprep.subr.mxu1 %v14133_v0  ;;  %422 = vmatprep.mubr.f32.mxu0 %v14133_v0 }
  0xff   :  { %8017 = vmatpush3.msra.mxu1 %v10576_v45  ;;  %820 = vmatprep.subr.mxu0 %v10486_v25 }
 0x100   :  { %8018 = vmatprep.subr.mxu1 %v14133_v0  ;;  %7269 = vmatmul.mubr.msk.f32.gmra.mxu0 %vm302_vm1, %v10452_v15 }
 0x101   :  { %8019 = vmatpush3.msra.mxu1 %v10582_v46  ;;  %821 = vmatpush1.msra.mxu0 %v10496_v27 }
 0x102   :  { %8020 = vmatprep.subr.mxu1 %v14133_v0  ;;  %822 = vmatprep.subr.mxu0 %v10500_v28 }
 0x103   :  { %8021 = vmatpush3.msra.mxu1 %v10589_v47  ;;  %823 = vmatpush1.msra.mxu0 %v10504_v29 }
 0x104   :  { %8022 = vmatprep.subr.mxu1 %v14133_v0  ;;  %428 = vmatprep.mubr.f32.mxu0 %v14133_v0 }
 0x105   :  { %8023 = vmatpush3.msra.mxu1 %v10595_v48  ;;  %824 = vmatprep.subr.mxu0 %v10509_v30 }
 0x106   :  { %8024 = vmatprep.subr.mxu1 %v14133_v0  ;;  %7270 = vmatmul.mubr.msk.f32.gmra.mxu0 %vm302_vm1, %v10467_v18 }
 0x107   :  { %8025 = vmatpush3.msra.mxu1 %v10601_v49  ;;  %825 = vmatpush1.msra.mxu0 %v10513_v31 }
 0x108   :  { %8026 = vmatprep.subr.mxu1 %v14133_v0  ;;  %826 = vmatprep.subr.mxu0 %v10517_v32 }
 0x109   :  { %8027 = vmatpush3.msra.mxu1 %v10608_v50  ;;  %827 = vmatpush1.msra.mxu0 %v10521_v33 }
 0x10a   :  { %8028 = vmatprep.subr.mxu1 %v14133_v0  ;;  %434 = vmatprep.mubr.f32.mxu0 %v14133_v0 }
 0x10b   :  { %8029 = vmatpush3.msra.mxu1 %v10614_v51  ;;  %828 = vmatprep.subr.mxu0 %v10525_v34 }
 0x10c   :  { %8030 = vmatprep.subr.mxu1 %v14133_v0  ;;  %7271 = vmatmul.mubr.msk.f32.gmra.mxu0 %vm302_vm1, %v10475_v20 }
 0x10d   :  { %8031 = vmatpush3.msra.mxu1 %v10620_v52  ;;  %829 = vmatpush1.msra.mxu0 %v10529_v35 }
 0x10e   :  { %8032 = vmatprep.subr.mxu1 %v14133_v0  ;;  %830 = vmatprep.subr.mxu0 %v10533_v36 }
 0x10f   :  { %8033 = vmatpush3.msra.mxu1 %v10627_v53  ;;  %831 = vmatpush1.msra.mxu0 %v10538_v37 }
 0x110   :  { %8034 = vmatprep.subr.mxu1 %v14133_v0  ;;  %440 = vmatprep.mubr.f32.mxu0 %v14133_v0 }
 0x111   :  { %8035 = vmatpush3.msra.mxu1 %v10633_v54  ;;  %832 = vmatprep.subr.mxu0 %v10542_v38 }
 0x112   :  { %8036 = vmatprep.subr.mxu1 %v14133_v0  ;;  %7272 = vmatmul.mubr.msk.f32.gmra.mxu0 %vm302_vm1, %v10493_v26 }
 0x113   :  { %8037 = vmatpush3.msra.mxu1 %v10639_v55  ;;  %833 = vmatpush1.msra.mxu0 %v10546_v39 }
 0x114   :  { %8038 = vmatprep.subr.mxu1 %v14133_v0  ;;  %834 = vmatprep.subr.mxu0 %v10550_v40 }
 0x115   :  { %8039 = vmatpush3.msra.mxu1 %v10646_v56  ;;  %835 = vmatpush1.msra.mxu0 %v10554_v41 }
 0x116   :  { %8040 = vmatprep.subr.mxu1 %v14133_v0  ;;  %836 = vmatprep.subr.mxu0 %v10558_v42 }
 0x117   :  { %8041 = vmatpush3.msra.mxu1 %v10652_v57  ;;  %837 = vmatpush1.msra.mxu0 %v10563_v43  ;;  %v10730_v43 = vsub.s32 0, %v285_v61 }
 0x118   :  { %8042 = vmatprep.subr.mxu1 %v14133_v0  ;;  %870 = vmatprep.mubr.f32.mxu0 %v14133_v0 }
 0x119   :  { %8043 = vmatpush3.msra.mxu1 %v10658_v58  ;;  %976 = vmatprep.subr.mxu0 %v10410_v4  ;;  %14273 = vst [vmem:[#allocation54_spill] sm:$0xff] %v10730_v43 }
 0x11a   :  { %8044 = vmatprep.subr.mxu1 %v14133_v0 }
 0x11b   :  { %8045 = vmatpush3.msra.mxu1 %v10665_v59 }
 0x11c   :  { %8047 = vmatmul.mubr.f32.vlgmr.msra.gmra.mxu1 %v14133_v0  ;;  %8049 = vmatprep.subr.mxu1 %v14133_v0 }
 0x11d   :  { %8050 = vmatpush3.msra.mxu1 %v10569_v44  ;;  %8081 = vmatprep.mubr.msk.f32.mxu1 %vm10226_vm2, %v14133_v0 }
 0x11e   :  { %8051 = vmatprep.subr.mxu1 %v14133_v0 }
 0x11f   :  { %8052 = vmatpush3.msra.mxu1 %v10576_v45 }
 0x120   :  { %8053 = vmatprep.subr.mxu1 %v14133_v0 }
 0x121   :  { %8054 = vmatpush3.msra.mxu1 %v10582_v46 }
 0x122   :  { %8055 = vmatprep.subr.mxu1 %v14133_v0 }
 0x123   :  { %8056 = vmatpush3.msra.mxu1 %v10589_v47 }
 0x124   :  { %8057 = vmatprep.subr.mxu1 %v14133_v0 }
 0x125   :  { %8058 = vmatpush3.msra.mxu1 %v10595_v48 }
 0x126   :  { %8059 = vmatprep.subr.mxu1 %v14133_v0 }
 0x127   :  { %8060 = vmatpush3.msra.mxu1 %v10601_v49 }
 0x128   :  { %8061 = vmatprep.subr.mxu1 %v14133_v0 }
 0x129   :  { %8062 = vmatpush3.msra.mxu1 %v10608_v50 }
 0x12a   :  { %8063 = vmatprep.subr.mxu1 %v14133_v0 }
 0x12b   :  { %8064 = vmatpush3.msra.mxu1 %v10614_v51 }
 0x12c   :  { %8065 = vmatprep.subr.mxu1 %v14133_v0 }
 0x12d   :  { %8066 = vmatpush3.msra.mxu1 %v10620_v52 }
 0x12e   :  { %8067 = vmatprep.subr.mxu1 %v14133_v0 }
 0x12f   :  { %8068 = vmatpush3.msra.mxu1 %v10627_v53 }
 0x130   :  { %8069 = vmatprep.subr.mxu1 %v14133_v0 }
 0x131   :  { %8070 = vmatpush3.msra.mxu1 %v10633_v54 }
 0x132   :  { %8071 = vmatprep.subr.mxu1 %v14133_v0 }
 0x133   :  { %8072 = vmatpush3.msra.mxu1 %v10639_v55 }
 0x134   :  { %8073 = vmatprep.subr.mxu1 %v14133_v0 }
 0x135   :  { %8074 = vmatpush3.msra.mxu1 %v10646_v56 }
 0x136   :  { %8075 = vmatprep.subr.mxu1 %v14133_v0 }
 0x137   :  { %8076 = vmatpush3.msra.mxu1 %v10652_v57 }
 0x138   :  { %8077 = vmatprep.subr.mxu1 %v14133_v0 }
 0x139   :  { %8078 = vmatpush3.msra.mxu1 %v10658_v58 }
 0x13a   :  { %8079 = vmatprep.subr.mxu1 %v14133_v0 }
 0x13b   :  { %8080 = vmatpush3.msra.mxu1 %v10665_v59 }
 0x13c   :  { %8084 = vmatprep.subr.mxu1 %v14133_v0 }
 0x19c   :  { %v8004_v2 = vpop.f32.mrf.mxu1 }
 0x19d   :  { %v10716_v3 = vadd.f32 %v8004_v2, %v295_v1 }
 0x19e   :  { %v513_v11 = vpop.f32.mrf.mxu1 }
 0x19f   :  { %14266 = vst [vmem:[#allocation47_spill] sm:$0xff] %v10716_v3 }
 0x1a0   :  { %v8007_v13 = vpop.f32.mrf.mxu1 }
 0x1a1   :  { %v10718_v15 = vadd.f32 %v8007_v13, %v295_v1 }
 0x1a2   :  { %v523_v18 = vpop.f32.mrf.mxu1 }
 0x1a3   :  { %14267 = vst [vmem:[#allocation48_spill] sm:$0xff] %v10718_v15  ;;  %v10720_v20 = vadd.f32 %v523_v18, %v295_v1  ;;  %v400_v62 = vpop.f32.mrf.mxu0 }
 0x1a4   :  { %v8010_v21 = vpop.f32.mrf.mxu1 }
 0x1a5   :  { %14268 = vst [vmem:[#allocation49_spill] sm:$0xff] %v10720_v20  ;;  %v10722_v23 = vadd.f32 %v8010_v21, %v295_v1  ;;  %v402_v3 = vpop.f32.mrf.mxu0  ;;  %v10737_v21 = vrot.slane %v274_v63, %v10730_v43 }
 0x1a6   :  { %v533_v26 = vpop.f32.mrf.mxu1 }
 0x1a7   :  { %14269 = vst [vmem:[#allocation50_spill] sm:$0xff] %v10722_v23  ;;  %v10724_v60 = vadd.f32 %v533_v26, %v295_v1 }
 0x1a8   :  { %v8013_v0 = vpop.f32.mrf.mxu1 }
 0x1a9   :  { %14270 = vst [vmem:[#allocation51_spill] sm:$0xff] %v10724_v60  ;;  %v10726_v4 = vadd.f32 %v8013_v0, %v295_v1  ;;  %v401_v0 = vadd.f32 %v400_v62, %v10737_v21  ;;  %v10745_v60 = vsub.s32 1, %v285_v61 }
 0x1aa   :  { %v543_v59 = vpop.f32.mrf.mxu1 }
 0x1ab   :  { %14271 = vst [vmem:[#allocation52_spill] sm:$0xff] %v10726_v4  ;;  %v10728_v2 = vadd.f32 %v543_v59, %v295_v1  ;;  %14278 = vst [vmem:[#allocation59_spill] sm:$0xff] %v10745_v60 }
 0x1ac   :  { %v10732_v13 = vpop.f32.mrf.mxu0 }
 0x1ad   :  { %14272 = vst [vmem:[#allocation53_spill] sm:$0xff] %v10728_v2  ;;  %14274 = vst [vmem:[#allocation55_spill] sm:$0xff] %v10732_v13 }
 0x1ae   :  { %v10734_v18 = vpop.f32.mrf.mxu0 }
 0x1af   :  { %14275 = vst [vmem:[#allocation56_spill] sm:$0xff] %v10734_v18  ;;  %v10753_v18 = vrot.slane %v274_v63, %v10745_v60 }
 0x1b1   :  { %14281 = vst [vmem:[#allocation62_spill] sm:$0xff] %v10753_v18  ;;  %v403_v62 = vadd.f32 %v402_v3, %v10753_v18 }
 0x1b2   :  { %v412_v23 = vpop.f32.mrf.mxu0 }
 0x1b3   :  { %v10740_v26 = vadd.f32 %v412_v23, %v10737_v21 }
 0x1b4   :  { %v10743_v4 = vpop.f32.mrf.mxu0 }
 0x1b5   :  { %14276 = vst [vmem:[#allocation57_spill] sm:$0xff] %v10740_v26  ;;  %14277 = vst [vmem:[#allocation58_spill] sm:$0xff] %v10743_v4 }
 0x1b8   :  { %v418_v20 = vpop.f32.mrf.mxu0 }
 0x1b9   :  { %v10748_v13 = vadd.f32 %v418_v20, %v10737_v21 }
 0x1ba   :  { %v10750_v43 = vpop.f32.mrf.mxu0 }
 0x1bb   :  { %14279 = vst [vmem:[#allocation60_spill] sm:$0xff] %v10748_v13  ;;  %14280 = vst [vmem:[#allocation61_spill] sm:$0xff] %v10750_v43 }
 0x1bc   :  { %v703_v59 = vpop.f32.mrf.mxu1 }
 0x1bd   :  { %v778_v2 = vadd.f32 %v703_v59, %v401_v0 }
 0x1be   :  { %v705_v23 = vpop.f32.mrf.mxu1 }
 0x1bf   :  { %v7283_v15 = vmul.f32 -1.442695, %v778_v2  ;;  %v785_v2 = vadd.f32 %v705_v23, %v403_v62  ;;  %v10774_v62 = vld [vmem:[#allocation10] ss:$0 sm:$0xff] }
 0x1c0   :  { %v424_v26 = vpop.f32.mrf.mxu0 }
 0x1c1   :  { %9332 = vpow2.f32 %v7283_v15  ;;  %v10757_v4 = vadd.f32 %v424_v26, %v10737_v21  ;;  %v7284_v59 = vmul.f32 -1.442695, %v785_v2 }
 0x1c2   :  { %v10759_v61 = vpop.f32.mrf.mxu0 }
 0x1c3   :  { %14282 = vst [vmem:[#allocation63_spill] sm:$0xff] %v10757_v4  ;;  %14283 = vst [vmem:[#allocation64_spill] sm:$0xff] %v10759_v61  ;;  %9334 = vpow2.f32 %v7284_v59  ;;  %v514_v59 = vadd.f32 %v513_v11, %v295_v1  ;;  %v14290_v1 = vmov 0.0   ;;  %v14291_v11 = vld [vmem:[#allocation43_spill] sm:$0xff] }
 0x1c6   :  { %v430_v0 = vpop.f32.mrf.mxu0 }
 0x1c7   :  { %v10762_v20 = vadd.f32 %v430_v0, %v10737_v21 }
 0x1c8   :  { %v10764_v15 = vpop.f32.mrf.mxu0 }
 0x1c9   :  { %14284 = vst [vmem:[#allocation65_spill] sm:$0xff] %v10762_v20  ;;  %14285 = vst [vmem:[#allocation66_spill] sm:$0xff] %v10764_v15 }
 0x1cc   :  { %v436_v60 = vpop.f32.mrf.mxu0 }
 0x1cd   :  { %v10767_v3 = vadd.f32 %v436_v60, %v10737_v21 }
 0x1ce   :  { %v9333_v43 = vpop.eup %9332  ;;  %v10769_v26 = vpop.f32.mrf.mxu0 }
 0x1cf   :  { %v782_v63 = vadd.f32 1.0, %v9333_v43  ;;  %14286 = vst [vmem:[#allocation67_spill] sm:$0xff] %v10767_v3  ;;  %14287 = vst [vmem:[#allocation68_spill] sm:$0xff] %v10769_v26 }
 0x1d0   :  { %v9335_v0 = vpop.eup %9334 }
 0x1d1   :  { %9336 = vrcp.f32 %v782_v63  ;;  %v789_v61 = vadd.f32 1.0, %v9335_v0 }
 0x1d2   :  { %v442_v4 = vpop.f32.mrf.mxu0 }
 0x1d3   :  { %v10772_v23 = vadd.f32 %v442_v4, %v10737_v21 }
 0x1d5   :  { %14288 = vst [vmem:[#allocation69_spill] sm:$0xff] %v10772_v23 }
 0x1dc   :  { %v774_v2 = vpop.f32.mrf.mxu1 }
 0x1dd   :  { %v792_v15 = vadd.f32 %v10774_v62, %v774_v2 }
 0x1de   :  { %v9337_v20 = vpop.eup %9336  ;;  %v8048_v43 = vpop.f32.mrf.mxu1 }
 0x1df   :  { %v793_v63 = vmul.f32 %v9337_v20, %v792_v15  ;;  %v14295_v20 = vld [vmem:[#allocation55_spill] sm:$0xff] }
 0x1e0   :  { %v407_v15 = vadd.f32 %v14295_v20, %v10737_v21 }
 0x1e1   :  { %v794_v13 = vadd.f32 %v793_v63, %v514_v59  ;;  %v14296_v63 = vld [vmem:[#allocation62_spill] sm:$0xff] }
 0x1e3   :  { %9338 = vtanh.f32 %v794_v13  ;;  %v14292_v13 = vld [vmem:[#allocation45_spill] sm:$0xff] }
 0x1e4   :  { %9340 = vrcp.f32 %v789_v61  ;;  %v10848_v61 = vpop.f32.mrf.mxu0 }
 0x1e5   :  { %14294 = vst [vmem:[#allocation71_spill] sm:$0xff] %v10848_v61 }
 0x1f0   :  { %v9339_v60 = vpop.eup %9338 }
 0x1f1   :  { %v796_v26 = vsub.f32 0.0, %v9339_v60  ;;  %v9341_v3 = vpop.eup %9340 }
 0x1f3   :  { %v797_v18 = vmul.f32 %v9341_v3, %v796_v26 }
 0x1f5   :  { %v10777_v4 = vadd.f32 %v9339_v60, %v797_v18  ;;  %v14293_v18 = vld [vmem:[#allocation40_spill] sm:$0xff] }
 0x1f6   :  { %v14297_v60 = vld [vmem:[#allocation56_spill] sm:$0xff] }
 0x1f7   :  { %14289 = vst [vmem:[#allocation70_spill] sm:$0xff] %v10777_v4  ;;  %871 = vmatmul.mubr.f32.vlgmr.msra.gmra.mxu0 %v10777_v4  ;;  %8082 = vmatmul.mubr.f32.vlgmr.msra.gmra.mxu1 %v10777_v4  ;;  %v409_v23 = vadd.f32 %v14297_v60, %v14296_v63  ;;  %v14306_v60 = vld [vmem:[#allocation57_spill] sm:$0xff] }
 0x1f8   :  { %977 = vmatpush1.msra.mxu0 %v10412_v5  ;;  %8085 = vmatpush3.msra.mxu1 %v10569_v44 }
 0x1f9   :  { %978 = vmatprep.subr.mxu0 %v10415_v6  ;;  %8086 = vmatprep.subr.mxu1 %v14290_v1 }
 0x1fa   :  { %979 = vmatpush1.msra.mxu0 %v10420_v7  ;;  %8087 = vmatpush3.msra.mxu1 %v10576_v45 }
 0x1fb   :  { %980 = vmatprep.subr.mxu0 %v10423_v8  ;;  %8088 = vmatprep.subr.mxu1 %v14290_v1 }
 0x1fc   :  { %981 = vmatpush1.msra.mxu0 %v10426_v9  ;;  %8089 = vmatpush3.msra.mxu1 %v10582_v46 }
 0x1fd   :  { %982 = vmatprep.subr.mxu0 %v10429_v10  ;;  %8090 = vmatprep.subr.mxu1 %v14290_v1 }
 0x1fe   :  { %983 = vmatpush1.msra.mxu0 %v10437_v12  ;;  %8091 = vmatpush3.msra.mxu1 %v10589_v47 }
 0x1ff   :  { %984 = vmatprep.subr.mxu0 %v10447_v14  ;;  %8092 = vmatprep.subr.mxu1 %v14290_v1 }
 0x200   :  { %985 = vmatpush1.msra.mxu0 %v10455_v16  ;;  %8093 = vmatpush3.msra.mxu1 %v10595_v48 }
 0x201   :  { %986 = vmatprep.subr.mxu0 %v10460_v17  ;;  %8094 = vmatprep.subr.mxu1 %v14290_v1 }
 0x202   :  { %987 = vmatpush1.msra.mxu0 %v10470_v19  ;;  %8095 = vmatpush3.msra.mxu1 %v10601_v49 }
 0x203   :  { %988 = vmatprep.subr.mxu0 %v10478_v22  ;;  %8096 = vmatprep.subr.mxu1 %v14290_v1 }
 0x204   :  { %989 = vmatpush1.msra.mxu0 %v10481_v24  ;;  %8097 = vmatpush3.msra.mxu1 %v10608_v50 }
 0x205   :  { %990 = vmatprep.subr.mxu0 %v10486_v25  ;;  %8098 = vmatprep.subr.mxu1 %v14290_v1 }
 0x206   :  { %991 = vmatpush1.msra.mxu0 %v10496_v27  ;;  %8099 = vmatpush3.msra.mxu1 %v10614_v51 }
 0x207   :  { %992 = vmatprep.subr.mxu0 %v10500_v28  ;;  %8100 = vmatprep.subr.mxu1 %v14290_v1 }
 0x208   :  { %993 = vmatpush1.msra.mxu0 %v10504_v29  ;;  %8101 = vmatpush3.msra.mxu1 %v10620_v52 }
 0x209   :  { %994 = vmatprep.subr.mxu0 %v10509_v30  ;;  %8102 = vmatprep.subr.mxu1 %v14290_v1 }
 0x20a   :  { %995 = vmatpush1.msra.mxu0 %v10513_v31  ;;  %8103 = vmatpush3.msra.mxu1 %v10627_v53 }
 0x20b   :  { %996 = vmatprep.subr.mxu0 %v10517_v32  ;;  %8104 = vmatprep.subr.mxu1 %v14290_v1 }
 0x20c   :  { %997 = vmatpush1.msra.mxu0 %v10521_v33  ;;  %8105 = vmatpush3.msra.mxu1 %v10633_v54 }
 0x20d   :  { %998 = vmatprep.subr.mxu0 %v10525_v34  ;;  %8106 = vmatprep.subr.mxu1 %v14290_v1 }
 0x20e   :  { %999 = vmatpush1.msra.mxu0 %v10529_v35  ;;  %8107 = vmatpush3.msra.mxu1 %v10639_v55 }
 0x20f   :  { %1000 = vmatprep.subr.mxu0 %v10533_v36  ;;  %8108 = vmatprep.subr.mxu1 %v14290_v1 }
 0x210   :  { %1001 = vmatpush1.msra.mxu0 %v10538_v37  ;;  %8109 = vmatpush3.msra.mxu1 %v10646_v56 }
 0x211   :  { %1002 = vmatprep.subr.mxu0 %v10542_v38  ;;  %8110 = vmatprep.subr.mxu1 %v14290_v1 }
 0x212   :  { %1003 = vmatpush1.msra.mxu0 %v10546_v39  ;;  %8111 = vmatpush3.msra.mxu1 %v10652_v57 }
 0x213   :  { %1004 = vmatprep.subr.mxu0 %v10550_v40  ;;  %8112 = vmatprep.subr.mxu1 %v14290_v1 }
 0x214   :  { %1005 = vmatpush1.msra.mxu0 %v10554_v41  ;;  %8113 = vmatpush3.msra.mxu1 %v10658_v58  ;;  %v14298_v41 = vld [vmem:[#allocation47_spill] sm:$0xff] }
 0x215   :  { %1006 = vmatprep.subr.mxu0 %v10558_v42  ;;  %8114 = vmatprep.subr.mxu1 %v14290_v1 }
 0x216   :  { %1007 = vmatpush1.msra.mxu0 %v14291_v11  ;;  %1040 = vmatprep.mubr.f32.mxu0 %v14290_v1 }
 0x217   :  { %8115 = vmatpush3.msra.mxu1 %v14292_v13  ;;  %8116 = vmatprep.mubr.msk.f32.mxu1 %vm10226_vm2, %v14290_v1 }
 0x218   :  { %1146 = vmatprep.subr.mxu0 %v14293_v18  ;;  %8119 = vmatprep.subr.mxu1 %v14290_v1 }
 0x2b7   :  { %v872_v3 = vpop.f32.mrf.mxu0  ;;  %v943_v26 = vpop.f32.mrf.mxu1 }
 0x2b8   :  { %v947_v2 = vadd.f32 %v872_v3, %v407_v15  ;;  %v961_v58 = vadd.f32 %v10774_v62, %v943_v26 }
 0x2b9   :  { %v8083_v0 = vpop.f32.mrf.mxu1  ;;  %v874_v59 = vpop.f32.mrf.mxu0 }
 0x2ba   :  { %v7285_v43 = vmul.f32 -1.442695, %v947_v2  ;;  %v954_v13 = vadd.f32 %v874_v59, %v409_v23 }
 0x2bc   :  { %9342 = vpow2.f32 %v7285_v43  ;;  %v7286_v11 = vmul.f32 -1.442695, %v954_v13 }
 0x2be   :  { %9344 = vpow2.f32 %v7286_v11  ;;  %v14303_v11 = vld [vmem:[#allocation43_spill] sm:$0xff] }
 0x2c9   :  { %v9343_v18 = vpop.eup %9342 }
 0x2ca   :  { %v951_v42 = vadd.f32 1.0, %v9343_v18  ;;  %v14304_v18 = vld [vmem:[#allocation45_spill] sm:$0xff] }
 0x2cb   :  { %v9345_v61 = vpop.eup %9344 }
 0x2cc   :  { %9346 = vrcp.f32 %v951_v42  ;;  %v958_v3 = vadd.f32 1.0, %v9345_v61  ;;  %v14301_v42 = vld [vmem:[#allocation44_spill] sm:$0xff] }
 0x2cd   :  { %v14305_v61 = vld [vmem:[#allocation40_spill] sm:$0xff] }
 0x2d9   :  { %v9347_v21 = vpop.eup %9346 }
 0x2da   :  { %v962_v20 = vmul.f32 %v9347_v21, %v961_v58  ;;  %v14302_v58 = vld [vmem:[#allocation42_spill] sm:$0xff] }
 0x2dc   :  { %v963_v15 = vadd.f32 %v962_v20, %v14298_v41  ;;  %v14300_v41 = vld [vmem:[#allocation41_spill] sm:$0xff] }
 0x2de   :  { %9348 = vtanh.f32 %v963_v15 }
 0x2df   :  { %9350 = vrcp.f32 %v958_v3 }
 0x2eb   :  { %v9349_v2 = vpop.eup %9348 }
 0x2ec   :  { %v965_v0 = vsub.f32 %v10777_v4, %v9349_v2  ;;  %v9351_v43 = vpop.eup %9350 }
 0x2ee   :  { %v966_v23 = vmul.f32 %v9351_v43, %v965_v0 }
 0x2f0   :  { %v10857_v13 = vadd.f32 %v9349_v2, %v966_v23  ;;  %v14307_v2 = vld [vmem:[#allocation58_spill] sm:$0xff] }
 0x2f1   :  { %v415_v0 = vadd.f32 %v14307_v2, %v14296_v63 }
 0x2f2   :  { %14299 = vst [vmem:[#allocation55_spill] sm:$0xff] %v10857_v13  ;;  %1041 = vmatmul.mubr.f32.vlgmr.msra.gmra.mxu0 %v10857_v13  ;;  %8117 = vmatmul.mubr.f32.vlgmr.msra.gmra.mxu1 %v10857_v13 }
 0x2f3   :  { %1147 = vmatpush1.msra.mxu0 %v10412_v5  ;;  %8120 = vmatpush3.msra.mxu1 %v10569_v44 }
 0x2f4   :  { %1148 = vmatprep.subr.mxu0 %v10415_v6  ;;  %8121 = vmatprep.subr.mxu1 %v14290_v1 }
 0x2f5   :  { %1149 = vmatpush1.msra.mxu0 %v10420_v7  ;;  %8122 = vmatpush3.msra.mxu1 %v10576_v45 }
 0x2f6   :  { %1150 = vmatprep.subr.mxu0 %v10423_v8  ;;  %8123 = vmatprep.subr.mxu1 %v14290_v1 }
 0x2f7   :  { %1151 = vmatpush1.msra.mxu0 %v10426_v9  ;;  %8124 = vmatpush3.msra.mxu1 %v10582_v46 }
 0x2f8   :  { %1152 = vmatprep.subr.mxu0 %v10429_v10  ;;  %8125 = vmatprep.subr.mxu1 %v14290_v1 }
 0x2f9   :  { %1153 = vmatpush1.msra.mxu0 %v10437_v12  ;;  %8126 = vmatpush3.msra.mxu1 %v10589_v47 }
 0x2fa   :  { %1154 = vmatprep.subr.mxu0 %v10447_v14  ;;  %8127 = vmatprep.subr.mxu1 %v14290_v1 }
 0x2fb   :  { %1155 = vmatpush1.msra.mxu0 %v10455_v16  ;;  %8128 = vmatpush3.msra.mxu1 %v10595_v48 }
 0x2fc   :  { %1156 = vmatprep.subr.mxu0 %v10460_v17  ;;  %8129 = vmatprep.subr.mxu1 %v14290_v1 }
 0x2fd   :  { %1157 = vmatpush1.msra.mxu0 %v10470_v19  ;;  %8130 = vmatpush3.msra.mxu1 %v10601_v49 }
 0x2fe   :  { %1158 = vmatprep.subr.mxu0 %v10478_v22  ;;  %8131 = vmatprep.subr.mxu1 %v14290_v1 }
 0x2ff   :  { %1159 = vmatpush1.msra.mxu0 %v10481_v24  ;;  %8132 = vmatpush3.msra.mxu1 %v10608_v50 }
 0x300   :  { %1160 = vmatprep.subr.mxu0 %v10486_v25  ;;  %8133 = vmatprep.subr.mxu1 %v14290_v1 }
 0x301   :  { %1161 = vmatpush1.msra.mxu0 %v10496_v27  ;;  %8134 = vmatpush3.msra.mxu1 %v10614_v51 }
 0x302   :  { %1162 = vmatprep.subr.mxu0 %v10500_v28  ;;  %8135 = vmatprep.subr.mxu1 %v14290_v1 }
 0x303   :  { %1163 = vmatpush1.msra.mxu0 %v10504_v29  ;;  %8136 = vmatpush3.msra.mxu1 %v10620_v52 }
 0x304   :  { %1164 = vmatprep.subr.mxu0 %v10509_v30  ;;  %8137 = vmatprep.subr.mxu1 %v14290_v1 }
 0x305   :  { %1165 = vmatpush1.msra.mxu0 %v10513_v31  ;;  %8138 = vmatpush3.msra.mxu1 %v10627_v53 }
 0x306   :  { %1166 = vmatprep.subr.mxu0 %v10517_v32  ;;  %8139 = vmatprep.subr.mxu1 %v14290_v1 }
 0x307   :  { %1167 = vmatpush1.msra.mxu0 %v10521_v33  ;;  %8140 = vmatpush3.msra.mxu1 %v10633_v54 }
 0x308   :  { %1168 = vmatprep.subr.mxu0 %v10525_v34  ;;  %8141 = vmatprep.subr.mxu1 %v14290_v1 }
 0x309   :  { %1169 = vmatpush1.msra.mxu0 %v10529_v35  ;;  %8142 = vmatpush3.msra.mxu1 %v10639_v55 }
 0x30a   :  { %1170 = vmatprep.subr.mxu0 %v10533_v36  ;;  %8143 = vmatprep.subr.mxu1 %v14290_v1 }
 0x30b   :  { %1171 = vmatpush1.msra.mxu0 %v10538_v37  ;;  %8144 = vmatpush3.msra.mxu1 %v10646_v56 }
 0x30c   :  { %1172 = vmatprep.subr.mxu0 %v10542_v38  ;;  %8145 = vmatprep.subr.mxu1 %v14290_v1 }
 0x30d   :  { %1173 = vmatpush1.msra.mxu0 %v10546_v39  ;;  %8146 = vmatpush3.msra.mxu1 %v10652_v57 }
 0x30e   :  { %1174 = vmatprep.subr.mxu0 %v10550_v40  ;;  %8147 = vmatprep.subr.mxu1 %v14290_v1 }
 0x30f   :  { %1175 = vmatpush1.msra.mxu0 %v14300_v41  ;;  %8148 = vmatpush3.msra.mxu1 %v14301_v42  ;;  %v14308_v41 = vld [vmem:[#allocation49_spill] sm:$0xff] }
 0x310   :  { %1176 = vmatprep.subr.mxu0 %v14302_v58  ;;  %8149 = vmatprep.subr.mxu1 %v14290_v1 }
 0x311   :  { %1177 = vmatpush1.msra.mxu0 %v14303_v11  ;;  %1210 = vmatprep.mubr.f32.mxu0 %v14290_v1 }
 0x312   :  { %8150 = vmatpush3.msra.mxu1 %v14304_v18  ;;  %8151 = vmatprep.mubr.msk.f32.mxu1 %vm10226_vm2, %v14290_v1 }
 0x313   :  { %1316 = vmatprep.subr.mxu0 %v14305_v61  ;;  %8154 = vmatprep.subr.mxu1 %v14290_v1 }
 0x3b2   :  { %v1042_v26 = vpop.f32.mrf.mxu0  ;;  %v1113_v59 = vpop.f32.mrf.mxu1 }
 0x3b3   :  { %v1117_v21 = vadd.f32 %v1042_v26, %v14306_v60  ;;  %v1131_v11 = vadd.f32 %v10774_v62, %v1113_v59  ;;  %v11029_v59 = vld [vmem:[#allocation7 + $0x140] sm:$0xff] }
 0x3b4   :  { %v8118_v20 = vpop.f32.mrf.mxu1  ;;  %v1044_v3 = vpop.f32.mrf.mxu0 }
 0x3b5   :  { %v7287_v15 = vmul.f32 -1.442695, %v1117_v21  ;;  %v1124_v43 = vadd.f32 %v1044_v3, %v415_v0  ;;  %v11033_v0 = vld [vmem:[#allocation7 + $0x138] sm:$0xff] }
 0x3b7   :  { %9352 = vpow2.f32 %v7287_v15  ;;  %v7288_v23 = vmul.f32 -1.442695, %v1124_v43  ;;  %v11041_v43 = vld [vmem:[#allocation7 + $0x120] sm:$0xff] }
 0x3b9   :  { %9354 = vpow2.f32 %v7288_v23  ;;  %v11049_v23 = vld [vmem:[#allocation7 + $0x108] sm:$0xff] }
 0x3c4   :  { %v9353_v4 = vpop.eup %9352 }
 0x3c5   :  { %v1121_v18 = vadd.f32 1.0, %v9353_v4 }
 0x3c6   :  { %v9355_v61 = vpop.eup %9354 }
 0x3c7   :  { %9356 = vrcp.f32 %v1121_v18  ;;  %v1128_v60 = vadd.f32 1.0, %v9355_v61  ;;  %v11025_v18 = vld [vmem:[#allocation7 + $0x150] sm:$0xff] }
 0x3c8   :  { %v11057_v61 = vld [vmem:[#allocation7 + $0xf0] sm:$0xff] }
 0x3d4   :  { %v9357_v58 = vpop.eup %9356 }
 0x3d5   :  { %v1132_v42 = vmul.f32 %v9357_v58, %v1131_v11  ;;  %v11017_v58 = vld [vmem:[#allocation7 + $0x168] sm:$0xff]  ;;  %v11021_v11 = vld [vmem:[#allocation7 + $0x158] sm:$0xff] }
 0x3d7   :  { %v1133_v26 = vadd.f32 %v1132_v42, %v14308_v41 }
 0x3d9   :  { %9358 = vtanh.f32 %v1133_v26  ;;  %v11065_v26 = vld [vmem:[#allocation7 + $0xd8] sm:$0xff] }
 0x3da   :  { %9360 = vrcp.f32 %v1128_v60  ;;  %v11073_v60 = vld [vmem:[#allocation7 + $0xc0] sm:$0xff] }
 0x3e6   :  { %v9359_v21 = vpop.eup %9358 }
 0x3e7   :  { %v1135_v20 = vsub.f32 %v10857_v13, %v9359_v21  ;;  %v9361_v15 = vpop.eup %9360 }
 0x3e9   :  { %v1136_v3 = vmul.f32 %v9361_v15, %v1135_v20  ;;  %v11089_v20 = vld [vmem:[#allocation7 + $0x90] sm:$0xff]  ;;  %v11097_v15 = vld [vmem:[#allocation7 + $0x78] sm:$0xff] }
 0x3eb   :  { %v10934_v2 = vadd.f32 %v9359_v21, %v1136_v3  ;;  %v11081_v21 = vld [vmem:[#allocation7 + $0xa8] sm:$0xff]  ;;  %v11105_v3 = vld [vmem:[#allocation7 + $0x60] sm:$0xff] }
 0x3ed   :  { %14309 = vst [vmem:[#allocation62_spill] sm:$0xff] %v10934_v2  ;;  %1211 = vmatmul.mubr.f32.vlgmr.msra.gmra.mxu0 %v10934_v2  ;;  %8152 = vmatmul.mubr.f32.vlgmr.msra.gmra.mxu1 %v10934_v2 }
 0x3ee   :  { %1317 = vmatpush1.msra.mxu0 %v10412_v5  ;;  %8155 = vmatpush3.msra.mxu1 %v10569_v44  ;;  %v14310_v5 = vld [vmem:[#allocation41_spill] sm:$0xff] }
 0x3ef   :  { %1318 = vmatprep.subr.mxu0 %v10415_v6  ;;  %8156 = vmatprep.subr.mxu1 %v14290_v1  ;;  %v14311_v6 = vld [vmem:[#allocation44_spill] sm:$0xff] }
 0x3f0   :  { %1319 = vmatpush1.msra.mxu0 %v10420_v7  ;;  %8157 = vmatpush3.msra.mxu1 %v10576_v45  ;;  %v14312_v7 = vld [vmem:[#allocation42_spill] sm:$0xff] }
 0x3f1   :  { %1320 = vmatprep.subr.mxu0 %v10423_v8  ;;  %8158 = vmatprep.subr.mxu1 %v14290_v1  ;;  %v14313_v8 = vld [vmem:[#allocation43_spill] sm:$0xff] }
 0x3f2   :  { %1321 = vmatpush1.msra.mxu0 %v10426_v9  ;;  %8159 = vmatpush3.msra.mxu1 %v10582_v46  ;;  %v14314_v9 = vld [vmem:[#allocation45_spill] sm:$0xff] }
 0x3f3   :  { %1322 = vmatprep.subr.mxu0 %v10429_v10  ;;  %8160 = vmatprep.subr.mxu1 %v14290_v1  ;;  %v11003_v10 = vld [vmem:[#allocation7 + $0x170] sm:$0xff] }
 0x3f4   :  { %1323 = vmatpush1.msra.mxu0 %v10437_v12  ;;  %8161 = vmatpush3.msra.mxu1 %v10589_v47 }
 0x3f5   :  { %1324 = vmatprep.subr.mxu0 %v10447_v14  ;;  %8162 = vmatprep.subr.mxu1 %v14290_v1 }
 0x3f6   :  { %1325 = vmatpush1.msra.mxu0 %v10455_v16  ;;  %8163 = vmatpush3.msra.mxu1 %v10595_v48  ;;  %v14315_v16 = vld [vmem:[#allocation60_spill] sm:$0xff] }
 0x3f7   :  { %1326 = vmatprep.subr.mxu0 %v10460_v17  ;;  %8164 = vmatprep.subr.mxu1 %v14290_v1 }
 0x3f8   :  { %1327 = vmatpush1.msra.mxu0 %v10470_v19  ;;  %8165 = vmatpush3.msra.mxu1 %v10601_v49 }
 0x3f9   :  { %1328 = vmatprep.subr.mxu0 %v10478_v22  ;;  %8166 = vmatprep.subr.mxu1 %v14290_v1 }
 0x3fa   :  { %1329 = vmatpush1.msra.mxu0 %v10481_v24  ;;  %8167 = vmatpush3.msra.mxu1 %v10608_v50 }
 0x3fb   :  { %1330 = vmatprep.subr.mxu0 %v10486_v25  ;;  %8168 = vmatprep.subr.mxu1 %v14290_v1  ;;  %v14316_v25 = vld [vmem:[#allocation61_spill] sm:$0xff] }
 0x3fc   :  { %1331 = vmatpush1.msra.mxu0 %v10496_v27  ;;  %8169 = vmatpush3.msra.mxu1 %v10614_v51  ;;  %v421_v27 = vadd.f32 %v14316_v25, %v14296_v63 }
 0x3fd   :  { %1332 = vmatprep.subr.mxu0 %v10500_v28  ;;  %8170 = vmatprep.subr.mxu1 %v14290_v1 }
 0x3fe   :  { %1333 = vmatpush1.msra.mxu0 %v10504_v29  ;;  %8171 = vmatpush3.msra.mxu1 %v10620_v52 }
 0x3ff   :  { %1334 = vmatprep.subr.mxu0 %v10509_v30  ;;  %8172 = vmatprep.subr.mxu1 %v14290_v1 }
 0x400   :  { %1335 = vmatpush1.msra.mxu0 %v10513_v31  ;;  %8173 = vmatpush3.msra.mxu1 %v10627_v53 }
 0x401   :  { %1336 = vmatprep.subr.mxu0 %v10517_v32  ;;  %8174 = vmatprep.subr.mxu1 %v14290_v1 }
 0x402   :  { %1337 = vmatpush1.msra.mxu0 %v10521_v33  ;;  %8175 = vmatpush3.msra.mxu1 %v10633_v54 }
 0x403   :  { %1338 = vmatprep.subr.mxu0 %v10525_v34  ;;  %8176 = vmatprep.subr.mxu1 %v14290_v1 }
 0x404   :  { %1339 = vmatpush1.msra.mxu0 %v10529_v35  ;;  %8177 = vmatpush3.msra.mxu1 %v10639_v55 }
 0x405   :  { %1340 = vmatprep.subr.mxu0 %v10533_v36  ;;  %8178 = vmatprep.subr.mxu1 %v14290_v1  ;;  %v14317_v36 = vld [vmem:[#allocation48_spill] sm:$0xff] }
 0x406   :  { %1341 = vmatpush1.msra.mxu0 %v10538_v37  ;;  %8179 = vmatpush3.msra.mxu1 %v10646_v56 }
 0x407   :  { %1342 = vmatprep.subr.mxu0 %v10542_v38  ;;  %8180 = vmatprep.subr.mxu1 %v14290_v1 }
 0x408   :  { %1343 = vmatpush1.msra.mxu0 %v10546_v39  ;;  %8181 = vmatpush3.msra.mxu1 %v10652_v57 }
 0x409   :  { %1344 = vmatprep.subr.mxu0 %v10550_v40  ;;  %8182 = vmatprep.subr.mxu1 %v14290_v1 }
 0x40a   :  { %1345 = vmatpush1.msra.mxu0 %v14310_v5  ;;  %8183 = vmatpush3.msra.mxu1 %v14311_v6  ;;  %v11113_v5 = vld [vmem:[#allocation7 + $0x48] sm:$0xff] }
 0x40b   :  { %1346 = vmatprep.subr.mxu0 %v14312_v7  ;;  %8184 = vmatprep.subr.mxu1 %v14290_v1  ;;  %v11121_v7 = vld [vmem:[#allocation7 + $0x30] sm:$0xff] }
 0x40c   :  { %1347 = vmatpush1.msra.mxu0 %v14313_v8  ;;  %1380 = vmatprep.mubr.f32.mxu0 %v14290_v1  ;;  %v11129_v8 = vld [vmem:[#allocation7 + $0x18] sm:$0xff] }
 0x40d   :  { %8185 = vmatpush3.msra.mxu1 %v14314_v9  ;;  %8186 = vmatprep.mubr.msk.f32.mxu1 %vm10226_vm2, %v14290_v1  ;;  %14319 = vst [vmem:[#allocation47_spill] sm:$0xff] %v11129_v8 }
 0x40e   :  { %1486 = vmatprep.subr.mxu0 %v11003_v10  ;;  %8189 = vmatprep.subr.mxu1 %v14290_v1 }
 0x4ad   :  { %v1212_v12 = vpop.f32.mrf.mxu0  ;;  %v1283_v14 = vpop.f32.mrf.mxu1 }
 0x4ae   :  { %v1287_v17 = vadd.f32 %v1212_v12, %v14315_v16  ;;  %v1301_v33 = vadd.f32 %v10774_v62, %v1283_v14  ;;  %v11137_v12 = vld [vmem:[#allocation7] sm:$0xff]  ;;  %v14322_v14 = vld [vmem:[#allocation63_spill] sm:$0xff] }
 0x4af   :  { %v8153_v19 = vpop.f32.mrf.mxu1  ;;  %v1214_v24 = vpop.f32.mrf.mxu0  ;;  %14321 = vst [vmem:[#allocation57_spill] sm:$0xff] %v11137_v12 }
 0x4b0   :  { %v7289_v22 = vmul.f32 -1.442695, %v1287_v17  ;;  %v1294_v28 = vadd.f32 %v1214_v24, %v421_v27  ;;  %v14323_v24 = vld [vmem:[#allocation64_spill] sm:$0xff] }
 0x4b1   :  { %v427_v25 = vadd.f32 %v14323_v24, %v14296_v63  ;;  %v11205_v24 = vld [vmem:[#allocation7 + $0xb8] sm:$0xff] }
 0x4b2   :  { %9362 = vpow2.f32 %v7289_v22  ;;  %v7290_v29 = vmul.f32 -1.442695, %v1294_v28 }
 0x4b4   :  { %9364 = vpow2.f32 %v7290_v29 }
 0x4bf   :  { %v9363_v30 = vpop.eup %9362 }
 0x4c0   :  { %v1291_v31 = vadd.f32 1.0, %v9363_v30 }
 0x4c1   :  { %v9365_v32 = vpop.eup %9364 }
 0x4c2   :  { %9366 = vrcp.f32 %v1291_v31  ;;  %v1298_v38 = vadd.f32 1.0, %v9365_v32 }
 0x4cf   :  { %v9367_v34 = vpop.eup %9366 }
 0x4d0   :  { %v1302_v35 = vmul.f32 %v9367_v34, %v1301_v33  ;;  %v14324_v34 = vld [vmem:[#allocation51_spill] sm:$0xff] }
 0x4d2   :  { %v1303_v37 = vadd.f32 %v1302_v35, %v14317_v36 }
 0x4d4   :  { %9368 = vtanh.f32 %v1303_v37 }
 0x4d5   :  { %9370 = vrcp.f32 %v1298_v38 }
 0x4e1   :  { %v9369_v39 = vpop.eup %9368 }
 0x4e2   :  { %v1305_v40 = vsub.f32 %v10934_v2, %v9369_v39  ;;  %v9371_v4 = vpop.eup %9370 }
 0x4e4   :  { %v1306_v41 = vmul.f32 %v9371_v4, %v1305_v40 }
 0x4e6   :  { %v11013_v42 = vadd.f32 %v9369_v39, %v1306_v41  ;;  %v11157_v41 = vld [vmem:[#allocation7 + $0x178] sm:$0xff] }
 0x4e8   :  { %14318 = vst [vmem:[#allocation56_spill] sm:$0xff] %v11013_v42  ;;  %1381 = vmatmul.mubr.f32.vlgmr.msra.gmra.mxu0 %v11013_v42  ;;  %8187 = vmatmul.mubr.f32.vlgmr.msra.gmra.mxu1 %v11013_v42 }
 0x4e9   :  { %1487 = vmatpush1.msra.mxu0 %v11017_v58  ;;  %8190 = vmatpush3.msra.mxu1 %v10569_v44  ;;  %v11037_v44 = vld [vmem:[#allocation7 + $0x128] sm:$0xff] }
 0x4ea   :  { %1488 = vmatprep.subr.mxu0 %v11021_v11  ;;  %8191 = vmatprep.subr.mxu1 %v14290_v1 }
 0x4eb   :  { %1489 = vmatpush1.msra.mxu0 %v11025_v18  ;;  %8192 = vmatpush3.msra.mxu1 %v10576_v45  ;;  %v11045_v45 = vld [vmem:[#allocation7 + $0x110] sm:$0xff] }
 0x4ec   :  { %1490 = vmatprep.subr.mxu0 %v11029_v59  ;;  %8193 = vmatprep.subr.mxu1 %v14290_v1 }
 0x4ed   :  { %1491 = vmatpush1.msra.mxu0 %v11033_v0  ;;  %8194 = vmatpush3.msra.mxu1 %v10582_v46  ;;  %v11053_v46 = vld [vmem:[#allocation7 + $0xf8] sm:$0xff] }
 0x4ee   :  { %1492 = vmatprep.subr.mxu0 %v11037_v44  ;;  %8195 = vmatprep.subr.mxu1 %v14290_v1 }
 0x4ef   :  { %1493 = vmatpush1.msra.mxu0 %v11041_v43  ;;  %8196 = vmatpush3.msra.mxu1 %v10589_v47  ;;  %v11061_v47 = vld [vmem:[#allocation7 + $0xe0] sm:$0xff] }
 0x4f0   :  { %1494 = vmatprep.subr.mxu0 %v11045_v45  ;;  %8197 = vmatprep.subr.mxu1 %v14290_v1 }
 0x4f1   :  { %1495 = vmatpush1.msra.mxu0 %v11049_v23  ;;  %8198 = vmatpush3.msra.mxu1 %v10595_v48  ;;  %v11069_v48 = vld [vmem:[#allocation7 + $0xc8] sm:$0xff] }
 0x4f2   :  { %1496 = vmatprep.subr.mxu0 %v11053_v46  ;;  %8199 = vmatprep.subr.mxu1 %v14290_v1 }
 0x4f3   :  { %1497 = vmatpush1.msra.mxu0 %v11057_v61  ;;  %8200 = vmatpush3.msra.mxu1 %v10601_v49  ;;  %v11077_v49 = vld [vmem:[#allocation7 + $0xb0] sm:$0xff] }
 0x4f4   :  { %1498 = vmatprep.subr.mxu0 %v11061_v47  ;;  %8201 = vmatprep.subr.mxu1 %v14290_v1 }
 0x4f5   :  { %1499 = vmatpush1.msra.mxu0 %v11065_v26  ;;  %8202 = vmatpush3.msra.mxu1 %v10608_v50  ;;  %v11085_v50 = vld [vmem:[#allocation7 + $0x98] sm:$0xff] }
 0x4f6   :  { %1500 = vmatprep.subr.mxu0 %v11069_v48  ;;  %8203 = vmatprep.subr.mxu1 %v14290_v1 }
 0x4f7   :  { %1501 = vmatpush1.msra.mxu0 %v11073_v60  ;;  %8204 = vmatpush3.msra.mxu1 %v10614_v51  ;;  %v11093_v51 = vld [vmem:[#allocation7 + $0x80] sm:$0xff] }
 0x4f8   :  { %1502 = vmatprep.subr.mxu0 %v11077_v49  ;;  %8205 = vmatprep.subr.mxu1 %v14290_v1 }
 0x4f9   :  { %1503 = vmatpush1.msra.mxu0 %v11081_v21  ;;  %8206 = vmatpush3.msra.mxu1 %v10620_v52  ;;  %v11101_v52 = vld [vmem:[#allocation7 + $0x68] sm:$0xff] }
 0x4fa   :  { %1504 = vmatprep.subr.mxu0 %v11085_v50  ;;  %8207 = vmatprep.subr.mxu1 %v14290_v1 }
 0x4fb   :  { %1505 = vmatpush1.msra.mxu0 %v11089_v20  ;;  %8208 = vmatpush3.msra.mxu1 %v10627_v53  ;;  %v11109_v53 = vld [vmem:[#allocation7 + $0x50] sm:$0xff] }
 0x4fc   :  { %1506 = vmatprep.subr.mxu0 %v11093_v51  ;;  %8209 = vmatprep.subr.mxu1 %v14290_v1 }
 0x4fd   :  { %1507 = vmatpush1.msra.mxu0 %v11097_v15  ;;  %8210 = vmatpush3.msra.mxu1 %v10633_v54  ;;  %v11117_v54 = vld [vmem:[#allocation7 + $0x38] sm:$0xff] }
 0x4fe   :  { %1508 = vmatprep.subr.mxu0 %v11101_v52  ;;  %8211 = vmatprep.subr.mxu1 %v14290_v1 }
 0x4ff   :  { %1509 = vmatpush1.msra.mxu0 %v11105_v3  ;;  %8212 = vmatpush3.msra.mxu1 %v10639_v55  ;;  %v11125_v55 = vld [vmem:[#allocation7 + $0x20] sm:$0xff] }
 0x500   :  { %1510 = vmatprep.subr.mxu0 %v11109_v53  ;;  %8213 = vmatprep.subr.mxu1 %v14290_v1 }
 0x501   :  { %1511 = vmatpush1.msra.mxu0 %v11113_v5  ;;  %8214 = vmatpush3.msra.mxu1 %v10646_v56  ;;  %v11133_v56 = vld [vmem:[#allocation7 + $0x8] sm:$0xff] }
 0x502   :  { %1512 = vmatprep.subr.mxu0 %v11117_v54  ;;  %8215 = vmatprep.subr.mxu1 %v14290_v1  ;;  %14320 = vst [vmem:[#allocation40_spill] sm:$0xff] %v11133_v56 }
 0x503   :  { %1513 = vmatpush1.msra.mxu0 %v11121_v7  ;;  %8216 = vmatpush3.msra.mxu1 %v10652_v57 }
 0x504   :  { %1514 = vmatprep.subr.mxu0 %v11125_v55  ;;  %8217 = vmatprep.subr.mxu1 %v14290_v1 }
 0x505   :  { %1515 = vmatpush1.msra.mxu0 %v11129_v8  ;;  %8218 = vmatpush3.msra.mxu1 %v14311_v6 }
 0x506   :  { %1516 = vmatprep.subr.mxu0 %v11133_v56  ;;  %8219 = vmatprep.subr.mxu1 %v14290_v1 }
 0x507   :  { %1517 = vmatpush1.msra.mxu0 %v11137_v12  ;;  %1550 = vmatprep.mubr.f32.mxu0 %v14290_v1 }
 0x508   :  { %8220 = vmatpush3.msra.mxu1 %v14314_v9  ;;  %8221 = vmatprep.mubr.msk.f32.mxu1 %vm10226_vm2, %v14290_v1 }
 0x509   :  { %1656 = vmatprep.subr.mxu0 %v11003_v10  ;;  %8224 = vmatprep.subr.mxu1 %v14290_v1 }
 0x5a8   :  { %v1382_v57 = vpop.f32.mrf.mxu0  ;;  %v1453_v6 = vpop.f32.mrf.mxu1 }
 0x5a9   :  { %v1457_v16 = vadd.f32 %v1382_v57, %v14322_v14  ;;  %v1471_v31 = vadd.f32 %v10774_v62, %v1453_v6  ;;  %v11163_v57 = vld [vmem:[#allocation7 + $0x160] sm:$0xff]  ;;  %v11169_v6 = vld [vmem:[#allocation7 + $0x148] sm:$0xff]  ;;  %v11175_v14 = vld [vmem:[#allocation7 + $0x130] sm:$0xff] }
 0x5aa   :  { %v8188_v17 = vpop.f32.mrf.mxu1  ;;  %v1384_v22 = vpop.f32.mrf.mxu0 }
 0x5ab   :  { %v7291_v19 = vmul.f32 -1.442695, %v1457_v16  ;;  %v1464_v27 = vadd.f32 %v1384_v22, %v427_v25  ;;  %v11181_v16 = vld [vmem:[#allocation7 + $0x118] sm:$0xff]  ;;  %v11187_v17 = vld [vmem:[#allocation7 + $0x100] sm:$0xff]  ;;  %v11199_v22 = vld [vmem:[#allocation7 + $0xd0] sm:$0xff] }
 0x5ac   :  { %v11211_v25 = vld [vmem:[#allocation7 + $0xa0] sm:$0xff] }
 0x5ad   :  { %9372 = vpow2.f32 %v7291_v19  ;;  %v7292_v9 = vmul.f32 -1.442695, %v1464_v27  ;;  %v11193_v19 = vld [vmem:[#allocation7 + $0xe8] sm:$0xff] }
 0x5ae   :  { %v11217_v27 = vld [vmem:[#allocation7 + $0x88] sm:$0xff] }
 0x5af   :  { %9374 = vpow2.f32 %v7292_v9  ;;  %v11223_v9 = vld [vmem:[#allocation7 + $0x70] sm:$0xff] }
 0x5ba   :  { %v9373_v28 = vpop.eup %9372 }
 0x5bb   :  { %v1461_v29 = vadd.f32 1.0, %v9373_v28  ;;  %v11229_v28 = vld [vmem:[#allocation7 + $0x58] sm:$0xff] }
 0x5bc   :  { %v9375_v30 = vpop.eup %9374 }
 0x5bd   :  { %9376 = vrcp.f32 %v1461_v29  ;;  %v1468_v36 = vadd.f32 1.0, %v9375_v30  ;;  %v11235_v29 = vld [vmem:[#allocation7 + $0x40] sm:$0xff]  ;;  %v11241_v30 = vld [vmem:[#allocation7 + $0x28] sm:$0xff] }
 0x5be   :  { %14325 = vst [vmem:[#allocation58_spill] sm:$0xff] %v11241_v30 }
 0x5ca   :  { %v9377_v32 = vpop.eup %9376 }
 0x5cb   :  { %v1472_v33 = vmul.f32 %v9377_v32, %v1471_v31  ;;  %v11248_v31 = vld [vmem:[#allocation7 + $0x10] sm:$0xff] }
 0x5cc   :  { %14326 = vst [vmem:[#allocation49_spill] sm:$0xff] %v11248_v31 }
 0x5cd   :  { %v1473_v35 = vadd.f32 %v1472_v33, %v14324_v34  ;;  %v14327_v34 = vld [vmem:[#allocation65_spill] sm:$0xff] }
 0x5cf   :  { %9378 = vtanh.f32 %v1473_v35 }
 0x5d0   :  { %9380 = vrcp.f32 %v1468_v36 }
 0x5dc   :  { %v9379_v37 = vpop.eup %9378 }
 0x5dd   :  { %v1475_v38 = vsub.f32 %v11013_v42, %v9379_v37  ;;  %v9381_v39 = vpop.eup %9380 }
 0x5df   :  { %v1476_v40 = vmul.f32 %v9381_v39, %v1475_v38  ;;  %v14328_v39 = vld [vmem:[#allocation66_spill] sm:$0xff] }
 0x5e1   :  { %v11152_v4 = vadd.f32 %v9379_v37, %v1476_v40  ;;  %v433_v40 = vadd.f32 %v14328_v39, %v14296_v63  ;;  %v2019_v39 = vld [vmem:[#allocation12 + $0xe8] sm:$0xff] }
 0x5e3   :  { %1551 = vmatmul.mubr.f32.vlgmr.msra.gmra.mxu0 %v11152_v4  ;;  %8222 = vmatmul.mubr.f32.vlgmr.msra.gmra.mxu1 %v11152_v4 }
 0x5e4   :  { %1657 = vmatpush1.msra.mxu0 %v11017_v58  ;;  %8225 = vmatpush3.msra.mxu1 %v11157_v41 }
 0x5e5   :  { %1658 = vmatprep.subr.mxu0 %v11021_v11  ;;  %8226 = vmatprep.subr.mxu1 %v14290_v1 }
 0x5e6   :  { %1659 = vmatpush1.msra.mxu0 %v11025_v18  ;;  %8227 = vmatpush3.msra.mxu1 %v11163_v57 }
 0x5e7   :  { %1660 = vmatprep.subr.mxu0 %v11029_v59  ;;  %8228 = vmatprep.subr.mxu1 %v14290_v1 }
 0x5e8   :  { %1661 = vmatpush1.msra.mxu0 %v11033_v0  ;;  %8229 = vmatpush3.msra.mxu1 %v11169_v6 }
 0x5e9   :  { %1662 = vmatprep.subr.mxu0 %v11037_v44  ;;  %8230 = vmatprep.subr.mxu1 %v14290_v1 }
 0x5ea   :  { %1663 = vmatpush1.msra.mxu0 %v11041_v43  ;;  %8231 = vmatpush3.msra.mxu1 %v11175_v14 }
 0x5eb   :  { %1664 = vmatprep.subr.mxu0 %v11045_v45  ;;  %8232 = vmatprep.subr.mxu1 %v14290_v1 }
 0x5ec   :  { %1665 = vmatpush1.msra.mxu0 %v11049_v23  ;;  %8233 = vmatpush3.msra.mxu1 %v11181_v16 }
 0x5ed   :  { %1666 = vmatprep.subr.mxu0 %v11053_v46  ;;  %8234 = vmatprep.subr.mxu1 %v14290_v1 }
 0x5ee   :  { %1667 = vmatpush1.msra.mxu0 %v11057_v61  ;;  %8235 = vmatpush3.msra.mxu1 %v11187_v17 }
 0x5ef   :  { %1668 = vmatprep.subr.mxu0 %v11061_v47  ;;  %8236 = vmatprep.subr.mxu1 %v14290_v1 }
 0x5f0   :  { %1669 = vmatpush1.msra.mxu0 %v11065_v26  ;;  %8237 = vmatpush3.msra.mxu1 %v11193_v19 }
 0x5f1   :  { %1670 = vmatprep.subr.mxu0 %v11069_v48  ;;  %8238 = vmatprep.subr.mxu1 %v14290_v1 }
 0x5f2   :  { %1671 = vmatpush1.msra.mxu0 %v11073_v60  ;;  %8239 = vmatpush3.msra.mxu1 %v11199_v22 }
 0x5f3   :  { %1672 = vmatprep.subr.mxu0 %v11077_v49  ;;  %8240 = vmatprep.subr.mxu1 %v14290_v1 }
 0x5f4   :  { %1673 = vmatpush1.msra.mxu0 %v11081_v21  ;;  %8241 = vmatpush3.msra.mxu1 %v11205_v24 }
 0x5f5   :  { %1674 = vmatprep.subr.mxu0 %v11085_v50  ;;  %8242 = vmatprep.subr.mxu1 %v14290_v1 }
 0x5f6   :  { %1675 = vmatpush1.msra.mxu0 %v11089_v20  ;;  %8243 = vmatpush3.msra.mxu1 %v11211_v25 }
 0x5f7   :  { %1676 = vmatprep.subr.mxu0 %v11093_v51  ;;  %8244 = vmatprep.subr.mxu1 %v14290_v1 }
 0x5f8   :  { %1677 = vmatpush1.msra.mxu0 %v11097_v15  ;;  %8245 = vmatpush3.msra.mxu1 %v11217_v27 }
 0x5f9   :  { %1678 = vmatprep.subr.mxu0 %v11101_v52  ;;  %8246 = vmatprep.subr.mxu1 %v14290_v1 }
 0x5fa   :  { %1679 = vmatpush1.msra.mxu0 %v11105_v3  ;;  %8247 = vmatpush3.msra.mxu1 %v11223_v9 }
 0x5fb   :  { %1680 = vmatprep.subr.mxu0 %v11109_v53  ;;  %8248 = vmatprep.subr.mxu1 %v14290_v1 }
 0x5fc   :  { %1681 = vmatpush1.msra.mxu0 %v11113_v5  ;;  %8249 = vmatpush3.msra.mxu1 %v11229_v28 }
 0x5fd   :  { %1682 = vmatprep.subr.mxu0 %v11117_v54  ;;  %8250 = vmatprep.subr.mxu1 %v14290_v1 }
 0x5fe   :  { %1683 = vmatpush1.msra.mxu0 %v11121_v7  ;;  %8251 = vmatpush3.msra.mxu1 %v11235_v29 }
 0x5ff   :  { %1684 = vmatprep.subr.mxu0 %v11125_v55  ;;  %8252 = vmatprep.subr.mxu1 %v14290_v1 }
 0x600   :  { %1685 = vmatpush1.msra.mxu0 %v11129_v8  ;;  %8253 = vmatpush3.msra.mxu1 %v11241_v30  ;;  %v14329_v8 = vld [vmem:[#allocation50_spill] sm:$0xff] }
 0x601   :  { %1686 = vmatprep.subr.mxu0 %v11133_v56  ;;  %8254 = vmatprep.subr.mxu1 %v14290_v1 }
 0x602   :  { %1687 = vmatpush1.msra.mxu0 %v11137_v12  ;;  %1720 = vmatprep.mubr.f32.mxu0 %v14290_v1 }
 0x603   :  { %8255 = vmatpush3.msra.mxu1 %v11248_v31  ;;  %8256 = vmatprep.mubr.msk.f32.mxu1 %vm10226_vm2, %v14290_v1 }
 0x604   :  { %1826 = vmatprep.subr.mxu0 %v11003_v10  ;;  %8259 = vmatprep.subr.mxu1 %v14290_v1 }
 0x6a3   :  { %v1552_v32 = vpop.f32.mrf.mxu0  ;;  %v1623_v33 = vpop.f32.mrf.mxu1 }
 0x6a4   :  { %v1627_v35 = vadd.f32 %v1552_v32, %v14327_v34  ;;  %v1641_v12 = vadd.f32 %v10774_v62, %v1623_v33  ;;  %v14330_v62 = vld [vmem:[#allocation47_spill] sm:$0xff]  ;;  %v2018_v33 = vld [vmem:[#allocation12 + $0xe0] sm:$0xff] }
 0x6a5   :  { %v8223_v36 = vpop.f32.mrf.mxu1  ;;  %v1554_v38 = vpop.f32.mrf.mxu0 }
 0x6a6   :  { %v7293_v37 = vmul.f32 -1.442695, %v1627_v35  ;;  %v1634_v42 = vadd.f32 %v1554_v38, %v433_v40  ;;  %v2017_v40 = vld [vmem:[#allocation12 + $0xd8] sm:$0xff] }
 0x6a8   :  { %9382 = vpow2.f32 %v7293_v37  ;;  %v7294_v2 = vmul.f32 -1.442695, %v1634_v42 }
 0x6aa   :  { %9384 = vpow2.f32 %v7294_v2  ;;  %v14332_v2 = vld [vmem:[#allocation40_spill] sm:$0xff] }
 0x6b5   :  { %v9383_v13 = vpop.eup %9382 }
 0x6b6   :  { %v1631_v31 = vadd.f32 1.0, %v9383_v13  ;;  %v14331_v13 = vld [vmem:[#allocation58_spill] sm:$0xff] }
 0x6b7   :  { %v9385_v10 = vpop.eup %9384 }
 0x6b8   :  { %9386 = vrcp.f32 %v1631_v31  ;;  %v1638_v34 = vadd.f32 1.0, %v9385_v10  ;;  %v2020_v31 = vld [vmem:[#allocation12 + $0xf0] sm:$0xff]  ;;  %v2015_v10 = vld [vmem:[#allocation12 + $0xc8] sm:$0xff] }
 0x6c5   :  { %v9387_v56 = vpop.eup %9386 }
 0x6c6   :  { %v1642_v30 = vmul.f32 %v9387_v56, %v1641_v12  ;;  %v2035_v12 = vld [vmem:[#allocation12 + $0x168] sm:$0xff] }
 0x6c8   :  { %v1643_v32 = vadd.f32 %v1642_v30, %v14329_v8  ;;  %v2022_v30 = vld [vmem:[#allocation12 + $0x100] sm:$0xff] }
 0x6ca   :  { %9388 = vtanh.f32 %v1643_v32  ;;  %v2016_v32 = vld [vmem:[#allocation12 + $0xd0] sm:$0xff] }
 0x6cb   :  { %9390 = vrcp.f32 %v1638_v34  ;;  %v2014_v34 = vld [vmem:[#allocation12 + $0xc0] sm:$0xff] }
 0x6d7   :  { %v9389_v35 = vpop.eup %9388 }
 0x6d8   :  { %v1645_v36 = vsub.f32 %v11152_v4, %v9389_v35  ;;  %v9391_v37 = vpop.eup %9390 }
 0x6da   :  { %v1646_v38 = vmul.f32 %v9391_v37, %v1645_v36  ;;  %v2013_v36 = vld [vmem:[#allocation12 + $0xb8] sm:$0xff]  ;;  %v2011_v37 = vld [vmem:[#allocation12 + $0xa8] sm:$0xff] }
 0x6dc   :  { %v11261_v42 = vadd.f32 %v9389_v35, %v1646_v38  ;;  %v2012_v35 = vld [vmem:[#allocation12 + $0xb0] sm:$0xff]  ;;  %v2009_v38 = vld [vmem:[#allocation12 + $0x98] sm:$0xff] }
 0x6de   :  { %1721 = vmatmul.mubr.f32.vlgmr.msra.gmra.mxu0 %v11261_v42  ;;  %8257 = vmatmul.mubr.f32.vlgmr.msra.gmra.mxu1 %v11261_v42 }
 0x6df   :  { %1827 = vmatpush1.msra.mxu0 %v11017_v58  ;;  %8260 = vmatpush3.msra.mxu1 %v11157_v41  ;;  %v14333_v58 = vld [vmem:[#allocation57_spill] sm:$0xff] }
 0x6e0   :  { %1828 = vmatprep.subr.mxu0 %v11021_v11  ;;  %8261 = vmatprep.subr.mxu1 %v14290_v1  ;;  %v14334_v11 = vld [vmem:[#allocation49_spill] sm:$0xff] }
 0x6e1   :  { %1829 = vmatpush1.msra.mxu0 %v11025_v18  ;;  %8262 = vmatpush3.msra.mxu1 %v11163_v57  ;;  %v2036_v18 = vld [vmem:[#allocation12 + $0x170] sm:$0xff]  ;;  %v2033_v41 = vld [vmem:[#allocation12 + $0x158] sm:$0xff]  ;;  %v2034_v57 = vld [vmem:[#allocation12 + $0x160] sm:$0xff] }
 0x6e2   :  { %1830 = vmatprep.subr.mxu0 %v11029_v59  ;;  %8263 = vmatprep.subr.mxu1 %v14290_v1  ;;  %v2037_v59 = vld [vmem:[#allocation12 + $0x178] sm:$0xff] }
 0x6e3   :  { %1831 = vmatpush1.msra.mxu0 %v11033_v0  ;;  %8264 = vmatpush3.msra.mxu1 %v11169_v6  ;;  %v2032_v6 = vld [vmem:[#allocation12 + $0x150] sm:$0xff] }
 0x6e4   :  { %1832 = vmatprep.subr.mxu0 %v11037_v44  ;;  %8265 = vmatprep.subr.mxu1 %v14290_v1 }
 0x6e5   :  { %1833 = vmatpush1.msra.mxu0 %v11041_v43  ;;  %8266 = vmatpush3.msra.mxu1 %v11175_v14  ;;  %v14335_v43 = vld [vmem:[#allocation67_spill] sm:$0xff]  ;;  %v2030_v14 = vld [vmem:[#allocation12 + $0x140] sm:$0xff] }
 0x6e6   :  { %1834 = vmatprep.subr.mxu0 %v11045_v45  ;;  %8267 = vmatprep.subr.mxu1 %v14290_v1 }
 0x6e7   :  { %1835 = vmatpush1.msra.mxu0 %v11049_v23  ;;  %8268 = vmatpush3.msra.mxu1 %v11181_v16  ;;  %v2031_v16 = vld [vmem:[#allocation12 + $0x148] sm:$0xff] }
 0x6e8   :  { %1836 = vmatprep.subr.mxu0 %v11053_v46  ;;  %8269 = vmatprep.subr.mxu1 %v14290_v1 }
 0x6e9   :  { %1837 = vmatpush1.msra.mxu0 %v11057_v61  ;;  %8270 = vmatpush3.msra.mxu1 %v11187_v17  ;;  %v2029_v17 = vld [vmem:[#allocation12 + $0x138] sm:$0xff] }
 0x6ea   :  { %1838 = vmatprep.subr.mxu0 %v11061_v47  ;;  %8271 = vmatprep.subr.mxu1 %v14290_v1  ;;  %v14336_v47 = vld [vmem:[#allocation68_spill] sm:$0xff] }
 0x6eb   :  { %1839 = vmatpush1.msra.mxu0 %v11065_v26  ;;  %8272 = vmatpush3.msra.mxu1 %v11193_v19  ;;  %v439_v26 = vadd.f32 %v14336_v47, %v14296_v63  ;;  %v14338_v19 = vld [vmem:[#allocation70_spill] sm:$0xff] }
 0x6ec   :  { %1840 = vmatprep.subr.mxu0 %v11069_v48  ;;  %8273 = vmatprep.subr.mxu1 %v14290_v1  ;;  %v1994_v47 = vld [vmem:[#allocation12 + $0x20] sm:$0xff] }
 0x6ed   :  { %1841 = vmatpush1.msra.mxu0 %v11073_v60  ;;  %8274 = vmatpush3.msra.mxu1 %v11199_v22  ;;  %v2027_v22 = vld [vmem:[#allocation12 + $0x128] sm:$0xff] }
 0x6ee   :  { %1842 = vmatprep.subr.mxu0 %v11077_v49  ;;  %8275 = vmatprep.subr.mxu1 %v14290_v1 }
 0x6ef   :  { %1843 = vmatpush1.msra.mxu0 %v11081_v21  ;;  %8276 = vmatpush3.msra.mxu1 %v11205_v24  ;;  %v2028_v24 = vld [vmem:[#allocation12 + $0x130] sm:$0xff] }
 0x6f0   :  { %1844 = vmatprep.subr.mxu0 %v11085_v50  ;;  %8277 = vmatprep.subr.mxu1 %v14290_v1 }
 0x6f1   :  { %1845 = vmatpush1.msra.mxu0 %v11089_v20  ;;  %8278 = vmatpush3.msra.mxu1 %v11211_v25  ;;  %v11333_v20 = vld [vmem:[#allocation10] ss:$0 sm:$0xff]  ;;  %v2026_v25 = vld [vmem:[#allocation12 + $0x120] sm:$0xff] }
 0x6f2   :  { %1846 = vmatprep.subr.mxu0 %v11093_v51  ;;  %8279 = vmatprep.subr.mxu1 %v14290_v1 }
 0x6f3   :  { %1847 = vmatpush1.msra.mxu0 %v11097_v15  ;;  %8280 = vmatpush3.msra.mxu1 %v11217_v27  ;;  %v2024_v27 = vld [vmem:[#allocation12 + $0x110] sm:$0xff] }
 0x6f4   :  { %1848 = vmatprep.subr.mxu0 %v11101_v52  ;;  %8281 = vmatprep.subr.mxu1 %v14290_v1 }
 0x6f5   :  { %1849 = vmatpush1.msra.mxu0 %v11105_v3  ;;  %8282 = vmatpush3.msra.mxu1 %v11223_v9  ;;  %v14337_v3 = vld [vmem:[#allocation53_spill] sm:$0xff] }
 0x6f6   :  { %1850 = vmatprep.subr.mxu0 %v11109_v53  ;;  %8283 = vmatprep.subr.mxu1 %v14290_v1  ;;  %v2025_v9 = vld [vmem:[#allocation12 + $0x118] sm:$0xff] }
 0x6f7   :  { %1851 = vmatpush1.msra.mxu0 %v11113_v5  ;;  %8284 = vmatpush3.msra.mxu1 %v11229_v28  ;;  %v2023_v28 = vld [vmem:[#allocation12 + $0x108] sm:$0xff] }
 0x6f8   :  { %1852 = vmatprep.subr.mxu0 %v11117_v54  ;;  %8285 = vmatprep.subr.mxu1 %v14290_v1 }
 0x6f9   :  { %1853 = vmatpush1.msra.mxu0 %v11121_v7  ;;  %8286 = vmatpush3.msra.mxu1 %v11235_v29  ;;  %v2021_v29 = vld [vmem:[#allocation12 + $0xf8] sm:$0xff] }
 0x6fa   :  { %1854 = vmatprep.subr.mxu0 %v11125_v55  ;;  %8287 = vmatprep.subr.mxu1 %v14290_v1 }
 0x6fb   :  { %1855 = vmatpush1.msra.mxu0 %v14330_v62  ;;  %8288 = vmatpush3.msra.mxu1 %v14331_v13  ;;  %v2010_v62 = vld [vmem:[#allocation12 + $0xa0] sm:$0xff]  ;;  %v2008_v13 = vld [vmem:[#allocation12 + $0x90] sm:$0xff] }
 0x6fc   :  { %1856 = vmatprep.subr.mxu0 %v14332_v2  ;;  %8289 = vmatprep.subr.mxu1 %v14290_v1  ;;  %v2006_v2 = vld [vmem:[#allocation12 + $0x80] sm:$0xff] }
 0x6fd   :  { %1857 = vmatpush1.msra.mxu0 %v14333_v58  ;;  %8290 = vmatpush3.msra.mxu1 %v14334_v11  ;;  %v2007_v58 = vld [vmem:[#allocation12 + $0x88] sm:$0xff]  ;;  %v2005_v11 = vld [vmem:[#allocation12 + $0x78] sm:$0xff] }
 0x6fe   :  { %1890 = vmatprep.mubr.f32.mxu0 %v14290_v1  ;;  %8291 = vmatprep.mubr.msk.f32.mxu1 %vm10226_vm2, %v14290_v1 }
 0x6ff   :  { %2063 = vmatprep.subr.mxu0 %v2036_v18  ;;  %8294 = vmatprep.subr.mxu1 %v2037_v59  ;;  %v2003_v18 = vld [vmem:[#allocation12 + $0x68] sm:$0xff] }
 0x79e   :  { %v1722_v0 = vpop.f32.mrf.mxu0  ;;  %v1793_v44 = vpop.f32.mrf.mxu1 }
 0x79f   :  { %v1797_v45 = vadd.f32 %v1722_v0, %v14335_v43  ;;  %v1811_v51 = vadd.f32 %v11333_v20, %v1793_v44  ;;  %v2002_v0 = vld [vmem:[#allocation12 + $0x60] sm:$0xff]  ;;  %v2000_v44 = vld [vmem:[#allocation12 + $0x50] sm:$0xff]  ;;  %v2001_v43 = vld [vmem:[#allocation12 + $0x58] sm:$0xff] }
 0x7a0   :  { %v8258_v23 = vpop.f32.mrf.mxu1  ;;  %v1724_v61 = vpop.f32.mrf.mxu0 }
 0x7a1   :  { %v7295_v46 = vmul.f32 -1.442695, %v1797_v45  ;;  %v1804_v48 = vadd.f32 %v1724_v61, %v439_v26  ;;  %v1999_v45 = vld [vmem:[#allocation12 + $0x48] sm:$0xff]  ;;  %v1997_v23 = vld [vmem:[#allocation12 + $0x38] sm:$0xff]  ;;  %v1996_v61 = vld [vmem:[#allocation12 + $0x30] sm:$0xff] }
 0x7a2   :  { %v1995_v26 = vld [vmem:[#allocation12 + $0x28] sm:$0xff] }
 0x7a3   :  { %9392 = vpow2.f32 %v7295_v46  ;;  %v7296_v60 = vmul.f32 -1.442695, %v1804_v48  ;;  %v1998_v46 = vld [vmem:[#allocation12 + $0x40] sm:$0xff]  ;;  %v1993_v48 = vld [vmem:[#allocation12 + $0x18] sm:$0xff] }
 0x7a5   :  { %9394 = vpow2.f32 %v7296_v60  ;;  %v1991_v60 = vld [vmem:[#allocation12 + $0x8] sm:$0xff] }
 0x7b0   :  { %v9393_v49 = vpop.eup %9392 }
 0x7b1   :  { %v1801_v21 = vadd.f32 1.0, %v9393_v49  ;;  %v1992_v49 = vld [vmem:[#allocation12 + $0x10] sm:$0xff] }
 0x7b2   :  { %v9395_v50 = vpop.eup %9394 }
 0x7b3   :  { %9396 = vrcp.f32 %v1801_v21  ;;  %v1808_v5 = vadd.f32 1.0, %v9395_v50  ;;  %v1990_v21 = vld [vmem:[#allocation12] sm:$0xff]  ;;  %v14339_v50 = vld [vmem:[#allocation55_spill] sm:$0xff] }
 0x7c0   :  { %v9397_v15 = vpop.eup %9396 }
 0x7c1   :  { %v1812_v52 = vmul.f32 %v9397_v15, %v1811_v51  ;;  %v14340_v51 = vld [vmem:[#allocation62_spill] sm:$0xff]  ;;  %v14341_v15 = vld [vmem:[#allocation56_spill] sm:$0xff] }
 0x7c3   :  { %v1813_v53 = vadd.f32 %v1812_v52, %v14337_v3  ;;  %v11365_v52 = vld [vmem:[#allocation13 + $0x170] sm:$0xff]  ;;  %v11368_v3 = vld [vmem:[#allocation13 + $0x168] sm:$0xff] }
 0x7c4   :  { %14342 = vst [vmem:[#allocation41_spill] sm:$0xff] %v11365_v52 }
 0x7c5   :  { %9398 = vtanh.f32 %v1813_v53  ;;  %v11371_v53 = vld [vmem:[#allocation13 + $0x158] sm:$0xff] }
 0x7c6   :  { %9400 = vrcp.f32 %v1808_v5  ;;  %v11380_v5 = vld [vmem:[#allocation13 + $0x138] sm:$0xff] }
 0x7d2   :  { %v9399_v54 = vpop.eup %9398 }
 0x7d3   :  { %v1815_v7 = vsub.f32 %v11261_v42, %v9399_v54  ;;  %v9401_v55 = vpop.eup %9400 }
 0x7d5   :  { %v1816_v8 = vmul.f32 %v9401_v55, %v1815_v7  ;;  %v11386_v7 = vld [vmem:[#allocation13 + $0x120] sm:$0xff]  ;;  %v11389_v55 = vld [vmem:[#allocation13 + $0x110] sm:$0xff] }
 0x7d7   :  { %v11338_v56 = vadd.f32 %v9399_v54, %v1816_v8  ;;  %v11383_v54 = vld [vmem:[#allocation13 + $0x128] sm:$0xff] }
 0x7d8   :  { %v11392_v8 = vld [vmem:[#allocation13 + $0x108] sm:$0xff] }
 0x7d9   :  { %1891 = vmatmul.mubr.f32.vlgmr.msra.gmra.mxu0 %v11338_v56  ;;  %8292 = vmatmul.mubr.f32.vlgmr.msra.gmra.mxu1 %v11338_v56 }
 0x7da   :  { %2064 = vmatpush1.msra.mxu0 %v2035_v12  ;;  %8295 = vmatpush3.msra.mxu1 %v2037_v59  ;;  %v2004_v59 = vld [vmem:[#allocation12 + $0x70] sm:$0xff]  ;;  %v11395_v12 = vld [vmem:[#allocation13 + $0xf8] sm:$0xff] }
 0x7db   :  { %2065 = vmatprep.subr.mxu0 %v2033_v41  ;;  %8296 = vmatprep.subr.mxu1 %v2034_v57  ;;  %v11398_v41 = vld [vmem:[#allocation13 + $0xf0] sm:$0xff] }
 0x7dc   :  { %8326 = vmatprep.mubr.f32.mxu1 %v14338_v19  ;;  %2066 = vmatpush1.msra.mxu0 %v2032_v6  ;;  %v11404_v6 = vld [vmem:[#allocation13 + $0xd8] sm:$0xff] }
 0x7dd   :  { %8297 = vmatpush3.msra.mxu1 %v2034_v57  ;;  %2067 = vmatprep.subr.mxu0 %v2030_v14  ;;  %v11401_v57 = vld [vmem:[#allocation13 + $0xe0] sm:$0xff]  ;;  %v11407_v14 = vld [vmem:[#allocation13 + $0xc8] sm:$0xff] }
 0x7de   :  { %8298 = vmatprep.subr.mxu1 %v2031_v16  ;;  %2068 = vmatpush1.msra.mxu0 %v2029_v17  ;;  %v11413_v17 = vld [vmem:[#allocation13 + $0xb0] sm:$0xff] }
 0x7df   :  { %8299 = vmatpush3.msra.mxu1 %v2031_v16  ;;  %2069 = vmatprep.subr.mxu0 %v2027_v22  ;;  %v11410_v16 = vld [vmem:[#allocation13 + $0xc0] sm:$0xff]  ;;  %v11419_v22 = vld [vmem:[#allocation13 + $0x98] sm:$0xff] }
 0x7e0   :  { %8300 = vmatprep.subr.mxu1 %v2028_v24  ;;  %2070 = vmatpush1.msra.mxu0 %v2026_v25  ;;  %v11425_v25 = vld [vmem:[#allocation13 + $0x80] sm:$0xff] }
 0x7e1   :  { %8301 = vmatpush3.msra.mxu1 %v2028_v24  ;;  %2071 = vmatprep.subr.mxu0 %v2024_v27  ;;  %v11422_v24 = vld [vmem:[#allocation13 + $0x90] sm:$0xff]  ;;  %v11428_v27 = vld [vmem:[#allocation13 + $0x78] sm:$0xff] }
 0x7e2   :  { %8302 = vmatprep.subr.mxu1 %v2025_v9  ;;  %2072 = vmatpush1.msra.mxu0 %v2023_v28  ;;  %v11434_v28 = vld [vmem:[#allocation13 + $0x60] sm:$0xff] }
 0x7e3   :  { %8303 = vmatpush3.msra.mxu1 %v2025_v9  ;;  %2073 = vmatprep.subr.mxu0 %v2021_v29  ;;  %v11431_v9 = vld [vmem:[#allocation13 + $0x68] sm:$0xff]  ;;  %v11437_v29 = vld [vmem:[#allocation13 + $0x50] sm:$0xff] }
 0x7e4   :  { %8304 = vmatprep.subr.mxu1 %v2022_v30  ;;  %2074 = vmatpush1.msra.mxu0 %v2020_v31  ;;  %v11443_v31 = vld [vmem:[#allocation13 + $0x38] sm:$0xff] }
 0x7e5   :  { %8305 = vmatpush3.msra.mxu1 %v2022_v30  ;;  %2075 = vmatprep.subr.mxu0 %v2018_v33  ;;  %v11440_v30 = vld [vmem:[#allocation13 + $0x48] sm:$0xff]  ;;  %v11446_v33 = vld [vmem:[#allocation13 + $0x30] sm:$0xff] }
 0x7e6   :  { %8306 = vmatprep.subr.mxu1 %v2019_v39  ;;  %2076 = vmatpush1.msra.mxu0 %v2017_v40  ;;  %v11451_v40 = vld [vmem:[#allocation13 + $0x18] sm:$0xff] }
 0x7e7   :  { %8307 = vmatpush3.msra.mxu1 %v2019_v39  ;;  %2077 = vmatprep.subr.mxu0 %v2015_v10  ;;  %v11449_v39 = vld [vmem:[#allocation13 + $0x20] sm:$0xff]  ;;  %14343 = vst [vmem:[#allocation44_spill] sm:$0xff] %v11451_v40  ;;  %v11453_v10 = vld [vmem:[#allocation13 + $0x8] sm:$0xff] }
 0x7e8   :  { %8308 = vmatprep.subr.mxu1 %v2016_v32  ;;  %2078 = vmatpush1.msra.mxu0 %v2014_v34  ;;  %14344 = vst [vmem:[#allocation42_spill] sm:$0xff] %v11453_v10  ;;  %v11458_v34 = vld [vmem:[#allocation13 + $0x178] sm:$0xff] }
 0x7e9   :  { %8309 = vmatpush3.msra.mxu1 %v2016_v32  ;;  %2079 = vmatprep.subr.mxu0 %v2012_v35  ;;  %v11456_v32 = vld [vmem:[#allocation13] sm:$0xff] }
 0x7ea   :  { %8310 = vmatprep.subr.mxu1 %v2013_v36  ;;  %2080 = vmatpush1.msra.mxu0 %v2011_v37  ;;  %14345 = vst [vmem:[#allocation43_spill] sm:$0xff] %v11456_v32  ;;  %v11464_v35 = vld [vmem:[#allocation13 + $0x160] sm:$0xff]  ;;  %v11471_v37 = vld [vmem:[#allocation13 + $0x130] sm:$0xff] }
 0x7eb   :  { %8311 = vmatpush3.msra.mxu1 %v2013_v36  ;;  %2081 = vmatprep.subr.mxu0 %v2009_v38  ;;  %v11466_v36 = vld [vmem:[#allocation13 + $0x148] sm:$0xff]  ;;  %v11476_v38 = vld [vmem:[#allocation13 + $0x118] sm:$0xff] }
 0x7ec   :  { %8312 = vmatprep.subr.mxu1 %v2010_v62  ;;  %2082 = vmatpush1.msra.mxu0 %v2008_v13  ;;  %v11484_v13 = vld [vmem:[#allocation13 + $0xe8] sm:$0xff] }
 0x7ed   :  { %8313 = vmatpush3.msra.mxu1 %v2010_v62  ;;  %2083 = vmatprep.subr.mxu0 %v2006_v2  ;;  %v11480_v62 = vld [vmem:[#allocation13 + $0x100] sm:$0xff]  ;;  %v11488_v2 = vld [vmem:[#allocation13 + $0xd0] sm:$0xff] }
 0x7ee   :  { %8314 = vmatprep.subr.mxu1 %v2007_v58  ;;  %2084 = vmatpush1.msra.mxu0 %v2005_v11  ;;  %v11496_v11 = vld [vmem:[#allocation13 + $0xa0] sm:$0xff] }
 0x7ef   :  { %8315 = vmatpush3.msra.mxu1 %v2007_v58  ;;  %2085 = vmatprep.subr.mxu0 %v2003_v18  ;;  %v11492_v58 = vld [vmem:[#allocation13 + $0xb8] sm:$0xff]  ;;  %v11500_v18 = vld [vmem:[#allocation13 + $0x88] sm:$0xff] }
 0x7f0   :  { %8316 = vmatprep.subr.mxu1 %v2004_v59  ;;  %2086 = vmatpush1.msra.mxu0 %v2002_v0  ;;  %v11508_v0 = vld [vmem:[#allocation13 + $0x58] sm:$0xff] }
 0x7f1   :  { %8317 = vmatpush3.msra.mxu1 %v2004_v59  ;;  %2087 = vmatprep.subr.mxu0 %v2000_v44  ;;  %v11504_v59 = vld [vmem:[#allocation13 + $0x70] sm:$0xff]  ;;  %v11512_v44 = vld [vmem:[#allocation13 + $0x40] sm:$0xff] }
 0x7f2   :  { %8318 = vmatprep.subr.mxu1 %v2001_v43  ;;  %2088 = vmatpush1.msra.mxu0 %v1999_v45  ;;  %v11520_v45 = vld [vmem:[#allocation13 + $0x10] sm:$0xff] }
 0x7f3   :  { %8319 = vmatpush3.msra.mxu1 %v2001_v43  ;;  %2089 = vmatprep.subr.mxu0 %v1997_v23  ;;  %v11516_v43 = vld [vmem:[#allocation13 + $0x28] sm:$0xff]  ;;  %14347 = vst [vmem:[#allocation60_spill] sm:$0xff] %v11520_v45 }
 0x7f4   :  { %8320 = vmatprep.subr.mxu1 %v1998_v46  ;;  %2090 = vmatpush1.msra.mxu0 %v1996_v61  ;;  %14346 = vst [vmem:[#allocation45_spill] sm:$0xff] %v11516_v43  ;;  %v14348_v61 = vld [vmem:[#allocation69_spill] sm:$0xff] }
 0x7f5   :  { %8321 = vmatpush3.msra.mxu1 %v1998_v46  ;;  %2091 = vmatprep.subr.mxu0 %v1994_v47 }
 0x7f6   :  { %8322 = vmatprep.subr.mxu1 %v1995_v26  ;;  %2092 = vmatpush1.msra.mxu0 %v1993_v48 }
 0x7f7   :  { %8323 = vmatpush3.msra.mxu1 %v1995_v26  ;;  %2093 = vmatprep.subr.mxu0 %v1991_v60 }
 0x7f8   :  { %8324 = vmatprep.subr.mxu1 %v1992_v49  ;;  %2094 = vmatpush1.msra.mxu0 %v1990_v21 }
 0x7f9   :  { %2127 = vmatprep.mubr.f32.mxu0 %v14290_v1  ;;  %8325 = vmatpush3.msra.mxu1 %v1992_v49  ;;  %v14349_v49 = vld [vmem:[#allocation71_spill] sm:$0xff] }
 0x7fa   :  { %2128 = vmatmul.mubr.f32.vlgmr.msra.gmra.mxu0 %v14338_v19  ;;  %8327 = vmatmul.mubr.f32.vlgmr.msra.gmra.mxu1 %v14339_v50  ;;  %v11416_v19 = vld [vmem:[#allocation13 + $0xa8] sm:$0xff]  ;;  %v445_v21 = vadd.f32 %v14349_v49, %v14296_v63 }
 0x7fb   :  { %8329 = vmatprep.mubr.f32.mxu1 %v14340_v51  ;;  %2133 = vmatprep.mubr.f32.mxu0 %v14290_v1 }
 0x7fc   :  { %8338 = vmatprep.subr.mxu1 %v14290_v1  ;;  %2363 = vmatprep.subr.mxu0 %v11365_v52 }
 0x7fd   :  { %2364 = vmatpush1.msra.mxu0 %v11368_v3  ;;  %8339 = vmatpush3.msra.mxu1 %v11458_v34 }
 0x7fe   :  { %2134 = vmatmul.mubr.f32.gmra.mxu0 %v14339_v50  ;;  %8330 = vmatmul.mubr.f32.gmra.mxu1 %v14341_v15 }
 0x7ff   :  { %8332 = vmatprep.mubr.f32.mxu1 %v11152_v4  ;;  %2139 = vmatprep.mubr.f32.mxu0 %v14290_v1 }
 0x800   :  { %2365 = vmatprep.subr.mxu0 %v11371_v53  ;;  %8340 = vmatprep.subr.mxu1 %v14290_v1 }
 0x801   :  { %8341 = vmatpush3.msra.mxu1 %v11464_v35 }
 0x802   :  { %2140 = vmatmul.mubr.f32.gmra.mxu0 %v14340_v51  ;;  %8333 = vmatmul.mubr.f32.gmra.mxu1 %v11261_v42 }
 0x803   :  { %8335 = vmatprep.mubr.f32.mxu1 %v11338_v56  ;;  %2145 = vmatprep.mubr.f32.mxu0 %v14290_v1 }
 0x804   :  { %8342 = vmatprep.subr.mxu1 %v14290_v1 }
 0x805   :  { %8343 = vmatpush3.msra.mxu1 %v11466_v36 }
 0x806   :  { %2146 = vmatmul.mubr.f32.gmra.mxu0 %v14341_v15  ;;  %8344 = vmatprep.subr.mxu1 %v14290_v1 }
 0x807   :  { %2151 = vmatprep.mubr.f32.mxu0 %v14290_v1  ;;  %8345 = vmatpush3.msra.mxu1 %v11471_v37 }
 0x808   :  { %8346 = vmatprep.subr.mxu1 %v14290_v1 }
 0x809   :  { %8347 = vmatpush3.msra.mxu1 %v11476_v38 }
 0x80a   :  { %2152 = vmatmul.mubr.f32.gmra.mxu0 %v11152_v4  ;;  %v11374_v4 = vld [vmem:[#allocation13 + $0x150] sm:$0xff]  ;;  %8348 = vmatprep.subr.mxu1 %v14290_v1 }
 0x80b   :  { %2157 = vmatprep.mubr.f32.mxu0 %v14290_v1  ;;  %2366 = vmatpush1.msra.mxu0 %v11374_v4 }
 0x80c   :  { %8349 = vmatpush3.msra.mxu1 %v11480_v62 }
 0x80d   :  { %8350 = vmatprep.subr.mxu1 %v14290_v1 }
 0x80e   :  { %2158 = vmatmul.mubr.f32.gmra.mxu0 %v11261_v42  ;;  %v11377_v42 = vld [vmem:[#allocation13 + $0x140] sm:$0xff]  ;;  %8351 = vmatpush3.msra.mxu1 %v11484_v13 }
 0x80f   :  { %2163 = vmatprep.mubr.f32.mxu0 %v14290_v1  ;;  %2367 = vmatprep.subr.mxu0 %v11377_v42 }
 0x810   :  { %2368 = vmatpush1.msra.mxu0 %v11380_v5  ;;  %8352 = vmatprep.subr.mxu1 %v14290_v1 }
 0x811   :  { %2369 = vmatprep.subr.mxu0 %v11383_v54  ;;  %8353 = vmatpush3.msra.mxu1 %v11488_v2 }
 0x812   :  { %2164 = vmatmul.mubr.f32.gmra.mxu0 %v11338_v56  ;;  %8354 = vmatprep.subr.mxu1 %v14290_v1 }
 0x813   :  { %2169 = vmatprep.mubr.f32.mxu0 %v14290_v1  ;;  %2370 = vmatpush1.msra.mxu0 %v11386_v7 }
 0x814   :  { %2371 = vmatprep.subr.mxu0 %v11389_v55  ;;  %8355 = vmatpush3.msra.mxu1 %v11492_v58 }
 0x815   :  { %2372 = vmatpush1.msra.mxu0 %v11392_v8  ;;  %8356 = vmatprep.subr.mxu1 %v14290_v1 }
 0x816   :  { %2373 = vmatprep.subr.mxu0 %v11395_v12  ;;  %8357 = vmatpush3.msra.mxu1 %v11496_v11 }
 0x817   :  { %2374 = vmatpush1.msra.mxu0 %v11398_v41  ;;  %8358 = vmatprep.subr.mxu1 %v14290_v1 }
 0x818   :  { %2375 = vmatprep.subr.mxu0 %v11401_v57  ;;  %8359 = vmatpush3.msra.mxu1 %v11500_v18 }
 0x819   :  { %2376 = vmatpush1.msra.mxu0 %v11404_v6  ;;  %8360 = vmatprep.subr.mxu1 %v14290_v1 }
 0x81a   :  { %2377 = vmatprep.subr.mxu0 %v11407_v14  ;;  %8361 = vmatpush3.msra.mxu1 %v11504_v59 }
 0x81b   :  { %2378 = vmatpush1.msra.mxu0 %v11410_v16  ;;  %8362 = vmatprep.subr.mxu1 %v14290_v1 }
 0x81c   :  { %2379 = vmatprep.subr.mxu0 %v11413_v17  ;;  %8363 = vmatpush3.msra.mxu1 %v11508_v0 }
 0x81d   :  { %2380 = vmatpush1.msra.mxu0 %v11416_v19  ;;  %8364 = vmatprep.subr.mxu1 %v14290_v1 }
 0x81e   :  { %2381 = vmatprep.subr.mxu0 %v11419_v22  ;;  %8365 = vmatpush3.msra.mxu1 %v11512_v44 }
 0x81f   :  { %2382 = vmatpush1.msra.mxu0 %v11422_v24  ;;  %8366 = vmatprep.subr.mxu1 %v14290_v1 }
 0x820   :  { %2383 = vmatprep.subr.mxu0 %v11425_v25  ;;  %8367 = vmatpush3.msra.mxu1 %v11516_v43 }
 0x821   :  { %2384 = vmatpush1.msra.mxu0 %v11428_v27  ;;  %8368 = vmatprep.subr.mxu1 %v14290_v1 }
 0x822   :  { %2385 = vmatprep.subr.mxu0 %v11431_v9  ;;  %8369 = vmatpush3.msra.mxu1 %v11520_v45 }
 0x823   :  { %2386 = vmatpush1.msra.mxu0 %v11434_v28  ;;  %8373 = vmatprep.subr.mxu1 %v14290_v1 }
 0x824   :  { %2387 = vmatprep.subr.mxu0 %v11437_v29 }
 0x825   :  { %2388 = vmatpush1.msra.mxu0 %v11440_v30 }
 0x826   :  { %2389 = vmatprep.subr.mxu0 %v11443_v31 }
 0x827   :  { %2390 = vmatpush1.msra.mxu0 %v11446_v33 }
 0x828   :  { %2391 = vmatprep.subr.mxu0 %v11449_v39 }
 0x829   :  { %2392 = vmatpush1.msra.mxu0 %v11451_v40  ;;  %v14350_v40 = vld [vmem:[#allocation52_spill] sm:$0xff] }
 0x82a   :  { %2393 = vmatprep.subr.mxu0 %v11453_v10 }
 0x82b   :  { %2394 = vmatpush1.msra.mxu0 %v11456_v32 }
 0x82c   :  { %2529 = vmatprep.subr.mxu0 %v11365_v52 }
 0x899   :  { %v1892_v23 = vpop.f32.mrf.mxu0  ;;  %v1963_v46 = vpop.f32.mrf.mxu1 }
 0x89a   :  { %v1967_v47 = vadd.f32 %v1892_v23, %v14348_v61  ;;  %v1981_v32 = vadd.f32 %v11333_v20, %v1963_v46  ;;  %v14351_v20 = vld [vmem:[#allocation44_spill] sm:$0xff] }
 0x89b   :  { %v8293_v26 = vpop.f32.mrf.mxu1  ;;  %v1894_v60 = vpop.f32.mrf.mxu0 }
 0x89c   :  { %v7297_v48 = vmul.f32 -1.442695, %v1967_v47  ;;  %v1974_v50 = vadd.f32 %v1894_v60, %v445_v21 }
 0x89e   :  { %9402 = vpow2.f32 %v7297_v48  ;;  %v7298_v51 = vmul.f32 -1.442695, %v1974_v50 }
 0x8a0   :  { %9404 = vpow2.f32 %v7298_v51 }
 0x8ab   :  { %v9403_v15 = vpop.eup %9402 }
 0x8ac   :  { %v1971_v52 = vadd.f32 1.0, %v9403_v15 }
 0x8ad   :  { %v9405_v45 = vpop.eup %9404 }
 0x8ae   :  { %9406 = vrcp.f32 %v1971_v52  ;;  %v1978_v61 = vadd.f32 1.0, %v9405_v45  ;;  %v14353_v52 = vld [vmem:[#allocation42_spill] sm:$0xff] }
 0x8bb   :  { %v9407_v10 = vpop.eup %9406 }
 0x8bc   :  { %v1982_v43 = vmul.f32 %v9407_v10, %v1981_v32  ;;  %v14355_v10 = vld [vmem:[#allocation60_spill] sm:$0xff]  ;;  %v14356_v32 = vld [vmem:[#allocation41_spill] sm:$0xff] }
 0x8be   :  { %v1983_v23 = vadd.f32 %v1982_v43, %v14350_v40  ;;  %v14354_v40 = vld [vmem:[#allocation43_spill] sm:$0xff]  ;;  %v2129_v43 = vpop.f32.mrf.mxu0 }
 0x8c0   :  { %9408 = vtanh.f32 %v1983_v23  ;;  %v2131_v45 = vpop.f32.mrf.mxu0  ;;  %v11616_v23 = vpop.f32.mrf.mxu1 }
 0x8c1   :  { %9410 = vrcp.f32 %v1978_v61  ;;  %14363 = vst [vmem:[#allocation66_spill] sm:$0xff] %v11616_v23 }
 0x8c2   :  { %v11604_v46 = vpop.f32.mrf.mxu0 }
 0x8c3   :  { %14357 = vst [vmem:[#allocation61_spill] sm:$0xff] %v11604_v46 }
 0x8c4   :  { %v11606_v49 = vpop.f32.mrf.mxu0 }
 0x8c5   :  { %14358 = vst [vmem:[#allocation48_spill] sm:$0xff] %v11606_v49 }
 0x8c6   :  { %v11608_v21 = vpop.f32.mrf.mxu0 }
 0x8c7   :  { %14359 = vst [vmem:[#allocation63_spill] sm:$0xff] %v11608_v21 }
 0x8c8   :  { %v11610_v50 = vpop.f32.mrf.mxu0 }
 0x8c9   :  { %14360 = vst [vmem:[#allocation64_spill] sm:$0xff] %v11610_v50 }
 0x8ca   :  { %v11612_v51 = vpop.f32.mrf.mxu0 }
 0x8cb   :  { %14361 = vst [vmem:[#allocation51_spill] sm:$0xff] %v11612_v51 }
 0x8cc   :  { %v11614_v15 = vpop.f32.mrf.mxu0 }
 0x8cd   :  { %v9409_v47 = vpop.eup %9408  ;;  %14362 = vst [vmem:[#allocation65_spill] sm:$0xff] %v11614_v15  ;;  %v2038_v15 = vld [vmem:[#allocation15] sm:$0x7] }
 0x8ce   :  { %v1985_v26 = vsub.f32 %v11338_v56, %v9409_v47  ;;  %v9411_v63 = vpop.eup %9410  ;;  %v14352_v56 = vld [vmem:[#allocation45_spill] sm:$0xff]  ;;  %v11618_v61 = vpop.f32.mrf.mxu0 }
 0x8cf   :  { %14364 = vst [vmem:[#allocation50_spill] sm:$0xff] %v11618_v61  ;;  %v14374_v61 = vld [vmem:[#allocation54_spill] sm:$0xff] }
 0x8d0   :  { %v1986_v48 = vmul.f32 %v9411_v63, %v1985_v26  ;;  %v11620_v26 = vpop.f32.mrf.mxu0  ;;  %v11639_v46 = vrot.slane %v2038_v15, %v14374_v61 }
 0x8d1   :  { %14365 = vst [vmem:[#allocation47_spill] sm:$0xff] %v11620_v26 }
 0x8d2   :  { %v1987_v60 = vadd.f32 %v9409_v47, %v1986_v48  ;;  %v2242_v47 = vpop.f32.mrf.mxu1  ;;  %v11624_v48 = vpop.f32.mrf.mxu0  ;;  %14375 = vst [vmem:[#allocation55_spill] sm:$0xff] %v11639_v46 }
 0x8d3   :  { %14367 = vst [vmem:[#allocation40_spill] sm:$0xff] %v11624_v48 }
 0x8d4   :  { %2170 = vmatmul.mubr.f32.gmra.mxu0 %v1987_v60  ;;  %8336 = vmatmul.mubr.f32.gmra.mxu1 %v1987_v60  ;;  %v11622_v63 = vpop.f32.mrf.mxu1  ;;  %v11628_v21 = vpop.f32.mrf.mxu0 }
 0x8d5   :  { %2427 = vmatprep.mubr.f32.mxu0 %v14290_v1  ;;  %8370 = vmatprep.mubr.msk.f32.mxu1 %vm10226_vm2, %v14290_v1  ;;  %14366 = vst [vmem:[#allocation58_spill] sm:$0xff] %v11622_v63  ;;  %14369 = vst [vmem:[#allocation49_spill] sm:$0xff] %v11628_v21 }
 0x8d6   :  { %v11626_v60 = vpop.f32.mrf.mxu1  ;;  %v11632_v51 = vpop.f32.mrf.mxu0 }
 0x8d7   :  { %14368 = vst [vmem:[#allocation57_spill] sm:$0xff] %v11626_v60  ;;  %14371 = vst [vmem:[#allocation68_spill] sm:$0xff] %v11632_v51 }
 0x8d8   :  { %2428 = vmatmul.mubr.f32.vlgmr.msra.gmra.mxu0 %v14290_v1  ;;  %8371 = vmatmul.mubr.f32.vlgmr.msra.gmra.mxu1 %v14290_v1  ;;  %v11630_v50 = vpop.f32.mrf.mxu1  ;;  %v11636_v23 = vpop.f32.mrf.mxu0 }
 0x8d9   :  { %2530 = vmatpush1.msra.mxu0 %v11368_v3  ;;  %8374 = vmatpush3.msra.mxu1 %v11458_v34  ;;  %14370 = vst [vmem:[#allocation67_spill] sm:$0xff] %v11630_v50  ;;  %14373 = vst [vmem:[#allocation70_spill] sm:$0xff] %v11636_v23  ;;  %v2130_v50 = vadd.f32 %v2129_v43, %v11639_v46  ;;  %v14380_v23 = vld [vmem:[#allocation59_spill] sm:$0xff] }
 0x8da   :  { %2531 = vmatprep.subr.mxu0 %v11371_v53  ;;  %8375 = vmatprep.subr.mxu1 %v14290_v1  ;;  %v11634_v49 = vpop.f32.mrf.mxu1 }
 0x8db   :  { %2532 = vmatpush1.msra.mxu0 %v11374_v4  ;;  %8376 = vmatpush3.msra.mxu1 %v11464_v35  ;;  %14372 = vst [vmem:[#allocation53_spill] sm:$0xff] %v11634_v49 }
 0x8dc   :  { %2533 = vmatprep.subr.mxu0 %v11377_v42  ;;  %8377 = vmatprep.subr.mxu1 %v14290_v1 }
 0x8dd   :  { %2534 = vmatpush1.msra.mxu0 %v11380_v5  ;;  %8378 = vmatpush3.msra.mxu1 %v11466_v36 }
 0x8de   :  { %2535 = vmatprep.subr.mxu0 %v11383_v54  ;;  %8379 = vmatprep.subr.mxu1 %v14290_v1 }
 0x8df   :  { %2536 = vmatpush1.msra.mxu0 %v11386_v7  ;;  %8380 = vmatpush3.msra.mxu1 %v11471_v37 }
 0x8e0   :  { %2537 = vmatprep.subr.mxu0 %v11389_v55  ;;  %8381 = vmatprep.subr.mxu1 %v14290_v1 }
 0x8e1   :  { %2538 = vmatpush1.msra.mxu0 %v11392_v8  ;;  %8382 = vmatpush3.msra.mxu1 %v11476_v38 }
 0x8e2   :  { %2539 = vmatprep.subr.mxu0 %v11395_v12  ;;  %8383 = vmatprep.subr.mxu1 %v14290_v1 }
 0x8e3   :  { %2540 = vmatpush1.msra.mxu0 %v11398_v41  ;;  %8384 = vmatpush3.msra.mxu1 %v11480_v62 }
 0x8e4   :  { %2541 = vmatprep.subr.mxu0 %v11401_v57  ;;  %8385 = vmatprep.subr.mxu1 %v14290_v1 }
 0x8e5   :  { %2542 = vmatpush1.msra.mxu0 %v11404_v6  ;;  %8386 = vmatpush3.msra.mxu1 %v11484_v13 }
 0x8e6   :  { %2543 = vmatprep.subr.mxu0 %v11407_v14  ;;  %8387 = vmatprep.subr.mxu1 %v14290_v1 }
 0x8e7   :  { %2544 = vmatpush1.msra.mxu0 %v11410_v16  ;;  %8388 = vmatpush3.msra.mxu1 %v11488_v2 }
 0x8e8   :  { %2545 = vmatprep.subr.mxu0 %v11413_v17  ;;  %8389 = vmatprep.subr.mxu1 %v14290_v1 }
 0x8e9   :  { %2546 = vmatpush1.msra.mxu0 %v11416_v19  ;;  %8390 = vmatpush3.msra.mxu1 %v11492_v58 }
 0x8ea   :  { %2547 = vmatprep.subr.mxu0 %v11419_v22  ;;  %8391 = vmatprep.subr.mxu1 %v14290_v1 }
 0x8eb   :  { %2548 = vmatpush1.msra.mxu0 %v11422_v24  ;;  %8392 = vmatpush3.msra.mxu1 %v11496_v11 }
 0x8ec   :  { %2549 = vmatprep.subr.mxu0 %v11425_v25  ;;  %8393 = vmatprep.subr.mxu1 %v14290_v1 }
 0x8ed   :  { %2550 = vmatpush1.msra.mxu0 %v11428_v27  ;;  %8394 = vmatpush3.msra.mxu1 %v11500_v18 }
 0x8ee   :  { %2551 = vmatprep.subr.mxu0 %v11431_v9  ;;  %8395 = vmatprep.subr.mxu1 %v14290_v1 }
 0x8ef   :  { %2552 = vmatpush1.msra.mxu0 %v11434_v28  ;;  %8396 = vmatpush3.msra.mxu1 %v11504_v59 }
 0x8f0   :  { %2553 = vmatprep.subr.mxu0 %v11437_v29  ;;  %8397 = vmatprep.subr.mxu1 %v14290_v1 }
 0x8f1   :  { %2554 = vmatpush1.msra.mxu0 %v11440_v30  ;;  %8398 = vmatpush3.msra.mxu1 %v11508_v0 }
 0x8f2   :  { %2555 = vmatprep.subr.mxu0 %v11443_v31  ;;  %8399 = vmatprep.subr.mxu1 %v14290_v1 }
 0x8f3   :  { %2556 = vmatpush1.msra.mxu0 %v11446_v33  ;;  %8400 = vmatpush3.msra.mxu1 %v11512_v44 }
 0x8f4   :  { %2557 = vmatprep.subr.mxu0 %v11449_v39  ;;  %8401 = vmatprep.subr.mxu1 %v14290_v1 }
 0x8f5   :  { %2558 = vmatpush1.msra.mxu0 %v14351_v20  ;;  %8402 = vmatpush3.msra.mxu1 %v14352_v56 }
 0x8f6   :  { %2559 = vmatprep.subr.mxu0 %v14353_v52  ;;  %8403 = vmatprep.subr.mxu1 %v14290_v1 }
 0x8f7   :  { %2560 = vmatpush1.msra.mxu0 %v14354_v40  ;;  %2593 = vmatprep.mubr.f32.mxu0 %v14290_v1  ;;  %v11651_v40 = vrot.slane %v2038_v15, %v14380_v23 }
 0x8f8   :  { %8404 = vmatpush3.msra.mxu1 %v14355_v10  ;;  %8405 = vmatprep.mubr.msk.f32.mxu1 %vm10226_vm2, %v14290_v1 }
 0x8f9   :  { %2696 = vmatprep.subr.mxu0 %v14356_v32  ;;  %8408 = vmatprep.subr.mxu1 %v14290_v1 }
 0x994   :  { %v11641_v26 = vpop.f32.mrf.mxu0  ;;  %v11643_v63 = vpop.f32.mrf.mxu1 }
 0x995   :  { %14376 = vst [vmem:[#allocation62_spill] sm:$0xff] %v11641_v26  ;;  %14377 = vst [vmem:[#allocation56_spill] sm:$0xff] %v11643_v63  ;;  %v2132_v26 = vadd.f32 %v2131_v45, %v11651_v40 }
 0x996   :  { %v11645_v48 = vpop.f32.mrf.mxu0  ;;  %v11647_v60 = vpop.f32.mrf.mxu1 }
 0x997   :  { %14378 = vst [vmem:[#allocation69_spill] sm:$0xff] %v11645_v48  ;;  %14379 = vst [vmem:[#allocation71_spill] sm:$0xff] %v11647_v60  ;;  %v11654_v60 = vld [vmem:[#allocation16] ss:$0 sm:$0xff] }
 0x998   :  { %v2429_v21 = vpop.f32.mrf.mxu0  ;;  %v2500_v51 = vpop.f32.mrf.mxu1 }
 0x999   :  { %v2504_v32 = vadd.f32 %v2429_v21, %v2130_v50  ;;  %v2518_v43 = vadd.f32 %v11654_v60, %v2500_v51  ;;  %v14384_v51 = vld [vmem:[#allocation42_spill] sm:$0xff] }
 0x99a   :  { %v8372_v10 = vpop.f32.mrf.mxu1  ;;  %v2431_v61 = vpop.f32.mrf.mxu0 }
 0x99b   :  { %v7300_v49 = vmul.f32 -1.442695, %v2504_v32  ;;  %v2511_v52 = vadd.f32 %v2431_v61, %v2132_v26  ;;  %v14381_v10 = vld [vmem:[#allocation46_spill] sm:$0xff] }
 0x99c   :  { %v11658_v32 = vrot.slane %v2038_v15, %v14381_v10  ;;  %v14385_v15 = vld [vmem:[#allocation43_spill] sm:$0xff] }
 0x99d   :  { %9412 = vpow2.f32 %v7300_v49  ;;  %v7301_v63 = vmul.f32 -1.442695, %v2511_v52 }
 0x99e   :  { %v2243_v50 = vadd.f32 %v2242_v47, %v11658_v32  ;;  %v14387_v47 = vld [vmem:[#allocation41_spill] sm:$0xff] }
 0x99f   :  { %9414 = vpow2.f32 %v7301_v63 }
 0x9aa   :  { %v9413_v56 = vpop.eup %9412 }
 0x9ab   :  { %v2508_v48 = vadd.f32 1.0, %v9413_v56 }
 0x9ac   :  { %v9415_v21 = vpop.eup %9414 }
 0x9ad   :  { %9416 = vrcp.f32 %v2508_v48  ;;  %v2515_v46 = vadd.f32 1.0, %v9415_v21  ;;  %v14388_v48 = vld [vmem:[#allocation55_spill] sm:$0xff] }
 0x9ba   :  { %v9417_v49 = vpop.eup %9416 }
 0x9bb   :  { %v2519_v23 = vmul.f32 %v9417_v49, %v2518_v43  ;;  %v14389_v43 = vld [vmem:[#allocation61_spill] sm:$0xff] }
 0x9bc   :  { %v2136_v21 = vadd.f32 %v14389_v43, %v14388_v48  ;;  %v14391_v48 = vld [vmem:[#allocation66_spill] sm:$0xff] }
 0x9bd   :  { %v2520_v45 = vadd.f32 %v2519_v23, %v2243_v50  ;;  %v14386_v23 = vld [vmem:[#allocation60_spill] sm:$0xff] }
 0x9bf   :  { %9418 = vtanh.f32 %v2520_v45 }
 0x9c0   :  { %9420 = vrcp.f32 %v2515_v46  ;;  %v14383_v46 = vld [vmem:[#allocation45_spill] sm:$0xff] }
 0x9cc   :  { %v9419_v52 = vpop.eup %9418 }
 0x9cd   :  { %v2522_v56 = vsub.f32 0.0, %v9419_v52  ;;  %v9421_v61 = vpop.eup %9420 }
 0x9cf   :  { %v2523_v26 = vmul.f32 %v9421_v61, %v2522_v56 }
 0x9d1   :  { %v11661_v63 = vadd.f32 %v9419_v52, %v2523_v26  ;;  %v14390_v26 = vld [vmem:[#allocation48_spill] sm:$0xff] }
 0x9d2   :  { %v2138_v10 = vadd.f32 %v14390_v26, %v11651_v40  ;;  %v14399_v26 = vld [vmem:[#allocation55_spill] sm:$0xff] }
 0x9d3   :  { %14382 = vst [vmem:[#allocation52_spill] sm:$0xff] %v11661_v63  ;;  %2594 = vmatmul.mubr.f32.vlgmr.msra.gmra.mxu0 %v11661_v63  ;;  %8406 = vmatmul.mubr.f32.vlgmr.msra.gmra.mxu1 %v11661_v63 }
 0x9d4   :  { %2697 = vmatpush1.msra.mxu0 %v11368_v3  ;;  %8409 = vmatpush3.msra.mxu1 %v11458_v34 }
 0x9d5   :  { %2698 = vmatprep.subr.mxu0 %v11371_v53  ;;  %8410 = vmatprep.subr.mxu1 %v14290_v1 }
 0x9d6   :  { %2699 = vmatpush1.msra.mxu0 %v11374_v4  ;;  %8411 = vmatpush3.msra.mxu1 %v11464_v35 }
 0x9d7   :  { %2700 = vmatprep.subr.mxu0 %v11377_v42  ;;  %8412 = vmatprep.subr.mxu1 %v14290_v1 }
 0x9d8   :  { %2701 = vmatpush1.msra.mxu0 %v11380_v5  ;;  %8413 = vmatpush3.msra.mxu1 %v11466_v36 }
 0x9d9   :  { %2702 = vmatprep.subr.mxu0 %v11383_v54  ;;  %8414 = vmatprep.subr.mxu1 %v14290_v1 }
 0x9da   :  { %2703 = vmatpush1.msra.mxu0 %v11386_v7  ;;  %8415 = vmatpush3.msra.mxu1 %v11471_v37 }
 0x9db   :  { %2704 = vmatprep.subr.mxu0 %v11389_v55  ;;  %8416 = vmatprep.subr.mxu1 %v14290_v1 }
 0x9dc   :  { %2705 = vmatpush1.msra.mxu0 %v11392_v8  ;;  %8417 = vmatpush3.msra.mxu1 %v11476_v38 }
 0x9dd   :  { %2706 = vmatprep.subr.mxu0 %v11395_v12  ;;  %8418 = vmatprep.subr.mxu1 %v14290_v1 }
 0x9de   :  { %2707 = vmatpush1.msra.mxu0 %v11398_v41  ;;  %8419 = vmatpush3.msra.mxu1 %v11480_v62 }
 0x9df   :  { %2708 = vmatprep.subr.mxu0 %v11401_v57  ;;  %8420 = vmatprep.subr.mxu1 %v14290_v1 }
 0x9e0   :  { %2709 = vmatpush1.msra.mxu0 %v11404_v6  ;;  %8421 = vmatpush3.msra.mxu1 %v11484_v13 }
 0x9e1   :  { %2710 = vmatprep.subr.mxu0 %v11407_v14  ;;  %8422 = vmatprep.subr.mxu1 %v14290_v1 }
 0x9e2   :  { %2711 = vmatpush1.msra.mxu0 %v11410_v16  ;;  %8423 = vmatpush3.msra.mxu1 %v11488_v2 }
 0x9e3   :  { %2712 = vmatprep.subr.mxu0 %v11413_v17  ;;  %8424 = vmatprep.subr.mxu1 %v14290_v1 }
 0x9e4   :  { %2713 = vmatpush1.msra.mxu0 %v11416_v19  ;;  %8425 = vmatpush3.msra.mxu1 %v11492_v58 }
 0x9e5   :  { %2714 = vmatprep.subr.mxu0 %v11419_v22  ;;  %8426 = vmatprep.subr.mxu1 %v14290_v1 }
 0x9e6   :  { %2715 = vmatpush1.msra.mxu0 %v11422_v24  ;;  %8427 = vmatpush3.msra.mxu1 %v11496_v11 }
 0x9e7   :  { %2716 = vmatprep.subr.mxu0 %v11425_v25  ;;  %8428 = vmatprep.subr.mxu1 %v14290_v1 }
 0x9e8   :  { %2717 = vmatpush1.msra.mxu0 %v11428_v27  ;;  %8429 = vmatpush3.msra.mxu1 %v11500_v18 }
 0x9e9   :  { %2718 = vmatprep.subr.mxu0 %v11431_v9  ;;  %8430 = vmatprep.subr.mxu1 %v14290_v1 }
 0x9ea   :  { %2719 = vmatpush1.msra.mxu0 %v11434_v28  ;;  %8431 = vmatpush3.msra.mxu1 %v11504_v59 }
 0x9eb   :  { %2720 = vmatprep.subr.mxu0 %v11437_v29  ;;  %8432 = vmatprep.subr.mxu1 %v14290_v1 }
 0x9ec   :  { %2721 = vmatpush1.msra.mxu0 %v11440_v30  ;;  %8433 = vmatpush3.msra.mxu1 %v11508_v0 }
 0x9ed   :  { %2722 = vmatprep.subr.mxu0 %v11443_v31  ;;  %8434 = vmatprep.subr.mxu1 %v14290_v1 }
 0x9ee   :  { %2723 = vmatpush1.msra.mxu0 %v11446_v33  ;;  %8435 = vmatpush3.msra.mxu1 %v11512_v44 }
 0x9ef   :  { %2724 = vmatprep.subr.mxu0 %v11449_v39  ;;  %8436 = vmatprep.subr.mxu1 %v14290_v1 }
 0x9f0   :  { %2725 = vmatpush1.msra.mxu0 %v14351_v20  ;;  %8437 = vmatpush3.msra.mxu1 %v14383_v46 }
 0x9f1   :  { %2726 = vmatprep.subr.mxu0 %v14384_v51  ;;  %8438 = vmatprep.subr.mxu1 %v14290_v1 }
 0x9f2   :  { %2727 = vmatpush1.msra.mxu0 %v14385_v15  ;;  %2760 = vmatprep.mubr.f32.mxu0 %v14290_v1 }
 0x9f3   :  { %8439 = vmatpush3.msra.mxu1 %v14386_v23  ;;  %8440 = vmatprep.mubr.msk.f32.mxu1 %vm10226_vm2, %v14290_v1 }
 0x9f4   :  { %2863 = vmatprep.subr.mxu0 %v14387_v47  ;;  %8443 = vmatprep.subr.mxu1 %v14290_v1 }
 0xa93   :  { %v2595_v49 = vpop.f32.mrf.mxu0  ;;  %v2666_v50 = vpop.f32.mrf.mxu1 }
 0xa94   :  { %v2670_v45 = vadd.f32 %v2595_v49, %v2136_v21  ;;  %v2684_v20 = vadd.f32 %v11654_v60, %v2666_v50  ;;  %v2248_v21 = vadd.f32 %v14391_v48, %v11658_v32  ;;  %v14397_v48 = vld [vmem:[#allocation60_spill] sm:$0xff]  ;;  %v14398_v50 = vld [vmem:[#allocation41_spill] sm:$0xff] }
 0xa95   :  { %v8407_v52 = vpop.f32.mrf.mxu1  ;;  %v2597_v61 = vpop.f32.mrf.mxu0 }
 0xa96   :  { %v7302_v56 = vmul.f32 -1.442695, %v2670_v45  ;;  %v2677_v23 = vadd.f32 %v2597_v61, %v2138_v10 }
 0xa98   :  { %9422 = vpow2.f32 %v7302_v56  ;;  %v7303_v15 = vmul.f32 -1.442695, %v2677_v23 }
 0xa9a   :  { %9424 = vpow2.f32 %v7303_v15  ;;  %v14395_v15 = vld [vmem:[#allocation42_spill] sm:$0xff] }
 0xaa5   :  { %v9423_v51 = vpop.eup %9422 }
 0xaa6   :  { %v2674_v46 = vadd.f32 1.0, %v9423_v51 }
 0xaa7   :  { %v9425_v47 = vpop.eup %9424 }
 0xaa8   :  { %9426 = vrcp.f32 %v2674_v46  ;;  %v2681_v52 = vadd.f32 1.0, %v9425_v47  ;;  %v14394_v46 = vld [vmem:[#allocation45_spill] sm:$0xff]  ;;  %v14396_v47 = vld [vmem:[#allocation43_spill] sm:$0xff] }
 0xab5   :  { %v9427_v43 = vpop.eup %9426 }
 0xab6   :  { %v2685_v49 = vmul.f32 %v9427_v43, %v2684_v20  ;;  %v14393_v20 = vld [vmem:[#allocation44_spill] sm:$0xff]  ;;  %v14400_v43 = vld [vmem:[#allocation63_spill] sm:$0xff] }
 0xab8   :  { %v2686_v45 = vadd.f32 %v2685_v49, %v2248_v21  ;;  %v2142_v21 = vadd.f32 %v14400_v43, %v14399_v26  ;;  %v14402_v26 = vld [vmem:[#allocation57_spill] sm:$0xff] }
 0xaba   :  { %9428 = vtanh.f32 %v2686_v45 }
 0xabb   :  { %9430 = vrcp.f32 %v2681_v52 }
 0xac7   :  { %v9429_v56 = vpop.eup %9428 }
 0xac8   :  { %v2688_v10 = vsub.f32 %v11661_v63, %v9429_v56  ;;  %v9431_v23 = vpop.eup %9430 }
 0xaca   :  { %v2689_v61 = vmul.f32 %v9431_v23, %v2688_v10 }
 0xacc   :  { %v11740_v51 = vadd.f32 %v9429_v56, %v2689_v61  ;;  %v14401_v61 = vld [vmem:[#allocation64_spill] sm:$0xff] }
 0xacd   :  { %v2144_v63 = vadd.f32 %v14401_v61, %v11651_v40  ;;  %v11912_v61 = vld [vmem:[#allocation13 + $0x150] sm:$0xff] }
 0xace   :  { %14392 = vst [vmem:[#allocation61_spill] sm:$0xff] %v11740_v51  ;;  %2761 = vmatmul.mubr.f32.vlgmr.msra.gmra.mxu0 %v11740_v51  ;;  %8441 = vmatmul.mubr.f32.vlgmr.msra.gmra.mxu1 %v11740_v51 }
 0xacf   :  { %2864 = vmatpush1.msra.mxu0 %v11368_v3  ;;  %8444 = vmatpush3.msra.mxu1 %v11458_v34 }
 0xad0   :  { %2865 = vmatprep.subr.mxu0 %v11371_v53  ;;  %8445 = vmatprep.subr.mxu1 %v14290_v1 }
 0xad1   :  { %2866 = vmatpush1.msra.mxu0 %v11374_v4  ;;  %8446 = vmatpush3.msra.mxu1 %v11464_v35 }
 0xad2   :  { %2867 = vmatprep.subr.mxu0 %v11377_v42  ;;  %8447 = vmatprep.subr.mxu1 %v14290_v1 }
 0xad3   :  { %2868 = vmatpush1.msra.mxu0 %v11380_v5  ;;  %8448 = vmatpush3.msra.mxu1 %v11466_v36 }
 0xad4   :  { %2869 = vmatprep.subr.mxu0 %v11383_v54  ;;  %8449 = vmatprep.subr.mxu1 %v14290_v1 }
 0xad5   :  { %2870 = vmatpush1.msra.mxu0 %v11386_v7  ;;  %8450 = vmatpush3.msra.mxu1 %v11471_v37 }
 0xad6   :  { %2871 = vmatprep.subr.mxu0 %v11389_v55  ;;  %8451 = vmatprep.subr.mxu1 %v14290_v1 }
 0xad7   :  { %2872 = vmatpush1.msra.mxu0 %v11392_v8  ;;  %8452 = vmatpush3.msra.mxu1 %v11476_v38 }
 0xad8   :  { %2873 = vmatprep.subr.mxu0 %v11395_v12  ;;  %8453 = vmatprep.subr.mxu1 %v14290_v1 }
 0xad9   :  { %2874 = vmatpush1.msra.mxu0 %v11398_v41  ;;  %8454 = vmatpush3.msra.mxu1 %v11480_v62 }
 0xada   :  { %2875 = vmatprep.subr.mxu0 %v11401_v57  ;;  %8455 = vmatprep.subr.mxu1 %v14290_v1 }
 0xadb   :  { %2876 = vmatpush1.msra.mxu0 %v11404_v6  ;;  %8456 = vmatpush3.msra.mxu1 %v11484_v13 }
 0xadc   :  { %2877 = vmatprep.subr.mxu0 %v11407_v14  ;;  %8457 = vmatprep.subr.mxu1 %v14290_v1 }
 0xadd   :  { %2878 = vmatpush1.msra.mxu0 %v11410_v16  ;;  %8458 = vmatpush3.msra.mxu1 %v11488_v2 }
 0xade   :  { %2879 = vmatprep.subr.mxu0 %v11413_v17  ;;  %8459 = vmatprep.subr.mxu1 %v14290_v1 }
 0xadf   :  { %2880 = vmatpush1.msra.mxu0 %v11416_v19  ;;  %8460 = vmatpush3.msra.mxu1 %v11492_v58 }
 0xae0   :  { %2881 = vmatprep.subr.mxu0 %v11419_v22  ;;  %8461 = vmatprep.subr.mxu1 %v14290_v1 }
 0xae1   :  { %2882 = vmatpush1.msra.mxu0 %v11422_v24  ;;  %8462 = vmatpush3.msra.mxu1 %v11496_v11 }
 0xae2   :  { %2883 = vmatprep.subr.mxu0 %v11425_v25  ;;  %8463 = vmatprep.subr.mxu1 %v14290_v1 }
 0xae3   :  { %2884 = vmatpush1.msra.mxu0 %v11428_v27  ;;  %8464 = vmatpush3.msra.mxu1 %v11500_v18 }
 0xae4   :  { %2885 = vmatprep.subr.mxu0 %v11431_v9  ;;  %8465 = vmatprep.subr.mxu1 %v14290_v1 }
 0xae5   :  { %2886 = vmatpush1.msra.mxu0 %v11434_v28  ;;  %8466 = vmatpush3.msra.mxu1 %v11504_v59 }
 0xae6   :  { %2887 = vmatprep.subr.mxu0 %v11437_v29  ;;  %8467 = vmatprep.subr.mxu1 %v14290_v1 }
 0xae7   :  { %2888 = vmatpush1.msra.mxu0 %v11440_v30  ;;  %8468 = vmatpush3.msra.mxu1 %v11508_v0 }
 0xae8   :  { %2889 = vmatprep.subr.mxu0 %v11443_v31  ;;  %8469 = vmatprep.subr.mxu1 %v14290_v1 }
 0xae9   :  { %2890 = vmatpush1.msra.mxu0 %v11446_v33  ;;  %8470 = vmatpush3.msra.mxu1 %v11512_v44 }
 0xaea   :  { %2891 = vmatprep.subr.mxu0 %v11449_v39  ;;  %8471 = vmatprep.subr.mxu1 %v14290_v1 }
 0xaeb   :  { %2892 = vmatpush1.msra.mxu0 %v14393_v20  ;;  %8472 = vmatpush3.msra.mxu1 %v14394_v46 }
 0xaec   :  { %2893 = vmatprep.subr.mxu0 %v14395_v15  ;;  %8473 = vmatprep.subr.mxu1 %v14290_v1 }
 0xaed   :  { %2894 = vmatpush1.msra.mxu0 %v14396_v47  ;;  %2927 = vmatprep.mubr.f32.mxu0 %v14290_v1 }
 0xaee   :  { %8474 = vmatpush3.msra.mxu1 %v14397_v48  ;;  %8475 = vmatprep.mubr.msk.f32.mxu1 %vm10226_vm2, %v14290_v1 }
 0xaef   :  { %3030 = vmatprep.subr.mxu0 %v14398_v50  ;;  %8478 = vmatprep.subr.mxu1 %v14290_v1 }
 0xb8e   :  { %v2762_v49 = vpop.f32.mrf.mxu0  ;;  %v2833_v45 = vpop.f32.mrf.mxu1 }
 0xb8f   :  { %v2837_v52 = vadd.f32 %v2762_v49, %v2142_v21  ;;  %v2851_v20 = vadd.f32 %v11654_v60, %v2833_v45  ;;  %v2253_v21 = vadd.f32 %v14402_v26, %v11658_v32  ;;  %v11904_v26 = vld [vmem:[#allocation13 + $0x168] sm:$0xff]  ;;  %v11908_v45 = vld [vmem:[#allocation13 + $0x158] sm:$0xff] }
 0xb90   :  { %v8442_v56 = vpop.f32.mrf.mxu1  ;;  %v2764_v23 = vpop.f32.mrf.mxu0 }
 0xb91   :  { %v7304_v10 = vmul.f32 -1.442695, %v2837_v52  ;;  %v2844_v48 = vadd.f32 %v2764_v23, %v2144_v63 }
 0xb93   :  { %9432 = vpow2.f32 %v7304_v10  ;;  %v7305_v47 = vmul.f32 -1.442695, %v2844_v48 }
 0xb95   :  { %9434 = vpow2.f32 %v7305_v47 }
 0xba0   :  { %v9433_v15 = vpop.eup %9432 }
 0xba1   :  { %v2841_v46 = vadd.f32 1.0, %v9433_v15 }
 0xba2   :  { %v9435_v50 = vpop.eup %9434 }
 0xba3   :  { %9436 = vrcp.f32 %v2841_v46  ;;  %v2848_v56 = vadd.f32 1.0, %v9435_v50  ;;  %v11916_v50 = vld [vmem:[#allocation13 + $0x140] sm:$0xff] }
 0xbb0   :  { %v9437_v43 = vpop.eup %9436 }
 0xbb1   :  { %v2852_v49 = vmul.f32 %v9437_v43, %v2851_v20  ;;  %v11920_v43 = vld [vmem:[#allocation13 + $0x138] sm:$0xff] }
 0xbb3   :  { %v2853_v52 = vadd.f32 %v2852_v49, %v2253_v21  ;;  %v11928_v21 = vld [vmem:[#allocation13 + $0x120] sm:$0xff]  ;;  %v11936_v49 = vld [vmem:[#allocation13 + $0x108] sm:$0xff] }
 0xbb5   :  { %9438 = vtanh.f32 %v2853_v52  ;;  %v11944_v52 = vld [vmem:[#allocation13 + $0xf0] sm:$0xff] }
 0xbb6   :  { %9440 = vrcp.f32 %v2848_v56  ;;  %v11952_v56 = vld [vmem:[#allocation13 + $0xd8] sm:$0xff] }
 0xbc2   :  { %v9439_v10 = vpop.eup %9438 }
 0xbc3   :  { %v2855_v63 = vsub.f32 %v11740_v51, %v9439_v10  ;;  %v9441_v48 = vpop.eup %9440 }
 0xbc5   :  { %v2856_v23 = vmul.f32 %v9441_v48, %v2855_v63  ;;  %v11968_v63 = vld [vmem:[#allocation13 + $0xa8] sm:$0xff]  ;;  %v11976_v48 = vld [vmem:[#allocation13 + $0x90] sm:$0xff] }
 0xbc7   :  { %v11819_v15 = vadd.f32 %v9439_v10, %v2856_v23  ;;  %v11960_v10 = vld [vmem:[#allocation13 + $0xc0] sm:$0xff]  ;;  %v11984_v23 = vld [vmem:[#allocation13 + $0x78] sm:$0xff] }
 0xbc9   :  { %14403 = vst [vmem:[#allocation48_spill] sm:$0xff] %v11819_v15  ;;  %2928 = vmatmul.mubr.f32.vlgmr.msra.gmra.mxu0 %v11819_v15  ;;  %8476 = vmatmul.mubr.f32.vlgmr.msra.gmra.mxu1 %v11819_v15 }
 0xbca   :  { %3031 = vmatpush1.msra.mxu0 %v11368_v3  ;;  %8479 = vmatpush3.msra.mxu1 %v11458_v34  ;;  %v14404_v3 = vld [vmem:[#allocation44_spill] sm:$0xff] }
 0xbcb   :  { %3032 = vmatprep.subr.mxu0 %v11371_v53  ;;  %8480 = vmatprep.subr.mxu1 %v14290_v1  ;;  %v14405_v53 = vld [vmem:[#allocation45_spill] sm:$0xff] }
 0xbcc   :  { %3033 = vmatpush1.msra.mxu0 %v11374_v4  ;;  %8481 = vmatpush3.msra.mxu1 %v11464_v35  ;;  %v14406_v4 = vld [vmem:[#allocation42_spill] sm:$0xff] }
 0xbcd   :  { %3034 = vmatprep.subr.mxu0 %v11377_v42  ;;  %8482 = vmatprep.subr.mxu1 %v14290_v1  ;;  %v14407_v42 = vld [vmem:[#allocation43_spill] sm:$0xff] }
 0xbce   :  { %3035 = vmatpush1.msra.mxu0 %v11380_v5  ;;  %8483 = vmatpush3.msra.mxu1 %v11466_v36  ;;  %v14408_v5 = vld [vmem:[#allocation60_spill] sm:$0xff] }
 0xbcf   :  { %3036 = vmatprep.subr.mxu0 %v11383_v54  ;;  %8484 = vmatprep.subr.mxu1 %v14290_v1  ;;  %v11888_v54 = vld [vmem:[#allocation13 + $0x170] sm:$0xff] }
 0xbd0   :  { %3037 = vmatpush1.msra.mxu0 %v11386_v7  ;;  %8485 = vmatpush3.msra.mxu1 %v11471_v37  ;;  %v14409_v7 = vld [vmem:[#allocation55_spill] sm:$0xff] }
 0xbd1   :  { %3038 = vmatprep.subr.mxu0 %v11389_v55  ;;  %8486 = vmatprep.subr.mxu1 %v14290_v1  ;;  %v14410_v55 = vld [vmem:[#allocation51_spill] sm:$0xff] }
 0xbd2   :  { %3039 = vmatpush1.msra.mxu0 %v11392_v8  ;;  %8487 = vmatpush3.msra.mxu1 %v11476_v38  ;;  %v2148_v8 = vadd.f32 %v14410_v55, %v14409_v7  ;;  %v12015_v55 = vld [vmem:[#allocation13 + $0x40] sm:$0xff] }
 0xbd3   :  { %3040 = vmatprep.subr.mxu0 %v11395_v12  ;;  %8488 = vmatprep.subr.mxu1 %v14290_v1 }
 0xbd4   :  { %3041 = vmatpush1.msra.mxu0 %v11398_v41  ;;  %8489 = vmatpush3.msra.mxu1 %v11480_v62 }
 0xbd5   :  { %3042 = vmatprep.subr.mxu0 %v11401_v57  ;;  %8490 = vmatprep.subr.mxu1 %v14290_v1 }
 0xbd6   :  { %3043 = vmatpush1.msra.mxu0 %v11404_v6  ;;  %8491 = vmatpush3.msra.mxu1 %v11484_v13 }
 0xbd7   :  { %3044 = vmatprep.subr.mxu0 %v11407_v14  ;;  %8492 = vmatprep.subr.mxu1 %v14290_v1 }
 0xbd8   :  { %3045 = vmatpush1.msra.mxu0 %v11410_v16  ;;  %8493 = vmatpush3.msra.mxu1 %v11488_v2 }
 0xbd9   :  { %3046 = vmatprep.subr.mxu0 %v11413_v17  ;;  %8494 = vmatprep.subr.mxu1 %v14290_v1  ;;  %v14411_v17 = vld [vmem:[#allocation65_spill] sm:$0xff] }
 0xbda   :  { %3047 = vmatpush1.msra.mxu0 %v11416_v19  ;;  %8495 = vmatpush3.msra.mxu1 %v11492_v58  ;;  %v2150_v19 = vadd.f32 %v14411_v17, %v11651_v40 }
 0xbdb   :  { %3048 = vmatprep.subr.mxu0 %v11419_v22  ;;  %8496 = vmatprep.subr.mxu1 %v14290_v1 }
 0xbdc   :  { %3049 = vmatpush1.msra.mxu0 %v11422_v24  ;;  %8497 = vmatpush3.msra.mxu1 %v11496_v11 }
 0xbdd   :  { %3050 = vmatprep.subr.mxu0 %v11425_v25  ;;  %8498 = vmatprep.subr.mxu1 %v14290_v1 }
 0xbde   :  { %3051 = vmatpush1.msra.mxu0 %v11428_v27  ;;  %8499 = vmatpush3.msra.mxu1 %v11500_v18 }
 0xbdf   :  { %3052 = vmatprep.subr.mxu0 %v11431_v9  ;;  %8500 = vmatprep.subr.mxu1 %v14290_v1 }
 0xbe0   :  { %3053 = vmatpush1.msra.mxu0 %v11434_v28  ;;  %8501 = vmatpush3.msra.mxu1 %v11504_v59 }
 0xbe1   :  { %3054 = vmatprep.subr.mxu0 %v11437_v29  ;;  %8502 = vmatprep.subr.mxu1 %v14290_v1 }
 0xbe2   :  { %3055 = vmatpush1.msra.mxu0 %v11440_v30  ;;  %8503 = vmatpush3.msra.mxu1 %v11508_v0  ;;  %v14412_v30 = vld [vmem:[#allocation58_spill] sm:$0xff] }
 0xbe3   :  { %3056 = vmatprep.subr.mxu0 %v11443_v31  ;;  %8504 = vmatprep.subr.mxu1 %v14290_v1  ;;  %v2258_v31 = vadd.f32 %v14412_v30, %v11658_v32 }
 0xbe4   :  { %3057 = vmatpush1.msra.mxu0 %v11446_v33  ;;  %8505 = vmatpush3.msra.mxu1 %v11512_v44 }
 0xbe5   :  { %3058 = vmatprep.subr.mxu0 %v11449_v39  ;;  %8506 = vmatprep.subr.mxu1 %v14290_v1 }
 0xbe6   :  { %3059 = vmatpush1.msra.mxu0 %v14404_v3  ;;  %8507 = vmatpush3.msra.mxu1 %v14405_v53  ;;  %v11992_v3 = vld [vmem:[#allocation13 + $0x60] sm:$0xff]  ;;  %v11998_v53 = vld [vmem:[#allocation13 + $0x50] sm:$0xff] }
 0xbe7   :  { %3060 = vmatprep.subr.mxu0 %v14406_v4  ;;  %8508 = vmatprep.subr.mxu1 %v14290_v1  ;;  %v12005_v4 = vld [vmem:[#allocation13 + $0x58] sm:$0xff] }
 0xbe8   :  { %3061 = vmatpush1.msra.mxu0 %v14407_v42  ;;  %3094 = vmatprep.mubr.f32.mxu0 %v14290_v1  ;;  %v12008_v42 = vld [vmem:[#allocation13 + $0x38] sm:$0xff] }
 0xbe9   :  { %8509 = vmatpush3.msra.mxu1 %v14408_v5  ;;  %8510 = vmatprep.mubr.msk.f32.mxu1 %vm10226_vm2, %v14290_v1  ;;  %v12012_v5 = vld [vmem:[#allocation13 + $0x30] sm:$0xff] }
 0xbea   :  { %3197 = vmatprep.subr.mxu0 %v11888_v54  ;;  %8513 = vmatprep.subr.mxu1 %v14290_v1 }
 0xc89   :  { %v2929_v12 = vpop.f32.mrf.mxu0  ;;  %v3000_v41 = vpop.f32.mrf.mxu1 }
 0xc8a   :  { %v3004_v57 = vadd.f32 %v2929_v12, %v2148_v8  ;;  %v3018_v28 = vadd.f32 %v11654_v60, %v3000_v41  ;;  %v12018_v8 = vld [vmem:[#allocation13 + $0x20] sm:$0xff]  ;;  %v12022_v12 = vld [vmem:[#allocation13 + $0x18] sm:$0xff]  ;;  %v12025_v41 = vld [vmem:[#allocation13 + $0x28] sm:$0xff] }
 0xc8b   :  { %v8477_v6 = vpop.f32.mrf.mxu1  ;;  %v2931_v16 = vpop.f32.mrf.mxu0  ;;  %14414 = vst [vmem:[#allocation41_spill] sm:$0xff] %v12022_v12  ;;  %14415 = vst [vmem:[#allocation63_spill] sm:$0xff] %v12025_v41 }
 0xc8c   :  { %v7306_v14 = vmul.f32 -1.442695, %v3004_v57  ;;  %v3011_v22 = vadd.f32 %v2931_v16, %v2150_v19  ;;  %v12028_v57 = vld [vmem:[#allocation13 + $0x8] sm:$0xff]  ;;  %v12032_v6 = vld [vmem:[#allocation13] sm:$0xff] }
 0xc8d   :  { %14416 = vst [vmem:[#allocation64_spill] sm:$0xff] %v12028_v57  ;;  %14417 = vst [vmem:[#allocation57_spill] sm:$0xff] %v12032_v6  ;;  %v14419_v16 = vld [vmem:[#allocation50_spill] sm:$0xff] }
 0xc8e   :  { %9442 = vpow2.f32 %v7306_v14  ;;  %v7307_v24 = vmul.f32 -1.442695, %v3011_v22  ;;  %v12036_v14 = vld [vmem:[#allocation13 + $0x10] sm:$0xff]  ;;  %v2154_v17 = vadd.f32 %v14419_v16, %v14409_v7 }
 0xc8f   :  { %14418 = vst [vmem:[#allocation44_spill] sm:$0xff] %v12036_v14 }
 0xc90   :  { %9444 = vpow2.f32 %v7307_v24 }
 0xc9b   :  { %v9443_v25 = vpop.eup %9442 }
 0xc9c   :  { %v3008_v27 = vadd.f32 1.0, %v9443_v25 }
 0xc9d   :  { %v9445_v9 = vpop.eup %9444 }
 0xc9e   :  { %9446 = vrcp.f32 %v3008_v27  ;;  %v3015_v59 = vadd.f32 1.0, %v9445_v9 }
 0xcab   :  { %v9447_v29 = vpop.eup %9446 }
 0xcac   :  { %v3019_v33 = vmul.f32 %v9447_v29, %v3018_v28  ;;  %v14420_v28 = vld [vmem:[#allocation47_spill] sm:$0xff] }
 0xcad   :  { %v2156_v29 = vadd.f32 %v14420_v28, %v11651_v40 }
 0xcae   :  { %v3020_v39 = vadd.f32 %v3019_v33, %v2258_v31 }
 0xcb0   :  { %9448 = vtanh.f32 %v3020_v39 }
 0xcb1   :  { %9450 = vrcp.f32 %v3015_v59 }
 0xcbd   :  { %v9449_v0 = vpop.eup %9448 }
 0xcbe   :  { %v3022_v44 = vsub.f32 %v11819_v15, %v9449_v0  ;;  %v9451_v20 = vpop.eup %9450  ;;  %v14423_v15 = vld [vmem:[#allocation49_spill] sm:$0xff] }
 0xcbf   :  { %v2162_v51 = vadd.f32 %v14423_v15, %v11651_v40 }
 0xcc0   :  { %v3023_v46 = vmul.f32 %v9451_v20, %v3022_v44  ;;  %v14421_v20 = vld [vmem:[#allocation53_spill] sm:$0xff] }
 0xcc2   :  { %v11900_v47 = vadd.f32 %v9449_v0, %v3023_v46  ;;  %v2263_v46 = vadd.f32 %v14421_v20, %v11658_v32  ;;  %v12110_v20 = vld [vmem:[#allocation13 + $0xa0] sm:$0xff] }
 0xcc4   :  { %14413 = vst [vmem:[#allocation66_spill] sm:$0xff] %v11900_v47  ;;  %3095 = vmatmul.mubr.f32.vlgmr.msra.gmra.mxu0 %v11900_v47  ;;  %8511 = vmatmul.mubr.f32.vlgmr.msra.gmra.mxu1 %v11900_v47 }
 0xcc5   :  { %3198 = vmatpush1.msra.mxu0 %v11904_v26  ;;  %8514 = vmatpush3.msra.mxu1 %v11458_v34  ;;  %v11924_v34 = vld [vmem:[#allocation13 + $0x128] sm:$0xff] }
 0xcc6   :  { %3199 = vmatprep.subr.mxu0 %v11908_v45  ;;  %8515 = vmatprep.subr.mxu1 %v14290_v1 }
 0xcc7   :  { %3200 = vmatpush1.msra.mxu0 %v11912_v61  ;;  %8516 = vmatpush3.msra.mxu1 %v11464_v35  ;;  %v11932_v35 = vld [vmem:[#allocation13 + $0x110] sm:$0xff] }
 0xcc8   :  { %3201 = vmatprep.subr.mxu0 %v11916_v50  ;;  %8517 = vmatprep.subr.mxu1 %v14290_v1 }
 0xcc9   :  { %3202 = vmatpush1.msra.mxu0 %v11920_v43  ;;  %8518 = vmatpush3.msra.mxu1 %v11466_v36  ;;  %v11940_v36 = vld [vmem:[#allocation13 + $0xf8] sm:$0xff] }
 0xcca   :  { %3203 = vmatprep.subr.mxu0 %v11924_v34  ;;  %8519 = vmatprep.subr.mxu1 %v14290_v1 }
 0xccb   :  { %3204 = vmatpush1.msra.mxu0 %v11928_v21  ;;  %8520 = vmatpush3.msra.mxu1 %v11471_v37  ;;  %v11948_v37 = vld [vmem:[#allocation13 + $0xe0] sm:$0xff] }
 0xccc   :  { %3205 = vmatprep.subr.mxu0 %v11932_v35  ;;  %8521 = vmatprep.subr.mxu1 %v14290_v1 }
 0xccd   :  { %3206 = vmatpush1.msra.mxu0 %v11936_v49  ;;  %8522 = vmatpush3.msra.mxu1 %v11476_v38  ;;  %v11956_v38 = vld [vmem:[#allocation13 + $0xc8] sm:$0xff] }
 0xcce   :  { %3207 = vmatprep.subr.mxu0 %v11940_v36  ;;  %8523 = vmatprep.subr.mxu1 %v14290_v1 }
 0xccf   :  { %3208 = vmatpush1.msra.mxu0 %v11944_v52  ;;  %8524 = vmatpush3.msra.mxu1 %v11480_v62  ;;  %v11964_v62 = vld [vmem:[#allocation13 + $0xb0] sm:$0xff] }
 0xcd0   :  { %3209 = vmatprep.subr.mxu0 %v11948_v37  ;;  %8525 = vmatprep.subr.mxu1 %v14290_v1 }
 0xcd1   :  { %3210 = vmatpush1.msra.mxu0 %v11952_v56  ;;  %8526 = vmatpush3.msra.mxu1 %v11484_v13  ;;  %v11972_v13 = vld [vmem:[#allocation13 + $0x98] sm:$0xff] }
 0xcd2   :  { %3211 = vmatprep.subr.mxu0 %v11956_v38  ;;  %8527 = vmatprep.subr.mxu1 %v14290_v1 }
 0xcd3   :  { %3212 = vmatpush1.msra.mxu0 %v11960_v10  ;;  %8528 = vmatpush3.msra.mxu1 %v11488_v2  ;;  %v11980_v2 = vld [vmem:[#allocation13 + $0x80] sm:$0xff] }
 0xcd4   :  { %3213 = vmatprep.subr.mxu0 %v11964_v62  ;;  %8529 = vmatprep.subr.mxu1 %v14290_v1 }
 0xcd5   :  { %3214 = vmatpush1.msra.mxu0 %v11968_v63  ;;  %8530 = vmatpush3.msra.mxu1 %v11492_v58  ;;  %v11988_v58 = vld [vmem:[#allocation13 + $0x68] sm:$0xff] }
 0xcd6   :  { %3215 = vmatprep.subr.mxu0 %v11972_v13  ;;  %8531 = vmatprep.subr.mxu1 %v14290_v1 }
 0xcd7   :  { %3216 = vmatpush1.msra.mxu0 %v11976_v48  ;;  %8532 = vmatpush3.msra.mxu1 %v11496_v11  ;;  %v11995_v11 = vld [vmem:[#allocation13 + $0x70] sm:$0xff] }
 0xcd8   :  { %3217 = vmatprep.subr.mxu0 %v11980_v2  ;;  %8533 = vmatprep.subr.mxu1 %v14290_v1 }
 0xcd9   :  { %3218 = vmatpush1.msra.mxu0 %v11984_v23  ;;  %8534 = vmatpush3.msra.mxu1 %v11500_v18  ;;  %v12002_v18 = vld [vmem:[#allocation13 + $0x48] sm:$0xff] }
 0xcda   :  { %3219 = vmatprep.subr.mxu0 %v11988_v58  ;;  %8535 = vmatprep.subr.mxu1 %v14290_v1 }
 0xcdb   :  { %3220 = vmatpush1.msra.mxu0 %v11992_v3  ;;  %8536 = vmatpush3.msra.mxu1 %v11995_v11 }
 0xcdc   :  { %3221 = vmatprep.subr.mxu0 %v11998_v53  ;;  %8537 = vmatprep.subr.mxu1 %v14290_v1 }
 0xcdd   :  { %3222 = vmatpush1.msra.mxu0 %v12002_v18  ;;  %8538 = vmatpush3.msra.mxu1 %v12005_v4 }
 0xcde   :  { %3223 = vmatprep.subr.mxu0 %v12008_v42  ;;  %8539 = vmatprep.subr.mxu1 %v14290_v1 }
 0xcdf   :  { %3224 = vmatpush1.msra.mxu0 %v12012_v5  ;;  %8540 = vmatpush3.msra.mxu1 %v12015_v55 }
 0xce0   :  { %3225 = vmatprep.subr.mxu0 %v12018_v8  ;;  %8541 = vmatprep.subr.mxu1 %v14290_v1 }
 0xce1   :  { %3226 = vmatpush1.msra.mxu0 %v12022_v12  ;;  %8542 = vmatpush3.msra.mxu1 %v12025_v41 }
 0xce2   :  { %3227 = vmatprep.subr.mxu0 %v12028_v57  ;;  %8543 = vmatprep.subr.mxu1 %v14290_v1 }
 0xce3   :  { %3228 = vmatpush1.msra.mxu0 %v12032_v6  ;;  %3261 = vmatprep.mubr.f32.mxu0 %v14290_v1 }
 0xce4   :  { %8544 = vmatpush3.msra.mxu1 %v12036_v14  ;;  %8545 = vmatprep.mubr.msk.f32.mxu1 %vm10226_vm2, %v14290_v1 }
 0xce5   :  { %3364 = vmatprep.subr.mxu0 %v11888_v54  ;;  %8548 = vmatprep.subr.mxu1 %v14290_v1 }
 0xd84   :  { %v3096_v19 = vpop.f32.mrf.mxu0  ;;  %v3167_v22 = vpop.f32.mrf.mxu1 }
 0xd85   :  { %v3171_v24 = vadd.f32 %v3096_v19, %v2154_v17  ;;  %v3185_v0 = vadd.f32 %v11654_v60, %v3167_v22  ;;  %v12056_v22 = vld [vmem:[#allocation13 + $0x178] sm:$0xff] }
 0xd86   :  { %v8512_v25 = vpop.f32.mrf.mxu1  ;;  %v3098_v9 = vpop.f32.mrf.mxu0 }
 0xd87   :  { %v7308_v27 = vmul.f32 -1.442695, %v3171_v24  ;;  %v3178_v30 = vadd.f32 %v3098_v9, %v2156_v29  ;;  %v12062_v29 = vld [vmem:[#allocation13 + $0x160] sm:$0xff] }
 0xd89   :  { %9452 = vpow2.f32 %v7308_v27  ;;  %v7309_v31 = vmul.f32 -1.442695, %v3178_v30  ;;  %v12068_v30 = vld [vmem:[#allocation13 + $0x148] sm:$0xff] }
 0xd8b   :  { %9454 = vpow2.f32 %v7309_v31  ;;  %v12074_v31 = vld [vmem:[#allocation13 + $0x130] sm:$0xff] }
 0xd96   :  { %v9453_v33 = vpop.eup %9452 }
 0xd97   :  { %v3175_v39 = vadd.f32 1.0, %v9453_v33  ;;  %v12080_v33 = vld [vmem:[#allocation13 + $0x118] sm:$0xff] }
 0xd98   :  { %v9455_v59 = vpop.eup %9454 }
 0xd99   :  { %9456 = vrcp.f32 %v3175_v39  ;;  %v3182_v19 = vadd.f32 1.0, %v9455_v59  ;;  %v12086_v39 = vld [vmem:[#allocation13 + $0x100] sm:$0xff]  ;;  %v12092_v59 = vld [vmem:[#allocation13 + $0xe8] sm:$0xff] }
 0xda6   :  { %v9457_v44 = vpop.eup %9456 }
 0xda7   :  { %v3186_v16 = vmul.f32 %v9457_v44, %v3185_v0  ;;  %v12098_v0 = vld [vmem:[#allocation13 + $0xd0] sm:$0xff]  ;;  %v12104_v44 = vld [vmem:[#allocation13 + $0xb8] sm:$0xff] }
 0xda9   :  { %v3187_v17 = vadd.f32 %v3186_v16, %v2263_v46  ;;  %v12116_v46 = vld [vmem:[#allocation13 + $0x88] sm:$0xff]  ;;  %v14422_v16 = vld [vmem:[#allocation40_spill] sm:$0xff] }
 0xdab   :  { %9458 = vtanh.f32 %v3187_v17  ;;  %v2160_v17 = vadd.f32 %v14422_v16, %v14409_v7  ;;  %v14424_v7 = vld [vmem:[#allocation67_spill] sm:$0xff] }
 0xdac   :  { %9460 = vrcp.f32 %v3182_v19 }
 0xdb8   :  { %v9459_v24 = vpop.eup %9458 }
 0xdb9   :  { %v3189_v25 = vsub.f32 %v11900_v47, %v9459_v24  ;;  %v9461_v27 = vpop.eup %9460 }
 0xdbb   :  { %v3190_v9 = vmul.f32 %v9461_v27, %v3189_v25 }
 0xdbd   :  { %v12051_v28 = vadd.f32 %v9459_v24, %v3190_v9 }
 0xdbf   :  { %3262 = vmatmul.mubr.f32.vlgmr.msra.gmra.mxu0 %v12051_v28  ;;  %8546 = vmatmul.mubr.f32.vlgmr.msra.gmra.mxu1 %v12051_v28 }
 0xdc0   :  { %3365 = vmatpush1.msra.mxu0 %v11904_v26  ;;  %8549 = vmatpush3.msra.mxu1 %v12056_v22 }
 0xdc1   :  { %3366 = vmatprep.subr.mxu0 %v11908_v45  ;;  %8550 = vmatprep.subr.mxu1 %v14290_v1 }
 0xdc2   :  { %3367 = vmatpush1.msra.mxu0 %v11912_v61  ;;  %8551 = vmatpush3.msra.mxu1 %v12062_v29 }
 0xdc3   :  { %3368 = vmatprep.subr.mxu0 %v11916_v50  ;;  %8552 = vmatprep.subr.mxu1 %v14290_v1 }
 0xdc4   :  { %3369 = vmatpush1.msra.mxu0 %v11920_v43  ;;  %8553 = vmatpush3.msra.mxu1 %v12068_v30 }
 0xdc5   :  { %3370 = vmatprep.subr.mxu0 %v11924_v34  ;;  %8554 = vmatprep.subr.mxu1 %v14290_v1 }
 0xdc6   :  { %3371 = vmatpush1.msra.mxu0 %v11928_v21  ;;  %8555 = vmatpush3.msra.mxu1 %v12074_v31 }
 0xdc7   :  { %3372 = vmatprep.subr.mxu0 %v11932_v35  ;;  %8556 = vmatprep.subr.mxu1 %v14290_v1 }
 0xdc8   :  { %3373 = vmatpush1.msra.mxu0 %v11936_v49  ;;  %8557 = vmatpush3.msra.mxu1 %v12080_v33 }
 0xdc9   :  { %3374 = vmatprep.subr.mxu0 %v11940_v36  ;;  %8558 = vmatprep.subr.mxu1 %v14290_v1 }
 0xdca   :  { %3375 = vmatpush1.msra.mxu0 %v11944_v52  ;;  %8559 = vmatpush3.msra.mxu1 %v12086_v39 }
 0xdcb   :  { %3376 = vmatprep.subr.mxu0 %v11948_v37  ;;  %8560 = vmatprep.subr.mxu1 %v14290_v1 }
 0xdcc   :  { %3377 = vmatpush1.msra.mxu0 %v11952_v56  ;;  %8561 = vmatpush3.msra.mxu1 %v12092_v59 }
 0xdcd   :  { %3378 = vmatprep.subr.mxu0 %v11956_v38  ;;  %8562 = vmatprep.subr.mxu1 %v14290_v1 }
 0xdce   :  { %3379 = vmatpush1.msra.mxu0 %v11960_v10  ;;  %8563 = vmatpush3.msra.mxu1 %v12098_v0 }
 0xdcf   :  { %3380 = vmatprep.subr.mxu0 %v11964_v62  ;;  %8564 = vmatprep.subr.mxu1 %v14290_v1 }
 0xdd0   :  { %3381 = vmatpush1.msra.mxu0 %v11968_v63  ;;  %8565 = vmatpush3.msra.mxu1 %v12104_v44 }
 0xdd1   :  { %3382 = vmatprep.subr.mxu0 %v11972_v13  ;;  %8566 = vmatprep.subr.mxu1 %v14290_v1 }
 0xdd2   :  { %3383 = vmatpush1.msra.mxu0 %v11976_v48  ;;  %8567 = vmatpush3.msra.mxu1 %v12110_v20 }
 0xdd3   :  { %3384 = vmatprep.subr.mxu0 %v11980_v2  ;;  %8568 = vmatprep.subr.mxu1 %v14290_v1 }
 0xdd4   :  { %3385 = vmatpush1.msra.mxu0 %v11984_v23  ;;  %8569 = vmatpush3.msra.mxu1 %v12116_v46 }
 0xdd5   :  { %3386 = vmatprep.subr.mxu0 %v11988_v58  ;;  %8570 = vmatprep.subr.mxu1 %v14290_v1 }
 0xdd6   :  { %3387 = vmatpush1.msra.mxu0 %v11992_v3  ;;  %8571 = vmatpush3.msra.mxu1 %v11995_v11 }
 0xdd7   :  { %3388 = vmatprep.subr.mxu0 %v11998_v53  ;;  %8572 = vmatprep.subr.mxu1 %v14290_v1 }
 0xdd8   :  { %3389 = vmatpush1.msra.mxu0 %v12002_v18  ;;  %8573 = vmatpush3.msra.mxu1 %v12005_v4 }
 0xdd9   :  { %3390 = vmatprep.subr.mxu0 %v12008_v42  ;;  %8574 = vmatprep.subr.mxu1 %v14290_v1 }
 0xdda   :  { %3391 = vmatpush1.msra.mxu0 %v12012_v5  ;;  %8575 = vmatpush3.msra.mxu1 %v12015_v55 }
 0xddb   :  { %3392 = vmatprep.subr.mxu0 %v12018_v8  ;;  %8576 = vmatprep.subr.mxu1 %v14290_v1 }
 0xddc   :  { %3393 = vmatpush1.msra.mxu0 %v12022_v12  ;;  %8577 = vmatpush3.msra.mxu1 %v12025_v41 }
 0xddd   :  { %3394 = vmatprep.subr.mxu0 %v12028_v57  ;;  %8578 = vmatprep.subr.mxu1 %v14290_v1 }
 0xdde   :  { %3395 = vmatpush1.msra.mxu0 %v12032_v6  ;;  %3428 = vmatprep.mubr.f32.mxu0 %v14290_v1 }
 0xddf   :  { %8579 = vmatpush3.msra.mxu1 %v12036_v14  ;;  %8580 = vmatprep.mubr.msk.f32.mxu1 %vm10226_vm2, %v14290_v1 }
 0xde0   :  { %3531 = vmatprep.subr.mxu0 %v11888_v54  ;;  %8583 = vmatprep.subr.mxu1 %v14290_v1 }
 0xe7f   :  { %v3263_v19 = vpop.f32.mrf.mxu0  ;;  %v3334_v24 = vpop.f32.mrf.mxu1 }
 0xe80   :  { %v3338_v25 = vadd.f32 %v3263_v19, %v2160_v17  ;;  %v3352_v12 = vadd.f32 %v11654_v60, %v3334_v24  ;;  %v2268_v17 = vadd.f32 %v14424_v7, %v11658_v32  ;;  %v14425_v60 = vld [vmem:[#allocation41_spill] sm:$0xff]  ;;  %v14426_v7 = vld [vmem:[#allocation63_spill] sm:$0xff] }
 0xe81   :  { %v8547_v27 = vpop.f32.mrf.mxu1  ;;  %v3265_v47 = vpop.f32.mrf.mxu0  ;;  %v3730_v24 = vld [vmem:[#allocation18 + $0x118] sm:$0xff] }
 0xe82   :  { %v7310_v9 = vmul.f32 -1.442695, %v3338_v25  ;;  %v3345_v14 = vadd.f32 %v3265_v47, %v2162_v51 }
 0xe84   :  { %9462 = vpow2.f32 %v7310_v9  ;;  %v7311_v6 = vmul.f32 -1.442695, %v3345_v14  ;;  %v3740_v14 = vld [vmem:[#allocation18 + $0x168] sm:$0xff] }
 0xe86   :  { %9464 = vpow2.f32 %v7311_v6 }
 0xe91   :  { %v9463_v57 = vpop.eup %9462 }
 0xe92   :  { %v3342_v41 = vadd.f32 1.0, %v9463_v57 }
 0xe93   :  { %v9465_v54 = vpop.eup %9464 }
 0xe94   :  { %9466 = vrcp.f32 %v3342_v41  ;;  %v3349_v27 = vadd.f32 1.0, %v9465_v54  ;;  %v3728_v54 = vld [vmem:[#allocation18 + $0x108] sm:$0xff] }
 0xea1   :  { %v9467_v16 = vpop.eup %9466 }
 0xea2   :  { %v3353_v19 = vmul.f32 %v9467_v16, %v3352_v12  ;;  %v3726_v16 = vld [vmem:[#allocation18 + $0xf8] sm:$0xff] }
 0xea4   :  { %v3354_v25 = vadd.f32 %v3353_v19, %v2268_v17  ;;  %v3727_v17 = vld [vmem:[#allocation18 + $0x100] sm:$0xff]  ;;  %v3725_v19 = vld [vmem:[#allocation18 + $0xf0] sm:$0xff] }
 0xea6   :  { %9468 = vtanh.f32 %v3354_v25  ;;  %v3723_v25 = vld [vmem:[#allocation18 + $0xe0] sm:$0xff] }
 0xea7   :  { %9470 = vrcp.f32 %v3349_v27  ;;  %v3724_v27 = vld [vmem:[#allocation18 + $0xe8] sm:$0xff] }
 0xeb3   :  { %v9469_v9 = vpop.eup %9468 }
 0xeb4   :  { %v3356_v51 = vsub.f32 %v12051_v28, %v9469_v9  ;;  %v9471_v15 = vpop.eup %9470 }
 0xeb6   :  { %v3357_v47 = vmul.f32 %v9471_v15, %v3356_v51  ;;  %v3720_v51 = vld [vmem:[#allocation18 + $0xc8] sm:$0xff]  ;;  %v3721_v15 = vld [vmem:[#allocation18 + $0xd0] sm:$0xff] }
 0xeb8   :  { %v12152_v57 = vadd.f32 %v9469_v9, %v3357_v47  ;;  %v3722_v9 = vld [vmem:[#allocation18 + $0xd8] sm:$0xff]  ;;  %v3719_v47 = vld [vmem:[#allocation18 + $0xc0] sm:$0xff] }
 0xeba   :  { %3429 = vmatmul.mubr.f32.vlgmr.msra.gmra.mxu0 %v12152_v57  ;;  %8581 = vmatmul.mubr.f32.vlgmr.msra.gmra.mxu1 %v12152_v57 }
 0xebb   :  { %3532 = vmatpush1.msra.mxu0 %v11904_v26  ;;  %8584 = vmatpush3.msra.mxu1 %v12056_v22  ;;  %v14427_v26 = vld [vmem:[#allocation64_spill] sm:$0xff]  ;;  %v3738_v22 = vld [vmem:[#allocation18 + $0x158] sm:$0xff] }
 0xebc   :  { %3533 = vmatprep.subr.mxu0 %v11908_v45  ;;  %8585 = vmatprep.subr.mxu1 %v14290_v1  ;;  %v14428_v45 = vld [vmem:[#allocation57_spill] sm:$0xff] }
 0xebd   :  { %3534 = vmatpush1.msra.mxu0 %v11912_v61  ;;  %8586 = vmatpush3.msra.mxu1 %v12062_v29  ;;  %v14429_v61 = vld [vmem:[#allocation44_spill] sm:$0xff]  ;;  %v3739_v29 = vld [vmem:[#allocation18 + $0x160] sm:$0xff] }
 0xebe   :  { %3535 = vmatprep.subr.mxu0 %v11916_v50  ;;  %8587 = vmatprep.subr.mxu1 %v14290_v1  ;;  %v3741_v50 = vld [vmem:[#allocation18 + $0x170] sm:$0xff] }
 0xebf   :  { %3536 = vmatpush1.msra.mxu0 %v11920_v43  ;;  %8588 = vmatpush3.msra.mxu1 %v12068_v30  ;;  %v3742_v43 = vld [vmem:[#allocation18 + $0x178] sm:$0xff]  ;;  %v3737_v30 = vld [vmem:[#allocation18 + $0x150] sm:$0xff] }
 0xec0   :  { %3537 = vmatprep.subr.mxu0 %v11924_v34  ;;  %8589 = vmatprep.subr.mxu1 %v14290_v1  ;;  %v14430_v34 = vld [vmem:[#allocation55_spill] sm:$0xff] }
 0xec1   :  { %3538 = vmatpush1.msra.mxu0 %v11928_v21  ;;  %8590 = vmatpush3.msra.mxu1 %v12074_v31  ;;  %v14431_v21 = vld [vmem:[#allocation68_spill] sm:$0xff]  ;;  %v3735_v31 = vld [vmem:[#allocation18 + $0x140] sm:$0xff] }
 0xec2   :  { %3539 = vmatprep.subr.mxu0 %v11932_v35  ;;  %8591 = vmatprep.subr.mxu1 %v14290_v1  ;;  %v2166_v35 = vadd.f32 %v14431_v21, %v14430_v34  ;;  %v3712_v21 = vld [vmem:[#allocation18 + $0x88] sm:$0xff] }
 0xec3   :  { %3540 = vmatpush1.msra.mxu0 %v11936_v49  ;;  %8592 = vmatpush3.msra.mxu1 %v12080_v33  ;;  %v3736_v33 = vld [vmem:[#allocation18 + $0x148] sm:$0xff] }
 0xec4   :  { %3541 = vmatprep.subr.mxu0 %v11940_v36  ;;  %8593 = vmatprep.subr.mxu1 %v14290_v1 }
 0xec5   :  { %3542 = vmatpush1.msra.mxu0 %v11944_v52  ;;  %8594 = vmatpush3.msra.mxu1 %v12086_v39  ;;  %v3734_v39 = vld [vmem:[#allocation18 + $0x138] sm:$0xff] }
 0xec6   :  { %3543 = vmatprep.subr.mxu0 %v11948_v37  ;;  %8595 = vmatprep.subr.mxu1 %v14290_v1 }
 0xec7   :  { %3544 = vmatpush1.msra.mxu0 %v11952_v56  ;;  %8596 = vmatpush3.msra.mxu1 %v12092_v59  ;;  %v14434_v59 = vld [vmem:[#allocation52_spill] sm:$0xff] }
 0xec8   :  { %3545 = vmatprep.subr.mxu0 %v11956_v38  ;;  %8597 = vmatprep.subr.mxu1 %v14290_v1 }
 0xec9   :  { %3546 = vmatpush1.msra.mxu0 %v11960_v10  ;;  %8598 = vmatpush3.msra.mxu1 %v12098_v0  ;;  %v14432_v10 = vld [vmem:[#allocation70_spill] sm:$0xff]  ;;  %v3732_v0 = vld [vmem:[#allocation18 + $0x128] sm:$0xff] }
 0xeca   :  { %3547 = vmatprep.subr.mxu0 %v11964_v62  ;;  %8599 = vmatprep.subr.mxu1 %v14290_v1  ;;  %v2168_v62 = vadd.f32 %v14432_v10, %v11651_v40  ;;  %v3702_v10 = vld [vmem:[#allocation18 + $0x38] sm:$0xff] }
 0xecb   :  { %3548 = vmatpush1.msra.mxu0 %v11968_v63  ;;  %8600 = vmatpush3.msra.mxu1 %v12104_v44  ;;  %v3733_v44 = vld [vmem:[#allocation18 + $0x130] sm:$0xff] }
 0xecc   :  { %3549 = vmatprep.subr.mxu0 %v11972_v13  ;;  %8601 = vmatprep.subr.mxu1 %v14290_v1 }
 0xecd   :  { %3550 = vmatpush1.msra.mxu0 %v11976_v48  ;;  %8602 = vmatpush3.msra.mxu1 %v12110_v20  ;;  %v3731_v20 = vld [vmem:[#allocation18 + $0x120] sm:$0xff] }
 0xece   :  { %3551 = vmatprep.subr.mxu0 %v11980_v2  ;;  %8603 = vmatprep.subr.mxu1 %v14290_v1 }
 0xecf   :  { %3552 = vmatpush1.msra.mxu0 %v11984_v23  ;;  %8604 = vmatpush3.msra.mxu1 %v12116_v46  ;;  %v3729_v46 = vld [vmem:[#allocation18 + $0x110] sm:$0xff] }
 0xed0   :  { %3553 = vmatprep.subr.mxu0 %v11988_v58  ;;  %8605 = vmatprep.subr.mxu1 %v14290_v1  ;;  %v12225_v58 = vld [vmem:[#allocation16] ss:$0 sm:$0xff] }
 0xed1   :  { %3554 = vmatpush1.msra.mxu0 %v11992_v3  ;;  %8606 = vmatpush3.msra.mxu1 %v11995_v11 }
 0xed2   :  { %3555 = vmatprep.subr.mxu0 %v11998_v53  ;;  %8607 = vmatprep.subr.mxu1 %v14290_v1  ;;  %v14433_v53 = vld [vmem:[#allocation71_spill] sm:$0xff] }
 0xed3   :  { %3556 = vmatpush1.msra.mxu0 %v12002_v18  ;;  %8608 = vmatpush3.msra.mxu1 %v12005_v4  ;;  %v2273_v18 = vadd.f32 %v14433_v53, %v11658_v32  ;;  %v14435_v53 = vld [vmem:[#allocation61_spill] sm:$0xff] }
 0xed4   :  { %3557 = vmatprep.subr.mxu0 %v12008_v42  ;;  %8609 = vmatprep.subr.mxu1 %v14290_v1 }
 0xed5   :  { %3558 = vmatpush1.msra.mxu0 %v12012_v5  ;;  %8610 = vmatpush3.msra.mxu1 %v12015_v55 }
 0xed6   :  { %3559 = vmatprep.subr.mxu0 %v12018_v8  ;;  %8611 = vmatprep.subr.mxu1 %v14290_v1 }
 0xed7   :  { %3560 = vmatpush1.msra.mxu0 %v14425_v60  ;;  %8612 = vmatpush3.msra.mxu1 %v14426_v7  ;;  %v3717_v60 = vld [vmem:[#allocation18 + $0xb0] sm:$0xff]  ;;  %v3718_v7 = vld [vmem:[#allocation18 + $0xb8] sm:$0xff] }
 0xed8   :  { %3561 = vmatprep.subr.mxu0 %v14427_v26  ;;  %8613 = vmatprep.subr.mxu1 %v14290_v1  ;;  %v3716_v26 = vld [vmem:[#allocation18 + $0xa8] sm:$0xff] }
 0xed9   :  { %3562 = vmatpush1.msra.mxu0 %v14428_v45  ;;  %8614 = vmatpush3.msra.mxu1 %v14429_v61  ;;  %v3714_v45 = vld [vmem:[#allocation18 + $0x98] sm:$0xff]  ;;  %v3715_v61 = vld [vmem:[#allocation18 + $0xa0] sm:$0xff] }
 0xeda   :  { %3595 = vmatprep.mubr.f32.mxu0 %v14290_v1  ;;  %8615 = vmatprep.mubr.msk.f32.mxu1 %vm10226_vm2, %v14290_v1 }
 0xedb   :  { %3768 = vmatprep.subr.mxu0 %v3741_v50  ;;  %8618 = vmatprep.subr.mxu1 %v3742_v43  ;;  %v3713_v50 = vld [vmem:[#allocation18 + $0x90] sm:$0xff] }
 0xf7a   :  { %v3430_v49 = vpop.f32.mrf.mxu0  ;;  %v3501_v36 = vpop.f32.mrf.mxu1 }
 0xf7b   :  { %v3505_v52 = vadd.f32 %v3430_v49, %v2166_v35  ;;  %v3519_v3 = vadd.f32 %v12225_v58, %v3501_v36  ;;  %v3710_v35 = vld [vmem:[#allocation18 + $0x78] sm:$0xff]  ;;  %v3708_v49 = vld [vmem:[#allocation18 + $0x68] sm:$0xff]  ;;  %v3709_v36 = vld [vmem:[#allocation18 + $0x70] sm:$0xff] }
 0xf7c   :  { %v8582_v37 = vpop.f32.mrf.mxu1  ;;  %v3432_v38 = vpop.f32.mrf.mxu0 }
 0xf7d   :  { %v7312_v56 = vmul.f32 -1.442695, %v3505_v52  ;;  %v3512_v63 = vadd.f32 %v3432_v38, %v2168_v62  ;;  %v3707_v52 = vld [vmem:[#allocation18 + $0x60] sm:$0xff]  ;;  %v3705_v37 = vld [vmem:[#allocation18 + $0x50] sm:$0xff]  ;;  %v3704_v38 = vld [vmem:[#allocation18 + $0x48] sm:$0xff] }
 0xf7e   :  { %v3703_v62 = vld [vmem:[#allocation18 + $0x40] sm:$0xff] }
 0xf7f   :  { %9472 = vpow2.f32 %v7312_v56  ;;  %v7313_v13 = vmul.f32 -1.442695, %v3512_v63  ;;  %v3706_v56 = vld [vmem:[#allocation18 + $0x58] sm:$0xff]  ;;  %v3701_v63 = vld [vmem:[#allocation18 + $0x30] sm:$0xff] }
 0xf81   :  { %9474 = vpow2.f32 %v7313_v13  ;;  %v3699_v13 = vld [vmem:[#allocation18 + $0x20] sm:$0xff] }
 0xf8c   :  { %v9473_v48 = vpop.eup %9472 }
 0xf8d   :  { %v3509_v2 = vadd.f32 1.0, %v9473_v48  ;;  %v3700_v48 = vld [vmem:[#allocation18 + $0x28] sm:$0xff] }
 0xf8e   :  { %v9475_v23 = vpop.eup %9474 }
 0xf8f   :  { %9476 = vrcp.f32 %v3509_v2  ;;  %v3516_v5 = vadd.f32 1.0, %v9475_v23  ;;  %v3698_v2 = vld [vmem:[#allocation18 + $0x18] sm:$0xff]  ;;  %v3696_v23 = vld [vmem:[#allocation18 + $0x8] sm:$0xff] }
 0xf9c   :  { %v9477_v11 = vpop.eup %9476 }
 0xf9d   :  { %v3520_v4 = vmul.f32 %v9477_v11, %v3519_v3  ;;  %v3697_v3 = vld [vmem:[#allocation18 + $0x10] sm:$0xff]  ;;  %v3695_v11 = vld [vmem:[#allocation18] sm:$0xff] }
 0xf9f   :  { %v3521_v42 = vadd.f32 %v3520_v4, %v2273_v18  ;;  %v14436_v18 = vld [vmem:[#allocation48_spill] sm:$0xff]  ;;  %v14437_v4 = vld [vmem:[#allocation66_spill] sm:$0xff] }
 0xfa1   :  { %9478 = vtanh.f32 %v3521_v42  ;;  %v12258_v42 = vld [vmem:[#allocation19 + $0x170] sm:$0xff] }
 0xfa2   :  { %9480 = vrcp.f32 %v3516_v5  ;;  %14438 = vst [vmem:[#allocation45_spill] sm:$0xff] %v12258_v42  ;;  %v12261_v5 = vld [vmem:[#allocation19 + $0x168] sm:$0xff] }
 0xfae   :  { %v9479_v55 = vpop.eup %9478 }
 0xfaf   :  { %v3523_v8 = vsub.f32 %v12152_v57, %v9479_v55  ;;  %v9481_v12 = vpop.eup %9480 }
 0xfb1   :  { %v3524_v41 = vmul.f32 %v9481_v12, %v3523_v8  ;;  %v12273_v8 = vld [vmem:[#allocation19 + $0x138] sm:$0xff]  ;;  %v12276_v12 = vld [vmem:[#allocation19 + $0x128] sm:$0xff] }
 0xfb3   :  { %v12231_v6 = vadd.f32 %v9479_v55, %v3524_v41  ;;  %v12264_v55 = vld [vmem:[#allocation19 + $0x158] sm:$0xff]  ;;  %v12279_v41 = vld [vmem:[#allocation19 + $0x120] sm:$0xff] }
 0xfb5   :  { %3596 = vmatmul.mubr.f32.vlgmr.msra.gmra.mxu0 %v12231_v6  ;;  %8616 = vmatmul.mubr.f32.vlgmr.msra.gmra.mxu1 %v12231_v6 }
 0xfb6   :  { %3769 = vmatpush1.msra.mxu0 %v3740_v14  ;;  %8619 = vmatpush3.msra.mxu1 %v3742_v43  ;;  %v3711_v43 = vld [vmem:[#allocation18 + $0x80] sm:$0xff]  ;;  %v12282_v14 = vld [vmem:[#allocation19 + $0x110] sm:$0xff] }
 0xfb7   :  { %3770 = vmatprep.subr.mxu0 %v3738_v22  ;;  %8620 = vmatprep.subr.mxu1 %v3739_v29  ;;  %v12285_v22 = vld [vmem:[#allocation19 + $0x108] sm:$0xff] }
 0xfb8   :  { %8650 = vmatprep.mubr.f32.mxu1 %v14434_v59  ;;  %3771 = vmatpush1.msra.mxu0 %v3737_v30  ;;  %v12291_v30 = vld [vmem:[#allocation19 + $0xf0] sm:$0xff] }
 0xfb9   :  { %8621 = vmatpush3.msra.mxu1 %v3739_v29  ;;  %3772 = vmatprep.subr.mxu0 %v3735_v31  ;;  %v12288_v29 = vld [vmem:[#allocation19 + $0xf8] sm:$0xff]  ;;  %v12294_v31 = vld [vmem:[#allocation19 + $0xe0] sm:$0xff] }
 0xfba   :  { %8622 = vmatprep.subr.mxu1 %v3736_v33  ;;  %3773 = vmatpush1.msra.mxu0 %v3734_v39  ;;  %v12300_v39 = vld [vmem:[#allocation19 + $0xc8] sm:$0xff] }
 0xfbb   :  { %8623 = vmatpush3.msra.mxu1 %v3736_v33  ;;  %3774 = vmatprep.subr.mxu0 %v3732_v0  ;;  %v12297_v33 = vld [vmem:[#allocation19 + $0xd8] sm:$0xff]  ;;  %v12306_v0 = vld [vmem:[#allocation19 + $0xb0] sm:$0xff] }
 0xfbc   :  { %8624 = vmatprep.subr.mxu1 %v3733_v44  ;;  %3775 = vmatpush1.msra.mxu0 %v3731_v20  ;;  %v12312_v20 = vld [vmem:[#allocation19 + $0x98] sm:$0xff] }
 0xfbd   :  { %8625 = vmatpush3.msra.mxu1 %v3733_v44  ;;  %3776 = vmatprep.subr.mxu0 %v3729_v46  ;;  %v12309_v44 = vld [vmem:[#allocation19 + $0xa8] sm:$0xff]  ;;  %v12315_v46 = vld [vmem:[#allocation19 + $0x90] sm:$0xff] }
 0xfbe   :  { %8626 = vmatprep.subr.mxu1 %v3730_v24  ;;  %3777 = vmatpush1.msra.mxu0 %v3728_v54  ;;  %v12321_v54 = vld [vmem:[#allocation19 + $0x78] sm:$0xff] }
 0xfbf   :  { %8627 = vmatpush3.msra.mxu1 %v3730_v24  ;;  %3778 = vmatprep.subr.mxu0 %v3726_v16  ;;  %v12318_v24 = vld [vmem:[#allocation19 + $0x80] sm:$0xff]  ;;  %v12324_v16 = vld [vmem:[#allocation19 + $0x68] sm:$0xff] }
 0xfc0   :  { %8628 = vmatprep.subr.mxu1 %v3727_v17  ;;  %3779 = vmatpush1.msra.mxu0 %v3725_v19  ;;  %v12330_v19 = vld [vmem:[#allocation19 + $0x50] sm:$0xff] }
 0xfc1   :  { %8629 = vmatpush3.msra.mxu1 %v3727_v17  ;;  %3780 = vmatprep.subr.mxu0 %v3723_v25  ;;  %v12327_v17 = vld [vmem:[#allocation19 + $0x60] sm:$0xff]  ;;  %v12333_v25 = vld [vmem:[#allocation19 + $0x48] sm:$0xff] }
 0xfc2   :  { %8630 = vmatprep.subr.mxu1 %v3724_v27  ;;  %3781 = vmatpush1.msra.mxu0 %v3722_v9  ;;  %v12339_v9 = vld [vmem:[#allocation19 + $0x30] sm:$0xff] }
 0xfc3   :  { %8631 = vmatpush3.msra.mxu1 %v3724_v27  ;;  %3782 = vmatprep.subr.mxu0 %v3720_v51  ;;  %v12336_v27 = vld [vmem:[#allocation19 + $0x38] sm:$0xff]  ;;  %v12342_v51 = vld [vmem:[#allocation19 + $0x20] sm:$0xff] }
 0xfc4   :  { %8632 = vmatprep.subr.mxu1 %v3721_v15  ;;  %3783 = vmatpush1.msra.mxu0 %v3719_v47  ;;  %v12346_v47 = vld [vmem:[#allocation19 + $0x8] sm:$0xff] }
 0xfc5   :  { %8633 = vmatpush3.msra.mxu1 %v3721_v15  ;;  %3784 = vmatprep.subr.mxu0 %v3717_v60  ;;  %v12344_v15 = vld [vmem:[#allocation19 + $0x18] sm:$0xff]  ;;  %14440 = vst [vmem:[#allocation43_spill] sm:$0xff] %v12346_v47  ;;  %v12349_v60 = vld [vmem:[#allocation19] sm:$0xff] }
 0xfc6   :  { %8634 = vmatprep.subr.mxu1 %v3718_v7  ;;  %3785 = vmatpush1.msra.mxu0 %v3716_v26  ;;  %14439 = vst [vmem:[#allocation42_spill] sm:$0xff] %v12344_v15  ;;  %14441 = vst [vmem:[#allocation60_spill] sm:$0xff] %v12349_v60  ;;  %v12357_v26 = vld [vmem:[#allocation19 + $0x160] sm:$0xff] }
 0xfc7   :  { %8635 = vmatpush3.msra.mxu1 %v3718_v7  ;;  %3786 = vmatprep.subr.mxu0 %v3714_v45  ;;  %v12351_v7 = vld [vmem:[#allocation19 + $0x178] sm:$0xff]  ;;  %v12359_v45 = vld [vmem:[#allocation19 + $0x148] sm:$0xff] }
 0xfc8   :  { %8636 = vmatprep.subr.mxu1 %v3715_v61  ;;  %3787 = vmatpush1.msra.mxu0 %v3713_v50  ;;  %v12369_v50 = vld [vmem:[#allocation19 + $0x118] sm:$0xff] }
 0xfc9   :  { %8637 = vmatpush3.msra.mxu1 %v3715_v61  ;;  %3788 = vmatprep.subr.mxu0 %v3711_v43  ;;  %v12364_v61 = vld [vmem:[#allocation19 + $0x130] sm:$0xff]  ;;  %v12373_v43 = vld [vmem:[#allocation19 + $0x100] sm:$0xff] }
 0xfca   :  { %8638 = vmatprep.subr.mxu1 %v3712_v21  ;;  %3789 = vmatpush1.msra.mxu0 %v3710_v35  ;;  %v12381_v35 = vld [vmem:[#allocation19 + $0xd0] sm:$0xff] }
 0xfcb   :  { %8639 = vmatpush3.msra.mxu1 %v3712_v21  ;;  %3790 = vmatprep.subr.mxu0 %v3708_v49  ;;  %v12377_v21 = vld [vmem:[#allocation19 + $0xe8] sm:$0xff]  ;;  %v12385_v49 = vld [vmem:[#allocation19 + $0xb8] sm:$0xff] }
 0xfcc   :  { %8640 = vmatprep.subr.mxu1 %v3709_v36  ;;  %3791 = vmatpush1.msra.mxu0 %v3707_v52  ;;  %v12393_v52 = vld [vmem:[#allocation19 + $0x88] sm:$0xff] }
 0xfcd   :  { %8641 = vmatpush3.msra.mxu1 %v3709_v36  ;;  %3792 = vmatprep.subr.mxu0 %v3705_v37  ;;  %v12389_v36 = vld [vmem:[#allocation19 + $0xa0] sm:$0xff]  ;;  %v12397_v37 = vld [vmem:[#allocation19 + $0x70] sm:$0xff] }
 0xfce   :  { %8642 = vmatprep.subr.mxu1 %v3706_v56  ;;  %3793 = vmatpush1.msra.mxu0 %v3704_v38  ;;  %v12405_v38 = vld [vmem:[#allocation19 + $0x40] sm:$0xff] }
 0xfcf   :  { %8643 = vmatpush3.msra.mxu1 %v3706_v56  ;;  %3794 = vmatprep.subr.mxu0 %v3702_v10  ;;  %v12401_v56 = vld [vmem:[#allocation19 + $0x58] sm:$0xff]  ;;  %v12409_v10 = vld [vmem:[#allocation19 + $0x28] sm:$0xff] }
 0xfd0   :  { %8644 = vmatprep.subr.mxu1 %v3703_v62  ;;  %3795 = vmatpush1.msra.mxu0 %v3701_v63  ;;  %14442 = vst [vmem:[#allocation51_spill] sm:$0xff] %v12409_v10  ;;  %v14444_v63 = vld [vmem:[#allocation62_spill] sm:$0xff] }
 0xfd1   :  { %8645 = vmatpush3.msra.mxu1 %v3703_v62  ;;  %3796 = vmatprep.subr.mxu0 %v3699_v13  ;;  %v12413_v62 = vld [vmem:[#allocation19 + $0x10] sm:$0xff]  ;;  %v2172_v13 = vadd.f32 %v14444_v63, %v14430_v34 }
 0xfd2   :  { %8646 = vmatprep.subr.mxu1 %v3700_v48  ;;  %3797 = vmatpush1.msra.mxu0 %v3698_v2  ;;  %14443 = vst [vmem:[#allocation65_spill] sm:$0xff] %v12413_v62  ;;  %v14446_v63 = vld [vmem:[#allocation56_spill] sm:$0xff] }
 0xfd3   :  { %8647 = vmatpush3.msra.mxu1 %v3700_v48  ;;  %3798 = vmatprep.subr.mxu0 %v3696_v23 }
 0xfd4   :  { %8648 = vmatprep.subr.mxu1 %v3697_v3  ;;  %3799 = vmatpush1.msra.mxu0 %v3695_v11 }
 0xfd5   :  { %3832 = vmatprep.mubr.f32.mxu0 %v14290_v1  ;;  %8649 = vmatpush3.msra.mxu1 %v3697_v3 }
 0xfd6   :  { %3833 = vmatmul.mubr.f32.vlgmr.msra.gmra.mxu0 %v14434_v59  ;;  %8651 = vmatmul.mubr.f32.vlgmr.msra.gmra.mxu1 %v14435_v53  ;;  %v12303_v59 = vld [vmem:[#allocation19 + $0xc0] sm:$0xff] }
 0xfd7   :  { %8653 = vmatprep.mubr.f32.mxu1 %v14436_v18  ;;  %3838 = vmatprep.mubr.f32.mxu0 %v14290_v1 }
 0xfd8   :  { %8662 = vmatprep.subr.mxu1 %v14290_v1  ;;  %4068 = vmatprep.subr.mxu0 %v12258_v42 }
 0xfd9   :  { %4069 = vmatpush1.msra.mxu0 %v12261_v5  ;;  %8663 = vmatpush3.msra.mxu1 %v12351_v7 }
 0xfda   :  { %3839 = vmatmul.mubr.f32.gmra.mxu0 %v14435_v53  ;;  %8654 = vmatmul.mubr.f32.gmra.mxu1 %v14437_v4 }
 0xfdb   :  { %8656 = vmatprep.mubr.f32.mxu1 %v12051_v28  ;;  %3844 = vmatprep.mubr.f32.mxu0 %v14290_v1 }
 0xfdc   :  { %4070 = vmatprep.subr.mxu0 %v12264_v55  ;;  %8664 = vmatprep.subr.mxu1 %v14290_v1 }
 0xfdd   :  { %8665 = vmatpush3.msra.mxu1 %v12357_v26 }
 0xfde   :  { %3845 = vmatmul.mubr.f32.gmra.mxu0 %v14436_v18  ;;  %8657 = vmatmul.mubr.f32.gmra.mxu1 %v12152_v57  ;;  %v14445_v18 = vld [vmem:[#allocation69_spill] sm:$0xff] }
 0xfdf   :  { %8659 = vmatprep.mubr.f32.mxu1 %v12231_v6  ;;  %3850 = vmatprep.mubr.f32.mxu0 %v14290_v1 }
 0xfe0   :  { %8666 = vmatprep.subr.mxu1 %v14290_v1 }
 0xfe1   :  { %8667 = vmatpush3.msra.mxu1 %v12359_v45 }
 0xfe2   :  { %3851 = vmatmul.mubr.f32.gmra.mxu0 %v14437_v4  ;;  %8668 = vmatprep.subr.mxu1 %v14290_v1  ;;  %v2174_v4 = vadd.f32 %v14445_v18, %v11651_v40 }
 0xfe3   :  { %3856 = vmatprep.mubr.f32.mxu0 %v14290_v1  ;;  %8669 = vmatpush3.msra.mxu1 %v12364_v61 }
 0xfe4   :  { %8670 = vmatprep.subr.mxu1 %v14290_v1 }
 0xfe5   :  { %8671 = vmatpush3.msra.mxu1 %v12369_v50 }
 0xfe6   :  { %3857 = vmatmul.mubr.f32.gmra.mxu0 %v12051_v28  ;;  %v12267_v28 = vld [vmem:[#allocation19 + $0x150] sm:$0xff]  ;;  %8672 = vmatprep.subr.mxu1 %v14290_v1 }
 0xfe7   :  { %3862 = vmatprep.mubr.f32.mxu0 %v14290_v1  ;;  %4071 = vmatpush1.msra.mxu0 %v12267_v28 }
 0xfe8   :  { %8673 = vmatpush3.msra.mxu1 %v12373_v43 }
 0xfe9   :  { %8674 = vmatprep.subr.mxu1 %v14290_v1 }
 0xfea   :  { %3863 = vmatmul.mubr.f32.gmra.mxu0 %v12152_v57  ;;  %v12270_v57 = vld [vmem:[#allocation19 + $0x140] sm:$0xff]  ;;  %8675 = vmatpush3.msra.mxu1 %v12377_v21 }
 0xfeb   :  { %3868 = vmatprep.mubr.f32.mxu0 %v14290_v1  ;;  %4072 = vmatprep.subr.mxu0 %v12270_v57 }
 0xfec   :  { %4073 = vmatpush1.msra.mxu0 %v12273_v8  ;;  %8676 = vmatprep.subr.mxu1 %v14290_v1 }
 0xfed   :  { %4074 = vmatprep.subr.mxu0 %v12276_v12  ;;  %8677 = vmatpush3.msra.mxu1 %v12381_v35 }
 0xfee   :  { %3869 = vmatmul.mubr.f32.gmra.mxu0 %v12231_v6  ;;  %8678 = vmatprep.subr.mxu1 %v14290_v1 }
 0xfef   :  { %3874 = vmatprep.mubr.f32.mxu0 %v14290_v1  ;;  %4075 = vmatpush1.msra.mxu0 %v12279_v41 }
 0xff0   :  { %4076 = vmatprep.subr.mxu0 %v12282_v14  ;;  %8679 = vmatpush3.msra.mxu1 %v12385_v49 }
 0xff1   :  { %4077 = vmatpush1.msra.mxu0 %v12285_v22  ;;  %8680 = vmatprep.subr.mxu1 %v14290_v1 }
 0xff2   :  { %4078 = vmatprep.subr.mxu0 %v12288_v29  ;;  %8681 = vmatpush3.msra.mxu1 %v12389_v36 }
 0xff3   :  { %4079 = vmatpush1.msra.mxu0 %v12291_v30  ;;  %8682 = vmatprep.subr.mxu1 %v14290_v1 }
 0xff4   :  { %4080 = vmatprep.subr.mxu0 %v12294_v31  ;;  %8683 = vmatpush3.msra.mxu1 %v12393_v52 }
 0xff5   :  { %4081 = vmatpush1.msra.mxu0 %v12297_v33  ;;  %8684 = vmatprep.subr.mxu1 %v14290_v1 }
 0xff6   :  { %4082 = vmatprep.subr.mxu0 %v12300_v39  ;;  %8685 = vmatpush3.msra.mxu1 %v12397_v37 }
 0xff7   :  { %4083 = vmatpush1.msra.mxu0 %v12303_v59  ;;  %8686 = vmatprep.subr.mxu1 %v14290_v1 }
 0xff8   :  { %4084 = vmatprep.subr.mxu0 %v12306_v0  ;;  %8687 = vmatpush3.msra.mxu1 %v12401_v56 }
 0xff9   :  { %4085 = vmatpush1.msra.mxu0 %v12309_v44  ;;  %8688 = vmatprep.subr.mxu1 %v14290_v1 }
 0xffa   :  { %4086 = vmatprep.subr.mxu0 %v12312_v20  ;;  %8689 = vmatpush3.msra.mxu1 %v12405_v38 }
 0xffb   :  { %4087 = vmatpush1.msra.mxu0 %v12315_v46  ;;  %8690 = vmatprep.subr.mxu1 %v14290_v1 }
 0xffc   :  { %4088 = vmatprep.subr.mxu0 %v12318_v24  ;;  %8691 = vmatpush3.msra.mxu1 %v12409_v10 }
 0xffd   :  { %4089 = vmatpush1.msra.mxu0 %v12321_v54  ;;  %8692 = vmatprep.subr.mxu1 %v14290_v1 }
 0xffe   :  { %4090 = vmatprep.subr.mxu0 %v12324_v16  ;;  %8693 = vmatpush3.msra.mxu1 %v12413_v62 }
 0xfff   :  { %4091 = vmatpush1.msra.mxu0 %v12327_v17  ;;  %8697 = vmatprep.subr.mxu1 %v14290_v1 }
0x1000   :  { %4092 = vmatprep.subr.mxu0 %v12330_v19 }
0x1001   :  { %4093 = vmatpush1.msra.mxu0 %v12333_v25 }
0x1002   :  { %4094 = vmatprep.subr.mxu0 %v12336_v27 }
0x1003   :  { %4095 = vmatpush1.msra.mxu0 %v12339_v9 }
0x1004   :  { %4096 = vmatprep.subr.mxu0 %v12342_v51 }
0x1005   :  { %4097 = vmatpush1.msra.mxu0 %v12344_v15 }
0x1006   :  { %4098 = vmatprep.subr.mxu0 %v12346_v47 }
0x1007   :  { %4099 = vmatpush1.msra.mxu0 %v12349_v60 }
0x1008   :  { %4234 = vmatprep.subr.mxu0 %v12258_v42 }
0x1075   :  { %v3597_v48 = vpop.f32.mrf.mxu0  ;;  %v3668_v2 = vpop.f32.mrf.mxu1 }
0x1076   :  { %v3672_v23 = vadd.f32 %v3597_v48, %v2172_v13  ;;  %v3686_v15 = vadd.f32 %v12225_v58, %v3668_v2  ;;  %v2278_v13 = vadd.f32 %v14446_v63, %v11658_v32  ;;  %v14447_v32 = vld [vmem:[#allocation42_spill] sm:$0xff]  ;;  %v14448_v58 = vld [vmem:[#allocation51_spill] sm:$0xff] }
0x1077   :  { %v8617_v3 = vpop.f32.mrf.mxu1  ;;  %v3599_v53 = vpop.f32.mrf.mxu0 }
0x1078   :  { %v7314_v11 = vmul.f32 -1.442695, %v3672_v23  ;;  %v3679_v42 = vadd.f32 %v3599_v53, %v2174_v4 }
0x107a   :  { %9482 = vpow2.f32 %v7314_v11  ;;  %v7315_v60 = vmul.f32 -1.442695, %v3679_v42 }
0x107c   :  { %9484 = vpow2.f32 %v7315_v60  ;;  %v14451_v60 = vld [vmem:[#allocation65_spill] sm:$0xff] }
0x1087   :  { %v9483_v47 = vpop.eup %9482 }
0x1088   :  { %v3676_v10 = vadd.f32 1.0, %v9483_v47 }
0x1089   :  { %v9485_v62 = vpop.eup %9484 }
0x108a   :  { %9486 = vrcp.f32 %v3676_v10  ;;  %v3683_v3 = vadd.f32 1.0, %v9485_v62  ;;  %v14452_v10 = vld [vmem:[#allocation45_spill] sm:$0xff] }
0x1096   :  { %v3834_v62 = vpop.f32.mrf.mxu0 }
0x1097   :  { %v9487_v34 = vpop.eup %9486 }
0x1098   :  { %v3687_v48 = vmul.f32 %v9487_v34, %v3686_v15  ;;  %v14450_v15 = vld [vmem:[#allocation60_spill] sm:$0xff]  ;;  %v3836_v2 = vpop.f32.mrf.mxu0 }
0x109a   :  { %v3688_v23 = vadd.f32 %v3687_v48, %v2278_v13  ;;  %v12499_v18 = vpop.f32.mrf.mxu0 }
0x109b   :  { %14453 = vst [vmem:[#allocation58_spill] sm:$0xff] %v12499_v18 }
0x109c   :  { %9488 = vtanh.f32 %v3688_v23  ;;  %v12501_v4 = vpop.f32.mrf.mxu0  ;;  %v12511_v23 = vpop.f32.mrf.mxu1 }
0x109d   :  { %9490 = vrcp.f32 %v3683_v3  ;;  %14454 = vst [vmem:[#allocation50_spill] sm:$0xff] %v12501_v4  ;;  %14459 = vst [vmem:[#allocation67_spill] sm:$0xff] %v12511_v23 }
0x109e   :  { %v12503_v34 = vpop.f32.mrf.mxu0 }
0x109f   :  { %14455 = vst [vmem:[#allocation47_spill] sm:$0xff] %v12503_v34 }
0x10a0   :  { %v12505_v63 = vpop.f32.mrf.mxu0 }
0x10a1   :  { %14456 = vst [vmem:[#allocation53_spill] sm:$0xff] %v12505_v63 }
0x10a2   :  { %v12507_v13 = vpop.f32.mrf.mxu0 }
0x10a3   :  { %14457 = vst [vmem:[#allocation40_spill] sm:$0xff] %v12507_v13 }
0x10a4   :  { %v12509_v48 = vpop.f32.mrf.mxu0 }
0x10a5   :  { %14458 = vst [vmem:[#allocation49_spill] sm:$0xff] %v12509_v48  ;;  %v3743_v48 = vld [vmem:[#allocation21] sm:$0x7] }
0x10a6   :  { %v12513_v3 = vpop.f32.mrf.mxu0 }
0x10a7   :  { %14460 = vst [vmem:[#allocation41_spill] sm:$0xff] %v12513_v3  ;;  %v14470_v3 = vld [vmem:[#allocation54_spill] sm:$0xff] }
0x10a8   :  { %v12534_v18 = vrot.slane %v3743_v48, %v14470_v3 }
0x10a9   :  { %v9489_v11 = vpop.eup %9488 }
0x10aa   :  { %v3690_v40 = vsub.f32 %v12231_v6, %v9489_v11  ;;  %v9491_v42 = vpop.eup %9490  ;;  %v14449_v6 = vld [vmem:[#allocation43_spill] sm:$0xff]  ;;  %14471 = vst [vmem:[#allocation61_spill] sm:$0xff] %v12534_v18 }
0x10ac   :  { %v3691_v53 = vmul.f32 %v9491_v42, %v3690_v40  ;;  %v12515_v40 = vpop.f32.mrf.mxu0 }
0x10ad   :  { %14461 = vst [vmem:[#allocation63_spill] sm:$0xff] %v12515_v40 }
0x10ae   :  { %v3692_v47 = vadd.f32 %v9489_v11, %v3691_v53  ;;  %v3947_v11 = vpop.f32.mrf.mxu1  ;;  %v12519_v53 = vpop.f32.mrf.mxu0 }
0x10af   :  { %14463 = vst [vmem:[#allocation57_spill] sm:$0xff] %v12519_v53 }
0x10b0   :  { %3875 = vmatmul.mubr.f32.gmra.mxu0 %v3692_v47  ;;  %8660 = vmatmul.mubr.f32.gmra.mxu1 %v3692_v47  ;;  %v12517_v42 = vpop.f32.mrf.mxu1  ;;  %v12523_v34 = vpop.f32.mrf.mxu0 }
0x10b1   :  { %4132 = vmatprep.mubr.f32.mxu0 %v14290_v1  ;;  %8694 = vmatprep.mubr.msk.f32.mxu1 %vm10226_vm2, %v14290_v1  ;;  %14462 = vst [vmem:[#allocation64_spill] sm:$0xff] %v12517_v42  ;;  %14465 = vst [vmem:[#allocation55_spill] sm:$0xff] %v12523_v34 }
0x10b2   :  { %v12521_v47 = vpop.f32.mrf.mxu1  ;;  %v12527_v13 = vpop.f32.mrf.mxu0 }
0x10b3   :  { %14464 = vst [vmem:[#allocation44_spill] sm:$0xff] %v12521_v47  ;;  %14467 = vst [vmem:[#allocation70_spill] sm:$0xff] %v12527_v13 }
0x10b4   :  { %4133 = vmatmul.mubr.f32.vlgmr.msra.gmra.mxu0 %v14290_v1  ;;  %8695 = vmatmul.mubr.f32.vlgmr.msra.gmra.mxu1 %v14290_v1  ;;  %v12525_v63 = vpop.f32.mrf.mxu1  ;;  %v12531_v23 = vpop.f32.mrf.mxu0 }
0x10b5   :  { %4235 = vmatpush1.msra.mxu0 %v12261_v5  ;;  %8698 = vmatpush3.msra.mxu1 %v12351_v7  ;;  %14466 = vst [vmem:[#allocation68_spill] sm:$0xff] %v12525_v63  ;;  %14469 = vst [vmem:[#allocation52_spill] sm:$0xff] %v12531_v23  ;;  %v3835_v63 = vadd.f32 %v3834_v62, %v12534_v18  ;;  %v14476_v23 = vld [vmem:[#allocation59_spill] sm:$0xff] }
0x10b6   :  { %4236 = vmatprep.subr.mxu0 %v12264_v55  ;;  %8699 = vmatprep.subr.mxu1 %v14290_v1  ;;  %v12529_v4 = vpop.f32.mrf.mxu1 }
0x10b7   :  { %4237 = vmatpush1.msra.mxu0 %v12267_v28  ;;  %8700 = vmatpush3.msra.mxu1 %v12357_v26  ;;  %14468 = vst [vmem:[#allocation71_spill] sm:$0xff] %v12529_v4 }
0x10b8   :  { %4238 = vmatprep.subr.mxu0 %v12270_v57  ;;  %8701 = vmatprep.subr.mxu1 %v14290_v1 }
0x10b9   :  { %4239 = vmatpush1.msra.mxu0 %v12273_v8  ;;  %8702 = vmatpush3.msra.mxu1 %v12359_v45 }
0x10ba   :  { %4240 = vmatprep.subr.mxu0 %v12276_v12  ;;  %8703 = vmatprep.subr.mxu1 %v14290_v1 }
0x10bb   :  { %4241 = vmatpush1.msra.mxu0 %v12279_v41  ;;  %8704 = vmatpush3.msra.mxu1 %v12364_v61 }
0x10bc   :  { %4242 = vmatprep.subr.mxu0 %v12282_v14  ;;  %8705 = vmatprep.subr.mxu1 %v14290_v1 }
0x10bd   :  { %4243 = vmatpush1.msra.mxu0 %v12285_v22  ;;  %8706 = vmatpush3.msra.mxu1 %v12369_v50 }
0x10be   :  { %4244 = vmatprep.subr.mxu0 %v12288_v29  ;;  %8707 = vmatprep.subr.mxu1 %v14290_v1 }
0x10bf   :  { %4245 = vmatpush1.msra.mxu0 %v12291_v30  ;;  %8708 = vmatpush3.msra.mxu1 %v12373_v43 }
0x10c0   :  { %4246 = vmatprep.subr.mxu0 %v12294_v31  ;;  %8709 = vmatprep.subr.mxu1 %v14290_v1 }
0x10c1   :  { %4247 = vmatpush1.msra.mxu0 %v12297_v33  ;;  %8710 = vmatpush3.msra.mxu1 %v12377_v21 }
0x10c2   :  { %4248 = vmatprep.subr.mxu0 %v12300_v39  ;;  %8711 = vmatprep.subr.mxu1 %v14290_v1 }
0x10c3   :  { %4249 = vmatpush1.msra.mxu0 %v12303_v59  ;;  %8712 = vmatpush3.msra.mxu1 %v12381_v35 }
0x10c4   :  { %4250 = vmatprep.subr.mxu0 %v12306_v0  ;;  %8713 = vmatprep.subr.mxu1 %v14290_v1 }
0x10c5   :  { %4251 = vmatpush1.msra.mxu0 %v12309_v44  ;;  %8714 = vmatpush3.msra.mxu1 %v12385_v49 }
0x10c6   :  { %4252 = vmatprep.subr.mxu0 %v12312_v20  ;;  %8715 = vmatprep.subr.mxu1 %v14290_v1 }
0x10c7   :  { %4253 = vmatpush1.msra.mxu0 %v12315_v46  ;;  %8716 = vmatpush3.msra.mxu1 %v12389_v36 }
0x10c8   :  { %4254 = vmatprep.subr.mxu0 %v12318_v24  ;;  %8717 = vmatprep.subr.mxu1 %v14290_v1 }
0x10c9   :  { %4255 = vmatpush1.msra.mxu0 %v12321_v54  ;;  %8718 = vmatpush3.msra.mxu1 %v12393_v52 }
0x10ca   :  { %4256 = vmatprep.subr.mxu0 %v12324_v16  ;;  %8719 = vmatprep.subr.mxu1 %v14290_v1 }
0x10cb   :  { %4257 = vmatpush1.msra.mxu0 %v12327_v17  ;;  %8720 = vmatpush3.msra.mxu1 %v12397_v37 }
0x10cc   :  { %4258 = vmatprep.subr.mxu0 %v12330_v19  ;;  %8721 = vmatprep.subr.mxu1 %v14290_v1 }
0x10cd   :  { %4259 = vmatpush1.msra.mxu0 %v12333_v25  ;;  %8722 = vmatpush3.msra.mxu1 %v12401_v56 }
0x10ce   :  { %4260 = vmatprep.subr.mxu0 %v12336_v27  ;;  %8723 = vmatprep.subr.mxu1 %v14290_v1 }
0x10cf   :  { %4261 = vmatpush1.msra.mxu0 %v12339_v9  ;;  %8724 = vmatpush3.msra.mxu1 %v12405_v38 }
0x10d0   :  { %4262 = vmatprep.subr.mxu0 %v12342_v51  ;;  %8725 = vmatprep.subr.mxu1 %v14290_v1 }
0x10d1   :  { %4263 = vmatpush1.msra.mxu0 %v14447_v32  ;;  %8726 = vmatpush3.msra.mxu1 %v14448_v58 }
0x10d2   :  { %4264 = vmatprep.subr.mxu0 %v14449_v6  ;;  %8727 = vmatprep.subr.mxu1 %v14290_v1 }
0x10d3   :  { %4265 = vmatpush1.msra.mxu0 %v14450_v15  ;;  %4298 = vmatprep.mubr.f32.mxu0 %v14290_v1  ;;  %v12546_v15 = vrot.slane %v3743_v48, %v14476_v23 }
0x10d4   :  { %8728 = vmatpush3.msra.mxu1 %v14451_v60  ;;  %8729 = vmatprep.mubr.msk.f32.mxu1 %vm10226_vm2, %v14290_v1 }
0x10d5   :  { %4400 = vmatprep.subr.mxu0 %v14452_v10  ;;  %8732 = vmatprep.subr.mxu1 %v14290_v1 }
0x1170   :  { %v12536_v40 = vpop.f32.mrf.mxu0  ;;  %v12538_v42 = vpop.f32.mrf.mxu1 }
0x1171   :  { %14472 = vst [vmem:[#allocation48_spill] sm:$0xff] %v12536_v40  ;;  %14473 = vst [vmem:[#allocation66_spill] sm:$0xff] %v12538_v42  ;;  %v3837_v40 = vadd.f32 %v3836_v2, %v12546_v15 }
0x1172   :  { %v12540_v53 = vpop.f32.mrf.mxu0  ;;  %v12542_v47 = vpop.f32.mrf.mxu1 }
0x1173   :  { %14474 = vst [vmem:[#allocation62_spill] sm:$0xff] %v12540_v53  ;;  %14475 = vst [vmem:[#allocation69_spill] sm:$0xff] %v12542_v47  ;;  %v12549_v47 = vld [vmem:[#allocation22] ss:$0 sm:$0xff] }
0x1174   :  { %v4134_v34 = vpop.f32.mrf.mxu0  ;;  %v4205_v13 = vpop.f32.mrf.mxu1 }
0x1175   :  { %v4209_v10 = vadd.f32 %v4134_v34, %v3835_v63  ;;  %v4223_v62 = vadd.f32 %v12549_v47, %v4205_v13  ;;  %v14480_v13 = vld [vmem:[#allocation43_spill] sm:$0xff] }
0x1176   :  { %v8696_v60 = vpop.f32.mrf.mxu1  ;;  %v4136_v3 = vpop.f32.mrf.mxu0 }
0x1177   :  { %v7317_v4 = vmul.f32 -1.442695, %v4209_v10  ;;  %v4216_v6 = vadd.f32 %v4136_v3, %v3837_v40  ;;  %v14477_v60 = vld [vmem:[#allocation46_spill] sm:$0xff] }
0x1178   :  { %v12553_v10 = vrot.slane %v3743_v48, %v14477_v60  ;;  %v14481_v48 = vld [vmem:[#allocation60_spill] sm:$0xff] }
0x1179   :  { %9492 = vpow2.f32 %v7317_v4  ;;  %v7318_v42 = vmul.f32 -1.442695, %v4216_v6 }
0x117a   :  { %v3948_v63 = vadd.f32 %v3947_v11, %v12553_v10  ;;  %v14483_v11 = vld [vmem:[#allocation45_spill] sm:$0xff] }
0x117b   :  { %9494 = vpow2.f32 %v7318_v42 }
0x1186   :  { %v9493_v58 = vpop.eup %9492 }
0x1187   :  { %v4213_v53 = vadd.f32 1.0, %v9493_v58 }
0x1188   :  { %v9495_v34 = vpop.eup %9494 }
0x1189   :  { %9496 = vrcp.f32 %v4213_v53  ;;  %v4220_v18 = vadd.f32 1.0, %v9495_v34  ;;  %v14484_v53 = vld [vmem:[#allocation61_spill] sm:$0xff] }
0x1196   :  { %v9497_v4 = vpop.eup %9496 }
0x1197   :  { %v4224_v23 = vmul.f32 %v9497_v4, %v4223_v62  ;;  %v14485_v62 = vld [vmem:[#allocation58_spill] sm:$0xff] }
0x1198   :  { %v3841_v34 = vadd.f32 %v14485_v62, %v14484_v53  ;;  %v14487_v53 = vld [vmem:[#allocation67_spill] sm:$0xff] }
0x1199   :  { %v4225_v2 = vadd.f32 %v4224_v23, %v3948_v63  ;;  %v14482_v23 = vld [vmem:[#allocation65_spill] sm:$0xff] }
0x119b   :  { %9498 = vtanh.f32 %v4225_v2 }
0x119c   :  { %9500 = vrcp.f32 %v4220_v18  ;;  %v14479_v18 = vld [vmem:[#allocation51_spill] sm:$0xff] }
0x11a8   :  { %v9499_v6 = vpop.eup %9498 }
0x11a9   :  { %v4227_v58 = vsub.f32 0.0, %v9499_v6  ;;  %v9501_v3 = vpop.eup %9500 }
0x11ab   :  { %v4228_v40 = vmul.f32 %v9501_v3, %v4227_v58 }
0x11ad   :  { %v12556_v42 = vadd.f32 %v9499_v6, %v4228_v40  ;;  %v14486_v40 = vld [vmem:[#allocation50_spill] sm:$0xff] }
0x11ae   :  { %v3843_v60 = vadd.f32 %v14486_v40, %v12546_v15  ;;  %v14495_v40 = vld [vmem:[#allocation61_spill] sm:$0xff] }
0x11af   :  { %14478 = vst [vmem:[#allocation56_spill] sm:$0xff] %v12556_v42  ;;  %4299 = vmatmul.mubr.f32.vlgmr.msra.gmra.mxu0 %v12556_v42  ;;  %8730 = vmatmul.mubr.f32.vlgmr.msra.gmra.mxu1 %v12556_v42 }
0x11b0   :  { %4401 = vmatpush1.msra.mxu0 %v12261_v5  ;;  %8733 = vmatpush3.msra.mxu1 %v12351_v7 }
0x11b1   :  { %4402 = vmatprep.subr.mxu0 %v12264_v55  ;;  %8734 = vmatprep.subr.mxu1 %v14290_v1 }
0x11b2   :  { %4403 = vmatpush1.msra.mxu0 %v12267_v28  ;;  %8735 = vmatpush3.msra.mxu1 %v12357_v26 }
0x11b3   :  { %4404 = vmatprep.subr.mxu0 %v12270_v57  ;;  %8736 = vmatprep.subr.mxu1 %v14290_v1 }
0x11b4   :  { %4405 = vmatpush1.msra.mxu0 %v12273_v8  ;;  %8737 = vmatpush3.msra.mxu1 %v12359_v45 }
0x11b5   :  { %4406 = vmatprep.subr.mxu0 %v12276_v12  ;;  %8738 = vmatprep.subr.mxu1 %v14290_v1 }
0x11b6   :  { %4407 = vmatpush1.msra.mxu0 %v12279_v41  ;;  %8739 = vmatpush3.msra.mxu1 %v12364_v61 }
0x11b7   :  { %4408 = vmatprep.subr.mxu0 %v12282_v14  ;;  %8740 = vmatprep.subr.mxu1 %v14290_v1 }
0x11b8   :  { %4409 = vmatpush1.msra.mxu0 %v12285_v22  ;;  %8741 = vmatpush3.msra.mxu1 %v12369_v50 }
0x11b9   :  { %4410 = vmatprep.subr.mxu0 %v12288_v29  ;;  %8742 = vmatprep.subr.mxu1 %v14290_v1 }
0x11ba   :  { %4411 = vmatpush1.msra.mxu0 %v12291_v30  ;;  %8743 = vmatpush3.msra.mxu1 %v12373_v43 }
0x11bb   :  { %4412 = vmatprep.subr.mxu0 %v12294_v31  ;;  %8744 = vmatprep.subr.mxu1 %v14290_v1 }
0x11bc   :  { %4413 = vmatpush1.msra.mxu0 %v12297_v33  ;;  %8745 = vmatpush3.msra.mxu1 %v12377_v21 }
0x11bd   :  { %4414 = vmatprep.subr.mxu0 %v12300_v39  ;;  %8746 = vmatprep.subr.mxu1 %v14290_v1 }
0x11be   :  { %4415 = vmatpush1.msra.mxu0 %v12303_v59  ;;  %8747 = vmatpush3.msra.mxu1 %v12381_v35 }
0x11bf   :  { %4416 = vmatprep.subr.mxu0 %v12306_v0  ;;  %8748 = vmatprep.subr.mxu1 %v14290_v1 }
0x11c0   :  { %4417 = vmatpush1.msra.mxu0 %v12309_v44  ;;  %8749 = vmatpush3.msra.mxu1 %v12385_v49 }
0x11c1   :  { %4418 = vmatprep.subr.mxu0 %v12312_v20  ;;  %8750 = vmatprep.subr.mxu1 %v14290_v1 }
0x11c2   :  { %4419 = vmatpush1.msra.mxu0 %v12315_v46  ;;  %8751 = vmatpush3.msra.mxu1 %v12389_v36 }
0x11c3   :  { %4420 = vmatprep.subr.mxu0 %v12318_v24  ;;  %8752 = vmatprep.subr.mxu1 %v14290_v1 }
0x11c4   :  { %4421 = vmatpush1.msra.mxu0 %v12321_v54  ;;  %8753 = vmatpush3.msra.mxu1 %v12393_v52 }
0x11c5   :  { %4422 = vmatprep.subr.mxu0 %v12324_v16  ;;  %8754 = vmatprep.subr.mxu1 %v14290_v1 }
0x11c6   :  { %4423 = vmatpush1.msra.mxu0 %v12327_v17  ;;  %8755 = vmatpush3.msra.mxu1 %v12397_v37 }
0x11c7   :  { %4424 = vmatprep.subr.mxu0 %v12330_v19  ;;  %8756 = vmatprep.subr.mxu1 %v14290_v1 }
0x11c8   :  { %4425 = vmatpush1.msra.mxu0 %v12333_v25  ;;  %8757 = vmatpush3.msra.mxu1 %v12401_v56 }
0x11c9   :  { %4426 = vmatprep.subr.mxu0 %v12336_v27  ;;  %8758 = vmatprep.subr.mxu1 %v14290_v1 }
0x11ca   :  { %4427 = vmatpush1.msra.mxu0 %v12339_v9  ;;  %8759 = vmatpush3.msra.mxu1 %v12405_v38 }
0x11cb   :  { %4428 = vmatprep.subr.mxu0 %v12342_v51  ;;  %8760 = vmatprep.subr.mxu1 %v14290_v1 }
0x11cc   :  { %4429 = vmatpush1.msra.mxu0 %v14447_v32  ;;  %8761 = vmatpush3.msra.mxu1 %v14479_v18 }
0x11cd   :  { %4430 = vmatprep.subr.mxu0 %v14480_v13  ;;  %8762 = vmatprep.subr.mxu1 %v14290_v1 }
0x11ce   :  { %4431 = vmatpush1.msra.mxu0 %v14481_v48  ;;  %4464 = vmatprep.mubr.f32.mxu0 %v14290_v1 }
0x11cf   :  { %8763 = vmatpush3.msra.mxu1 %v14482_v23  ;;  %8764 = vmatprep.mubr.msk.f32.mxu1 %vm10226_vm2, %v14290_v1 }
0x11d0   :  { %4566 = vmatprep.subr.mxu0 %v14483_v11  ;;  %8767 = vmatprep.subr.mxu1 %v14290_v1 }
0x126f   :  { %v4300_v4 = vpop.f32.mrf.mxu0  ;;  %v4371_v63 = vpop.f32.mrf.mxu1 }
0x1270   :  { %v4375_v2 = vadd.f32 %v4300_v4, %v3841_v34  ;;  %v4389_v32 = vadd.f32 %v12549_v47, %v4371_v63  ;;  %v3953_v34 = vadd.f32 %v14487_v53, %v12553_v10  ;;  %v14493_v53 = vld [vmem:[#allocation65_spill] sm:$0xff] }
0x1271   :  { %v8731_v6 = vpop.f32.mrf.mxu1  ;;  %v4302_v3 = vpop.f32.mrf.mxu0  ;;  %v14494_v63 = vld [vmem:[#allocation45_spill] sm:$0xff] }
0x1272   :  { %v7319_v58 = vmul.f32 -1.442695, %v4375_v2  ;;  %v4382_v23 = vadd.f32 %v4302_v3, %v3843_v60 }
0x1274   :  { %9502 = vpow2.f32 %v7319_v58  ;;  %v7320_v48 = vmul.f32 -1.442695, %v4382_v23 }
0x1276   :  { %9504 = vpow2.f32 %v7320_v48  ;;  %v14491_v48 = vld [vmem:[#allocation43_spill] sm:$0xff] }
0x1281   :  { %v9503_v13 = vpop.eup %9502 }
0x1282   :  { %v4379_v18 = vadd.f32 1.0, %v9503_v13 }
0x1283   :  { %v9505_v11 = vpop.eup %9504 }
0x1284   :  { %9506 = vrcp.f32 %v4379_v18  ;;  %v4386_v6 = vadd.f32 1.0, %v9505_v11  ;;  %v14490_v18 = vld [vmem:[#allocation51_spill] sm:$0xff]  ;;  %v14492_v11 = vld [vmem:[#allocation60_spill] sm:$0xff] }
0x1291   :  { %v9507_v62 = vpop.eup %9506 }
0x1292   :  { %v4390_v4 = vmul.f32 %v9507_v62, %v4389_v32  ;;  %v14489_v32 = vld [vmem:[#allocation42_spill] sm:$0xff]  ;;  %v14496_v62 = vld [vmem:[#allocation47_spill] sm:$0xff] }
0x1294   :  { %v4391_v2 = vadd.f32 %v4390_v4, %v3953_v34  ;;  %v3847_v34 = vadd.f32 %v14496_v62, %v14495_v40  ;;  %v14498_v40 = vld [vmem:[#allocation44_spill] sm:$0xff] }
0x1296   :  { %9508 = vtanh.f32 %v4391_v2 }
0x1297   :  { %9510 = vrcp.f32 %v4386_v6 }
0x12a3   :  { %v9509_v58 = vpop.eup %9508 }
0x12a4   :  { %v4393_v60 = vsub.f32 %v12556_v42, %v9509_v58  ;;  %v9511_v23 = vpop.eup %9510 }
0x12a6   :  { %v4394_v3 = vmul.f32 %v9511_v23, %v4393_v60 }
0x12a8   :  { %v12635_v13 = vadd.f32 %v9509_v58, %v4394_v3  ;;  %v14497_v3 = vld [vmem:[#allocation53_spill] sm:$0xff] }
0x12a9   :  { %v3849_v42 = vadd.f32 %v14497_v3, %v12546_v15  ;;  %v12815_v3 = vld [vmem:[#allocation19 + $0x138] sm:$0xff] }
0x12aa   :  { %14488 = vst [vmem:[#allocation58_spill] sm:$0xff] %v12635_v13  ;;  %4465 = vmatmul.mubr.f32.vlgmr.msra.gmra.mxu0 %v12635_v13  ;;  %8765 = vmatmul.mubr.f32.vlgmr.msra.gmra.mxu1 %v12635_v13 }
0x12ab   :  { %4567 = vmatpush1.msra.mxu0 %v12261_v5  ;;  %8768 = vmatpush3.msra.mxu1 %v12351_v7 }
0x12ac   :  { %4568 = vmatprep.subr.mxu0 %v12264_v55  ;;  %8769 = vmatprep.subr.mxu1 %v14290_v1 }
0x12ad   :  { %4569 = vmatpush1.msra.mxu0 %v12267_v28  ;;  %8770 = vmatpush3.msra.mxu1 %v12357_v26 }
0x12ae   :  { %4570 = vmatprep.subr.mxu0 %v12270_v57  ;;  %8771 = vmatprep.subr.mxu1 %v14290_v1 }
0x12af   :  { %4571 = vmatpush1.msra.mxu0 %v12273_v8  ;;  %8772 = vmatpush3.msra.mxu1 %v12359_v45 }
0x12b0   :  { %4572 = vmatprep.subr.mxu0 %v12276_v12  ;;  %8773 = vmatprep.subr.mxu1 %v14290_v1 }
0x12b1   :  { %4573 = vmatpush1.msra.mxu0 %v12279_v41  ;;  %8774 = vmatpush3.msra.mxu1 %v12364_v61 }
0x12b2   :  { %4574 = vmatprep.subr.mxu0 %v12282_v14  ;;  %8775 = vmatprep.subr.mxu1 %v14290_v1 }
0x12b3   :  { %4575 = vmatpush1.msra.mxu0 %v12285_v22  ;;  %8776 = vmatpush3.msra.mxu1 %v12369_v50 }
0x12b4   :  { %4576 = vmatprep.subr.mxu0 %v12288_v29  ;;  %8777 = vmatprep.subr.mxu1 %v14290_v1 }
0x12b5   :  { %4577 = vmatpush1.msra.mxu0 %v12291_v30  ;;  %8778 = vmatpush3.msra.mxu1 %v12373_v43 }
0x12b6   :  { %4578 = vmatprep.subr.mxu0 %v12294_v31  ;;  %8779 = vmatprep.subr.mxu1 %v14290_v1 }
0x12b7   :  { %4579 = vmatpush1.msra.mxu0 %v12297_v33  ;;  %8780 = vmatpush3.msra.mxu1 %v12377_v21 }
0x12b8   :  { %4580 = vmatprep.subr.mxu0 %v12300_v39  ;;  %8781 = vmatprep.subr.mxu1 %v14290_v1 }
0x12b9   :  { %4581 = vmatpush1.msra.mxu0 %v12303_v59  ;;  %8782 = vmatpush3.msra.mxu1 %v12381_v35 }
0x12ba   :  { %4582 = vmatprep.subr.mxu0 %v12306_v0  ;;  %8783 = vmatprep.subr.mxu1 %v14290_v1 }
0x12bb   :  { %4583 = vmatpush1.msra.mxu0 %v12309_v44  ;;  %8784 = vmatpush3.msra.mxu1 %v12385_v49 }
0x12bc   :  { %4584 = vmatprep.subr.mxu0 %v12312_v20  ;;  %8785 = vmatprep.subr.mxu1 %v14290_v1 }
0x12bd   :  { %4585 = vmatpush1.msra.mxu0 %v12315_v46  ;;  %8786 = vmatpush3.msra.mxu1 %v12389_v36 }
0x12be   :  { %4586 = vmatprep.subr.mxu0 %v12318_v24  ;;  %8787 = vmatprep.subr.mxu1 %v14290_v1 }
0x12bf   :  { %4587 = vmatpush1.msra.mxu0 %v12321_v54  ;;  %8788 = vmatpush3.msra.mxu1 %v12393_v52 }
0x12c0   :  { %4588 = vmatprep.subr.mxu0 %v12324_v16  ;;  %8789 = vmatprep.subr.mxu1 %v14290_v1 }
0x12c1   :  { %4589 = vmatpush1.msra.mxu0 %v12327_v17  ;;  %8790 = vmatpush3.msra.mxu1 %v12397_v37 }
0x12c2   :  { %4590 = vmatprep.subr.mxu0 %v12330_v19  ;;  %8791 = vmatprep.subr.mxu1 %v14290_v1 }
0x12c3   :  { %4591 = vmatpush1.msra.mxu0 %v12333_v25  ;;  %8792 = vmatpush3.msra.mxu1 %v12401_v56 }
0x12c4   :  { %4592 = vmatprep.subr.mxu0 %v12336_v27  ;;  %8793 = vmatprep.subr.mxu1 %v14290_v1 }
0x12c5   :  { %4593 = vmatpush1.msra.mxu0 %v12339_v9  ;;  %8794 = vmatpush3.msra.mxu1 %v12405_v38 }
0x12c6   :  { %4594 = vmatprep.subr.mxu0 %v12342_v51  ;;  %8795 = vmatprep.subr.mxu1 %v14290_v1 }
0x12c7   :  { %4595 = vmatpush1.msra.mxu0 %v14489_v32  ;;  %8796 = vmatpush3.msra.mxu1 %v14490_v18 }
0x12c8   :  { %4596 = vmatprep.subr.mxu0 %v14491_v48  ;;  %8797 = vmatprep.subr.mxu1 %v14290_v1 }
0x12c9   :  { %4597 = vmatpush1.msra.mxu0 %v14492_v11  ;;  %4630 = vmatprep.mubr.f32.mxu0 %v14290_v1 }
0x12ca   :  { %8798 = vmatpush3.msra.mxu1 %v14493_v53  ;;  %8799 = vmatprep.mubr.msk.f32.mxu1 %vm10226_vm2, %v14290_v1 }
0x12cb   :  { %4732 = vmatprep.subr.mxu0 %v14494_v63  ;;  %8802 = vmatprep.subr.mxu1 %v14290_v1 }
0x136a   :  { %v4466_v4 = vpop.f32.mrf.mxu0  ;;  %v4537_v2 = vpop.f32.mrf.mxu1 }
0x136b   :  { %v4541_v6 = vadd.f32 %v4466_v4, %v3847_v34  ;;  %v4555_v32 = vadd.f32 %v12549_v47, %v4537_v2  ;;  %v3958_v34 = vadd.f32 %v14498_v40, %v12553_v10  ;;  %v12807_v40 = vld [vmem:[#allocation19 + $0x150] sm:$0xff]  ;;  %v12811_v2 = vld [vmem:[#allocation19 + $0x140] sm:$0xff] }
0x136c   :  { %v8766_v58 = vpop.f32.mrf.mxu1  ;;  %v4468_v23 = vpop.f32.mrf.mxu0 }
0x136d   :  { %v7321_v60 = vmul.f32 -1.442695, %v4541_v6  ;;  %v4548_v53 = vadd.f32 %v4468_v23, %v3849_v42 }
0x136f   :  { %9512 = vpow2.f32 %v7321_v60  ;;  %v7322_v11 = vmul.f32 -1.442695, %v4548_v53 }
0x1371   :  { %9514 = vpow2.f32 %v7322_v11  ;;  %v12803_v11 = vld [vmem:[#allocation19 + $0x158] sm:$0xff] }
0x137c   :  { %v9513_v48 = vpop.eup %9512 }
0x137d   :  { %v4545_v18 = vadd.f32 1.0, %v9513_v48 }
0x137e   :  { %v9515_v63 = vpop.eup %9514 }
0x137f   :  { %9516 = vrcp.f32 %v4545_v18  ;;  %v4552_v58 = vadd.f32 1.0, %v9515_v63  ;;  %v12799_v18 = vld [vmem:[#allocation19 + $0x168] sm:$0xff]  ;;  %v12823_v63 = vld [vmem:[#allocation19 + $0x120] sm:$0xff] }
0x138c   :  { %v9517_v62 = vpop.eup %9516 }
0x138d   :  { %v4556_v4 = vmul.f32 %v9517_v62, %v4555_v32  ;;  %v12831_v62 = vld [vmem:[#allocation19 + $0x108] sm:$0xff] }
0x138f   :  { %v4557_v6 = vadd.f32 %v4556_v4, %v3958_v34  ;;  %v12839_v34 = vld [vmem:[#allocation19 + $0xf0] sm:$0xff]  ;;  %v12847_v4 = vld [vmem:[#allocation19 + $0xd8] sm:$0xff] }
0x1391   :  { %9518 = vtanh.f32 %v4557_v6  ;;  %v12855_v6 = vld [vmem:[#allocation19 + $0xc0] sm:$0xff] }
0x1392   :  { %9520 = vrcp.f32 %v4552_v58  ;;  %v12863_v58 = vld [vmem:[#allocation19 + $0xa8] sm:$0xff] }
0x139e   :  { %v9519_v60 = vpop.eup %9518 }
0x139f   :  { %v4559_v42 = vsub.f32 %v12635_v13, %v9519_v60  ;;  %v9521_v53 = vpop.eup %9520 }
0x13a1   :  { %v4560_v23 = vmul.f32 %v9521_v53, %v4559_v42  ;;  %v12877_v42 = vld [vmem:[#allocation19 + $0x80] sm:$0xff]  ;;  %v12884_v53 = vld [vmem:[#allocation19 + $0x88] sm:$0xff] }
0x13a3   :  { %v12714_v48 = vadd.f32 %v9519_v60, %v4560_v23  ;;  %v12871_v60 = vld [vmem:[#allocation19 + $0x90] sm:$0xff]  ;;  %v12887_v23 = vld [vmem:[#allocation19 + $0x68] sm:$0xff] }
0x13a5   :  { %14499 = vst [vmem:[#allocation50_spill] sm:$0xff] %v12714_v48  ;;  %4631 = vmatmul.mubr.f32.vlgmr.msra.gmra.mxu0 %v12714_v48  ;;  %8800 = vmatmul.mubr.f32.vlgmr.msra.gmra.mxu1 %v12714_v48 }
0x13a6   :  { %4733 = vmatpush1.msra.mxu0 %v12261_v5  ;;  %8803 = vmatpush3.msra.mxu1 %v12351_v7  ;;  %v14500_v5 = vld [vmem:[#allocation42_spill] sm:$0xff] }
0x13a7   :  { %4734 = vmatprep.subr.mxu0 %v12264_v55  ;;  %8804 = vmatprep.subr.mxu1 %v14290_v1  ;;  %v14501_v55 = vld [vmem:[#allocation51_spill] sm:$0xff] }
0x13a8   :  { %4735 = vmatpush1.msra.mxu0 %v12267_v28  ;;  %8805 = vmatpush3.msra.mxu1 %v12357_v26  ;;  %v14502_v28 = vld [vmem:[#allocation43_spill] sm:$0xff] }
0x13a9   :  { %4736 = vmatprep.subr.mxu0 %v12270_v57  ;;  %8806 = vmatprep.subr.mxu1 %v14290_v1  ;;  %v14503_v57 = vld [vmem:[#allocation60_spill] sm:$0xff] }
0x13aa   :  { %4737 = vmatpush1.msra.mxu0 %v12273_v8  ;;  %8807 = vmatpush3.msra.mxu1 %v12359_v45  ;;  %v14504_v8 = vld [vmem:[#allocation65_spill] sm:$0xff] }
0x13ab   :  { %4738 = vmatprep.subr.mxu0 %v12276_v12  ;;  %8808 = vmatprep.subr.mxu1 %v14290_v1  ;;  %v12783_v12 = vld [vmem:[#allocation19 + $0x170] sm:$0xff] }
0x13ac   :  { %4739 = vmatpush1.msra.mxu0 %v12279_v41  ;;  %8809 = vmatpush3.msra.mxu1 %v12364_v61  ;;  %v14505_v41 = vld [vmem:[#allocation61_spill] sm:$0xff] }
0x13ad   :  { %4740 = vmatprep.subr.mxu0 %v12282_v14  ;;  %8810 = vmatprep.subr.mxu1 %v14290_v1  ;;  %v14506_v14 = vld [vmem:[#allocation40_spill] sm:$0xff] }
0x13ae   :  { %4741 = vmatpush1.msra.mxu0 %v12285_v22  ;;  %8811 = vmatpush3.msra.mxu1 %v12369_v50  ;;  %v3853_v22 = vadd.f32 %v14506_v14, %v14505_v41  ;;  %v12907_v14 = vld [vmem:[#allocation19 + $0x38] sm:$0xff] }
0x13af   :  { %4742 = vmatprep.subr.mxu0 %v12288_v29  ;;  %8812 = vmatprep.subr.mxu1 %v14290_v1 }
0x13b0   :  { %4743 = vmatpush1.msra.mxu0 %v12291_v30  ;;  %8813 = vmatpush3.msra.mxu1 %v12373_v43 }
0x13b1   :  { %4744 = vmatprep.subr.mxu0 %v12294_v31  ;;  %8814 = vmatprep.subr.mxu1 %v14290_v1 }
0x13b2   :  { %4745 = vmatpush1.msra.mxu0 %v12297_v33  ;;  %8815 = vmatpush3.msra.mxu1 %v12377_v21 }
0x13b3   :  { %4746 = vmatprep.subr.mxu0 %v12300_v39  ;;  %8816 = vmatprep.subr.mxu1 %v14290_v1 }
0x13b4   :  { %4747 = vmatpush1.msra.mxu0 %v12303_v59  ;;  %8817 = vmatpush3.msra.mxu1 %v12381_v35 }
0x13b5   :  { %4748 = vmatprep.subr.mxu0 %v12306_v0  ;;  %8818 = vmatprep.subr.mxu1 %v14290_v1  ;;  %v14507_v0 = vld [vmem:[#allocation49_spill] sm:$0xff] }
0x13b6   :  { %4749 = vmatpush1.msra.mxu0 %v12309_v44  ;;  %8819 = vmatpush3.msra.mxu1 %v12385_v49  ;;  %v3855_v44 = vadd.f32 %v14507_v0, %v12546_v15  ;;  %v12935_v0 = vld [vmem:[#allocation19 + $0x10] sm:$0xff] }
0x13b7   :  { %4750 = vmatprep.subr.mxu0 %v12312_v20  ;;  %8820 = vmatprep.subr.mxu1 %v14290_v1  ;;  %14514 = vst [vmem:[#allocation42_spill] sm:$0xff] %v12935_v0 }
0x13b8   :  { %4751 = vmatpush1.msra.mxu0 %v12315_v46  ;;  %8821 = vmatpush3.msra.mxu1 %v12389_v36 }
0x13b9   :  { %4752 = vmatprep.subr.mxu0 %v12318_v24  ;;  %8822 = vmatprep.subr.mxu1 %v14290_v1 }
0x13ba   :  { %4753 = vmatpush1.msra.mxu0 %v12321_v54  ;;  %8823 = vmatpush3.msra.mxu1 %v12393_v52 }
0x13bb   :  { %4754 = vmatprep.subr.mxu0 %v12324_v16  ;;  %8824 = vmatprep.subr.mxu1 %v14290_v1 }
0x13bc   :  { %4755 = vmatpush1.msra.mxu0 %v12327_v17  ;;  %8825 = vmatpush3.msra.mxu1 %v12397_v37 }
0x13bd   :  { %4756 = vmatprep.subr.mxu0 %v12330_v19  ;;  %8826 = vmatprep.subr.mxu1 %v14290_v1 }
0x13be   :  { %4757 = vmatpush1.msra.mxu0 %v12333_v25  ;;  %8827 = vmatpush3.msra.mxu1 %v12401_v56  ;;  %v14508_v25 = vld [vmem:[#allocation64_spill] sm:$0xff] }
0x13bf   :  { %4758 = vmatprep.subr.mxu0 %v12336_v27  ;;  %8828 = vmatprep.subr.mxu1 %v14290_v1  ;;  %v3963_v27 = vadd.f32 %v14508_v25, %v12553_v10  ;;  %v14516_v25 = vld [vmem:[#allocation63_spill] sm:$0xff] }
0x13c0   :  { %4759 = vmatpush1.msra.mxu0 %v12339_v9  ;;  %8829 = vmatpush3.msra.mxu1 %v12405_v38 }
0x13c1   :  { %4760 = vmatprep.subr.mxu0 %v12342_v51  ;;  %8830 = vmatprep.subr.mxu1 %v14290_v1 }
0x13c2   :  { %4761 = vmatpush1.msra.mxu0 %v14500_v5  ;;  %8831 = vmatpush3.msra.mxu1 %v14501_v55  ;;  %v12891_v5 = vld [vmem:[#allocation19 + $0x60] sm:$0xff]  ;;  %v12894_v55 = vld [vmem:[#allocation19 + $0x70] sm:$0xff] }
0x13c3   :  { %4762 = vmatprep.subr.mxu0 %v14502_v28  ;;  %8832 = vmatprep.subr.mxu1 %v14290_v1  ;;  %v12897_v28 = vld [vmem:[#allocation19 + $0x50] sm:$0xff] }
0x13c4   :  { %4763 = vmatpush1.msra.mxu0 %v14503_v57  ;;  %4796 = vmatprep.mubr.f32.mxu0 %v14290_v1  ;;  %v12901_v57 = vld [vmem:[#allocation19 + $0x48] sm:$0xff] }
0x13c5   :  { %8833 = vmatpush3.msra.mxu1 %v14504_v8  ;;  %8834 = vmatprep.mubr.msk.f32.mxu1 %vm10226_vm2, %v14290_v1  ;;  %v12904_v8 = vld [vmem:[#allocation19 + $0x58] sm:$0xff] }
0x13c6   :  { %4898 = vmatprep.subr.mxu0 %v12783_v12  ;;  %8837 = vmatprep.subr.mxu1 %v14290_v1 }
0x1465   :  { %v4632_v29 = vpop.f32.mrf.mxu0  ;;  %v4703_v30 = vpop.f32.mrf.mxu1 }
0x1466   :  { %v4707_v31 = vadd.f32 %v4632_v29, %v3853_v22  ;;  %v4721_v17 = vadd.f32 %v12549_v47, %v4703_v30  ;;  %v12911_v22 = vld [vmem:[#allocation19 + $0x30] sm:$0xff]  ;;  %v12914_v29 = vld [vmem:[#allocation19 + $0x40] sm:$0xff] }
0x1467   :  { %v8801_v33 = vpop.f32.mrf.mxu1  ;;  %v4634_v59 = vpop.f32.mrf.mxu0  ;;  %v12917_v30 = vld [vmem:[#allocation19 + $0x20] sm:$0xff] }
0x1468   :  { %v7323_v39 = vmul.f32 -1.442695, %v4707_v31  ;;  %v4714_v20 = vadd.f32 %v4634_v59, %v3855_v44  ;;  %v12921_v31 = vld [vmem:[#allocation19 + $0x18] sm:$0xff]  ;;  %v12924_v33 = vld [vmem:[#allocation19 + $0x28] sm:$0xff]  ;;  %v12931_v59 = vld [vmem:[#allocation19] sm:$0xff] }
0x1469   :  { %14510 = vst [vmem:[#allocation45_spill] sm:$0xff] %v12921_v31  ;;  %14511 = vst [vmem:[#allocation47_spill] sm:$0xff] %v12924_v33  ;;  %v14515_v44 = vld [vmem:[#allocation41_spill] sm:$0xff] }
0x146a   :  { %9522 = vpow2.f32 %v7323_v39  ;;  %v7324_v46 = vmul.f32 -1.442695, %v4714_v20  ;;  %v12927_v39 = vld [vmem:[#allocation19 + $0x8] sm:$0xff]  ;;  %14513 = vst [vmem:[#allocation44_spill] sm:$0xff] %v12931_v59  ;;  %v3859_v20 = vadd.f32 %v14515_v44, %v14505_v41 }
0x146b   :  { %14512 = vst [vmem:[#allocation53_spill] sm:$0xff] %v12927_v39  ;;  %v14517_v44 = vld [vmem:[#allocation71_spill] sm:$0xff] }
0x146c   :  { %9524 = vpow2.f32 %v7324_v46 }
0x1477   :  { %v9523_v24 = vpop.eup %9522 }
0x1478   :  { %v4711_v54 = vadd.f32 1.0, %v9523_v24 }
0x1479   :  { %v9525_v16 = vpop.eup %9524 }
0x147a   :  { %9526 = vrcp.f32 %v4711_v54  ;;  %v4718_v36 = vadd.f32 1.0, %v9525_v16 }
0x1487   :  { %v9527_v19 = vpop.eup %9526 }
0x1488   :  { %v4722_v9 = vmul.f32 %v9527_v19, %v4721_v17 }
0x148a   :  { %v4723_v51 = vadd.f32 %v4722_v9, %v3963_v27  ;;  %v3861_v27 = vadd.f32 %v14516_v25, %v12546_v15 }
0x148c   :  { %9528 = vtanh.f32 %v4723_v51 }
0x148d   :  { %9530 = vrcp.f32 %v4718_v36 }
0x1499   :  { %v9529_v52 = vpop.eup %9528 }
0x149a   :  { %v4725_v37 = vsub.f32 %v12714_v48, %v9529_v52  ;;  %v9531_v56 = vpop.eup %9530  ;;  %v14519_v48 = vld [vmem:[#allocation55_spill] sm:$0xff] }
0x149b   :  { %v3867_v13 = vadd.f32 %v14519_v48, %v12546_v15 }
0x149c   :  { %v4726_v38 = vmul.f32 %v9531_v56, %v4725_v37 }
0x149e   :  { %v12795_v32 = vadd.f32 %v9529_v52, %v4726_v38 }
0x14a0   :  { %14509 = vst [vmem:[#allocation67_spill] sm:$0xff] %v12795_v32  ;;  %4797 = vmatmul.mubr.f32.vlgmr.msra.gmra.mxu0 %v12795_v32  ;;  %8835 = vmatmul.mubr.f32.vlgmr.msra.gmra.mxu1 %v12795_v32 }
0x14a1   :  { %4899 = vmatpush1.msra.mxu0 %v12799_v18  ;;  %8838 = vmatpush3.msra.mxu1 %v12351_v7  ;;  %v12819_v7 = vld [vmem:[#allocation19 + $0x128] sm:$0xff] }
0x14a2   :  { %4900 = vmatprep.subr.mxu0 %v12803_v11  ;;  %8839 = vmatprep.subr.mxu1 %v14290_v1 }
0x14a3   :  { %4901 = vmatpush1.msra.mxu0 %v12807_v40  ;;  %8840 = vmatpush3.msra.mxu1 %v12357_v26  ;;  %v12827_v26 = vld [vmem:[#allocation19 + $0x110] sm:$0xff] }
0x14a4   :  { %4902 = vmatprep.subr.mxu0 %v12811_v2  ;;  %8841 = vmatprep.subr.mxu1 %v14290_v1 }
0x14a5   :  { %4903 = vmatpush1.msra.mxu0 %v12815_v3  ;;  %8842 = vmatpush3.msra.mxu1 %v12359_v45  ;;  %v12835_v45 = vld [vmem:[#allocation19 + $0xf8] sm:$0xff] }
0x14a6   :  { %4904 = vmatprep.subr.mxu0 %v12819_v7  ;;  %8843 = vmatprep.subr.mxu1 %v14290_v1 }
0x14a7   :  { %4905 = vmatpush1.msra.mxu0 %v12823_v63  ;;  %8844 = vmatpush3.msra.mxu1 %v12364_v61  ;;  %v12843_v61 = vld [vmem:[#allocation19 + $0xe0] sm:$0xff] }
0x14a8   :  { %4906 = vmatprep.subr.mxu0 %v12827_v26  ;;  %8845 = vmatprep.subr.mxu1 %v14290_v1 }
0x14a9   :  { %4907 = vmatpush1.msra.mxu0 %v12831_v62  ;;  %8846 = vmatpush3.msra.mxu1 %v12369_v50  ;;  %v12851_v50 = vld [vmem:[#allocation19 + $0xc8] sm:$0xff] }
0x14aa   :  { %4908 = vmatprep.subr.mxu0 %v12835_v45  ;;  %8847 = vmatprep.subr.mxu1 %v14290_v1 }
0x14ab   :  { %4909 = vmatpush1.msra.mxu0 %v12839_v34  ;;  %8848 = vmatpush3.msra.mxu1 %v12373_v43  ;;  %v12859_v43 = vld [vmem:[#allocation19 + $0xb0] sm:$0xff] }
0x14ac   :  { %4910 = vmatprep.subr.mxu0 %v12843_v61  ;;  %8849 = vmatprep.subr.mxu1 %v14290_v1 }
0x14ad   :  { %4911 = vmatpush1.msra.mxu0 %v12847_v4  ;;  %8850 = vmatpush3.msra.mxu1 %v12377_v21  ;;  %v12867_v21 = vld [vmem:[#allocation19 + $0x98] sm:$0xff] }
0x14ae   :  { %4912 = vmatprep.subr.mxu0 %v12851_v50  ;;  %8851 = vmatprep.subr.mxu1 %v14290_v1 }
0x14af   :  { %4913 = vmatpush1.msra.mxu0 %v12855_v6  ;;  %8852 = vmatpush3.msra.mxu1 %v12381_v35  ;;  %v12874_v35 = vld [vmem:[#allocation19 + $0xa0] sm:$0xff] }
0x14b0   :  { %4914 = vmatprep.subr.mxu0 %v12859_v43  ;;  %8853 = vmatprep.subr.mxu1 %v14290_v1 }
0x14b1   :  { %4915 = vmatpush1.msra.mxu0 %v12863_v58  ;;  %8854 = vmatpush3.msra.mxu1 %v12385_v49  ;;  %v12881_v49 = vld [vmem:[#allocation19 + $0x78] sm:$0xff] }
0x14b2   :  { %4916 = vmatprep.subr.mxu0 %v12867_v21  ;;  %8855 = vmatprep.subr.mxu1 %v14290_v1 }
0x14b3   :  { %4917 = vmatpush1.msra.mxu0 %v12871_v60  ;;  %8856 = vmatpush3.msra.mxu1 %v12874_v35 }
0x14b4   :  { %4918 = vmatprep.subr.mxu0 %v12877_v42  ;;  %8857 = vmatprep.subr.mxu1 %v14290_v1 }
0x14b5   :  { %4919 = vmatpush1.msra.mxu0 %v12881_v49  ;;  %8858 = vmatpush3.msra.mxu1 %v12884_v53 }
0x14b6   :  { %4920 = vmatprep.subr.mxu0 %v12887_v23  ;;  %8859 = vmatprep.subr.mxu1 %v14290_v1 }
0x14b7   :  { %4921 = vmatpush1.msra.mxu0 %v12891_v5  ;;  %8860 = vmatpush3.msra.mxu1 %v12894_v55 }
0x14b8   :  { %4922 = vmatprep.subr.mxu0 %v12897_v28  ;;  %8861 = vmatprep.subr.mxu1 %v14290_v1 }
0x14b9   :  { %4923 = vmatpush1.msra.mxu0 %v12901_v57  ;;  %8862 = vmatpush3.msra.mxu1 %v12904_v8 }
0x14ba   :  { %4924 = vmatprep.subr.mxu0 %v12907_v14  ;;  %8863 = vmatprep.subr.mxu1 %v14290_v1 }
0x14bb   :  { %4925 = vmatpush1.msra.mxu0 %v12911_v22  ;;  %8864 = vmatpush3.msra.mxu1 %v12914_v29 }
0x14bc   :  { %4926 = vmatprep.subr.mxu0 %v12917_v30  ;;  %8865 = vmatprep.subr.mxu1 %v14290_v1 }
0x14bd   :  { %4927 = vmatpush1.msra.mxu0 %v12921_v31  ;;  %8866 = vmatpush3.msra.mxu1 %v12924_v33 }
0x14be   :  { %4928 = vmatprep.subr.mxu0 %v12927_v39  ;;  %8867 = vmatprep.subr.mxu1 %v14290_v1 }
0x14bf   :  { %4929 = vmatpush1.msra.mxu0 %v12931_v59  ;;  %4962 = vmatprep.mubr.f32.mxu0 %v14290_v1 }
0x14c0   :  { %8868 = vmatpush3.msra.mxu1 %v12935_v0  ;;  %8869 = vmatprep.mubr.msk.f32.mxu1 %vm10226_vm2, %v14290_v1 }
0x14c1   :  { %5064 = vmatprep.subr.mxu0 %v12783_v12  ;;  %8872 = vmatprep.subr.mxu1 %v14290_v1 }
0x1560   :  { %v4798_v46 = vpop.f32.mrf.mxu0  ;;  %v4869_v24 = vpop.f32.mrf.mxu1 }
0x1561   :  { %v4873_v54 = vadd.f32 %v4798_v46, %v3859_v20  ;;  %v4887_v56 = vadd.f32 %v12549_v47, %v4869_v24  ;;  %v3968_v20 = vadd.f32 %v14517_v44, %v12553_v10  ;;  %v12955_v24 = vld [vmem:[#allocation19 + $0x178] sm:$0xff]  ;;  %v12997_v44 = vld [vmem:[#allocation19 + $0xd0] sm:$0xff] }
0x1562   :  { %v8836_v16 = vpop.f32.mrf.mxu1  ;;  %v4800_v19 = vpop.f32.mrf.mxu0 }
0x1563   :  { %v7325_v17 = vmul.f32 -1.442695, %v4873_v54  ;;  %v4880_v9 = vadd.f32 %v4800_v19, %v3861_v27 }
0x1565   :  { %9532 = vpow2.f32 %v7325_v17  ;;  %v7326_v51 = vmul.f32 -1.442695, %v4880_v9 }
0x1567   :  { %9534 = vpow2.f32 %v7326_v51  ;;  %v12961_v51 = vld [vmem:[#allocation19 + $0x160] sm:$0xff] }
0x1572   :  { %v9533_v36 = vpop.eup %9532 }
0x1573   :  { %v4877_v52 = vadd.f32 1.0, %v9533_v36  ;;  %v12967_v36 = vld [vmem:[#allocation19 + $0x148] sm:$0xff] }
0x1574   :  { %v9535_v37 = vpop.eup %9534 }
0x1575   :  { %9536 = vrcp.f32 %v4877_v52  ;;  %v4884_v16 = vadd.f32 1.0, %v9535_v37  ;;  %v12973_v52 = vld [vmem:[#allocation19 + $0x130] sm:$0xff]  ;;  %v12979_v37 = vld [vmem:[#allocation19 + $0x118] sm:$0xff] }
0x1582   :  { %v9537_v38 = vpop.eup %9536 }
0x1583   :  { %v4888_v46 = vmul.f32 %v9537_v38, %v4887_v56  ;;  %v12985_v56 = vld [vmem:[#allocation19 + $0x100] sm:$0xff]  ;;  %v12991_v38 = vld [vmem:[#allocation19 + $0xe8] sm:$0xff] }
0x1585   :  { %v4889_v54 = vadd.f32 %v4888_v46, %v3968_v20  ;;  %v13003_v20 = vld [vmem:[#allocation19 + $0xb8] sm:$0xff] }
0x1586   :  { %v14518_v46 = vld [vmem:[#allocation57_spill] sm:$0xff] }
0x1587   :  { %9538 = vtanh.f32 %v4889_v54  ;;  %v3865_v54 = vadd.f32 %v14518_v46, %v14505_v41  ;;  %v14520_v41 = vld [vmem:[#allocation68_spill] sm:$0xff] }
0x1588   :  { %9540 = vrcp.f32 %v4884_v16 }
0x1594   :  { %v9539_v17 = vpop.eup %9538 }
0x1595   :  { %v4891_v19 = vsub.f32 %v12795_v32, %v9539_v17  ;;  %v9541_v25 = vpop.eup %9540 }
0x1597   :  { %v4892_v27 = vmul.f32 %v9541_v25, %v4891_v19 }
0x1599   :  { %v12950_v9 = vadd.f32 %v9539_v17, %v4892_v27 }
0x159b   :  { %4963 = vmatmul.mubr.f32.vlgmr.msra.gmra.mxu0 %v12950_v9  ;;  %8870 = vmatmul.mubr.f32.vlgmr.msra.gmra.mxu1 %v12950_v9 }
0x159c   :  { %5065 = vmatpush1.msra.mxu0 %v12799_v18  ;;  %8873 = vmatpush3.msra.mxu1 %v12955_v24 }
0x159d   :  { %5066 = vmatprep.subr.mxu0 %v12803_v11  ;;  %8874 = vmatprep.subr.mxu1 %v14290_v1 }
0x159e   :  { %5067 = vmatpush1.msra.mxu0 %v12807_v40  ;;  %8875 = vmatpush3.msra.mxu1 %v12961_v51 }
0x159f   :  { %5068 = vmatprep.subr.mxu0 %v12811_v2  ;;  %8876 = vmatprep.subr.mxu1 %v14290_v1 }
0x15a0   :  { %5069 = vmatpush1.msra.mxu0 %v12815_v3  ;;  %8877 = vmatpush3.msra.mxu1 %v12967_v36 }
0x15a1   :  { %5070 = vmatprep.subr.mxu0 %v12819_v7  ;;  %8878 = vmatprep.subr.mxu1 %v14290_v1 }
0x15a2   :  { %5071 = vmatpush1.msra.mxu0 %v12823_v63  ;;  %8879 = vmatpush3.msra.mxu1 %v12973_v52 }
0x15a3   :  { %5072 = vmatprep.subr.mxu0 %v12827_v26  ;;  %8880 = vmatprep.subr.mxu1 %v14290_v1 }
0x15a4   :  { %5073 = vmatpush1.msra.mxu0 %v12831_v62  ;;  %8881 = vmatpush3.msra.mxu1 %v12979_v37 }
0x15a5   :  { %5074 = vmatprep.subr.mxu0 %v12835_v45  ;;  %8882 = vmatprep.subr.mxu1 %v14290_v1 }
0x15a6   :  { %5075 = vmatpush1.msra.mxu0 %v12839_v34  ;;  %8883 = vmatpush3.msra.mxu1 %v12985_v56 }
0x15a7   :  { %5076 = vmatprep.subr.mxu0 %v12843_v61  ;;  %8884 = vmatprep.subr.mxu1 %v14290_v1 }
0x15a8   :  { %5077 = vmatpush1.msra.mxu0 %v12847_v4  ;;  %8885 = vmatpush3.msra.mxu1 %v12991_v38 }
0x15a9   :  { %5078 = vmatprep.subr.mxu0 %v12851_v50  ;;  %8886 = vmatprep.subr.mxu1 %v14290_v1 }
0x15aa   :  { %5079 = vmatpush1.msra.mxu0 %v12855_v6  ;;  %8887 = vmatpush3.msra.mxu1 %v12997_v44 }
0x15ab   :  { %5080 = vmatprep.subr.mxu0 %v12859_v43  ;;  %8888 = vmatprep.subr.mxu1 %v14290_v1 }
0x15ac   :  { %5081 = vmatpush1.msra.mxu0 %v12863_v58  ;;  %8889 = vmatpush3.msra.mxu1 %v13003_v20 }
0x15ad   :  { %5082 = vmatprep.subr.mxu0 %v12867_v21  ;;  %8890 = vmatprep.subr.mxu1 %v14290_v1 }
0x15ae   :  { %5083 = vmatpush1.msra.mxu0 %v12871_v60  ;;  %8891 = vmatpush3.msra.mxu1 %v12874_v35 }
0x15af   :  { %5084 = vmatprep.subr.mxu0 %v12877_v42  ;;  %8892 = vmatprep.subr.mxu1 %v14290_v1 }
0x15b0   :  { %5085 = vmatpush1.msra.mxu0 %v12881_v49  ;;  %8893 = vmatpush3.msra.mxu1 %v12884_v53 }
0x15b1   :  { %5086 = vmatprep.subr.mxu0 %v12887_v23  ;;  %8894 = vmatprep.subr.mxu1 %v14290_v1 }
0x15b2   :  { %5087 = vmatpush1.msra.mxu0 %v12891_v5  ;;  %8895 = vmatpush3.msra.mxu1 %v12894_v55 }
0x15b3   :  { %5088 = vmatprep.subr.mxu0 %v12897_v28  ;;  %8896 = vmatprep.subr.mxu1 %v14290_v1 }
0x15b4   :  { %5089 = vmatpush1.msra.mxu0 %v12901_v57  ;;  %8897 = vmatpush3.msra.mxu1 %v12904_v8 }
0x15b5   :  { %5090 = vmatprep.subr.mxu0 %v12907_v14  ;;  %8898 = vmatprep.subr.mxu1 %v14290_v1 }
0x15b6   :  { %5091 = vmatpush1.msra.mxu0 %v12911_v22  ;;  %8899 = vmatpush3.msra.mxu1 %v12914_v29 }
0x15b7   :  { %5092 = vmatprep.subr.mxu0 %v12917_v30  ;;  %8900 = vmatprep.subr.mxu1 %v14290_v1 }
0x15b8   :  { %5093 = vmatpush1.msra.mxu0 %v12921_v31  ;;  %8901 = vmatpush3.msra.mxu1 %v12924_v33 }
0x15b9   :  { %5094 = vmatprep.subr.mxu0 %v12927_v39  ;;  %8902 = vmatprep.subr.mxu1 %v14290_v1 }
0x15ba   :  { %5095 = vmatpush1.msra.mxu0 %v12931_v59  ;;  %5128 = vmatprep.mubr.f32.mxu0 %v14290_v1 }
0x15bb   :  { %8903 = vmatpush3.msra.mxu1 %v12935_v0  ;;  %8904 = vmatprep.mubr.msk.f32.mxu1 %vm10226_vm2, %v14290_v1 }
0x15bc   :  { %5230 = vmatprep.subr.mxu0 %v12783_v12  ;;  %8907 = vmatprep.subr.mxu1 %v14290_v1 }
0x165b   :  { %v4964_v16 = vpop.f32.mrf.mxu0  ;;  %v5035_v17 = vpop.f32.mrf.mxu1 }
0x165c   :  { %v5039_v19 = vadd.f32 %v4964_v16, %v3865_v54  ;;  %v5053_v31 = vadd.f32 %v12549_v47, %v5035_v17  ;;  %v3973_v54 = vadd.f32 %v14520_v41, %v12553_v10  ;;  %v14521_v47 = vld [vmem:[#allocation45_spill] sm:$0xff]  ;;  %v14522_v41 = vld [vmem:[#allocation47_spill] sm:$0xff]  ;;  %v5428_v17 = vld [vmem:[#allocation24 + $0x118] sm:$0xff] }
0x165d   :  { %v8871_v25 = vpop.f32.mrf.mxu1  ;;  %v4966_v32 = vpop.f32.mrf.mxu0 }
0x165e   :  { %v7327_v27 = vmul.f32 -1.442695, %v5039_v19  ;;  %v5046_v0 = vadd.f32 %v4966_v32, %v3867_v13 }
0x1660   :  { %9542 = vpow2.f32 %v7327_v27  ;;  %v7328_v59 = vmul.f32 -1.442695, %v5046_v0  ;;  %v5437_v0 = vld [vmem:[#allocation24 + $0x160] sm:$0xff] }
0x1662   :  { %9544 = vpow2.f32 %v7328_v59  ;;  %v5436_v59 = vld [vmem:[#allocation24 + $0x158] sm:$0xff] }
0x166d   :  { %v9543_v39 = vpop.eup %9542 }
0x166e   :  { %v5043_v33 = vadd.f32 1.0, %v9543_v39 }
0x166f   :  { %v9545_v12 = vpop.eup %9544 }
0x1670   :  { %9546 = vrcp.f32 %v5043_v33  ;;  %v5050_v25 = vadd.f32 1.0, %v9545_v12  ;;  %v5438_v33 = vld [vmem:[#allocation24 + $0x168] sm:$0xff] }
0x1671   :  { %v5426_v12 = vld [vmem:[#allocation24 + $0x108] sm:$0xff] }
0x167d   :  { %v9547_v46 = vpop.eup %9546 }
0x167e   :  { %v5054_v16 = vmul.f32 %v9547_v46, %v5053_v31  ;;  %v5424_v46 = vld [vmem:[#allocation24 + $0xf8] sm:$0xff] }
0x1680   :  { %v5055_v19 = vadd.f32 %v5054_v16, %v3973_v54  ;;  %v5425_v54 = vld [vmem:[#allocation24 + $0x100] sm:$0xff]  ;;  %v5423_v16 = vld [vmem:[#allocation24 + $0xf0] sm:$0xff] }
0x1682   :  { %9548 = vtanh.f32 %v5055_v19  ;;  %v5421_v19 = vld [vmem:[#allocation24 + $0xe0] sm:$0xff] }
0x1683   :  { %9550 = vrcp.f32 %v5050_v25  ;;  %v5422_v25 = vld [vmem:[#allocation24 + $0xe8] sm:$0xff] }
0x168f   :  { %v9549_v27 = vpop.eup %9548 }
0x1690   :  { %v5057_v13 = vsub.f32 %v12950_v9, %v9549_v27  ;;  %v9551_v48 = vpop.eup %9550 }
0x1692   :  { %v5058_v32 = vmul.f32 %v9551_v48, %v5057_v13  ;;  %v5418_v13 = vld [vmem:[#allocation24 + $0xc8] sm:$0xff]  ;;  %v5419_v48 = vld [vmem:[#allocation24 + $0xd0] sm:$0xff] }
0x1694   :  { %v13047_v39 = vadd.f32 %v9549_v27, %v5058_v32  ;;  %v5420_v27 = vld [vmem:[#allocation24 + $0xd8] sm:$0xff]  ;;  %v5417_v32 = vld [vmem:[#allocation24 + $0xc0] sm:$0xff] }
0x1696   :  { %5129 = vmatmul.mubr.f32.vlgmr.msra.gmra.mxu0 %v13047_v39  ;;  %8905 = vmatmul.mubr.f32.vlgmr.msra.gmra.mxu1 %v13047_v39 }
0x1697   :  { %5231 = vmatpush1.msra.mxu0 %v12799_v18  ;;  %8908 = vmatpush3.msra.mxu1 %v12955_v24  ;;  %v14523_v18 = vld [vmem:[#allocation53_spill] sm:$0xff] }
0x1698   :  { %5232 = vmatprep.subr.mxu0 %v12803_v11  ;;  %8909 = vmatprep.subr.mxu1 %v14290_v1  ;;  %v14524_v11 = vld [vmem:[#allocation44_spill] sm:$0xff]  ;;  %v5435_v24 = vld [vmem:[#allocation24 + $0x150] sm:$0xff] }
0x1699   :  { %5233 = vmatpush1.msra.mxu0 %v12807_v40  ;;  %8910 = vmatpush3.msra.mxu1 %v12961_v51  ;;  %v14525_v40 = vld [vmem:[#allocation42_spill] sm:$0xff]  ;;  %v5433_v51 = vld [vmem:[#allocation24 + $0x140] sm:$0xff] }
0x169a   :  { %5234 = vmatprep.subr.mxu0 %v12811_v2  ;;  %8911 = vmatprep.subr.mxu1 %v14290_v1  ;;  %v5439_v2 = vld [vmem:[#allocation24 + $0x170] sm:$0xff] }
0x169b   :  { %5235 = vmatpush1.msra.mxu0 %v12815_v3  ;;  %8912 = vmatpush3.msra.mxu1 %v12967_v36  ;;  %v5440_v3 = vld [vmem:[#allocation24 + $0x178] sm:$0xff]  ;;  %v5434_v36 = vld [vmem:[#allocation24 + $0x148] sm:$0xff] }
0x169c   :  { %5236 = vmatprep.subr.mxu0 %v12819_v7  ;;  %8913 = vmatprep.subr.mxu1 %v14290_v1  ;;  %v14526_v7 = vld [vmem:[#allocation61_spill] sm:$0xff] }
0x169d   :  { %5237 = vmatpush1.msra.mxu0 %v12823_v63  ;;  %8914 = vmatpush3.msra.mxu1 %v12973_v52  ;;  %v14527_v63 = vld [vmem:[#allocation70_spill] sm:$0xff] }
0x169e   :  { %5238 = vmatprep.subr.mxu0 %v12827_v26  ;;  %8915 = vmatprep.subr.mxu1 %v14290_v1  ;;  %v3871_v26 = vadd.f32 %v14527_v63, %v14526_v7  ;;  %v5432_v52 = vld [vmem:[#allocation24 + $0x138] sm:$0xff]  ;;  %v5410_v63 = vld [vmem:[#allocation24 + $0x88] sm:$0xff] }
0x169f   :  { %5239 = vmatpush1.msra.mxu0 %v12831_v62  ;;  %8916 = vmatpush3.msra.mxu1 %v12979_v37  ;;  %v14530_v37 = vld [vmem:[#allocation56_spill] sm:$0xff] }
0x16a0   :  { %5240 = vmatprep.subr.mxu0 %v12835_v45  ;;  %8917 = vmatprep.subr.mxu1 %v14290_v1 }
0x16a1   :  { %5241 = vmatpush1.msra.mxu0 %v12839_v34  ;;  %8918 = vmatpush3.msra.mxu1 %v12985_v56  ;;  %v5430_v56 = vld [vmem:[#allocation24 + $0x128] sm:$0xff] }
0x16a2   :  { %5242 = vmatprep.subr.mxu0 %v12843_v61  ;;  %8919 = vmatprep.subr.mxu1 %v14290_v1 }
0x16a3   :  { %5243 = vmatpush1.msra.mxu0 %v12847_v4  ;;  %8920 = vmatpush3.msra.mxu1 %v12991_v38  ;;  %v5431_v38 = vld [vmem:[#allocation24 + $0x130] sm:$0xff] }
0x16a4   :  { %5244 = vmatprep.subr.mxu0 %v12851_v50  ;;  %8921 = vmatprep.subr.mxu1 %v14290_v1 }
0x16a5   :  { %5245 = vmatpush1.msra.mxu0 %v12855_v6  ;;  %8922 = vmatpush3.msra.mxu1 %v12997_v44  ;;  %v14528_v6 = vld [vmem:[#allocation52_spill] sm:$0xff]  ;;  %v5429_v44 = vld [vmem:[#allocation24 + $0x120] sm:$0xff] }
0x16a6   :  { %5246 = vmatprep.subr.mxu0 %v12859_v43  ;;  %8923 = vmatprep.subr.mxu1 %v14290_v1  ;;  %v3873_v43 = vadd.f32 %v14528_v6, %v12546_v15  ;;  %v5400_v6 = vld [vmem:[#allocation24 + $0x38] sm:$0xff] }
0x16a7   :  { %5247 = vmatpush1.msra.mxu0 %v12863_v58  ;;  %8924 = vmatpush3.msra.mxu1 %v13003_v20  ;;  %v5427_v20 = vld [vmem:[#allocation24 + $0x110] sm:$0xff] }
0x16a8   :  { %5248 = vmatprep.subr.mxu0 %v12867_v21  ;;  %8925 = vmatprep.subr.mxu1 %v14290_v1 }
0x16a9   :  { %5249 = vmatpush1.msra.mxu0 %v12871_v60  ;;  %8926 = vmatpush3.msra.mxu1 %v12874_v35 }
0x16aa   :  { %5250 = vmatprep.subr.mxu0 %v12877_v42  ;;  %8927 = vmatprep.subr.mxu1 %v14290_v1 }
0x16ab   :  { %5251 = vmatpush1.msra.mxu0 %v12881_v49  ;;  %8928 = vmatpush3.msra.mxu1 %v12884_v53  ;;  %v13120_v49 = vld [vmem:[#allocation22] ss:$0 sm:$0xff] }
0x16ac   :  { %5252 = vmatprep.subr.mxu0 %v12887_v23  ;;  %8929 = vmatprep.subr.mxu1 %v14290_v1 }
0x16ad   :  { %5253 = vmatpush1.msra.mxu0 %v12891_v5  ;;  %8930 = vmatpush3.msra.mxu1 %v12894_v55  ;;  %v14529_v5 = vld [vmem:[#allocation69_spill] sm:$0xff] }
0x16ae   :  { %5254 = vmatprep.subr.mxu0 %v12897_v28  ;;  %8931 = vmatprep.subr.mxu1 %v14290_v1  ;;  %v3978_v55 = vadd.f32 %v14529_v5, %v12553_v10  ;;  %v14531_v5 = vld [vmem:[#allocation58_spill] sm:$0xff] }
0x16af   :  { %5255 = vmatpush1.msra.mxu0 %v12901_v57  ;;  %8932 = vmatpush3.msra.mxu1 %v12904_v8 }
0x16b0   :  { %5256 = vmatprep.subr.mxu0 %v12907_v14  ;;  %8933 = vmatprep.subr.mxu1 %v14290_v1 }
0x16b1   :  { %5257 = vmatpush1.msra.mxu0 %v12911_v22  ;;  %8934 = vmatpush3.msra.mxu1 %v12914_v29 }
0x16b2   :  { %5258 = vmatprep.subr.mxu0 %v12917_v30  ;;  %8935 = vmatprep.subr.mxu1 %v14290_v1 }
0x16b3   :  { %5259 = vmatpush1.msra.mxu0 %v14521_v47  ;;  %8936 = vmatpush3.msra.mxu1 %v14522_v41  ;;  %v5415_v47 = vld [vmem:[#allocation24 + $0xb0] sm:$0xff]  ;;  %v5416_v41 = vld [vmem:[#allocation24 + $0xb8] sm:$0xff] }
0x16b4   :  { %5260 = vmatprep.subr.mxu0 %v14523_v18  ;;  %8937 = vmatprep.subr.mxu1 %v14290_v1  ;;  %v5414_v18 = vld [vmem:[#allocation24 + $0xa8] sm:$0xff] }
0x16b5   :  { %5261 = vmatpush1.msra.mxu0 %v14524_v11  ;;  %8938 = vmatpush3.msra.mxu1 %v14525_v40  ;;  %v5412_v11 = vld [vmem:[#allocation24 + $0x98] sm:$0xff]  ;;  %v5413_v40 = vld [vmem:[#allocation24 + $0xa0] sm:$0xff] }
0x16b6   :  { %5294 = vmatprep.mubr.f32.mxu0 %v14290_v1  ;;  %8939 = vmatprep.mubr.msk.f32.mxu1 %vm10226_vm2, %v14290_v1 }
0x16b7   :  { %5466 = vmatprep.subr.mxu0 %v5439_v2  ;;  %8942 = vmatprep.subr.mxu1 %v5440_v3  ;;  %v5411_v2 = vld [vmem:[#allocation24 + $0x90] sm:$0xff] }
0x1756   :  { %v5130_v62 = vpop.f32.mrf.mxu0  ;;  %v5201_v45 = vpop.f32.mrf.mxu1 }
0x1757   :  { %v5205_v34 = vadd.f32 %v5130_v62, %v3871_v26  ;;  %v5219_v53 = vadd.f32 %v13120_v49, %v5201_v45  ;;  %v5408_v26 = vld [vmem:[#allocation24 + $0x78] sm:$0xff]  ;;  %v5406_v62 = vld [vmem:[#allocation24 + $0x68] sm:$0xff]  ;;  %v5407_v45 = vld [vmem:[#allocation24 + $0x70] sm:$0xff] }
0x1758   :  { %v8906_v61 = vpop.f32.mrf.mxu1  ;;  %v5132_v50 = vpop.f32.mrf.mxu0 }
0x1759   :  { %v7329_v4 = vmul.f32 -1.442695, %v5205_v34  ;;  %v5212_v58 = vadd.f32 %v5132_v50, %v3873_v43  ;;  %v5405_v34 = vld [vmem:[#allocation24 + $0x60] sm:$0xff]  ;;  %v5403_v61 = vld [vmem:[#allocation24 + $0x50] sm:$0xff]  ;;  %v5402_v50 = vld [vmem:[#allocation24 + $0x48] sm:$0xff] }
0x175a   :  { %v5401_v43 = vld [vmem:[#allocation24 + $0x40] sm:$0xff] }
0x175b   :  { %9552 = vpow2.f32 %v7329_v4  ;;  %v7330_v21 = vmul.f32 -1.442695, %v5212_v58  ;;  %v5404_v4 = vld [vmem:[#allocation24 + $0x58] sm:$0xff]  ;;  %v5399_v58 = vld [vmem:[#allocation24 + $0x30] sm:$0xff] }
0x175d   :  { %9554 = vpow2.f32 %v7330_v21  ;;  %v5397_v21 = vld [vmem:[#allocation24 + $0x20] sm:$0xff] }
0x1768   :  { %v9553_v60 = vpop.eup %9552 }
0x1769   :  { %v5209_v35 = vadd.f32 1.0, %v9553_v60  ;;  %v5398_v60 = vld [vmem:[#allocation24 + $0x28] sm:$0xff] }
0x176a   :  { %v9555_v42 = vpop.eup %9554 }
0x176b   :  { %9556 = vrcp.f32 %v5209_v35  ;;  %v5216_v8 = vadd.f32 1.0, %v9555_v42  ;;  %v5396_v35 = vld [vmem:[#allocation24 + $0x18] sm:$0xff]  ;;  %v5394_v42 = vld [vmem:[#allocation24 + $0x8] sm:$0xff] }
0x1778   :  { %v9557_v23 = vpop.eup %9556 }
0x1779   :  { %v5220_v28 = vmul.f32 %v9557_v23, %v5219_v53  ;;  %v5395_v53 = vld [vmem:[#allocation24 + $0x10] sm:$0xff]  ;;  %v5393_v23 = vld [vmem:[#allocation24] sm:$0xff] }
0x177b   :  { %v5221_v57 = vadd.f32 %v5220_v28, %v3978_v55  ;;  %v14532_v55 = vld [vmem:[#allocation50_spill] sm:$0xff]  ;;  %v14533_v28 = vld [vmem:[#allocation67_spill] sm:$0xff] }
0x177d   :  { %9558 = vtanh.f32 %v5221_v57  ;;  %v13153_v57 = vld [vmem:[#allocation25 + $0x170] sm:$0xff] }
0x177e   :  { %9560 = vrcp.f32 %v5216_v8  ;;  %14534 = vst [vmem:[#allocation51_spill] sm:$0xff] %v13153_v57  ;;  %v13156_v8 = vld [vmem:[#allocation25 + $0x168] sm:$0xff] }
0x178a   :  { %v9559_v14 = vpop.eup %9558 }
0x178b   :  { %v5223_v22 = vsub.f32 %v13047_v39, %v9559_v14  ;;  %v9561_v29 = vpop.eup %9560 }
0x178d   :  { %v5224_v30 = vmul.f32 %v9561_v29, %v5223_v22  ;;  %v13168_v22 = vld [vmem:[#allocation25 + $0x138] sm:$0xff]  ;;  %v13171_v29 = vld [vmem:[#allocation25 + $0x128] sm:$0xff] }
0x178f   :  { %v13126_v31 = vadd.f32 %v9559_v14, %v5224_v30  ;;  %v13159_v14 = vld [vmem:[#allocation25 + $0x158] sm:$0xff]  ;;  %v13174_v30 = vld [vmem:[#allocation25 + $0x120] sm:$0xff] }
0x1791   :  { %5295 = vmatmul.mubr.f32.vlgmr.msra.gmra.mxu0 %v13126_v31  ;;  %8940 = vmatmul.mubr.f32.vlgmr.msra.gmra.mxu1 %v13126_v31 }
0x1792   :  { %5467 = vmatpush1.msra.mxu0 %v5438_v33  ;;  %8943 = vmatpush3.msra.mxu1 %v5440_v3  ;;  %v5409_v3 = vld [vmem:[#allocation24 + $0x80] sm:$0xff]  ;;  %v13177_v33 = vld [vmem:[#allocation25 + $0x110] sm:$0xff] }
0x1793   :  { %5468 = vmatprep.subr.mxu0 %v5436_v59  ;;  %8944 = vmatprep.subr.mxu1 %v5437_v0  ;;  %v13180_v59 = vld [vmem:[#allocation25 + $0x108] sm:$0xff] }
0x1794   :  { %8974 = vmatprep.mubr.f32.mxu1 %v14530_v37  ;;  %5469 = vmatpush1.msra.mxu0 %v5435_v24  ;;  %v13186_v24 = vld [vmem:[#allocation25 + $0xf0] sm:$0xff] }
0x1795   :  { %8945 = vmatpush3.msra.mxu1 %v5437_v0  ;;  %5470 = vmatprep.subr.mxu0 %v5433_v51  ;;  %v13183_v0 = vld [vmem:[#allocation25 + $0xf8] sm:$0xff]  ;;  %v13189_v51 = vld [vmem:[#allocation25 + $0xe0] sm:$0xff] }
0x1796   :  { %8946 = vmatprep.subr.mxu1 %v5434_v36  ;;  %5471 = vmatpush1.msra.mxu0 %v5432_v52  ;;  %v13195_v52 = vld [vmem:[#allocation25 + $0xc8] sm:$0xff] }
0x1797   :  { %8947 = vmatpush3.msra.mxu1 %v5434_v36  ;;  %5472 = vmatprep.subr.mxu0 %v5430_v56  ;;  %v13192_v36 = vld [vmem:[#allocation25 + $0xd8] sm:$0xff]  ;;  %v13201_v56 = vld [vmem:[#allocation25 + $0xb0] sm:$0xff] }
0x1798   :  { %8948 = vmatprep.subr.mxu1 %v5431_v38  ;;  %5473 = vmatpush1.msra.mxu0 %v5429_v44  ;;  %v13207_v44 = vld [vmem:[#allocation25 + $0x98] sm:$0xff] }
0x1799   :  { %8949 = vmatpush3.msra.mxu1 %v5431_v38  ;;  %5474 = vmatprep.subr.mxu0 %v5427_v20  ;;  %v13204_v38 = vld [vmem:[#allocation25 + $0xa8] sm:$0xff]  ;;  %v13210_v20 = vld [vmem:[#allocation25 + $0x90] sm:$0xff] }
0x179a   :  { %8950 = vmatprep.subr.mxu1 %v5428_v17  ;;  %5475 = vmatpush1.msra.mxu0 %v5426_v12  ;;  %v13216_v12 = vld [vmem:[#allocation25 + $0x78] sm:$0xff] }
0x179b   :  { %8951 = vmatpush3.msra.mxu1 %v5428_v17  ;;  %5476 = vmatprep.subr.mxu0 %v5424_v46  ;;  %v13213_v17 = vld [vmem:[#allocation25 + $0x80] sm:$0xff]  ;;  %v13219_v46 = vld [vmem:[#allocation25 + $0x68] sm:$0xff] }
0x179c   :  { %8952 = vmatprep.subr.mxu1 %v5425_v54  ;;  %5477 = vmatpush1.msra.mxu0 %v5423_v16  ;;  %v13225_v16 = vld [vmem:[#allocation25 + $0x50] sm:$0xff] }
0x179d   :  { %8953 = vmatpush3.msra.mxu1 %v5425_v54  ;;  %5478 = vmatprep.subr.mxu0 %v5421_v19  ;;  %v13222_v54 = vld [vmem:[#allocation25 + $0x60] sm:$0xff]  ;;  %v13228_v19 = vld [vmem:[#allocation25 + $0x48] sm:$0xff] }
0x179e   :  { %8954 = vmatprep.subr.mxu1 %v5422_v25  ;;  %5479 = vmatpush1.msra.mxu0 %v5420_v27  ;;  %v13234_v27 = vld [vmem:[#allocation25 + $0x30] sm:$0xff] }
0x179f   :  { %8955 = vmatpush3.msra.mxu1 %v5422_v25  ;;  %5480 = vmatprep.subr.mxu0 %v5418_v13  ;;  %v13231_v25 = vld [vmem:[#allocation25 + $0x38] sm:$0xff]  ;;  %v13237_v13 = vld [vmem:[#allocation25 + $0x20] sm:$0xff] }
0x17a0   :  { %8956 = vmatprep.subr.mxu1 %v5419_v48  ;;  %5481 = vmatpush1.msra.mxu0 %v5417_v32  ;;  %v13241_v32 = vld [vmem:[#allocation25 + $0x8] sm:$0xff] }
0x17a1   :  { %8957 = vmatpush3.msra.mxu1 %v5419_v48  ;;  %5482 = vmatprep.subr.mxu0 %v5415_v47  ;;  %v13239_v48 = vld [vmem:[#allocation25 + $0x18] sm:$0xff]  ;;  %14536 = vst [vmem:[#allocation60_spill] sm:$0xff] %v13241_v32  ;;  %v13244_v47 = vld [vmem:[#allocation25] sm:$0xff] }
0x17a2   :  { %8958 = vmatprep.subr.mxu1 %v5416_v41  ;;  %5483 = vmatpush1.msra.mxu0 %v5414_v18  ;;  %14535 = vst [vmem:[#allocation43_spill] sm:$0xff] %v13239_v48  ;;  %14537 = vst [vmem:[#allocation65_spill] sm:$0xff] %v13244_v47  ;;  %v13252_v18 = vld [vmem:[#allocation25 + $0x160] sm:$0xff] }
0x17a3   :  { %8959 = vmatpush3.msra.mxu1 %v5416_v41  ;;  %5484 = vmatprep.subr.mxu0 %v5412_v11  ;;  %v13246_v41 = vld [vmem:[#allocation25 + $0x178] sm:$0xff]  ;;  %v13254_v11 = vld [vmem:[#allocation25 + $0x148] sm:$0xff] }
0x17a4   :  { %8960 = vmatprep.subr.mxu1 %v5413_v40  ;;  %5485 = vmatpush1.msra.mxu0 %v5411_v2  ;;  %v13264_v2 = vld [vmem:[#allocation25 + $0x118] sm:$0xff] }
0x17a5   :  { %8961 = vmatpush3.msra.mxu1 %v5413_v40  ;;  %5486 = vmatprep.subr.mxu0 %v5409_v3  ;;  %v13259_v40 = vld [vmem:[#allocation25 + $0x130] sm:$0xff]  ;;  %v13268_v3 = vld [vmem:[#allocation25 + $0x100] sm:$0xff] }
0x17a6   :  { %8962 = vmatprep.subr.mxu1 %v5410_v63  ;;  %5487 = vmatpush1.msra.mxu0 %v5408_v26  ;;  %v13276_v26 = vld [vmem:[#allocation25 + $0xd0] sm:$0xff] }
0x17a7   :  { %8963 = vmatpush3.msra.mxu1 %v5410_v63  ;;  %5488 = vmatprep.subr.mxu0 %v5406_v62  ;;  %v13272_v63 = vld [vmem:[#allocation25 + $0xe8] sm:$0xff]  ;;  %v13280_v62 = vld [vmem:[#allocation25 + $0xb8] sm:$0xff] }
0x17a8   :  { %8964 = vmatprep.subr.mxu1 %v5407_v45  ;;  %5489 = vmatpush1.msra.mxu0 %v5405_v34  ;;  %v13288_v34 = vld [vmem:[#allocation25 + $0x88] sm:$0xff] }
0x17a9   :  { %8965 = vmatpush3.msra.mxu1 %v5407_v45  ;;  %5490 = vmatprep.subr.mxu0 %v5403_v61  ;;  %v13284_v45 = vld [vmem:[#allocation25 + $0xa0] sm:$0xff]  ;;  %v13292_v61 = vld [vmem:[#allocation25 + $0x70] sm:$0xff] }
0x17aa   :  { %8966 = vmatprep.subr.mxu1 %v5404_v4  ;;  %5491 = vmatpush1.msra.mxu0 %v5402_v50  ;;  %v13300_v50 = vld [vmem:[#allocation25 + $0x40] sm:$0xff] }
0x17ab   :  { %8967 = vmatpush3.msra.mxu1 %v5404_v4  ;;  %5492 = vmatprep.subr.mxu0 %v5400_v6  ;;  %v13296_v4 = vld [vmem:[#allocation25 + $0x58] sm:$0xff]  ;;  %v13304_v6 = vld [vmem:[#allocation25 + $0x28] sm:$0xff] }
0x17ac   :  { %8968 = vmatprep.subr.mxu1 %v5401_v43  ;;  %5493 = vmatpush1.msra.mxu0 %v5399_v58  ;;  %14538 = vst [vmem:[#allocation40_spill] sm:$0xff] %v13304_v6  ;;  %v14540_v58 = vld [vmem:[#allocation48_spill] sm:$0xff] }
0x17ad   :  { %8969 = vmatpush3.msra.mxu1 %v5401_v43  ;;  %5494 = vmatprep.subr.mxu0 %v5397_v21  ;;  %v13308_v43 = vld [vmem:[#allocation25 + $0x10] sm:$0xff]  ;;  %v3877_v21 = vadd.f32 %v14540_v58, %v14526_v7  ;;  %v14542_v58 = vld [vmem:[#allocation66_spill] sm:$0xff] }
0x17ae   :  { %8970 = vmatprep.subr.mxu1 %v5398_v60  ;;  %5495 = vmatpush1.msra.mxu0 %v5396_v35  ;;  %14539 = vst [vmem:[#allocation49_spill] sm:$0xff] %v13308_v43 }
0x17af   :  { %8971 = vmatpush3.msra.mxu1 %v5398_v60  ;;  %5496 = vmatprep.subr.mxu0 %v5394_v42 }
0x17b0   :  { %8972 = vmatprep.subr.mxu1 %v5395_v53  ;;  %5497 = vmatpush1.msra.mxu0 %v5393_v23 }
0x17b1   :  { %5530 = vmatprep.mubr.f32.mxu0 %v14290_v1  ;;  %8973 = vmatpush3.msra.mxu1 %v5395_v53 }
0x17b2   :  { %5531 = vmatmul.mubr.f32.vlgmr.msra.gmra.mxu0 %v14530_v37  ;;  %8975 = vmatmul.mubr.f32.vlgmr.msra.gmra.mxu1 %v14531_v5  ;;  %v13198_v37 = vld [vmem:[#allocation25 + $0xc0] sm:$0xff] }
0x17b3   :  { %8977 = vmatprep.mubr.f32.mxu1 %v14532_v55  ;;  %5536 = vmatprep.mubr.f32.mxu0 %v14290_v1 }
0x17b4   :  { %8986 = vmatprep.subr.mxu1 %v14290_v1  ;;  %5766 = vmatprep.subr.mxu0 %v13153_v57 }
0x17b5   :  { %5767 = vmatpush1.msra.mxu0 %v13156_v8  ;;  %8987 = vmatpush3.msra.mxu1 %v13246_v41 }
0x17b6   :  { %5537 = vmatmul.mubr.f32.gmra.mxu0 %v14531_v5  ;;  %8978 = vmatmul.mubr.f32.gmra.mxu1 %v14533_v28 }
0x17b7   :  { %8980 = vmatprep.mubr.f32.mxu1 %v12950_v9  ;;  %5542 = vmatprep.mubr.f32.mxu0 %v14290_v1 }
0x17b8   :  { %5768 = vmatprep.subr.mxu0 %v13159_v14  ;;  %8988 = vmatprep.subr.mxu1 %v14290_v1 }
0x17b9   :  { %8989 = vmatpush3.msra.mxu1 %v13252_v18 }
0x17ba   :  { %5543 = vmatmul.mubr.f32.gmra.mxu0 %v14532_v55  ;;  %8981 = vmatmul.mubr.f32.gmra.mxu1 %v13047_v39  ;;  %v14541_v55 = vld [vmem:[#allocation62_spill] sm:$0xff] }
0x17bb   :  { %8983 = vmatprep.mubr.f32.mxu1 %v13126_v31  ;;  %5548 = vmatprep.mubr.f32.mxu0 %v14290_v1 }
0x17bc   :  { %8990 = vmatprep.subr.mxu1 %v14290_v1 }
0x17bd   :  { %8991 = vmatpush3.msra.mxu1 %v13254_v11 }
0x17be   :  { %5549 = vmatmul.mubr.f32.gmra.mxu0 %v14533_v28  ;;  %8992 = vmatprep.subr.mxu1 %v14290_v1  ;;  %v3879_v28 = vadd.f32 %v14541_v55, %v12546_v15 }
0x17bf   :  { %5554 = vmatprep.mubr.f32.mxu0 %v14290_v1  ;;  %8993 = vmatpush3.msra.mxu1 %v13259_v40 }
0x17c0   :  { %8994 = vmatprep.subr.mxu1 %v14290_v1 }
0x17c1   :  { %8995 = vmatpush3.msra.mxu1 %v13264_v2 }
0x17c2   :  { %5555 = vmatmul.mubr.f32.gmra.mxu0 %v12950_v9  ;;  %v13162_v9 = vld [vmem:[#allocation25 + $0x150] sm:$0xff]  ;;  %8996 = vmatprep.subr.mxu1 %v14290_v1 }
0x17c3   :  { %5560 = vmatprep.mubr.f32.mxu0 %v14290_v1  ;;  %5769 = vmatpush1.msra.mxu0 %v13162_v9 }
0x17c4   :  { %8997 = vmatpush3.msra.mxu1 %v13268_v3 }
0x17c5   :  { %8998 = vmatprep.subr.mxu1 %v14290_v1 }
0x17c6   :  { %5561 = vmatmul.mubr.f32.gmra.mxu0 %v13047_v39  ;;  %v13165_v39 = vld [vmem:[#allocation25 + $0x140] sm:$0xff]  ;;  %8999 = vmatpush3.msra.mxu1 %v13272_v63 }
0x17c7   :  { %5566 = vmatprep.mubr.f32.mxu0 %v14290_v1  ;;  %5770 = vmatprep.subr.mxu0 %v13165_v39 }
0x17c8   :  { %5771 = vmatpush1.msra.mxu0 %v13168_v22  ;;  %9000 = vmatprep.subr.mxu1 %v14290_v1 }
0x17c9   :  { %5772 = vmatprep.subr.mxu0 %v13171_v29  ;;  %9001 = vmatpush3.msra.mxu1 %v13276_v26 }
0x17ca   :  { %5567 = vmatmul.mubr.f32.gmra.mxu0 %v13126_v31  ;;  %9002 = vmatprep.subr.mxu1 %v14290_v1 }
0x17cb   :  { %5572 = vmatprep.mubr.f32.mxu0 %v14290_v1  ;;  %5773 = vmatpush1.msra.mxu0 %v13174_v30 }
0x17cc   :  { %5774 = vmatprep.subr.mxu0 %v13177_v33  ;;  %9003 = vmatpush3.msra.mxu1 %v13280_v62 }
0x17cd   :  { %5775 = vmatpush1.msra.mxu0 %v13180_v59  ;;  %9004 = vmatprep.subr.mxu1 %v14290_v1 }
0x17ce   :  { %5776 = vmatprep.subr.mxu0 %v13183_v0  ;;  %9005 = vmatpush3.msra.mxu1 %v13284_v45 }
0x17cf   :  { %5777 = vmatpush1.msra.mxu0 %v13186_v24  ;;  %9006 = vmatprep.subr.mxu1 %v14290_v1 }
0x17d0   :  { %5778 = vmatprep.subr.mxu0 %v13189_v51  ;;  %9007 = vmatpush3.msra.mxu1 %v13288_v34 }
0x17d1   :  { %5779 = vmatpush1.msra.mxu0 %v13192_v36  ;;  %9008 = vmatprep.subr.mxu1 %v14290_v1 }
0x17d2   :  { %5780 = vmatprep.subr.mxu0 %v13195_v52  ;;  %9009 = vmatpush3.msra.mxu1 %v13292_v61 }
0x17d3   :  { %5781 = vmatpush1.msra.mxu0 %v13198_v37  ;;  %9010 = vmatprep.subr.mxu1 %v14290_v1 }
0x17d4   :  { %5782 = vmatprep.subr.mxu0 %v13201_v56  ;;  %9011 = vmatpush3.msra.mxu1 %v13296_v4 }
0x17d5   :  { %5783 = vmatpush1.msra.mxu0 %v13204_v38  ;;  %9012 = vmatprep.subr.mxu1 %v14290_v1 }
0x17d6   :  { %5784 = vmatprep.subr.mxu0 %v13207_v44  ;;  %9013 = vmatpush3.msra.mxu1 %v13300_v50 }
0x17d7   :  { %5785 = vmatpush1.msra.mxu0 %v13210_v20  ;;  %9014 = vmatprep.subr.mxu1 %v14290_v1 }
0x17d8   :  { %5786 = vmatprep.subr.mxu0 %v13213_v17  ;;  %9015 = vmatpush3.msra.mxu1 %v13304_v6 }
0x17d9   :  { %5787 = vmatpush1.msra.mxu0 %v13216_v12  ;;  %9016 = vmatprep.subr.mxu1 %v14290_v1 }
0x17da   :  { %5788 = vmatprep.subr.mxu0 %v13219_v46  ;;  %9017 = vmatpush3.msra.mxu1 %v13308_v43 }
0x17db   :  { %5789 = vmatpush1.msra.mxu0 %v13222_v54  ;;  %9021 = vmatprep.subr.mxu1 %v14290_v1 }
0x17dc   :  { %5790 = vmatprep.subr.mxu0 %v13225_v16 }
0x17dd   :  { %5791 = vmatpush1.msra.mxu0 %v13228_v19 }
0x17de   :  { %5792 = vmatprep.subr.mxu0 %v13231_v25 }
0x17df   :  { %5793 = vmatpush1.msra.mxu0 %v13234_v27 }
0x17e0   :  { %5794 = vmatprep.subr.mxu0 %v13237_v13 }
0x17e1   :  { %5795 = vmatpush1.msra.mxu0 %v13239_v48 }
0x17e2   :  { %5796 = vmatprep.subr.mxu0 %v13241_v32 }
0x17e3   :  { %5797 = vmatpush1.msra.mxu0 %v13244_v47 }
0x17e4   :  { %5932 = vmatprep.subr.mxu0 %v13153_v57 }
0x1851   :  { %v5296_v60 = vpop.f32.mrf.mxu0  ;;  %v5367_v35 = vpop.f32.mrf.mxu1 }
0x1852   :  { %v5371_v42 = vadd.f32 %v5296_v60, %v3877_v21  ;;  %v5385_v48 = vadd.f32 %v13120_v49, %v5367_v35  ;;  %v3983_v21 = vadd.f32 %v14542_v58, %v12553_v10  ;;  %v14543_v10 = vld [vmem:[#allocation43_spill] sm:$0xff]  ;;  %v14544_v49 = vld [vmem:[#allocation40_spill] sm:$0xff] }
0x1853   :  { %v8941_v53 = vpop.f32.mrf.mxu1  ;;  %v5298_v5 = vpop.f32.mrf.mxu0 }
0x1854   :  { %v7331_v23 = vmul.f32 -1.442695, %v5371_v42  ;;  %v5378_v57 = vadd.f32 %v5298_v5, %v3879_v28 }
0x1856   :  { %9562 = vpow2.f32 %v7331_v23  ;;  %v7332_v47 = vmul.f32 -1.442695, %v5378_v57 }
0x1858   :  { %9564 = vpow2.f32 %v7332_v47  ;;  %v14547_v47 = vld [vmem:[#allocation49_spill] sm:$0xff] }
0x1863   :  { %v9563_v32 = vpop.eup %9562 }
0x1864   :  { %v5375_v6 = vadd.f32 1.0, %v9563_v32 }
0x1865   :  { %v9565_v43 = vpop.eup %9564 }
0x1866   :  { %9566 = vrcp.f32 %v5375_v6  ;;  %v5382_v53 = vadd.f32 1.0, %v9565_v43  ;;  %v14548_v6 = vld [vmem:[#allocation51_spill] sm:$0xff] }
0x1872   :  { %v5532_v43 = vpop.f32.mrf.mxu0 }
0x1873   :  { %v9567_v7 = vpop.eup %9566 }
0x1874   :  { %v5386_v60 = vmul.f32 %v9567_v7, %v5385_v48  ;;  %v14546_v48 = vld [vmem:[#allocation65_spill] sm:$0xff]  ;;  %v5534_v35 = vpop.f32.mrf.mxu0 }
0x1876   :  { %v5387_v42 = vadd.f32 %v5386_v60, %v3983_v21  ;;  %v13394_v55 = vpop.f32.mrf.mxu0 }
0x1877   :  { %14549 = vst [vmem:[#allocation64_spill] sm:$0xff] %v13394_v55 }
0x1878   :  { %9568 = vtanh.f32 %v5387_v42  ;;  %v13396_v28 = vpop.f32.mrf.mxu0  ;;  %v13406_v42 = vpop.f32.mrf.mxu1 }
0x1879   :  { %9570 = vrcp.f32 %v5382_v53  ;;  %14550 = vst [vmem:[#allocation41_spill] sm:$0xff] %v13396_v28  ;;  %14555 = vst [vmem:[#allocation68_spill] sm:$0xff] %v13406_v42 }
0x187a   :  { %v13398_v7 = vpop.f32.mrf.mxu0 }
0x187b   :  { %14551 = vst [vmem:[#allocation63_spill] sm:$0xff] %v13398_v7 }
0x187c   :  { %v13400_v58 = vpop.f32.mrf.mxu0 }
0x187d   :  { %14552 = vst [vmem:[#allocation71_spill] sm:$0xff] %v13400_v58 }
0x187e   :  { %v13402_v21 = vpop.f32.mrf.mxu0 }
0x187f   :  { %14553 = vst [vmem:[#allocation57_spill] sm:$0xff] %v13402_v21 }
0x1880   :  { %v13404_v60 = vpop.f32.mrf.mxu0 }
0x1881   :  { %14554 = vst [vmem:[#allocation55_spill] sm:$0xff] %v13404_v60  ;;  %v5441_v60 = vld [vmem:[#allocation27] sm:$0x7] }
0x1882   :  { %v13408_v53 = vpop.f32.mrf.mxu0 }
0x1883   :  { %14556 = vst [vmem:[#allocation45_spill] sm:$0xff] %v13408_v53  ;;  %v14566_v53 = vld [vmem:[#allocation54_spill] sm:$0xff] }
0x1884   :  { %v13429_v55 = vrot.slane %v5441_v60, %v14566_v53 }
0x1885   :  { %v9569_v23 = vpop.eup %9568 }
0x1886   :  { %v5389_v15 = vsub.f32 %v13126_v31, %v9569_v23  ;;  %v9571_v57 = vpop.eup %9570  ;;  %v14545_v31 = vld [vmem:[#allocation60_spill] sm:$0xff]  ;;  %14567 = vst [vmem:[#allocation58_spill] sm:$0xff] %v13429_v55 }
0x1888   :  { %v5390_v5 = vmul.f32 %v9571_v57, %v5389_v15  ;;  %v13410_v15 = vpop.f32.mrf.mxu0 }
0x1889   :  { %14557 = vst [vmem:[#allocation47_spill] sm:$0xff] %v13410_v15 }
0x188a   :  { %v5391_v32 = vadd.f32 %v9569_v23, %v5390_v5  ;;  %v5645_v23 = vpop.f32.mrf.mxu1  ;;  %v13414_v5 = vpop.f32.mrf.mxu0 }
0x188b   :  { %14559 = vst [vmem:[#allocation44_spill] sm:$0xff] %v13414_v5 }
0x188c   :  { %5573 = vmatmul.mubr.f32.gmra.mxu0 %v5391_v32  ;;  %8984 = vmatmul.mubr.f32.gmra.mxu1 %v5391_v32  ;;  %v13412_v57 = vpop.f32.mrf.mxu1  ;;  %v13418_v7 = vpop.f32.mrf.mxu0 }
0x188d   :  { %5830 = vmatprep.mubr.f32.mxu0 %v14290_v1  ;;  %9018 = vmatprep.mubr.msk.f32.mxu1 %vm10226_vm2, %v14290_v1  ;;  %14558 = vst [vmem:[#allocation53_spill] sm:$0xff] %v13412_v57  ;;  %14561 = vst [vmem:[#allocation61_spill] sm:$0xff] %v13418_v7 }
0x188e   :  { %v13416_v32 = vpop.f32.mrf.mxu1  ;;  %v13422_v21 = vpop.f32.mrf.mxu0 }
0x188f   :  { %14560 = vst [vmem:[#allocation42_spill] sm:$0xff] %v13416_v32  ;;  %14563 = vst [vmem:[#allocation52_spill] sm:$0xff] %v13422_v21 }
0x1890   :  { %5831 = vmatmul.mubr.f32.vlgmr.msra.gmra.mxu0 %v14290_v1  ;;  %9019 = vmatmul.mubr.f32.vlgmr.msra.gmra.mxu1 %v14290_v1  ;;  %v13420_v58 = vpop.f32.mrf.mxu1  ;;  %v13426_v42 = vpop.f32.mrf.mxu0 }
0x1891   :  { %5933 = vmatpush1.msra.mxu0 %v13156_v8  ;;  %9022 = vmatpush3.msra.mxu1 %v13246_v41  ;;  %14562 = vst [vmem:[#allocation70_spill] sm:$0xff] %v13420_v58  ;;  %14565 = vst [vmem:[#allocation56_spill] sm:$0xff] %v13426_v42  ;;  %v5533_v58 = vadd.f32 %v5532_v43, %v13429_v55  ;;  %v14572_v42 = vld [vmem:[#allocation59_spill] sm:$0xff] }
0x1892   :  { %5934 = vmatprep.subr.mxu0 %v13159_v14  ;;  %9023 = vmatprep.subr.mxu1 %v14290_v1  ;;  %v13424_v28 = vpop.f32.mrf.mxu1 }
0x1893   :  { %5935 = vmatpush1.msra.mxu0 %v13162_v9  ;;  %9024 = vmatpush3.msra.mxu1 %v13252_v18  ;;  %14564 = vst [vmem:[#allocation69_spill] sm:$0xff] %v13424_v28 }
0x1894   :  { %5936 = vmatprep.subr.mxu0 %v13165_v39  ;;  %9025 = vmatprep.subr.mxu1 %v14290_v1 }
0x1895   :  { %5937 = vmatpush1.msra.mxu0 %v13168_v22  ;;  %9026 = vmatpush3.msra.mxu1 %v13254_v11 }
0x1896   :  { %5938 = vmatprep.subr.mxu0 %v13171_v29  ;;  %9027 = vmatprep.subr.mxu1 %v14290_v1 }
0x1897   :  { %5939 = vmatpush1.msra.mxu0 %v13174_v30  ;;  %9028 = vmatpush3.msra.mxu1 %v13259_v40 }
0x1898   :  { %5940 = vmatprep.subr.mxu0 %v13177_v33  ;;  %9029 = vmatprep.subr.mxu1 %v14290_v1 }
0x1899   :  { %5941 = vmatpush1.msra.mxu0 %v13180_v59  ;;  %9030 = vmatpush3.msra.mxu1 %v13264_v2 }
0x189a   :  { %5942 = vmatprep.subr.mxu0 %v13183_v0  ;;  %9031 = vmatprep.subr.mxu1 %v14290_v1 }
0x189b   :  { %5943 = vmatpush1.msra.mxu0 %v13186_v24  ;;  %9032 = vmatpush3.msra.mxu1 %v13268_v3 }
0x189c   :  { %5944 = vmatprep.subr.mxu0 %v13189_v51  ;;  %9033 = vmatprep.subr.mxu1 %v14290_v1 }
0x189d   :  { %5945 = vmatpush1.msra.mxu0 %v13192_v36  ;;  %9034 = vmatpush3.msra.mxu1 %v13272_v63 }
0x189e   :  { %5946 = vmatprep.subr.mxu0 %v13195_v52  ;;  %9035 = vmatprep.subr.mxu1 %v14290_v1 }
0x189f   :  { %5947 = vmatpush1.msra.mxu0 %v13198_v37  ;;  %9036 = vmatpush3.msra.mxu1 %v13276_v26 }
0x18a0   :  { %5948 = vmatprep.subr.mxu0 %v13201_v56  ;;  %9037 = vmatprep.subr.mxu1 %v14290_v1 }
0x18a1   :  { %5949 = vmatpush1.msra.mxu0 %v13204_v38  ;;  %9038 = vmatpush3.msra.mxu1 %v13280_v62 }
0x18a2   :  { %5950 = vmatprep.subr.mxu0 %v13207_v44  ;;  %9039 = vmatprep.subr.mxu1 %v14290_v1 }
0x18a3   :  { %5951 = vmatpush1.msra.mxu0 %v13210_v20  ;;  %9040 = vmatpush3.msra.mxu1 %v13284_v45 }
0x18a4   :  { %5952 = vmatprep.subr.mxu0 %v13213_v17  ;;  %9041 = vmatprep.subr.mxu1 %v14290_v1 }
0x18a5   :  { %5953 = vmatpush1.msra.mxu0 %v13216_v12  ;;  %9042 = vmatpush3.msra.mxu1 %v13288_v34 }
0x18a6   :  { %5954 = vmatprep.subr.mxu0 %v13219_v46  ;;  %9043 = vmatprep.subr.mxu1 %v14290_v1 }
0x18a7   :  { %5955 = vmatpush1.msra.mxu0 %v13222_v54  ;;  %9044 = vmatpush3.msra.mxu1 %v13292_v61 }
0x18a8   :  { %5956 = vmatprep.subr.mxu0 %v13225_v16  ;;  %9045 = vmatprep.subr.mxu1 %v14290_v1 }
0x18a9   :  { %5957 = vmatpush1.msra.mxu0 %v13228_v19  ;;  %9046 = vmatpush3.msra.mxu1 %v13296_v4 }
0x18aa   :  { %5958 = vmatprep.subr.mxu0 %v13231_v25  ;;  %9047 = vmatprep.subr.mxu1 %v14290_v1 }
0x18ab   :  { %5959 = vmatpush1.msra.mxu0 %v13234_v27  ;;  %9048 = vmatpush3.msra.mxu1 %v13300_v50 }
0x18ac   :  { %5960 = vmatprep.subr.mxu0 %v13237_v13  ;;  %9049 = vmatprep.subr.mxu1 %v14290_v1 }
0x18ad   :  { %5961 = vmatpush1.msra.mxu0 %v14543_v10  ;;  %9050 = vmatpush3.msra.mxu1 %v14544_v49 }
0x18ae   :  { %5962 = vmatprep.subr.mxu0 %v14545_v31  ;;  %9051 = vmatprep.subr.mxu1 %v14290_v1 }
0x18af   :  { %5963 = vmatpush1.msra.mxu0 %v14546_v48  ;;  %5996 = vmatprep.mubr.f32.mxu0 %v14290_v1  ;;  %v13441_v48 = vrot.slane %v5441_v60, %v14572_v42 }
0x18b0   :  { %9052 = vmatpush3.msra.mxu1 %v14547_v47  ;;  %9053 = vmatprep.mubr.msk.f32.mxu1 %vm10226_vm2, %v14290_v1 }
0x18b1   :  { %6098 = vmatprep.subr.mxu0 %v14548_v6  ;;  %9056 = vmatprep.subr.mxu1 %v14290_v1 }
0x194c   :  { %v13431_v15 = vpop.f32.mrf.mxu0  ;;  %v13433_v57 = vpop.f32.mrf.mxu1 }
0x194d   :  { %14568 = vst [vmem:[#allocation50_spill] sm:$0xff] %v13431_v15  ;;  %14569 = vst [vmem:[#allocation67_spill] sm:$0xff] %v13433_v57  ;;  %v5535_v15 = vadd.f32 %v5534_v35, %v13441_v48 }
0x194e   :  { %v13435_v5 = vpop.f32.mrf.mxu0  ;;  %v13437_v32 = vpop.f32.mrf.mxu1 }
0x194f   :  { %14570 = vst [vmem:[#allocation48_spill] sm:$0xff] %v13435_v5  ;;  %14571 = vst [vmem:[#allocation62_spill] sm:$0xff] %v13437_v32  ;;  %v13444_v32 = vld [vmem:[#allocation28] ss:$0 sm:$0xff] }
0x1950   :  { %v5832_v7 = vpop.f32.mrf.mxu0  ;;  %v5903_v21 = vpop.f32.mrf.mxu1 }
0x1951   :  { %v5907_v6 = vadd.f32 %v5832_v7, %v5533_v58  ;;  %v5921_v43 = vadd.f32 %v13444_v32, %v5903_v21  ;;  %v14576_v21 = vld [vmem:[#allocation60_spill] sm:$0xff] }
0x1952   :  { %v9020_v47 = vpop.f32.mrf.mxu1  ;;  %v5834_v53 = vpop.f32.mrf.mxu0 }
0x1953   :  { %v7334_v28 = vmul.f32 -1.442695, %v5907_v6  ;;  %v5914_v31 = vadd.f32 %v5834_v53, %v5535_v15  ;;  %v14573_v47 = vld [vmem:[#allocation46_spill] sm:$0xff]  ;;  %v14579_v53 = vld [vmem:[#allocation51_spill] sm:$0xff] }
0x1954   :  { %v13448_v6 = vrot.slane %v5441_v60, %v14573_v47  ;;  %v14577_v60 = vld [vmem:[#allocation65_spill] sm:$0xff] }
0x1955   :  { %9572 = vpow2.f32 %v7334_v28  ;;  %v7335_v57 = vmul.f32 -1.442695, %v5914_v31 }
0x1956   :  { %v5646_v58 = vadd.f32 %v5645_v23, %v13448_v6  ;;  %v14578_v23 = vld [vmem:[#allocation49_spill] sm:$0xff] }
0x1957   :  { %9574 = vpow2.f32 %v7335_v57 }
0x1962   :  { %v9573_v49 = vpop.eup %9572 }
0x1963   :  { %v5911_v5 = vadd.f32 1.0, %v9573_v49 }
0x1964   :  { %v9575_v7 = vpop.eup %9574 }
0x1965   :  { %9576 = vrcp.f32 %v5911_v5  ;;  %v5918_v55 = vadd.f32 1.0, %v9575_v7  ;;  %v14581_v7 = vld [vmem:[#allocation64_spill] sm:$0xff] }
0x1972   :  { %v9577_v28 = vpop.eup %9576 }
0x1973   :  { %v5922_v42 = vmul.f32 %v9577_v28, %v5921_v43  ;;  %v14580_v43 = vld [vmem:[#allocation58_spill] sm:$0xff] }
0x1974   :  { %v5539_v47 = vadd.f32 %v14581_v7, %v14580_v43  ;;  %v14583_v43 = vld [vmem:[#allocation68_spill] sm:$0xff] }
0x1975   :  { %v5923_v35 = vadd.f32 %v5922_v42, %v5646_v58 }
0x1977   :  { %9578 = vtanh.f32 %v5923_v35 }
0x1978   :  { %9580 = vrcp.f32 %v5918_v55  ;;  %v14575_v55 = vld [vmem:[#allocation40_spill] sm:$0xff] }
0x1984   :  { %v9579_v31 = vpop.eup %9578 }
0x1985   :  { %v5925_v49 = vsub.f32 0.0, %v9579_v31  ;;  %v9581_v15 = vpop.eup %9580 }
0x1987   :  { %v5926_v57 = vmul.f32 %v9581_v15, %v5925_v49  ;;  %v14582_v15 = vld [vmem:[#allocation41_spill] sm:$0xff] }
0x1989   :  { %v13451_v5 = vadd.f32 %v9579_v31, %v5926_v57  ;;  %v5541_v57 = vadd.f32 %v14582_v15, %v13441_v48 }
0x198b   :  { %14574 = vst [vmem:[#allocation66_spill] sm:$0xff] %v13451_v5  ;;  %5997 = vmatmul.mubr.f32.vlgmr.msra.gmra.mxu0 %v13451_v5  ;;  %9054 = vmatmul.mubr.f32.vlgmr.msra.gmra.mxu1 %v13451_v5 }
0x198c   :  { %6099 = vmatpush1.msra.mxu0 %v13156_v8  ;;  %9057 = vmatpush3.msra.mxu1 %v13246_v41 }
0x198d   :  { %6100 = vmatprep.subr.mxu0 %v13159_v14  ;;  %9058 = vmatprep.subr.mxu1 %v14290_v1 }
0x198e   :  { %6101 = vmatpush1.msra.mxu0 %v13162_v9  ;;  %9059 = vmatpush3.msra.mxu1 %v13252_v18 }
0x198f   :  { %6102 = vmatprep.subr.mxu0 %v13165_v39  ;;  %9060 = vmatprep.subr.mxu1 %v14290_v1 }
0x1990   :  { %6103 = vmatpush1.msra.mxu0 %v13168_v22  ;;  %9061 = vmatpush3.msra.mxu1 %v13254_v11 }
0x1991   :  { %6104 = vmatprep.subr.mxu0 %v13171_v29  ;;  %9062 = vmatprep.subr.mxu1 %v14290_v1 }
0x1992   :  { %6105 = vmatpush1.msra.mxu0 %v13174_v30  ;;  %9063 = vmatpush3.msra.mxu1 %v13259_v40 }
0x1993   :  { %6106 = vmatprep.subr.mxu0 %v13177_v33  ;;  %9064 = vmatprep.subr.mxu1 %v14290_v1 }
0x1994   :  { %6107 = vmatpush1.msra.mxu0 %v13180_v59  ;;  %9065 = vmatpush3.msra.mxu1 %v13264_v2 }
0x1995   :  { %6108 = vmatprep.subr.mxu0 %v13183_v0  ;;  %9066 = vmatprep.subr.mxu1 %v14290_v1 }
0x1996   :  { %6109 = vmatpush1.msra.mxu0 %v13186_v24  ;;  %9067 = vmatpush3.msra.mxu1 %v13268_v3 }
0x1997   :  { %6110 = vmatprep.subr.mxu0 %v13189_v51  ;;  %9068 = vmatprep.subr.mxu1 %v14290_v1 }
0x1998   :  { %6111 = vmatpush1.msra.mxu0 %v13192_v36  ;;  %9069 = vmatpush3.msra.mxu1 %v13272_v63 }
0x1999   :  { %6112 = vmatprep.subr.mxu0 %v13195_v52  ;;  %9070 = vmatprep.subr.mxu1 %v14290_v1 }
0x199a   :  { %6113 = vmatpush1.msra.mxu0 %v13198_v37  ;;  %9071 = vmatpush3.msra.mxu1 %v13276_v26 }
0x199b   :  { %6114 = vmatprep.subr.mxu0 %v13201_v56  ;;  %9072 = vmatprep.subr.mxu1 %v14290_v1 }
0x199c   :  { %6115 = vmatpush1.msra.mxu0 %v13204_v38  ;;  %9073 = vmatpush3.msra.mxu1 %v13280_v62 }
0x199d   :  { %6116 = vmatprep.subr.mxu0 %v13207_v44  ;;  %9074 = vmatprep.subr.mxu1 %v14290_v1 }
0x199e   :  { %6117 = vmatpush1.msra.mxu0 %v13210_v20  ;;  %9075 = vmatpush3.msra.mxu1 %v13284_v45 }
0x199f   :  { %6118 = vmatprep.subr.mxu0 %v13213_v17  ;;  %9076 = vmatprep.subr.mxu1 %v14290_v1 }
0x19a0   :  { %6119 = vmatpush1.msra.mxu0 %v13216_v12  ;;  %9077 = vmatpush3.msra.mxu1 %v13288_v34 }
0x19a1   :  { %6120 = vmatprep.subr.mxu0 %v13219_v46  ;;  %9078 = vmatprep.subr.mxu1 %v14290_v1 }
0x19a2   :  { %6121 = vmatpush1.msra.mxu0 %v13222_v54  ;;  %9079 = vmatpush3.msra.mxu1 %v13292_v61 }
0x19a3   :  { %6122 = vmatprep.subr.mxu0 %v13225_v16  ;;  %9080 = vmatprep.subr.mxu1 %v14290_v1 }
0x19a4   :  { %6123 = vmatpush1.msra.mxu0 %v13228_v19  ;;  %9081 = vmatpush3.msra.mxu1 %v13296_v4 }
0x19a5   :  { %6124 = vmatprep.subr.mxu0 %v13231_v25  ;;  %9082 = vmatprep.subr.mxu1 %v14290_v1 }
0x19a6   :  { %6125 = vmatpush1.msra.mxu0 %v13234_v27  ;;  %9083 = vmatpush3.msra.mxu1 %v13300_v50 }
0x19a7   :  { %6126 = vmatprep.subr.mxu0 %v13237_v13  ;;  %9084 = vmatprep.subr.mxu1 %v14290_v1 }
0x19a8   :  { %6127 = vmatpush1.msra.mxu0 %v14543_v10  ;;  %9085 = vmatpush3.msra.mxu1 %v14575_v55 }
0x19a9   :  { %6128 = vmatprep.subr.mxu0 %v14576_v21  ;;  %9086 = vmatprep.subr.mxu1 %v14290_v1 }
0x19aa   :  { %6129 = vmatpush1.msra.mxu0 %v14577_v60  ;;  %6162 = vmatprep.mubr.f32.mxu0 %v14290_v1 }
0x19ab   :  { %9087 = vmatpush3.msra.mxu1 %v14578_v23  ;;  %9088 = vmatprep.mubr.msk.f32.mxu1 %vm10226_vm2, %v14290_v1 }
0x19ac   :  { %6264 = vmatprep.subr.mxu0 %v14579_v53  ;;  %9091 = vmatprep.subr.mxu1 %v14290_v1 }
0x1a4b   :  { %v5998_v28 = vpop.f32.mrf.mxu0  ;;  %v6069_v58 = vpop.f32.mrf.mxu1 }
0x1a4c   :  { %v6073_v42 = vadd.f32 %v5998_v28, %v5539_v47  ;;  %v6087_v10 = vadd.f32 %v13444_v32, %v6069_v58  ;;  %v5651_v47 = vadd.f32 %v14583_v43, %v13448_v6  ;;  %v14589_v43 = vld [vmem:[#allocation49_spill] sm:$0xff]  ;;  %v14590_v58 = vld [vmem:[#allocation51_spill] sm:$0xff] }
0x1a4d   :  { %v9055_v35 = vpop.f32.mrf.mxu1  ;;  %v6000_v49 = vpop.f32.mrf.mxu0 }
0x1a4e   :  { %v7336_v31 = vmul.f32 -1.442695, %v6073_v42  ;;  %v6080_v23 = vadd.f32 %v6000_v49, %v5541_v57  ;;  %v14591_v57 = vld [vmem:[#allocation58_spill] sm:$0xff] }
0x1a50   :  { %9582 = vpow2.f32 %v7336_v31  ;;  %v7337_v60 = vmul.f32 -1.442695, %v6080_v23 }
0x1a52   :  { %9584 = vpow2.f32 %v7337_v60  ;;  %v14587_v60 = vld [vmem:[#allocation60_spill] sm:$0xff] }
0x1a5d   :  { %v9583_v21 = vpop.eup %9582 }
0x1a5e   :  { %v6077_v55 = vadd.f32 1.0, %v9583_v21 }
0x1a5f   :  { %v9585_v53 = vpop.eup %9584 }
0x1a60   :  { %9586 = vrcp.f32 %v6077_v55  ;;  %v6084_v35 = vadd.f32 1.0, %v9585_v53  ;;  %v14586_v55 = vld [vmem:[#allocation40_spill] sm:$0xff]  ;;  %v14588_v53 = vld [vmem:[#allocation65_spill] sm:$0xff] }
0x1a6d   :  { %v9587_v7 = vpop.eup %9586 }
0x1a6e   :  { %v6088_v28 = vmul.f32 %v9587_v7, %v6087_v10  ;;  %v14585_v10 = vld [vmem:[#allocation43_spill] sm:$0xff] }
0x1a6f   :  { %v14592_v7 = vld [vmem:[#allocation63_spill] sm:$0xff] }
0x1a70   :  { %v6089_v42 = vadd.f32 %v6088_v28, %v5651_v47  ;;  %v5545_v47 = vadd.f32 %v14592_v7, %v14591_v57  ;;  %v14594_v57 = vld [vmem:[#allocation42_spill] sm:$0xff] }
0x1a72   :  { %9588 = vtanh.f32 %v6089_v42 }
0x1a73   :  { %9590 = vrcp.f32 %v6084_v35 }
0x1a7f   :  { %v9589_v31 = vpop.eup %9588 }
0x1a80   :  { %v6091_v49 = vsub.f32 %v13451_v5, %v9589_v31  ;;  %v9591_v23 = vpop.eup %9590 }
0x1a82   :  { %v6092_v15 = vmul.f32 %v9591_v23, %v6091_v49 }
0x1a84   :  { %v13530_v21 = vadd.f32 %v9589_v31, %v6092_v15  ;;  %v14593_v15 = vld [vmem:[#allocation71_spill] sm:$0xff] }
0x1a85   :  { %v5547_v5 = vadd.f32 %v14593_v15, %v13441_v48  ;;  %v13710_v15 = vld [vmem:[#allocation25 + $0x138] sm:$0xff] }
0x1a86   :  { %14584 = vst [vmem:[#allocation54_spill] sm:$0xff] %v13530_v21  ;;  %6163 = vmatmul.mubr.f32.vlgmr.msra.gmra.mxu0 %v13530_v21  ;;  %9089 = vmatmul.mubr.f32.vlgmr.msra.gmra.mxu1 %v13530_v21 }
0x1a87   :  { %6265 = vmatpush1.msra.mxu0 %v13156_v8  ;;  %9092 = vmatpush3.msra.mxu1 %v13246_v41 }
0x1a88   :  { %6266 = vmatprep.subr.mxu0 %v13159_v14  ;;  %9093 = vmatprep.subr.mxu1 %v14290_v1 }
0x1a89   :  { %6267 = vmatpush1.msra.mxu0 %v13162_v9  ;;  %9094 = vmatpush3.msra.mxu1 %v13252_v18 }
0x1a8a   :  { %6268 = vmatprep.subr.mxu0 %v13165_v39  ;;  %9095 = vmatprep.subr.mxu1 %v14290_v1 }
0x1a8b   :  { %6269 = vmatpush1.msra.mxu0 %v13168_v22  ;;  %9096 = vmatpush3.msra.mxu1 %v13254_v11 }
0x1a8c   :  { %6270 = vmatprep.subr.mxu0 %v13171_v29  ;;  %9097 = vmatprep.subr.mxu1 %v14290_v1 }
0x1a8d   :  { %6271 = vmatpush1.msra.mxu0 %v13174_v30  ;;  %9098 = vmatpush3.msra.mxu1 %v13259_v40 }
0x1a8e   :  { %6272 = vmatprep.subr.mxu0 %v13177_v33  ;;  %9099 = vmatprep.subr.mxu1 %v14290_v1 }
0x1a8f   :  { %6273 = vmatpush1.msra.mxu0 %v13180_v59  ;;  %9100 = vmatpush3.msra.mxu1 %v13264_v2 }
0x1a90   :  { %6274 = vmatprep.subr.mxu0 %v13183_v0  ;;  %9101 = vmatprep.subr.mxu1 %v14290_v1 }
0x1a91   :  { %6275 = vmatpush1.msra.mxu0 %v13186_v24  ;;  %9102 = vmatpush3.msra.mxu1 %v13268_v3 }
0x1a92   :  { %6276 = vmatprep.subr.mxu0 %v13189_v51  ;;  %9103 = vmatprep.subr.mxu1 %v14290_v1 }
0x1a93   :  { %6277 = vmatpush1.msra.mxu0 %v13192_v36  ;;  %9104 = vmatpush3.msra.mxu1 %v13272_v63 }
0x1a94   :  { %6278 = vmatprep.subr.mxu0 %v13195_v52  ;;  %9105 = vmatprep.subr.mxu1 %v14290_v1 }
0x1a95   :  { %6279 = vmatpush1.msra.mxu0 %v13198_v37  ;;  %9106 = vmatpush3.msra.mxu1 %v13276_v26 }
0x1a96   :  { %6280 = vmatprep.subr.mxu0 %v13201_v56  ;;  %9107 = vmatprep.subr.mxu1 %v14290_v1 }
0x1a97   :  { %6281 = vmatpush1.msra.mxu0 %v13204_v38  ;;  %9108 = vmatpush3.msra.mxu1 %v13280_v62 }
0x1a98   :  { %6282 = vmatprep.subr.mxu0 %v13207_v44  ;;  %9109 = vmatprep.subr.mxu1 %v14290_v1 }
0x1a99   :  { %6283 = vmatpush1.msra.mxu0 %v13210_v20  ;;  %9110 = vmatpush3.msra.mxu1 %v13284_v45 }
0x1a9a   :  { %6284 = vmatprep.subr.mxu0 %v13213_v17  ;;  %9111 = vmatprep.subr.mxu1 %v14290_v1 }
0x1a9b   :  { %6285 = vmatpush1.msra.mxu0 %v13216_v12  ;;  %9112 = vmatpush3.msra.mxu1 %v13288_v34 }
0x1a9c   :  { %6286 = vmatprep.subr.mxu0 %v13219_v46  ;;  %9113 = vmatprep.subr.mxu1 %v14290_v1 }
0x1a9d   :  { %6287 = vmatpush1.msra.mxu0 %v13222_v54  ;;  %9114 = vmatpush3.msra.mxu1 %v13292_v61 }
0x1a9e   :  { %6288 = vmatprep.subr.mxu0 %v13225_v16  ;;  %9115 = vmatprep.subr.mxu1 %v14290_v1 }
0x1a9f   :  { %6289 = vmatpush1.msra.mxu0 %v13228_v19  ;;  %9116 = vmatpush3.msra.mxu1 %v13296_v4 }
0x1aa0   :  { %6290 = vmatprep.subr.mxu0 %v13231_v25  ;;  %9117 = vmatprep.subr.mxu1 %v14290_v1 }
0x1aa1   :  { %6291 = vmatpush1.msra.mxu0 %v13234_v27  ;;  %9118 = vmatpush3.msra.mxu1 %v13300_v50 }
0x1aa2   :  { %6292 = vmatprep.subr.mxu0 %v13237_v13  ;;  %9119 = vmatprep.subr.mxu1 %v14290_v1 }
0x1aa3   :  { %6293 = vmatpush1.msra.mxu0 %v14585_v10  ;;  %9120 = vmatpush3.msra.mxu1 %v14586_v55 }
0x1aa4   :  { %6294 = vmatprep.subr.mxu0 %v14587_v60  ;;  %9121 = vmatprep.subr.mxu1 %v14290_v1 }
0x1aa5   :  { %6295 = vmatpush1.msra.mxu0 %v14588_v53  ;;  %6328 = vmatprep.mubr.f32.mxu0 %v14290_v1 }
0x1aa6   :  { %9122 = vmatpush3.msra.mxu1 %v14589_v43  ;;  %9123 = vmatprep.mubr.msk.f32.mxu1 %vm10226_vm2, %v14290_v1 }
0x1aa7   :  { %6430 = vmatprep.subr.mxu0 %v14590_v58  ;;  %9126 = vmatprep.subr.mxu1 %v14290_v1 }
0x1b46   :  { %v6164_v28 = vpop.f32.mrf.mxu0  ;;  %v6235_v42 = vpop.f32.mrf.mxu1 }
0x1b47   :  { %v6239_v35 = vadd.f32 %v6164_v28, %v5545_v47  ;;  %v6253_v10 = vadd.f32 %v13444_v32, %v6235_v42  ;;  %v5656_v47 = vadd.f32 %v14594_v57, %v13448_v6  ;;  %v13702_v57 = vld [vmem:[#allocation25 + $0x150] sm:$0xff]  ;;  %v13706_v42 = vld [vmem:[#allocation25 + $0x140] sm:$0xff] }
0x1b48   :  { %v9090_v31 = vpop.f32.mrf.mxu1  ;;  %v6166_v23 = vpop.f32.mrf.mxu0 }
0x1b49   :  { %v7338_v49 = vmul.f32 -1.442695, %v6239_v35  ;;  %v6246_v43 = vadd.f32 %v6166_v23, %v5547_v5 }
0x1b4b   :  { %9592 = vpow2.f32 %v7338_v49  ;;  %v7339_v53 = vmul.f32 -1.442695, %v6246_v43 }
0x1b4d   :  { %9594 = vpow2.f32 %v7339_v53  ;;  %v13698_v53 = vld [vmem:[#allocation25 + $0x158] sm:$0xff] }
0x1b58   :  { %v9593_v60 = vpop.eup %9592 }
0x1b59   :  { %v6243_v55 = vadd.f32 1.0, %v9593_v60 }
0x1b5a   :  { %v9595_v58 = vpop.eup %9594 }
0x1b5b   :  { %9596 = vrcp.f32 %v6243_v55  ;;  %v6250_v31 = vadd.f32 1.0, %v9595_v58  ;;  %v13694_v55 = vld [vmem:[#allocation25 + $0x168] sm:$0xff]  ;;  %v13718_v58 = vld [vmem:[#allocation25 + $0x120] sm:$0xff] }
0x1b68   :  { %v9597_v7 = vpop.eup %9596 }
0x1b69   :  { %v6254_v28 = vmul.f32 %v9597_v7, %v6253_v10  ;;  %v13726_v7 = vld [vmem:[#allocation25 + $0x108] sm:$0xff] }
0x1b6b   :  { %v6255_v35 = vadd.f32 %v6254_v28, %v5656_v47  ;;  %v13734_v47 = vld [vmem:[#allocation25 + $0xf0] sm:$0xff]  ;;  %v13742_v28 = vld [vmem:[#allocation25 + $0xd8] sm:$0xff] }
0x1b6d   :  { %9598 = vtanh.f32 %v6255_v35  ;;  %v13750_v35 = vld [vmem:[#allocation25 + $0xc0] sm:$0xff] }
0x1b6e   :  { %9600 = vrcp.f32 %v6250_v31  ;;  %v13758_v31 = vld [vmem:[#allocation25 + $0xa8] sm:$0xff] }
0x1b7a   :  { %v9599_v49 = vpop.eup %9598 }
0x1b7b   :  { %v6257_v5 = vsub.f32 %v13530_v21, %v9599_v49  ;;  %v9601_v43 = vpop.eup %9600 }
0x1b7d   :  { %v6258_v23 = vmul.f32 %v9601_v43, %v6257_v5  ;;  %v13772_v5 = vld [vmem:[#allocation25 + $0x80] sm:$0xff]  ;;  %v13779_v43 = vld [vmem:[#allocation25 + $0x88] sm:$0xff] }
0x1b7f   :  { %v13609_v60 = vadd.f32 %v9599_v49, %v6258_v23  ;;  %v13766_v49 = vld [vmem:[#allocation25 + $0x90] sm:$0xff]  ;;  %v13782_v23 = vld [vmem:[#allocation25 + $0x68] sm:$0xff] }
0x1b81   :  { %14595 = vst [vmem:[#allocation59_spill] sm:$0xff] %v13609_v60  ;;  %6329 = vmatmul.mubr.f32.vlgmr.msra.gmra.mxu0 %v13609_v60  ;;  %9124 = vmatmul.mubr.f32.vlgmr.msra.gmra.mxu1 %v13609_v60 }
0x1b82   :  { %6431 = vmatpush1.msra.mxu0 %v13156_v8  ;;  %9127 = vmatpush3.msra.mxu1 %v13246_v41  ;;  %v14596_v8 = vld [vmem:[#allocation43_spill] sm:$0xff] }
0x1b83   :  { %6432 = vmatprep.subr.mxu0 %v13159_v14  ;;  %9128 = vmatprep.subr.mxu1 %v14290_v1  ;;  %v14597_v14 = vld [vmem:[#allocation40_spill] sm:$0xff] }
0x1b84   :  { %6433 = vmatpush1.msra.mxu0 %v13162_v9  ;;  %9129 = vmatpush3.msra.mxu1 %v13252_v18  ;;  %v14598_v9 = vld [vmem:[#allocation60_spill] sm:$0xff] }
0x1b85   :  { %6434 = vmatprep.subr.mxu0 %v13165_v39  ;;  %9130 = vmatprep.subr.mxu1 %v14290_v1  ;;  %v14599_v39 = vld [vmem:[#allocation65_spill] sm:$0xff] }
0x1b86   :  { %6435 = vmatpush1.msra.mxu0 %v13168_v22  ;;  %9131 = vmatpush3.msra.mxu1 %v13254_v11  ;;  %v14600_v22 = vld [vmem:[#allocation49_spill] sm:$0xff] }
0x1b87   :  { %6436 = vmatprep.subr.mxu0 %v13171_v29  ;;  %9132 = vmatprep.subr.mxu1 %v14290_v1  ;;  %v13678_v29 = vld [vmem:[#allocation25 + $0x170] sm:$0xff] }
0x1b88   :  { %6437 = vmatpush1.msra.mxu0 %v13174_v30  ;;  %9133 = vmatpush3.msra.mxu1 %v13259_v40  ;;  %v14601_v30 = vld [vmem:[#allocation58_spill] sm:$0xff] }
0x1b89   :  { %6438 = vmatprep.subr.mxu0 %v13177_v33  ;;  %9134 = vmatprep.subr.mxu1 %v14290_v1  ;;  %v14602_v33 = vld [vmem:[#allocation57_spill] sm:$0xff] }
0x1b8a   :  { %6439 = vmatpush1.msra.mxu0 %v13180_v59  ;;  %9135 = vmatpush3.msra.mxu1 %v13264_v2  ;;  %v5551_v59 = vadd.f32 %v14602_v33, %v14601_v30  ;;  %v13802_v33 = vld [vmem:[#allocation25 + $0x38] sm:$0xff] }
0x1b8b   :  { %6440 = vmatprep.subr.mxu0 %v13183_v0  ;;  %9136 = vmatprep.subr.mxu1 %v14290_v1 }
0x1b8c   :  { %6441 = vmatpush1.msra.mxu0 %v13186_v24  ;;  %9137 = vmatpush3.msra.mxu1 %v13268_v3 }
0x1b8d   :  { %6442 = vmatprep.subr.mxu0 %v13189_v51  ;;  %9138 = vmatprep.subr.mxu1 %v14290_v1 }
0x1b8e   :  { %6443 = vmatpush1.msra.mxu0 %v13192_v36  ;;  %9139 = vmatpush3.msra.mxu1 %v13272_v63 }
0x1b8f   :  { %6444 = vmatprep.subr.mxu0 %v13195_v52  ;;  %9140 = vmatprep.subr.mxu1 %v14290_v1 }
0x1b90   :  { %6445 = vmatpush1.msra.mxu0 %v13198_v37  ;;  %9141 = vmatpush3.msra.mxu1 %v13276_v26 }
0x1b91   :  { %6446 = vmatprep.subr.mxu0 %v13201_v56  ;;  %9142 = vmatprep.subr.mxu1 %v14290_v1  ;;  %v14603_v56 = vld [vmem:[#allocation55_spill] sm:$0xff] }
0x1b92   :  { %6447 = vmatpush1.msra.mxu0 %v13204_v38  ;;  %9143 = vmatpush3.msra.mxu1 %v13280_v62  ;;  %v5553_v38 = vadd.f32 %v14603_v56, %v13441_v48  ;;  %v13830_v56 = vld [vmem:[#allocation25 + $0x10] sm:$0xff] }
0x1b93   :  { %6448 = vmatprep.subr.mxu0 %v13207_v44  ;;  %9144 = vmatprep.subr.mxu1 %v14290_v1  ;;  %14610 = vst [vmem:[#allocation63_spill] sm:$0xff] %v13830_v56 }
0x1b94   :  { %6449 = vmatpush1.msra.mxu0 %v13210_v20  ;;  %9145 = vmatpush3.msra.mxu1 %v13284_v45 }
0x1b95   :  { %6450 = vmatprep.subr.mxu0 %v13213_v17  ;;  %9146 = vmatprep.subr.mxu1 %v14290_v1 }
0x1b96   :  { %6451 = vmatpush1.msra.mxu0 %v13216_v12  ;;  %9147 = vmatpush3.msra.mxu1 %v13288_v34 }
0x1b97   :  { %6452 = vmatprep.subr.mxu0 %v13219_v46  ;;  %9148 = vmatprep.subr.mxu1 %v14290_v1 }
0x1b98   :  { %6453 = vmatpush1.msra.mxu0 %v13222_v54  ;;  %9149 = vmatpush3.msra.mxu1 %v13292_v61 }
0x1b99   :  { %6454 = vmatprep.subr.mxu0 %v13225_v16  ;;  %9150 = vmatprep.subr.mxu1 %v14290_v1 }
0x1b9a   :  { %6455 = vmatpush1.msra.mxu0 %v13228_v19  ;;  %9151 = vmatpush3.msra.mxu1 %v13296_v4  ;;  %v14604_v19 = vld [vmem:[#allocation53_spill] sm:$0xff] }
0x1b9b   :  { %6456 = vmatprep.subr.mxu0 %v13231_v25  ;;  %9152 = vmatprep.subr.mxu1 %v14290_v1  ;;  %v5661_v25 = vadd.f32 %v14604_v19, %v13448_v6  ;;  %v14612_v19 = vld [vmem:[#allocation47_spill] sm:$0xff] }
0x1b9c   :  { %6457 = vmatpush1.msra.mxu0 %v13234_v27  ;;  %9153 = vmatpush3.msra.mxu1 %v13300_v50 }
0x1b9d   :  { %6458 = vmatprep.subr.mxu0 %v13237_v13  ;;  %9154 = vmatprep.subr.mxu1 %v14290_v1 }
0x1b9e   :  { %6459 = vmatpush1.msra.mxu0 %v14596_v8  ;;  %9155 = vmatpush3.msra.mxu1 %v14597_v14  ;;  %v13786_v8 = vld [vmem:[#allocation25 + $0x60] sm:$0xff]  ;;  %v13789_v14 = vld [vmem:[#allocation25 + $0x70] sm:$0xff] }
0x1b9f   :  { %6460 = vmatprep.subr.mxu0 %v14598_v9  ;;  %9156 = vmatprep.subr.mxu1 %v14290_v1  ;;  %v13792_v9 = vld [vmem:[#allocation25 + $0x50] sm:$0xff] }
0x1ba0   :  { %6461 = vmatpush1.msra.mxu0 %v14599_v39  ;;  %6494 = vmatprep.mubr.f32.mxu0 %v14290_v1  ;;  %v13796_v39 = vld [vmem:[#allocation25 + $0x48] sm:$0xff] }
0x1ba1   :  { %9157 = vmatpush3.msra.mxu1 %v14600_v22  ;;  %9158 = vmatprep.mubr.msk.f32.mxu1 %vm10226_vm2, %v14290_v1  ;;  %v13799_v22 = vld [vmem:[#allocation25 + $0x58] sm:$0xff] }
0x1ba2   :  { %6596 = vmatprep.subr.mxu0 %v13678_v29  ;;  %9161 = vmatprep.subr.mxu1 %v14290_v1 }
0x1c41   :  { %v6330_v0 = vpop.f32.mrf.mxu0  ;;  %v6401_v24 = vpop.f32.mrf.mxu1 }
0x1c42   :  { %v6405_v51 = vadd.f32 %v6330_v0, %v5551_v59  ;;  %v6419_v54 = vadd.f32 %v13444_v32, %v6401_v24  ;;  %v13806_v59 = vld [vmem:[#allocation25 + $0x30] sm:$0xff]  ;;  %v13809_v0 = vld [vmem:[#allocation25 + $0x40] sm:$0xff] }
0x1c43   :  { %v9125_v36 = vpop.f32.mrf.mxu1  ;;  %v6332_v37 = vpop.f32.mrf.mxu0  ;;  %v13812_v24 = vld [vmem:[#allocation25 + $0x20] sm:$0xff] }
0x1c44   :  { %v7340_v52 = vmul.f32 -1.442695, %v6405_v51  ;;  %v6412_v44 = vadd.f32 %v6332_v37, %v5553_v38  ;;  %v13816_v51 = vld [vmem:[#allocation25 + $0x18] sm:$0xff]  ;;  %v13819_v36 = vld [vmem:[#allocation25 + $0x28] sm:$0xff]  ;;  %v13826_v37 = vld [vmem:[#allocation25] sm:$0xff] }
0x1c45   :  { %14606 = vst [vmem:[#allocation64_spill] sm:$0xff] %v13816_v51  ;;  %14607 = vst [vmem:[#allocation41_spill] sm:$0xff] %v13819_v36  ;;  %v14611_v38 = vld [vmem:[#allocation45_spill] sm:$0xff] }
0x1c46   :  { %9602 = vpow2.f32 %v7340_v52  ;;  %v7341_v20 = vmul.f32 -1.442695, %v6412_v44  ;;  %v13822_v52 = vld [vmem:[#allocation25 + $0x8] sm:$0xff]  ;;  %14609 = vst [vmem:[#allocation51_spill] sm:$0xff] %v13826_v37  ;;  %v5557_v44 = vadd.f32 %v14611_v38, %v14601_v30  ;;  %v14613_v38 = vld [vmem:[#allocation69_spill] sm:$0xff] }
0x1c47   :  { %14608 = vst [vmem:[#allocation68_spill] sm:$0xff] %v13822_v52 }
0x1c48   :  { %9604 = vpow2.f32 %v7341_v20 }
0x1c53   :  { %v9603_v17 = vpop.eup %9602 }
0x1c54   :  { %v6409_v12 = vadd.f32 1.0, %v9603_v17 }
0x1c55   :  { %v9605_v46 = vpop.eup %9604 }
0x1c56   :  { %9606 = vrcp.f32 %v6409_v12  ;;  %v6416_v45 = vadd.f32 1.0, %v9605_v46 }
0x1c63   :  { %v9607_v16 = vpop.eup %9606 }
0x1c64   :  { %v6420_v27 = vmul.f32 %v9607_v16, %v6419_v54 }
0x1c66   :  { %v6421_v13 = vadd.f32 %v6420_v27, %v5661_v25  ;;  %v5559_v25 = vadd.f32 %v14612_v19, %v13441_v48 }
0x1c68   :  { %9608 = vtanh.f32 %v6421_v13 }
0x1c69   :  { %9610 = vrcp.f32 %v6416_v45 }
0x1c75   :  { %v9609_v34 = vpop.eup %9608 }
0x1c76   :  { %v6423_v61 = vsub.f32 %v13609_v60, %v9609_v34  ;;  %v9611_v4 = vpop.eup %9610  ;;  %v14615_v60 = vld [vmem:[#allocation61_spill] sm:$0xff] }
0x1c77   :  { %v5565_v21 = vadd.f32 %v14615_v60, %v13441_v48 }
0x1c78   :  { %v6424_v50 = vmul.f32 %v9611_v4, %v6423_v61 }
0x1c7a   :  { %v13690_v10 = vadd.f32 %v9609_v34, %v6424_v50 }
0x1c7c   :  { %14605 = vst [vmem:[#allocation46_spill] sm:$0xff] %v13690_v10  ;;  %6495 = vmatmul.mubr.f32.vlgmr.msra.gmra.mxu0 %v13690_v10  ;;  %9159 = vmatmul.mubr.f32.vlgmr.msra.gmra.mxu1 %v13690_v10 }
0x1c7d   :  { %6597 = vmatpush1.msra.mxu0 %v13694_v55  ;;  %9162 = vmatpush3.msra.mxu1 %v13246_v41  ;;  %v13714_v41 = vld [vmem:[#allocation25 + $0x128] sm:$0xff] }
0x1c7e   :  { %6598 = vmatprep.subr.mxu0 %v13698_v53  ;;  %9163 = vmatprep.subr.mxu1 %v14290_v1 }
0x1c7f   :  { %6599 = vmatpush1.msra.mxu0 %v13702_v57  ;;  %9164 = vmatpush3.msra.mxu1 %v13252_v18  ;;  %v13722_v18 = vld [vmem:[#allocation25 + $0x110] sm:$0xff] }
0x1c80   :  { %6600 = vmatprep.subr.mxu0 %v13706_v42  ;;  %9165 = vmatprep.subr.mxu1 %v14290_v1 }
0x1c81   :  { %6601 = vmatpush1.msra.mxu0 %v13710_v15  ;;  %9166 = vmatpush3.msra.mxu1 %v13254_v11  ;;  %v13730_v11 = vld [vmem:[#allocation25 + $0xf8] sm:$0xff] }
0x1c82   :  { %6602 = vmatprep.subr.mxu0 %v13714_v41  ;;  %9167 = vmatprep.subr.mxu1 %v14290_v1 }
0x1c83   :  { %6603 = vmatpush1.msra.mxu0 %v13718_v58  ;;  %9168 = vmatpush3.msra.mxu1 %v13259_v40  ;;  %v13738_v40 = vld [vmem:[#allocation25 + $0xe0] sm:$0xff] }
0x1c84   :  { %6604 = vmatprep.subr.mxu0 %v13722_v18  ;;  %9169 = vmatprep.subr.mxu1 %v14290_v1 }
0x1c85   :  { %6605 = vmatpush1.msra.mxu0 %v13726_v7  ;;  %9170 = vmatpush3.msra.mxu1 %v13264_v2  ;;  %v13746_v2 = vld [vmem:[#allocation25 + $0xc8] sm:$0xff] }
0x1c86   :  { %6606 = vmatprep.subr.mxu0 %v13730_v11  ;;  %9171 = vmatprep.subr.mxu1 %v14290_v1 }
0x1c87   :  { %6607 = vmatpush1.msra.mxu0 %v13734_v47  ;;  %9172 = vmatpush3.msra.mxu1 %v13268_v3  ;;  %v13754_v3 = vld [vmem:[#allocation25 + $0xb0] sm:$0xff] }
0x1c88   :  { %6608 = vmatprep.subr.mxu0 %v13738_v40  ;;  %9173 = vmatprep.subr.mxu1 %v14290_v1 }
0x1c89   :  { %6609 = vmatpush1.msra.mxu0 %v13742_v28  ;;  %9174 = vmatpush3.msra.mxu1 %v13272_v63  ;;  %v13762_v63 = vld [vmem:[#allocation25 + $0x98] sm:$0xff] }
0x1c8a   :  { %6610 = vmatprep.subr.mxu0 %v13746_v2  ;;  %9175 = vmatprep.subr.mxu1 %v14290_v1 }
0x1c8b   :  { %6611 = vmatpush1.msra.mxu0 %v13750_v35  ;;  %9176 = vmatpush3.msra.mxu1 %v13276_v26  ;;  %v13769_v26 = vld [vmem:[#allocation25 + $0xa0] sm:$0xff] }
0x1c8c   :  { %6612 = vmatprep.subr.mxu0 %v13754_v3  ;;  %9177 = vmatprep.subr.mxu1 %v14290_v1 }
0x1c8d   :  { %6613 = vmatpush1.msra.mxu0 %v13758_v31  ;;  %9178 = vmatpush3.msra.mxu1 %v13280_v62  ;;  %v13776_v62 = vld [vmem:[#allocation25 + $0x78] sm:$0xff] }
0x1c8e   :  { %6614 = vmatprep.subr.mxu0 %v13762_v63  ;;  %9179 = vmatprep.subr.mxu1 %v14290_v1 }
0x1c8f   :  { %6615 = vmatpush1.msra.mxu0 %v13766_v49  ;;  %9180 = vmatpush3.msra.mxu1 %v13769_v26 }
0x1c90   :  { %6616 = vmatprep.subr.mxu0 %v13772_v5  ;;  %9181 = vmatprep.subr.mxu1 %v14290_v1 }
0x1c91   :  { %6617 = vmatpush1.msra.mxu0 %v13776_v62  ;;  %9182 = vmatpush3.msra.mxu1 %v13779_v43 }
0x1c92   :  { %6618 = vmatprep.subr.mxu0 %v13782_v23  ;;  %9183 = vmatprep.subr.mxu1 %v14290_v1 }
0x1c93   :  { %6619 = vmatpush1.msra.mxu0 %v13786_v8  ;;  %9184 = vmatpush3.msra.mxu1 %v13789_v14 }
0x1c94   :  { %6620 = vmatprep.subr.mxu0 %v13792_v9  ;;  %9185 = vmatprep.subr.mxu1 %v14290_v1 }
0x1c95   :  { %6621 = vmatpush1.msra.mxu0 %v13796_v39  ;;  %9186 = vmatpush3.msra.mxu1 %v13799_v22 }
0x1c96   :  { %6622 = vmatprep.subr.mxu0 %v13802_v33  ;;  %9187 = vmatprep.subr.mxu1 %v14290_v1 }
0x1c97   :  { %6623 = vmatpush1.msra.mxu0 %v13806_v59  ;;  %9188 = vmatpush3.msra.mxu1 %v13809_v0 }
0x1c98   :  { %6624 = vmatprep.subr.mxu0 %v13812_v24  ;;  %9189 = vmatprep.subr.mxu1 %v14290_v1 }
0x1c99   :  { %6625 = vmatpush1.msra.mxu0 %v13816_v51  ;;  %9190 = vmatpush3.msra.mxu1 %v13819_v36 }
0x1c9a   :  { %6626 = vmatprep.subr.mxu0 %v13822_v52  ;;  %9191 = vmatprep.subr.mxu1 %v14290_v1 }
0x1c9b   :  { %6627 = vmatpush1.msra.mxu0 %v13826_v37  ;;  %6660 = vmatprep.mubr.f32.mxu0 %v14290_v1 }
0x1c9c   :  { %9192 = vmatpush3.msra.mxu1 %v13830_v56  ;;  %9193 = vmatprep.mubr.msk.f32.mxu1 %vm10226_vm2, %v14290_v1 }
0x1c9d   :  { %6762 = vmatprep.subr.mxu0 %v13678_v29  ;;  %9196 = vmatprep.subr.mxu1 %v14290_v1 }
0x1d3c   :  { %v6496_v20 = vpop.f32.mrf.mxu0  ;;  %v6567_v17 = vpop.f32.mrf.mxu1 }
0x1d3d   :  { %v6571_v12 = vadd.f32 %v6496_v20, %v5557_v44  ;;  %v6585_v4 = vadd.f32 %v13444_v32, %v6567_v17  ;;  %v5666_v44 = vadd.f32 %v14613_v38, %v13448_v6  ;;  %v13850_v17 = vld [vmem:[#allocation25 + $0x178] sm:$0xff]  ;;  %v13892_v38 = vld [vmem:[#allocation25 + $0xd0] sm:$0xff] }
0x1d3e   :  { %v9160_v46 = vpop.f32.mrf.mxu1  ;;  %v6498_v16 = vpop.f32.mrf.mxu0 }
0x1d3f   :  { %v7342_v54 = vmul.f32 -1.442695, %v6571_v12  ;;  %v6578_v27 = vadd.f32 %v6498_v16, %v5559_v25 }
0x1d41   :  { %9612 = vpow2.f32 %v7342_v54  ;;  %v7343_v13 = vmul.f32 -1.442695, %v6578_v27 }
0x1d43   :  { %9614 = vpow2.f32 %v7343_v13  ;;  %v13856_v13 = vld [vmem:[#allocation25 + $0x160] sm:$0xff] }
0x1d4e   :  { %v9613_v45 = vpop.eup %9612 }
0x1d4f   :  { %v6575_v34 = vadd.f32 1.0, %v9613_v45  ;;  %v13862_v45 = vld [vmem:[#allocation25 + $0x148] sm:$0xff] }
0x1d50   :  { %v9615_v61 = vpop.eup %9614 }
0x1d51   :  { %9616 = vrcp.f32 %v6575_v34  ;;  %v6582_v46 = vadd.f32 1.0, %v9615_v61  ;;  %v13868_v34 = vld [vmem:[#allocation25 + $0x130] sm:$0xff]  ;;  %v13874_v61 = vld [vmem:[#allocation25 + $0x118] sm:$0xff] }
0x1d5e   :  { %v9617_v50 = vpop.eup %9616 }
0x1d5f   :  { %v6586_v20 = vmul.f32 %v9617_v50, %v6585_v4  ;;  %v13880_v4 = vld [vmem:[#allocation25 + $0x100] sm:$0xff]  ;;  %v13886_v50 = vld [vmem:[#allocation25 + $0xe8] sm:$0xff] }
0x1d61   :  { %v6587_v12 = vadd.f32 %v6586_v20, %v5666_v44  ;;  %v13898_v44 = vld [vmem:[#allocation25 + $0xb8] sm:$0xff]  ;;  %v14614_v20 = vld [vmem:[#allocation44_spill] sm:$0xff] }
0x1d63   :  { %9618 = vtanh.f32 %v6587_v12  ;;  %v5563_v12 = vadd.f32 %v14614_v20, %v14601_v30  ;;  %v14616_v30 = vld [vmem:[#allocation70_spill] sm:$0xff] }
0x1d64   :  { %9620 = vrcp.f32 %v6582_v46 }
0x1d70   :  { %v9619_v54 = vpop.eup %9618 }
0x1d71   :  { %v6589_v16 = vsub.f32 %v13690_v10, %v9619_v54  ;;  %v9621_v19 = vpop.eup %9620 }
0x1d73   :  { %v6590_v25 = vmul.f32 %v9621_v19, %v6589_v16 }
0x1d75   :  { %v13845_v27 = vadd.f32 %v9619_v54, %v6590_v25 }
0x1d77   :  { %6661 = vmatmul.mubr.f32.vlgmr.msra.gmra.mxu0 %v13845_v27  ;;  %9194 = vmatmul.mubr.f32.vlgmr.msra.gmra.mxu1 %v13845_v27 }
0x1d78   :  { %6763 = vmatpush1.msra.mxu0 %v13694_v55  ;;  %9197 = vmatpush3.msra.mxu1 %v13850_v17 }
0x1d79   :  { %6764 = vmatprep.subr.mxu0 %v13698_v53  ;;  %9198 = vmatprep.subr.mxu1 %v14290_v1 }
0x1d7a   :  { %6765 = vmatpush1.msra.mxu0 %v13702_v57  ;;  %9199 = vmatpush3.msra.mxu1 %v13856_v13 }
0x1d7b   :  { %6766 = vmatprep.subr.mxu0 %v13706_v42  ;;  %9200 = vmatprep.subr.mxu1 %v14290_v1 }
0x1d7c   :  { %6767 = vmatpush1.msra.mxu0 %v13710_v15  ;;  %9201 = vmatpush3.msra.mxu1 %v13862_v45 }
0x1d7d   :  { %6768 = vmatprep.subr.mxu0 %v13714_v41  ;;  %9202 = vmatprep.subr.mxu1 %v14290_v1 }
0x1d7e   :  { %6769 = vmatpush1.msra.mxu0 %v13718_v58  ;;  %9203 = vmatpush3.msra.mxu1 %v13868_v34 }
0x1d7f   :  { %6770 = vmatprep.subr.mxu0 %v13722_v18  ;;  %9204 = vmatprep.subr.mxu1 %v14290_v1 }
0x1d80   :  { %6771 = vmatpush1.msra.mxu0 %v13726_v7  ;;  %9205 = vmatpush3.msra.mxu1 %v13874_v61 }
0x1d81   :  { %6772 = vmatprep.subr.mxu0 %v13730_v11  ;;  %9206 = vmatprep.subr.mxu1 %v14290_v1 }
0x1d82   :  { %6773 = vmatpush1.msra.mxu0 %v13734_v47  ;;  %9207 = vmatpush3.msra.mxu1 %v13880_v4 }
0x1d83   :  { %6774 = vmatprep.subr.mxu0 %v13738_v40  ;;  %9208 = vmatprep.subr.mxu1 %v14290_v1 }
0x1d84   :  { %6775 = vmatpush1.msra.mxu0 %v13742_v28  ;;  %9209 = vmatpush3.msra.mxu1 %v13886_v50 }
0x1d85   :  { %6776 = vmatprep.subr.mxu0 %v13746_v2  ;;  %9210 = vmatprep.subr.mxu1 %v14290_v1 }
0x1d86   :  { %6777 = vmatpush1.msra.mxu0 %v13750_v35  ;;  %9211 = vmatpush3.msra.mxu1 %v13892_v38 }
0x1d87   :  { %6778 = vmatprep.subr.mxu0 %v13754_v3  ;;  %9212 = vmatprep.subr.mxu1 %v14290_v1 }
0x1d88   :  { %6779 = vmatpush1.msra.mxu0 %v13758_v31  ;;  %9213 = vmatpush3.msra.mxu1 %v13898_v44 }
0x1d89   :  { %6780 = vmatprep.subr.mxu0 %v13762_v63  ;;  %9214 = vmatprep.subr.mxu1 %v14290_v1 }
0x1d8a   :  { %6781 = vmatpush1.msra.mxu0 %v13766_v49  ;;  %9215 = vmatpush3.msra.mxu1 %v13769_v26 }
0x1d8b   :  { %6782 = vmatprep.subr.mxu0 %v13772_v5  ;;  %9216 = vmatprep.subr.mxu1 %v14290_v1 }
0x1d8c   :  { %6783 = vmatpush1.msra.mxu0 %v13776_v62  ;;  %9217 = vmatpush3.msra.mxu1 %v13779_v43 }
0x1d8d   :  { %6784 = vmatprep.subr.mxu0 %v13782_v23  ;;  %9218 = vmatprep.subr.mxu1 %v14290_v1 }
0x1d8e   :  { %6785 = vmatpush1.msra.mxu0 %v13786_v8  ;;  %9219 = vmatpush3.msra.mxu1 %v13789_v14 }
0x1d8f   :  { %6786 = vmatprep.subr.mxu0 %v13792_v9  ;;  %9220 = vmatprep.subr.mxu1 %v14290_v1 }
0x1d90   :  { %6787 = vmatpush1.msra.mxu0 %v13796_v39  ;;  %9221 = vmatpush3.msra.mxu1 %v13799_v22 }
0x1d91   :  { %6788 = vmatprep.subr.mxu0 %v13802_v33  ;;  %9222 = vmatprep.subr.mxu1 %v14290_v1 }
0x1d92   :  { %6789 = vmatpush1.msra.mxu0 %v13806_v59  ;;  %9223 = vmatpush3.msra.mxu1 %v13809_v0 }
0x1d93   :  { %6790 = vmatprep.subr.mxu0 %v13812_v24  ;;  %9224 = vmatprep.subr.mxu1 %v14290_v1 }
0x1d94   :  { %6791 = vmatpush1.msra.mxu0 %v13816_v51  ;;  %9225 = vmatpush3.msra.mxu1 %v13819_v36 }
0x1d95   :  { %6792 = vmatprep.subr.mxu0 %v13822_v52  ;;  %9226 = vmatprep.subr.mxu1 %v14290_v1 }
0x1d96   :  { %6793 = vmatpush1.msra.mxu0 %v13826_v37  ;;  %6826 = vmatprep.mubr.f32.mxu0 %v14290_v1 }
0x1d97   :  { %9227 = vmatpush3.msra.mxu1 %v13830_v56  ;;  %9228 = vmatprep.mubr.msk.f32.mxu1 %vm10226_vm2, %v14290_v1 }
0x1d98   :  { %6928 = vmatprep.subr.mxu0 %v13678_v29  ;;  %9231 = vmatprep.subr.mxu1 %v14290_v1 }
0x1e37   :  { %v6662_v46 = vpop.f32.mrf.mxu0  ;;  %v6733_v54 = vpop.f32.mrf.mxu1 }
0x1e38   :  { %v6737_v16 = vadd.f32 %v6662_v46, %v5563_v12  ;;  %v6751_v51 = vadd.f32 %v13444_v32, %v6733_v54  ;;  %v5671_v12 = vadd.f32 %v14616_v30, %v13448_v6  ;;  %v14617_v32 = vld [vmem:[#allocation64_spill] sm:$0xff]  ;;  %v14618_v30 = vld [vmem:[#allocation41_spill] sm:$0xff] }
0x1e39   :  { %v9195_v19 = vpop.f32.mrf.mxu1  ;;  %v6664_v10 = vpop.f32.mrf.mxu0  ;;  %v7092_v54 = vld [vmem:[%s14129_s17 + $0x8] sm:$0xff] }
0x1e3a   :  { %v7344_v25 = vmul.f32 -1.442695, %v6737_v16  ;;  %v6744_v56 = vadd.f32 %v6664_v10, %v5565_v21 }
0x1e3c   :  { %9622 = vpow2.f32 %v7344_v25  ;;  %v7345_v37 = vmul.f32 -1.442695, %v6744_v56  ;;  %v7102_v56 = vld [vmem:[%s14129_s17 + $0x58] sm:$0xff] }
0x1e3e   :  { %9624 = vpow2.f32 %v7345_v37  ;;  %v7103_v37 = vld [vmem:[%s14129_s17 + $0x60] sm:$0xff] }
0x1e49   :  { %v9623_v52 = vpop.eup %9622 }
0x1e4a   :  { %v6741_v36 = vadd.f32 1.0, %v9623_v52 }
0x1e4b   :  { %v9625_v29 = vpop.eup %9624 }
0x1e4c   :  { %9626 = vrcp.f32 %v6741_v36  ;;  %v6748_v19 = vadd.f32 1.0, %v9625_v29  ;;  %v7104_v36 = vld [vmem:[%s14129_s17 + $0x68] sm:$0xff]  ;;  %v7091_v29 = vld [vmem:[%s14129_s17] sm:$0xff] }
0x1e59   :  { %v9627_v20 = vpop.eup %9626 }
0x1e5a   :  { %v6752_v46 = vmul.f32 %v9627_v20, %v6751_v51  ;;  %v14626_v51 = vld [vmem:[#allocation66_spill] sm:$0xff] }
0x1e5b   :  { %v14627_v20 = vld [vmem:[#allocation54_spill] sm:$0xff] }
0x1e5c   :  { %v6753_v16 = vadd.f32 %v6752_v46, %v5671_v12  ;;  %v14628_v12 = vld [vmem:[#allocation59_spill] sm:$0xff]  ;;  %v14629_v46 = vld [vmem:[#allocation46_spill] sm:$0xff] }
0x1e5e   :  { %9628 = vtanh.f32 %v6753_v16  ;;  %v14630_v16 = vld [vmem:[#allocation50_spill] sm:$0xff] }
0x1e5f   :  { %9630 = vrcp.f32 %v6748_v19 }
0x1e6b   :  { %v9629_v25 = vpop.eup %9628 }
0x1e6c   :  { %v6755_v21 = vsub.f32 %v13845_v27, %v9629_v25  ;;  %v9631_v60 = vpop.eup %9630 }
0x1e6e   :  { %v6756_v10 = vmul.f32 %v9631_v60, %v6755_v21 }
0x1e70   :  { %v13942_v52 = vadd.f32 %v9629_v25, %v6756_v10 }
0x1e72   :  { %6827 = vmatmul.mubr.f32.vlgmr.msra.gmra.mxu0 %v13942_v52  ;;  %9229 = vmatmul.mubr.f32.vlgmr.msra.gmra.mxu1 %v13942_v52 }
0x1e73   :  { %6929 = vmatpush1.msra.mxu0 %v13694_v55  ;;  %9232 = vmatpush3.msra.mxu1 %v13850_v17  ;;  %v14619_v55 = vld [vmem:[#allocation68_spill] sm:$0xff]  ;;  %v7101_v17 = vld [vmem:[%s14129_s17 + $0x50] sm:$0xff] }
0x1e74   :  { %6930 = vmatprep.subr.mxu0 %v13698_v53  ;;  %9233 = vmatprep.subr.mxu1 %v14290_v1  ;;  %v14620_v53 = vld [vmem:[#allocation51_spill] sm:$0xff] }
0x1e75   :  { %6931 = vmatpush1.msra.mxu0 %v13702_v57  ;;  %9234 = vmatpush3.msra.mxu1 %v13856_v13  ;;  %v14621_v57 = vld [vmem:[#allocation63_spill] sm:$0xff]  ;;  %v7100_v13 = vld [vmem:[%s14129_s17 + $0x48] sm:$0xff] }
0x1e76   :  { %6932 = vmatprep.subr.mxu0 %v13706_v42  ;;  %9235 = vmatprep.subr.mxu1 %v14290_v1  ;;  %v7106_v42 = vld [vmem:[%s14129_s17 + $0x78] sm:$0xff] }
0x1e77   :  { %6933 = vmatpush1.msra.mxu0 %v13710_v15  ;;  %9236 = vmatpush3.msra.mxu1 %v13862_v45  ;;  %v14622_v15 = vld [vmem:[#allocation58_spill] sm:$0xff]  ;;  %v7099_v45 = vld [vmem:[%s14129_s17 + $0x40] sm:$0xff] }
0x1e78   :  { %6934 = vmatprep.subr.mxu0 %v13714_v41  ;;  %9237 = vmatprep.subr.mxu1 %v14290_v1  ;;  %v14623_v41 = vld [vmem:[#allocation52_spill] sm:$0xff]  ;;  %v5575_v19 = vadd.f32 %v14630_v16, %v14622_v15 }
0x1e79   :  { %6935 = vmatpush1.msra.mxu0 %v13718_v58  ;;  %9238 = vmatpush3.msra.mxu1 %v13868_v34  ;;  %v5569_v58 = vadd.f32 %v14623_v41, %v14622_v15  ;;  %v7098_v34 = vld [vmem:[%s14129_s17 + $0x38] sm:$0xff] }
0x1e7a   :  { %6936 = vmatprep.subr.mxu0 %v13722_v18  ;;  %9239 = vmatprep.subr.mxu1 %v14290_v1 }
0x1e7b   :  { %6937 = vmatpush1.msra.mxu0 %v13726_v7  ;;  %9240 = vmatpush3.msra.mxu1 %v13874_v61  ;;  %v7097_v61 = vld [vmem:[%s14129_s17 + $0x30] sm:$0xff] }
0x1e7c   :  { %6938 = vmatprep.subr.mxu0 %v13730_v11  ;;  %9241 = vmatprep.subr.mxu1 %v14290_v1 }
0x1e7d   :  { %6939 = vmatpush1.msra.mxu0 %v13734_v47  ;;  %9242 = vmatpush3.msra.mxu1 %v13880_v4  ;;  %v7096_v4 = vld [vmem:[%s14129_s17 + $0x28] sm:$0xff] }
0x1e7e   :  { %6940 = vmatprep.subr.mxu0 %v13738_v40  ;;  %9243 = vmatprep.subr.mxu1 %v14290_v1 }
0x1e7f   :  { %6941 = vmatpush1.msra.mxu0 %v13742_v28  ;;  %9244 = vmatpush3.msra.mxu1 %v13886_v50  ;;  %v7095_v50 = vld [vmem:[%s14129_s17 + $0x20] sm:$0xff] }
0x1e80   :  { %6942 = vmatprep.subr.mxu0 %v13746_v2  ;;  %9245 = vmatprep.subr.mxu1 %v14290_v1  ;;  %v14624_v2 = vld [vmem:[#allocation56_spill] sm:$0xff] }
0x1e81   :  { %6943 = vmatpush1.msra.mxu0 %v13750_v35  ;;  %9246 = vmatpush3.msra.mxu1 %v13892_v38  ;;  %v5571_v35 = vadd.f32 %v14624_v2, %v13441_v48  ;;  %v7094_v38 = vld [vmem:[%s14129_s17 + $0x18] sm:$0xff] }
0x1e82   :  { %6944 = vmatprep.subr.mxu0 %v13754_v3  ;;  %9247 = vmatprep.subr.mxu1 %v14290_v1 }
0x1e83   :  { %6945 = vmatpush1.msra.mxu0 %v13758_v31  ;;  %9248 = vmatpush3.msra.mxu1 %v13898_v44  ;;  %v7093_v44 = vld [vmem:[%s14129_s17 + $0x10] sm:$0xff] }
0x1e84   :  { %6946 = vmatprep.subr.mxu0 %v13762_v63  ;;  %9249 = vmatprep.subr.mxu1 %v14290_v1 }
0x1e85   :  { %6947 = vmatpush1.msra.mxu0 %v13766_v49  ;;  %9250 = vmatpush3.msra.mxu1 %v13769_v26  ;;  %v14018_v26 = vld [vmem:[#allocation28] ss:$0 sm:$0xff] }
0x1e86   :  { %6948 = vmatprep.subr.mxu0 %v13772_v5  ;;  %9251 = vmatprep.subr.mxu1 %v14290_v1 }
0x1e87   :  { %6949 = vmatpush1.msra.mxu0 %v13776_v62  ;;  %9252 = vmatpush3.msra.mxu1 %v13779_v43  ;;  %v14625_v43 = vld [vmem:[#allocation62_spill] sm:$0xff] }
0x1e88   :  { %6950 = vmatprep.subr.mxu0 %v13782_v23  ;;  %9253 = vmatprep.subr.mxu1 %v14290_v1  ;;  %v5676_v23 = vadd.f32 %v14625_v43, %v13448_v6 }
0x1e89   :  { %6951 = vmatpush1.msra.mxu0 %v13786_v8  ;;  %9254 = vmatpush3.msra.mxu1 %v13789_v14 }
0x1e8a   :  { %6952 = vmatprep.subr.mxu0 %v13792_v9  ;;  %9255 = vmatprep.subr.mxu1 %v14290_v1 }
0x1e8b   :  { %6953 = vmatpush1.msra.mxu0 %v13796_v39  ;;  %9256 = vmatpush3.msra.mxu1 %v13799_v22 }
0x1e8c   :  { %6954 = vmatprep.subr.mxu0 %v13802_v33  ;;  %9257 = vmatprep.subr.mxu1 %v14290_v1 }
0x1e8d   :  { %6955 = vmatpush1.msra.mxu0 %v13806_v59  ;;  %9258 = vmatpush3.msra.mxu1 %v13809_v0 }
0x1e8e   :  { %6956 = vmatprep.subr.mxu0 %v13812_v24  ;;  %9259 = vmatprep.subr.mxu1 %v14290_v1  ;;  %v7105_v24 = vld [vmem:[%s14129_s17 + $0x70] sm:$0xff] }
0x1e8f   :  { %6957 = vmatpush1.msra.mxu0 %v14617_v32  ;;  %9260 = vmatpush3.msra.mxu1 %v14618_v30 }
0x1e90   :  { %6958 = vmatprep.subr.mxu0 %v14619_v55  ;;  %9261 = vmatprep.subr.mxu1 %v14290_v1  ;;  %v14631_v55 = vld [vmem:[#allocation48_spill] sm:$0xff] }
0x1e91   :  { %6959 = vmatpush1.msra.mxu0 %v14620_v53  ;;  %6992 = vmatprep.mubr.f32.mxu0 %v14290_v1  ;;  %v5577_v53 = vadd.f32 %v14631_v55, %v13441_v48 }
0x1e92   :  { %9262 = vmatpush3.msra.mxu1 %v14621_v57  ;;  %9263 = vmatprep.mubr.msk.f32.mxu1 %vm10226_vm2, %v14290_v1 }
0x1e93   :  { %9266 = vmatprep.subr.mxu0 %v7106_v42 }
0x1f32   :  { %v6828_v18 = vpop.f32.mrf.mxu0  ;;  %v6899_v7 = vpop.f32.mrf.mxu1 }
0x1f33   :  { %v6903_v11 = vadd.f32 %v6828_v18, %v5569_v58  ;;  %v6917_v5 = vadd.f32 %v14018_v26, %v6899_v7 }
0x1f34   :  { %v9230_v47 = vpop.f32.mrf.mxu1  ;;  %v6830_v28 = vpop.f32.mrf.mxu0 }
0x1f35   :  { %v7346_v40 = vmul.f32 -1.442695, %v6903_v11  ;;  %v6910_v3 = vadd.f32 %v6830_v28, %v5571_v35 }
0x1f37   :  { %9632 = vpow2.f32 %v7346_v40  ;;  %v7347_v1 = vmul.f32 -1.442695, %v6910_v3  ;;  %v14632_v40 = vld [vmem:[#allocation67_spill] sm:$0xff] }
0x1f38   :  { %v5681_v28 = vadd.f32 %v14632_v40, %v13448_v6 }
0x1f39   :  { %9634 = vpow2.f32 %v7347_v1 }
0x1f44   :  { %v9633_v31 = vpop.eup %9632 }
0x1f45   :  { %v6907_v63 = vadd.f32 1.0, %v9633_v31 }
0x1f46   :  { %v9635_v49 = vpop.eup %9634 }
0x1f47   :  { %9636 = vrcp.f32 %v6907_v63  ;;  %v6914_v9 = vadd.f32 1.0, %v9635_v49 }
0x1f54   :  { %v9637_v62 = vpop.eup %9636 }
0x1f55   :  { %v6918_v8 = vmul.f32 %v9637_v62, %v6917_v5 }
0x1f57   :  { %v6919_v14 = vadd.f32 %v6918_v8, %v5676_v23 }
0x1f59   :  { %9638 = vtanh.f32 %v6919_v14 }
0x1f5a   :  { %9640 = vrcp.f32 %v6914_v9 }
0x1f66   :  { %v9639_v39 = vpop.eup %9638 }
0x1f67   :  { %v6921_v22 = vsub.f32 %v13942_v52, %v9639_v39  ;;  %v9641_v33 = vpop.eup %9640 }
0x1f69   :  { %v6922_v59 = vmul.f32 %v9641_v33, %v6921_v22 }
0x1f6b   :  { %v14024_v0 = vadd.f32 %v9639_v39, %v6922_v59 }
0x1f6d   :  { %6993 = vmatmul.mubr.f32.vlgmr.msra.gmra.mxu0 %v14024_v0  ;;  %9264 = vmatmul.mubr.f32.vlgmr.msra.gmra.mxu1 %v14024_v0 }
0x1f6e   :  { %9267 = vmatpush3.msra.mxu0 %v7106_v42  ;;  %9298 = vmatprep.mubr.f32.mxu0 %v14626_v51 }
0x1f6f   :  { %9268 = vmatprep.subr.mxu0 %v7105_v24 }
0x1f70   :  { %9269 = vmatpush3.msra.mxu0 %v7105_v24 }
0x1f71   :  { %9270 = vmatprep.subr.mxu0 %v7104_v36 }
0x1f72   :  { %9271 = vmatpush3.msra.mxu0 %v7104_v36 }
0x1f73   :  { %9272 = vmatprep.subr.mxu0 %v7103_v37 }
0x1f74   :  { %9273 = vmatpush3.msra.mxu0 %v7103_v37 }
0x1f75   :  { %9274 = vmatprep.subr.mxu0 %v7102_v56 }
0x1f76   :  { %9275 = vmatpush3.msra.mxu0 %v7102_v56 }
0x1f77   :  { %9276 = vmatprep.subr.mxu0 %v7101_v17 }
0x1f78   :  { %9277 = vmatpush3.msra.mxu0 %v7101_v17 }
0x1f79   :  { %9278 = vmatprep.subr.mxu0 %v7100_v13 }
0x1f7a   :  { %9279 = vmatpush3.msra.mxu0 %v7100_v13 }
0x1f7b   :  { %9280 = vmatprep.subr.mxu0 %v7099_v45 }
0x1f7c   :  { %9281 = vmatpush3.msra.mxu0 %v7099_v45 }
0x1f7d   :  { %9282 = vmatprep.subr.mxu0 %v7098_v34 }
0x1f7e   :  { %9283 = vmatpush3.msra.mxu0 %v7098_v34 }
0x1f7f   :  { %9284 = vmatprep.subr.mxu0 %v7097_v61 }
0x1f80   :  { %9285 = vmatpush3.msra.mxu0 %v7097_v61 }
0x1f81   :  { %9286 = vmatprep.subr.mxu0 %v7096_v4 }
0x1f82   :  { %9287 = vmatpush3.msra.mxu0 %v7096_v4 }
0x1f83   :  { %9288 = vmatprep.subr.mxu0 %v7095_v50 }
0x1f84   :  { %9289 = vmatpush3.msra.mxu0 %v7095_v50 }
0x1f85   :  { %9290 = vmatprep.subr.mxu0 %v7094_v38 }
0x1f86   :  { %9291 = vmatpush3.msra.mxu0 %v7094_v38 }
0x1f87   :  { %9292 = vmatprep.subr.mxu0 %v7093_v44 }
0x1f88   :  { %9293 = vmatpush3.msra.mxu0 %v7093_v44 }
0x1f89   :  { %9294 = vmatprep.subr.mxu0 %v7092_v54 }
0x1f8a   :  { %9295 = vmatpush3.msra.mxu0 %v7092_v54 }
0x1f8b   :  { %9296 = vmatprep.subr.mxu0 %v7091_v29 }
0x1f8c   :  { %9297 = vmatpush3.msra.mxu0 %v7091_v29 }
0x1f8d   :  { %9299 = vmatmul.mubr.f32.vlgmr.msra.gmra.mxu0 %v14627_v20 }
0x1f8e   :  { %9301 = vmatprep.mubr.f32.mxu0 %v14628_v12 }
0x1f91   :  { %9302 = vmatmul.mubr.f32.gmra.mxu0 %v14629_v46 }
0x1f92   :  { %9304 = vmatprep.mubr.f32.mxu0 %v13845_v27 }
0x1f95   :  { %9305 = vmatmul.mubr.f32.gmra.mxu0 %v13942_v52  ;;  %v7350_v52 = vld [vmem:[#allocation30] ss:$0 sm:$0xff] }
0x1f96   :  { %9307 = vmatprep.mubr.f32.mxu0 %v14024_v0 }
0x202d   :  { %v6994_v25 = vpop.f32.mrf.mxu0  ;;  %v7065_v21 = vpop.f32.mrf.mxu1 }
0x202e   :  { %v7069_v60 = vadd.f32 %v6994_v25, %v5575_v19  ;;  %v7083_v15 = vadd.f32 %v14018_v26, %v7065_v21 }
0x202f   :  { %v9265_v10 = vpop.f32.mrf.mxu1  ;;  %v6996_v30 = vpop.f32.mrf.mxu0 }
0x2030   :  { %v7348_v32 = vmul.f32 -1.442695, %v7069_v60  ;;  %v7076_v57 = vadd.f32 %v6996_v30, %v5577_v53 }
0x2032   :  { %9642 = vpow2.f32 %v7348_v32  ;;  %v7349_v42 = vmul.f32 -1.442695, %v7076_v57 }
0x2034   :  { %9644 = vpow2.f32 %v7349_v42 }
0x203f   :  { %v9643_v27 = vpop.eup %9642 }
0x2040   :  { %v7073_v41 = vadd.f32 1.0, %v9643_v27 }
0x2041   :  { %v9645_v18 = vpop.eup %9644 }
0x2042   :  { %9646 = vrcp.f32 %v7073_v41  ;;  %v7080_v31 = vadd.f32 1.0, %v9645_v18 }
0x204d   :  { %v9300_v58 = vpop.f32.mrf.mxu0 }
0x204e   :  { %v7194_v7 = vadd.f32 %v9300_v58, %v7350_v52 }
0x204f   :  { %v9647_v11 = vpop.eup %9646  ;;  %v7188_v47 = vpop.f32.mrf.mxu0 }
0x2050   :  { %v7084_v2 = vmul.f32 %v9647_v11, %v7083_v15  ;;  %v7228_v35 = vmax.f32 %v7194_v7, 0.0  ;;  %v7189_v48 = vadd.f32 %v7350_v52, %v7188_v47 }
0x2051   :  { %v9303_v3 = vpop.f32.mrf.mxu0 }
0x2052   :  { %v7085_v1 = vadd.f32 %v7084_v2, %v5681_v28  ;;  %7236 = vst [vmem:[%s14131_s19 + $0x8] sm:$0xff] %v7228_v35  ;;  %v7227_v63 = vmax.f32 %v7189_v48, 0.0  ;;  %v7204_v49 = vadd.f32 %v9303_v3, %v7350_v52 }
0x2053   :  { %v7198_v5 = vpop.f32.mrf.mxu0 }
0x2054   :  { %9648 = vtanh.f32 %v7085_v1  ;;  %7235 = vst [vmem:[%s14131_s19] sm:$0xff] %v7227_v63  ;;  %v7230_v26 = vmax.f32 %v7204_v49, 0.0  ;;  %v7199_v6 = vadd.f32 %v7350_v52, %v7198_v5 }
0x2055   :  { %v9306_v62 = vpop.f32.mrf.mxu0  ;;  %9650 = vrcp.f32 %v7080_v31 }
0x2056   :  { %7238 = vst [vmem:[%s14131_s19 + $0x18] sm:$0xff] %v7230_v26  ;;  %v7229_v43 = vmax.f32 %v7199_v6, 0.0  ;;  %v7214_v23 = vadd.f32 %v9306_v62, %v7350_v52 }
0x2057   :  { %v7208_v8 = vpop.f32.mrf.mxu0 }
0x2058   :  { %7237 = vst [vmem:[%s14131_s19 + $0x10] sm:$0xff] %v7229_v43  ;;  %v7232_v14 = vmax.f32 %v7214_v23, 0.0  ;;  %v7209_v9 = vadd.f32 %v7350_v52, %v7208_v8 }
0x205a   :  { %7240 = vst [vmem:[%s14131_s19 + $0x28] sm:$0xff] %v7232_v14  ;;  %v7231_v39 = vmax.f32 %v7209_v9, 0.0 }
0x205c   :  { %7239 = vst [vmem:[%s14131_s19 + $0x20] sm:$0xff] %v7231_v39 }
0x2061   :  { %v9649_v22 = vpop.eup %9648 }
0x2062   :  { %v7087_v33 = vsub.f32 %v14024_v0, %v9649_v22  ;;  %v9651_v59 = vpop.eup %9650 }
0x2064   :  { %v7088_v24 = vmul.f32 %v9651_v59, %v7087_v33 }
0x2066   :  { %v7089_v51 = vadd.f32 %v9649_v22, %v7088_v24 }
0x2068   :  { %9308 = vmatmul.mubr.f32.gmra.mxu0 %v7089_v51 }
0x2128   :  { %v9309_v36 = vpop.f32.mrf.mxu0 }
0x2129   :  { %v7224_v37 = vadd.f32 %v9309_v36, %v7350_v52 }
0x212a   :  { %v7218_v56 = vpop.f32.mrf.mxu0 }
0x212b   :  { %v7234_v17 = vmax.f32 %v7224_v37, 0.0  ;;  %v7219_v13 = vadd.f32 %v7350_v52, %v7218_v56 }
0x212d   :  { %7242 = vst [vmem:[%s14131_s19 + $0x38] sm:$0xff] %v7234_v17  ;;  %v7233_v45 = vmax.f32 %v7219_v13, 0.0 }
0x212f   :  { %7241 = vst [vmem:[%s14131_s19 + $0x30] sm:$0xff] %v7233_v45 }
0x2130   :  { %7247 = vsyncpa [#allocation6], 1 }
0x2131   :  { %7248 = vsyncpa [#allocation8], 1 }
0x2132   :  { %7249 = vsyncpa [#allocation11], 1 }
0x2133   :  { %7250 = vsyncpa [#allocation14], 1 }
0x2134   :  { %7251 = vsyncpa [#allocation17], 1 }
0x2135   :  { %7252 = vsyncpa [#allocation20], 1 }
0x2136   :  { %7253 = vsyncpa [#allocation23], 1 }
0x2137   :  { %7254 = vsyncpa [#allocation26], 1 }
0x2138   :  { %7255 = vsyncpa [#allocation29], 1 }

</bundles_post_ra>
